<compile_context>
chip_gen: v5e
topology: v5e:2x2
jax: 0.10.0
libtpu: 0.0.40
codegen_flags: <defaults>
</compile_context>

<pallas_src>
import functools

import jax
import jax.numpy as jnp
from jax.experimental import pallas as pl
from jax.experimental.pallas import tpu as pltpu


K_CONST = 20
HIDDEN = 100


def _full_block(shape):
    """Full-extent block for a 1-step grid."""
    n = len(shape)
    return pl.BlockSpec(shape, lambda i, _n=n: (0,) * _n)


_ARB1 = pltpu.CompilerParams(dimension_semantics=("arbitrary",))


# ----------------------------- Pallas kernels ------------------------------

def _bilinear_kernel(ua_ref, up_ref, wua_ref, wup_ref, ma_ref, mp_ref):
    # Two zero-free weight reads instead of one half-zero block matrix.
    ma_ref[...] = jnp.dot(ua_ref[...], wua_ref[...],
                          preferred_element_type=jnp.float32)
    mp_ref[...] = jnp.dot(up_ref[...], wup_ref[...],
                          preferred_element_type=jnp.float32)


def bilinear_pallas(u_a, u_p, w_ua, w_up):
    """(B,h)@(h,h*2K) for both u streams in one launch."""
    B, _ = u_a.shape
    n = w_ua.shape[1]
    return pl.pallas_call(
        _bilinear_kernel,
        out_shape=(jax.ShapeDtypeStruct((B, n), jnp.float32),
                   jax.ShapeDtypeStruct((B, n), jnp.float32)),
        grid=(1,),
        in_specs=[_full_block(u_a.shape), _full_block(u_p.shape),
                  _full_block(w_ua.shape), _full_block(w_up.shape)],
        out_specs=(_full_block((B, n)), _full_block((B, n))),
        compiler_params=_ARB1,
    )(u_a, u_p, w_ua, w_up)


def _ca_fx_kernel(h_ref, m_ref, wih_ref, bih_ref, o_ref):
    # f = tanh(H[b] @ M[b]) kept in VMEM, immediately projected per gate.
    nb = h_ref.shape[0]
    ws = [wih_ref[0], wih_ref[1], wih_ref[2]]
    bs = [bih_ref[0], bih_ref[1], bih_ref[2]]
    for b in range(nb):
        f = jnp.tanh(jnp.dot(h_ref[b], m_ref[b],
                             preferred_element_type=jnp.float32))
        for g in range(3):
            o_ref[b, g] = jnp.dot(f, ws[g],
                                  preferred_element_type=jnp.float32) + bs[g]


def ca_fx_pallas(H, M, wih3, bih3):
    """Fused bilinear-activation + GRU input projection.
    Returns xproj (B, 3, S, Dh) with the gate index on a leading axis."""
    B, S, _ = H.shape
    dh = wih3.shape[-1]
    return pl.pallas_call(
        _ca_fx_kernel,
        out_shape=jax.ShapeDtypeStruct((B, 3, S, dh), jnp.float32),
        grid=(1,),
        in_specs=[_full_block(H.shape), _full_block(M.shape),
                  _full_block(wih3.shape), _full_block(bih3.shape)],
        out_specs=_full_block((B, 3, S, dh)),
        compiler_params=_ARB1,
    )(H, M, wih3, bih3)


def _gru_kernel(xr_ref, xz_ref, xn_ref, whh_ref, bhh_ref, o_ref):
    """GRU recurrence with the sequence loop INSIDE the kernel.
    Gate selection is whole-tile leading-axis indexing (no lane slicing);
    the block-diagonal hh weights advance all coupled cells at once.
    PyTorch gate order (r, z, n); zero initial state; f32 gate math."""
    S, B, Dh = o_ref.shape
    w_r, w_z, w_n = whh_ref[0], whh_ref[1], whh_ref[2]
    b_r, b_z, b_n = bhh_ref[0], bhh_ref[1], bhh_ref[2]

    def step(t, h):
        hr = jnp.dot(h, w_r, preferred_element_type=jnp.float32) + b_r
        hz = jnp.dot(h, w_z, preferred_element_type=jnp.float32) + b_z
        hn = jnp.dot(h, w_n, preferred_element_type=jnp.float32) + b_n
        r = jax.nn.sigmoid(xr_ref[t] + hr)
        z = jax.nn.sigmoid(xz_ref[t] + hz)
        n = jnp.tanh(xn_ref[t] + r * hn)
        h_new = (1.0 - z) * n + z * h
        o_ref[t] = h_new
        return h_new

    jax.lax.fori_loop(0, S, step, jnp.zeros((B, Dh), jnp.float32),
                      unroll=(S <= 16))


def gru_pallas(xr, xz, xn, whh3, bhh3):
    """xr/xz/xn: (S, B, Dh) precomputed input projections per gate.
    whh3: (3, Dh, Dh), bhh3: (3, 1, Dh).  Returns hidden states (S, B, Dh)."""
    S, B, Dh = xr.shape
    return pl.pallas_call(
        _gru_kernel,
        out_shape=jax.ShapeDtypeStruct((S, B, Dh), jnp.float32),
        grid=(1,),
        in_specs=[_full_block(xr.shape), _full_block(xz.shape),
                  _full_block(xn.shape), _full_block(whh3.shape),
                  _full_block(bhh3.shape)],
        out_specs=_full_block((S, B, Dh)),
        # The recurrence must stay serial; single program, no grid to misuse.
        compiler_params=_ARB1,
    )(xr, xz, xn, whh3, bhh3)


def _attn_pool_kernel(h_ref, r_ref, v_ref, o_ref):
    # Both streams (aspect/opinion) share one (2,S) score matmul per batch;
    # exact softmax (no approx reciprocal) for parity.
    nb = h_ref.shape[0]
    v = v_ref[...]                                         # (2, 4K)
    for b in range(nb):
        e = jax.lax.dot_general(v, r_ref[b], (((1,), (1,)), ((), ())),
                                preferred_element_type=jnp.float32)   # (2, S)
        e = e - jnp.max(e, axis=1, keepdims=True)
        p = jnp.exp(e)
        w = p / jnp.sum(p, axis=1, keepdims=True)
        o_ref[b] = jnp.dot(w, h_ref[b], preferred_element_type=jnp.float32)


def attn_pool_pallas(H, rcat, V2):
    """out[b, 0] = H[b]^T softmax(ra[b] va^T), out[b, 1] likewise with vp."""
    B, S, D = H.shape
    return pl.pallas_call(
        _attn_pool_kernel,
        out_shape=jax.ShapeDtypeStruct((B, 2, D), jnp.float32),
        grid=(1,),
        in_specs=[_full_block(H.shape), _full_block(rcat.shape),
                  _full_block(V2.shape)],
        out_specs=_full_block((B, 2, D)),
        compiler_params=_ARB1,
    )(H, rcat, V2)


def _bmm_nt_kernel(a_ref, b_ref, o_ref):
    nb = a_ref.shape[0]
    for i in range(nb):
        o_ref[i] = jax.lax.dot_general(a_ref[i], b_ref[i],
                                       (((1,), (1,)), ((), ())),
                                       preferred_element_type=jnp.float32)


def bmm_nt_pallas(a, b):
    """(B,M,K) x (B,N,K) -> (B,M,N); all batches in one program."""
    B, M, _ = a.shape
    _, N, _ = b.shape
    return pl.pallas_call(
        _bmm_nt_kernel,
        out_shape=jax.ShapeDtypeStruct((B, M, N), jnp.float32),
        grid=(1,),
        in_specs=[_full_block(a.shape), _full_block(b.shape)],
        out_specs=_full_block((B, M, N)),
        compiler_params=_ARB1,
    )(a, b)


# ------------------- one-time weight re-layout (hoisted) -------------------

def prepare_params(params, K=K_CONST, hidden=HIDDEN):
    """Pure re-layout of the PyTorch-shaped parameters.  Run ONCE outside the
    jitted forward so no transposes/concats are rebuilt per call."""
    f32 = jnp.float32
    twoK = 2 * K

    def reorder(W):          # (K*h, h) -> (e, d, K): reorder[e,d,k] = W[k*h+e, d]
        return W.reshape(K, hidden, hidden).transpose(1, 2, 0)

    def gru_gates(g, h_dim):
        wih3 = jnp.stack([g['w_ih'][i * h_dim:(i + 1) * h_dim, :].T
                          for i in range(3)])                      # (3, in, h)
        bih3 = jnp.stack([g['b_ih'][i * h_dim:(i + 1) * h_dim][None, :]
                          for i in range(3)])                      # (3, 1, h)
        whh3 = jnp.stack([g['w_hh'][i * h_dim:(i + 1) * h_dim, :].T
                          for i in range(3)])                      # (3, h, h)
        bhh3 = jnp.stack([g['b_hh'][i * h_dim:(i + 1) * h_dim][None, :]
                          for i in range(3)])
        return wih3, bih3, whh3, bhh3

    def prep_ca(ca):
        # Zero-free bilinear weights.  M column blocks (K each), in order:
        #   [G_a.u_a | D_p.u_a | D_a.u_p | G_p.u_p]
        W_ua = jnp.concatenate([reorder(ca['G_a']), reorder(ca['D_p'])],
                               axis=-1).reshape(hidden, hidden * twoK)
        W_up = jnp.concatenate([reorder(ca['D_a']), reorder(ca['G_p'])],
                               axis=-1).reshape(hidden, hidden * twoK)

        wih_a, bih_a, whh_a, bhh_a = gru_gates(ca['gru_ra'], twoK)
        wih_p, bih_p, whh_p, bhh_p = gru_gates(ca['gru_rp'], twoK)

        # gru_ra input fa = [G_a.u_a, D_a.u_p]  -> f_all cols [0:K] and [2K:3K]
        # gru_rp input fp = [G_p.u_p, D_p.u_a]  -> f_all cols [3K:4K] and [K:2K]
        # Fold that permutation into the (gate-major) input weights.
        wih3 = jnp.zeros((3, 4 * K, 2 * twoK), f32)
        wih3 = wih3.at[:, 0:K, 0:twoK].set(wih_a[:, 0:K, :])
        wih3 = wih3.at[:, 2 * K:3 * K, 0:twoK].set(wih_a[:, K:twoK, :])
        wih3 = wih3.at[:, 3 * K:4 * K, twoK:].set(wih_p[:, 0:K, :])
        wih3 = wih3.at[:, K:2 * K, twoK:].set(wih_p[:, K:twoK, :])
        bih3 = jnp.concatenate([bih_a, bih_p], axis=-1)            # (3, 1, 4K)

        whh3 = jnp.zeros((3, 2 * twoK, 2 * twoK), f32)             # block-diag
        whh3 = whh3.at[:, :twoK, :twoK].set(whh_a)
        whh3 = whh3.at[:, twoK:, twoK:].set(whh_p)
        bhh3 = jnp.concatenate([bhh_a, bhh_p], axis=-1)

        V2 = jnp.zeros((2, 2 * twoK), f32)                         # [va; vp]
        V2 = V2.at[0, :twoK].set(ca['va'][0])
        V2 = V2.at[1, twoK:].set(ca['vp'][0])
        return dict(W_ua=W_ua, W_up=W_up, wih3=wih3, bih3=bih3,
                    whh3=whh3, bhh3=bhh3, V2=V2)

    gw, gb, gwh, gbh = gru_gates(params['gru'], hidden)
    return dict(
        embedding=params['embedding'],
        ua=params['ua'], up=params['up'],
        gru_wih3=gw, gru_bih3=gb, gru_whh3=gwh, gru_bhh3=gbh,
        CA1=prep_ca(params['CA1']), CA2=prep_ca(params['CA2']),
        Va_T=params['Va'].T, Vp_T=params['Vp'].T,
        a_fc_T=params['a_fc'].T, o_fc_T=params['o_fc'].T,
        biaffine_T=params['biaffine'].T,
    )


# ------------------------------- model glue --------------------------------

def coupled_attn(ca, H, u_a, u_p, K=K_CONST, hidden=HIDDEN):
    """CoupledAttn.forward; returns rcat = [ra | rp] of shape (B, S, 4K)."""
    B, S, _ = H.shape
    twoK = 2 * K

    # Re-associated bilinear forms: M[b] s.t. f_all = tanh(H @ M).
    m_ua, m_up = bilinear_pallas(u_a, u_p, ca['W_ua'], ca['W_up'])
    M = jnp.concatenate([m_ua.reshape(B, hidden, twoK),
                         m_up.reshape(B, hidden, twoK)], axis=-1)   # (B, h, 4K)

    # Fused tanh(H@M) + per-gate GRU input projection (f_all never hits HBM).
    xproj = ca_fx_pallas(H, M, ca['wih3'], ca['bih3'])              # (B,3,S,2H)
    xs = jnp.transpose(xproj, (1, 2, 0, 3))                         # (3,S,B,2H)

    # Both coupled GRUs advance together (block-diagonal hh weights),
    # sequence loop internal to the kernel.
    r_sb = gru_pallas(xs[0], xs[1], xs[2], ca['whh3'], ca['bhh3'])  # (S,B,2H)
    return jnp.transpose(r_sb, (1, 0, 2))                           # (B,S,4K)


def cmla_forward(prep, text_indices, text_mask, tag_dim, polarities_dim,
                 K=K_CONST, hidden=HIDDEN):
    B, S = text_indices.shape
    # TODO(synk): DynamicRNN's packed-sequence length masking is omitted;
    # with text_mask == all-ones the full-length GRU is exactly equivalent.
    del text_mask
    twoK = 2 * K

    embed = prep['embedding'][text_indices]                          # (B,S,E)
    # Sentence-GRU input projection (small; XLA fuses it), gate-major layout.
    xs_e = (jnp.einsum('bse,gei->gsbi', embed, prep['gru_wih3'])
            + prep['gru_bih3'][:, None])                             # (3,S,B,h)
    H_sb = gru_pallas(xs_e[0], xs_e[1], xs_e[2],
                      prep['gru_whh3'], prep['gru_bhh3'])            # (S,B,h)
    H = jnp.transpose(H_sb, (1, 0, 2))                               # (B,S,h)

    ua0 = jnp.broadcast_to(prep['ua'][None, :], (B, hidden))
    up0 = jnp.broadcast_to(prep['up'][None, :], (B, hidden))

    rcat1 = coupled_attn(prep['CA1'], H, ua0, up0, K, hidden)        # (B,S,4K)

    # Fused va/vp scoring + softmax over S + H^T @ softmax(e), all B at once.
    pooled = attn_pool_pallas(H, rcat1, prep['CA1']['V2'])           # (B,2,h)
    ua1 = jnp.tanh(ua0 @ prep['Va_T']) + pooled[:, 0, :]
    up1 = jnp.tanh(up0 @ prep['Vp_T']) + pooled[:, 1, :]

    rcat2 = coupled_attn(prep['CA2'], H, ua1, up1, K, hidden)

    feat = rcat1 + rcat2                                             # (B,S,4K)
    ap_feat = feat[..., :twoK]
    op_feat = feat[..., twoK:]

    # Tiny projections: plain jnp (lane widths 5/10 would waste the MXU).
    ap_out = jnp.einsum('bsk,kt->bst', ap_feat, prep['a_fc_T'])
    op_out = jnp.einsum('bsk,kt->bst', op_feat, prep['o_fc_T'])

    # Biaffine: first (narrow) matmul in jnp; the bmm as input2 @ affine^T.
    ones = jnp.ones((B, S, 1), jnp.float32)
    in1 = jnp.concatenate([ap_feat, ones], axis=-1)                  # (B,S,2K+1)
    affine = jnp.einsum('bsd,do->bso', in1, prep['biaffine_T'])      # (B,S,pol*2K)
    affine = affine.reshape(B, S * polarities_dim, twoK)
    biaff = bmm_nt_pallas(op_feat, affine)                           # (B,S,S*pol)
    triplet_out = biaff.reshape(B, S, S, polarities_dim)
    return [ap_out, op_out, triplet_out]


# --------------------------- parameter initializer --------------------------

def init_params(key, vocab_size, embed_dim, tag_dim, polarities_dim,
                K=K_CONST, hidden=HIDDEN):
    keys = iter(jax.random.split(key, 64))

    def lin(shape, scale=0.08):
        return jax.random.normal(next(keys), shape, jnp.float32) * scale

    def gru_params(in_dim, h_dim):
        return dict(w_ih=lin((3 * h_dim, in_dim)), b_ih=lin((3 * h_dim,)),
                    w_hh=lin((3 * h_dim, h_dim)), b_hh=lin((3 * h_dim,)))

    def ca_params():
        return dict(
            G_a=lin((K * hidden, hidden)), G_p=lin((K * hidden, hidden)),
            D_a=lin((K * hidden, hidden)), D_p=lin((K * hidden, hidden)),
            gru_ra=gru_params(2 * K, 2 * K), gru_rp=gru_params(2 * K, 2 * K),
            va=lin((1, 2 * K)), vp=lin((1, 2 * K)))

    return dict(
        embedding=lin((vocab_size, embed_dim), 0.1),
        gru=gru_params(embed_dim, hidden),
        ua=lin((hidden,)), up=lin((hidden,)),
        CA1=ca_params(), CA2=ca_params(),
        Va=lin((hidden, hidden)), Vp=lin((hidden, hidden)),
        a_fc=lin((tag_dim, 2 * K)), o_fc=lin((tag_dim, 2 * K)),
        # Biaffine linear: in = 2K + 1 (bias[0]=True), out = polarities * 2K
        biaffine=lin((polarities_dim * (2 * K), 2 * K + 1)),
    )


# ----------------------------------- main -----------------------------------

if __name__ == "__main__":
    B, S = 2, 8
    vocab, embed_dim = 50, 32
    tag_dim, polarities_dim = 5, 4

    key = jax.random.PRNGKey(0)
    pkey, dkey = jax.random.split(key)
    params = init_params(pkey, vocab, embed_dim, tag_dim, polarities_dim)
    prep = prepare_params(params)   # one-time weight re-layout (hoisted)

    text_indices = jax.random.randint(dkey, (B, S), 0, vocab, dtype=jnp.int32)
    text_mask = jnp.ones((B, S), jnp.float32)   # full-length sequences

    fwd = jax.jit(functools.partial(cmla_forward, tag_dim=tag_dim,
                                    polarities_dim=polarities_dim))
    outs = jax.block_until_ready(fwd(prep, text_indices, text_mask))
    ap_out, op_out, triplet_out = outs
    assert ap_out.shape == (B, S, tag_dim)
    assert op_out.shape == (B, S, tag_dim)
    assert triplet_out.shape == (B, S, S, polarities_dim)
    print("KERNEL_OK")
</pallas_src>

<mosaic_0001>
module attributes {stable_mosaic.version = 11 : i64} {
  func.func @_bilinear_kernel(%arg0: i32, %arg1: memref<2x100xf32, #tpu.memory_space<vmem>>, %arg2: memref<2x100xf32, #tpu.memory_space<vmem>>, %arg3: memref<100x4000xf32, #tpu.memory_space<vmem>>, %arg4: memref<100x4000xf32, #tpu.memory_space<vmem>>, %arg5: memref<2x4000xf32, #tpu.memory_space<vmem>>, %arg6: memref<2x4000xf32, #tpu.memory_space<vmem>>) attributes {dimension_semantics = [#tpu.dimension_semantics<arbitrary>], iteration_bounds = array<i64: 1>, scalar_prefetch = 0 : i64, scratch_operands = 0 : i64, tpu.core_type = #tpu.core_type<tc>, window_params = [{pipeline_mode = #tpu.pipeline_mode<synchronous>, transform_indices = @transform_0, window_bounds = array<i64: 2, 100>}, {pipeline_mode = #tpu.pipeline_mode<synchronous>, transform_indices = @transform_1, window_bounds = array<i64: 2, 100>}, {pipeline_mode = #tpu.pipeline_mode<synchronous>, transform_indices = @transform_2, window_bounds = array<i64: 100, 4000>}, {pipeline_mode = #tpu.pipeline_mode<synchronous>, transform_indices = @transform_3, window_bounds = array<i64: 100, 4000>}, {pipeline_mode = #tpu.pipeline_mode<synchronous>, transform_indices = @transform_4, window_bounds = array<i64: 2, 4000>}, {pipeline_mode = #tpu.pipeline_mode<synchronous>, transform_indices = @transform_5, window_bounds = array<i64: 2, 4000>}]} {
    %c0 = arith.constant 0 : index
    %c0_0 = arith.constant 0 : index
    %0 = vector.load %arg1[%c0, %c0_0] : memref<2x100xf32, #tpu.memory_space<vmem>>, vector<2x100xf32>
    %c0_1 = arith.constant 0 : index
    %c0_2 = arith.constant 0 : index
    %1 = vector.load %arg3[%c0_1, %c0_2] : memref<100x4000xf32, #tpu.memory_space<vmem>>, vector<100x4000xf32>
    %cst = arith.constant dense<0.000000e+00> : vector<2x4000xf32>
    %2 = tpu.matmul %0, %1, %cst {dimension_numbers = #tpu.dot_dimension_numbers<[1], [0], [0], [1], [0, 0, 1, 1], [], []>} : vector<2x100xf32>, vector<100x4000xf32>, vector<2x4000xf32> -> vector<2x4000xf32>
    %c0_3 = arith.constant 0 : index
    %c0_4 = arith.constant 0 : index
    %3 = vector.load %arg5[%c0_3, %c0_4] : memref<2x4000xf32, #tpu.memory_space<vmem>>, vector<2x4000xf32>
    tpu.vector_store %arg5[%c0_3, %c0_4], %2 {strides = array<i32>} : memref<2x4000xf32, #tpu.memory_space<vmem>>, vector<2x4000xf32>,
    %c0_5 = arith.constant 0 : index
    %c0_6 = arith.constant 0 : index
    %4 = vector.load %arg2[%c0_5, %c0_6] : memref<2x100xf32, #tpu.memory_space<vmem>>, vector<2x100xf32>
    %c0_7 = arith.constant 0 : index
    %c0_8 = arith.constant 0 : index
    %5 = vector.load %arg4[%c0_7, %c0_8] : memref<100x4000xf32, #tpu.memory_space<vmem>>, vector<100x4000xf32>
    %cst_9 = arith.constant dense<0.000000e+00> : vector<2x4000xf32>
    %6 = tpu.matmul %4, %5, %cst_9 {dimension_numbers = #tpu.dot_dimension_numbers<[1], [0], [0], [1], [0, 0, 1, 1], [], []>} : vector<2x100xf32>, vector<100x4000xf32>, vector<2x4000xf32> -> vector<2x4000xf32>
    %c0_10 = arith.constant 0 : index
    %c0_11 = arith.constant 0 : index
    %7 = vector.load %arg6[%c0_10, %c0_11] : memref<2x4000xf32, #tpu.memory_space<vmem>>, vector<2x4000xf32>
    tpu.vector_store %arg6[%c0_10, %c0_11], %6 {strides = array<i32>} : memref<2x4000xf32, #tpu.memory_space<vmem>>, vector<2x4000xf32>,
    return
  }
  func.func @transform_0(%arg0: i32) -> (i32, i32) {
    %c0_i32 = arith.constant 0 : i32
    %c0_i32_0 = arith.constant 0 : i32
    %c0_i32_1 = arith.constant 0 : i32
    return %c0_i32, %c0_i32_0 : i32, i32
  }
  func.func @transform_1(%arg0: i32) -> (i32, i32) {
    %c0_i32 = arith.constant 0 : i32
    %c0_i32_0 = arith.constant 0 : i32
    %c0_i32_1 = arith.constant 0 : i32
    return %c0_i32, %c0_i32_0 : i32, i32
  }
  func.func @transform_2(%arg0: i32) -> (i32, i32) {
    %c0_i32 = arith.constant 0 : i32
    %c0_i32_0 = arith.constant 0 : i32
    %c0_i32_1 = arith.constant 0 : i32
    return %c0_i32, %c0_i32_0 : i32, i32
  }
  func.func @transform_3(%arg0: i32) -> (i32, i32) {
    %c0_i32 = arith.constant 0 : i32
    %c0_i32_0 = arith.constant 0 : i32
    %c0_i32_1 = arith.constant 0 : i32
    return %c0_i32, %c0_i32_0 : i32, i32
  }
  func.func @transform_4(%arg0: i32) -> (i32, i32) {
    %c0_i32 = arith.constant 0 : i32
    %c0_i32_0 = arith.constant 0 : i32
    %c0_i32_1 = arith.constant 0 : i32
    return %c0_i32, %c0_i32_0 : i32, i32
  }
  func.func @transform_5(%arg0: i32) -> (i32, i32) {
    %c0_i32 = arith.constant 0 : i32
    %c0_i32_0 = arith.constant 0 : i32
    %c0_i32_1 = arith.constant 0 : i32
    return %c0_i32, %c0_i32_0 : i32, i32
  }
}

module attributes {stable_mosaic.version = 11 : i64} {
  func.func @_gru_kernel(%arg0: i32, %arg1: memref<8x2x100xf32, #tpu.memory_space<vmem>>, %arg2: memref<8x2x100xf32, #tpu.memory_space<vmem>>, %arg3: memref<8x2x100xf32, #tpu.memory_space<vmem>>, %arg4: memref<3x100x100xf32, #tpu.memory_space<vmem>>, %arg5: memref<3x1x100xf32, #tpu.memory_space<vmem>>, %arg6: memref<8x2x100xf32, #tpu.memory_space<vmem>>) attributes {dimension_semantics = [#tpu.dimension_semantics<arbitrary>], iteration_bounds = array<i64: 1>, scalar_prefetch = 0 : i64, scratch_operands = 0 : i64, tpu.core_type = #tpu.core_type<tc>, window_params = [{pipeline_mode = #tpu.pipeline_mode<synchronous>, transform_indices = @transform_0, window_bounds = array<i64: 8, 2, 100>}, {pipeline_mode = #tpu.pipeline_mode<synchronous>, transform_indices = @transform_1, window_bounds = array<i64: 8, 2, 100>}, {pipeline_mode = #tpu.pipeline_mode<synchronous>, transform_indices = @transform_2, window_bounds = array<i64: 8, 2, 100>}, {pipeline_mode = #tpu.pipeline_mode<synchronous>, transform_indices = @transform_3, window_bounds = array<i64: 3, 100, 100>}, {pipeline_mode = #tpu.pipeline_mode<synchronous>, transform_indices = @transform_4, window_bounds = array<i64: 3, 1, 100>}, {pipeline_mode = #tpu.pipeline_mode<synchronous>, transform_indices = @transform_5, window_bounds = array<i64: 8, 2, 100>}]} {
    %c0 = arith.constant 0 : index
    %c0_0 = arith.constant 0 : index
    %c0_1 = arith.constant 0 : index
    %0 = vector.load %arg4[%c0, %c0_0, %c0_1] : memref<3x100x100xf32, #tpu.memory_space<vmem>>, vector<1x100x100xf32>
    %1 = vector.shape_cast %0 : vector<1x100x100xf32> to vector<100x100xf32>
    %c1 = arith.constant 1 : index
    %c0_2 = arith.constant 0 : index
    %c0_3 = arith.constant 0 : index
    %2 = vector.load %arg4[%c1, %c0_2, %c0_3] : memref<3x100x100xf32, #tpu.memory_space<vmem>>, vector<1x100x100xf32>
    %3 = vector.shape_cast %2 : vector<1x100x100xf32> to vector<100x100xf32>
    %c2 = arith.constant 2 : index
    %c0_4 = arith.constant 0 : index
    %c0_5 = arith.constant 0 : index
    %4 = vector.load %arg4[%c2, %c0_4, %c0_5] : memref<3x100x100xf32, #tpu.memory_space<vmem>>, vector<1x100x100xf32>
    %5 = vector.shape_cast %4 : vector<1x100x100xf32> to vector<100x100xf32>
    %c0_6 = arith.constant 0 : index
    %c0_7 = arith.constant 0 : index
    %c0_8 = arith.constant 0 : index
    %6 = vector.load %arg5[%c0_6, %c0_7, %c0_8] : memref<3x1x100xf32, #tpu.memory_space<vmem>>, vector<1x1x100xf32>
    %7 = vector.shape_cast %6 : vector<1x1x100xf32> to vector<1x100xf32>
    %c1_9 = arith.constant 1 : index
    %c0_10 = arith.constant 0 : index
    %c0_11 = arith.constant 0 : index
    %8 = vector.load %arg5[%c1_9, %c0_10, %c0_11] : memref<3x1x100xf32, #tpu.memory_space<vmem>>, vector<1x1x100xf32>
    %9 = vector.shape_cast %8 : vector<1x1x100xf32> to vector<1x100xf32>
    %c2_12 = arith.constant 2 : index
    %c0_13 = arith.constant 0 : index
    %c0_14 = arith.constant 0 : index
    %10 = vector.load %arg5[%c2_12, %c0_13, %c0_14] : memref<3x1x100xf32, #tpu.memory_space<vmem>>, vector<1x1x100xf32>
    %11 = vector.shape_cast %10 : vector<1x1x100xf32> to vector<1x100xf32>
    %cst = arith.constant 0.000000e+00 : f32
    %12 = vector.broadcast %cst : f32 to vector<2x100xf32>
    %c0_i32 = arith.constant 0 : i32
    %cst_15 = arith.constant dense<0.000000e+00> : vector<2x100xf32>
    %13 = tpu.matmul %12, %1, %cst_15 {dimension_numbers = #tpu.dot_dimension_numbers<[1], [0], [0], [1], [0, 0, 1, 1], [], []>} : vector<2x100xf32>, vector<100x100xf32>, vector<2x100xf32> -> vector<2x100xf32>
    %14 = vector.broadcast %7 : vector<1x100xf32> to vector<2x100xf32>
    %15 = arith.addf %13, %14 : vector<2x100xf32>
    %cst_16 = arith.constant dense<0.000000e+00> : vector<2x100xf32>
    %16 = tpu.matmul %12, %3, %cst_16 {dimension_numbers = #tpu.dot_dimension_numbers<[1], [0], [0], [1], [0, 0, 1, 1], [], []>} : vector<2x100xf32>, vector<100x100xf32>, vector<2x100xf32> -> vector<2x100xf32>
    %17 = vector.broadcast %9 : vector<1x100xf32> to vector<2x100xf32>
    %18 = arith.addf %16, %17 : vector<2x100xf32>
    %cst_17 = arith.constant dense<0.000000e+00> : vector<2x100xf32>
    %19 = tpu.matmul %12, %5, %cst_17 {dimension_numbers = #tpu.dot_dimension_numbers<[1], [0], [0], [1], [0, 0, 1, 1], [], []>} : vector<2x100xf32>, vector<100x100xf32>, vector<2x100xf32> -> vector<2x100xf32>
    %20 = vector.broadcast %11 : vector<1x100xf32> to vector<2x100xf32>
    %21 = arith.addf %19, %20 : vector<2x100xf32>
    %22 = arith.index_cast %c0_i32 : i32 to index
    %c0_18 = arith.constant 0 : index
    %c0_19 = arith.constant 0 : index
    %23 = vector.load %arg1[%22, %c0_18, %c0_19] : memref<8x2x100xf32, #tpu.memory_space<vmem>>, vector<1x2x100xf32>
    %24 = vector.shape_cast %23 : vector<1x2x100xf32> to vector<2x100xf32>
    %25 = arith.addf %24, %15 : vector<2x100xf32>
    %26 = arith.negf %25 : vector<2x100xf32>
    %27 = math.exp %26 : vector<2x100xf32>
    %cst_20 = arith.constant 1.000000e+00 : f32
    %28 = vector.broadcast %cst_20 : f32 to vector<2x100xf32>
    %29 = arith.addf %28, %27 : vector<2x100xf32>
    %30 = arith.divf %28, %29 : vector<2x100xf32>
    %31 = arith.index_cast %c0_i32 : i32 to index
    %c0_21 = arith.constant 0 : index
    %c0_22 = arith.constant 0 : index
    %32 = vector.load %arg2[%31, %c0_21, %c0_22] : memref<8x2x100xf32, #tpu.memory_space<vmem>>, vector<1x2x100xf32>
    %33 = vector.shape_cast %32 : vector<1x2x100xf32> to vector<2x100xf32>
    %34 = arith.addf %33, %18 : vector<2x100xf32>
    %35 = arith.negf %34 : vector<2x100xf32>
    %36 = math.exp %35 : vector<2x100xf32>
    %cst_23 = arith.constant 1.000000e+00 : f32
    %37 = vector.broadcast %cst_23 : f32 to vector<2x100xf32>
    %38 = arith.addf %37, %36 : vector<2x100xf32>
    %39 = arith.divf %37, %38 : vector<2x100xf32>
    %40 = arith.index_cast %c0_i32 : i32 to index
    %c0_24 = arith.constant 0 : index
    %c0_25 = arith.constant 0 : index
    %41 = vector.load %arg3[%40, %c0_24, %c0_25] : memref<8x2x100xf32, #tpu.memory_space<vmem>>, vector<1x2x100xf32>
    %42 = vector.shape_cast %41 : vector<1x2x100xf32> to vector<2x100xf32>
    %43 = arith.mulf %30, %21 : vector<2x100xf32>
    %44 = arith.addf %42, %43 : vector<2x100xf32>
    %45 = math.tanh %44 : vector<2x100xf32>
    %cst_26 = arith.constant 1.000000e+00 : f32
    %46 = vector.broadcast %cst_26 : f32 to vector<2x100xf32>
    %47 = arith.subf %46, %39 : vector<2x100xf32>
    %48 = arith.mulf %47, %45 : vector<2x100xf32>
    %49 = arith.mulf %39, %12 : vector<2x100xf32>
    %50 = arith.addf %48, %49 : vector<2x100xf32>
    %51 = arith.index_cast %c0_i32 : i32 to index
    %c0_27 = arith.constant 0 : index
    %c0_28 = arith.constant 0 : index
    %52 = vector.load %arg6[%51, %c0_27, %c0_28] : memref<8x2x100xf32, #tpu.memory_space<vmem>>, vector<1x2x100xf32>
    %53 = vector.shape_cast %52 : vector<1x2x100xf32> to vector<2x100xf32>
    %54 = vector.shape_cast %50 : vector<2x100xf32> to vector<1x2x100xf32>
    tpu.vector_store %arg6[%51, %c0_27, %c0_28], %54 {strides = array<i32>} : memref<8x2x100xf32, #tpu.memory_space<vmem>>, vector<1x2x100xf32>,
    %c1_i32 = arith.constant 1 : i32
    %cst_29 = arith.constant dense<0.000000e+00> : vector<2x100xf32>
    %55 = tpu.matmul %50, %1, %cst_29 {dimension_numbers = #tpu.dot_dimension_numbers<[1], [0], [0], [1], [0, 0, 1, 1], [], []>} : vector<2x100xf32>, vector<100x100xf32>, vector<2x100xf32> -> vector<2x100xf32>
    %56 = vector.broadcast %7 : vector<1x100xf32> to vector<2x100xf32>
    %57 = arith.addf %55, %56 : vector<2x100xf32>
    %cst_30 = arith.constant dense<0.000000e+00> : vector<2x100xf32>
    %58 = tpu.matmul %50, %3, %cst_30 {dimension_numbers = #tpu.dot_dimension_numbers<[1], [0], [0], [1], [0, 0, 1, 1], [], []>} : vector<2x100xf32>, vector<100x100xf32>, vector<2x100xf32> -> vector<2x100xf32>
    %59 = vector.broadcast %9 : vector<1x100xf32> to vector<2x100xf32>
    %60 = arith.addf %58, %59 : vector<2x100xf32>
    %cst_31 = arith.constant dense<0.000000e+00> : vector<2x100xf32>
    %61 = tpu.matmul %50, %5, %cst_31 {dimension_numbers = #tpu.dot_dimension_numbers<[1], [0], [0], [1], [0, 0, 1, 1], [], []>} : vector<2x100xf32>, vector<100x100xf32>, vector<2x100xf32> -> vector<2x100xf32>
    %62 = vector.broadcast %11 : vector<1x100xf32> to vector<2x100xf32>
    %63 = arith.addf %61, %62 : vector<2x100xf32>
    %64 = arith.index_cast %c1_i32 : i32 to index
    %c0_32 = arith.constant 0 : index
    %c0_33 = arith.constant 0 : index
    %65 = vector.load %arg1[%64, %c0_32, %c0_33] : memref<8x2x100xf32, #tpu.memory_space<vmem>>, vector<1x2x100xf32>
    %66 = vector.shape_cast %65 : vector<1x2x100xf32> to vector<2x100xf32>
    %67 = arith.addf %66, %57 : vector<2x100xf32>
    %68 = arith.negf %67 : vector<2x100xf32>
    %69 = math.exp %68 : vector<2x100xf32>
    %cst_34 = arith.constant 1.000000e+00 : f32
    %70 = vector.broadcast %cst_34 : f32 to vector<2x100xf32>
    %71 = arith.addf %70, %69 : vector<2x100xf32>
    %72 = arith.divf %70, %71 : vector<2x100xf32>
    %73 = arith.index_cast %c1_i32 : i32 to index
    %c0_35 = arith.constant 0 : index
    %c0_36 = arith.constant 0 : index
    %74 = vector.load %arg2[%73, %c0_35, %c0_36] : memref<8x2x100xf32, #tpu.memory_space<vmem>>, vector<1x2x100xf32>
    %75 = vector.shape_cast %74 : vector<1x2x100xf32> to vector<2x100xf32>
    %76 = arith.addf %75, %60 : vector<2x100xf32>
    %77 = arith.negf %76 : vector<2x100xf32>
    %78 = math.exp %77 : vector<2x100xf32>
    %cst_37 = arith.constant 1.000000e+00 : f32
    %79 = vector.broadcast %cst_37 : f32 to vector<2x100xf32>
    %80 = arith.addf %79, %78 : vector<2x100xf32>
    %81 = arith.divf %79, %80 : vector<2x100xf32>
    %82 = arith.index_cast %c1_i32 : i32 to index
    %c0_38 = arith.constant 0 : index
    %c0_39 = arith.constant 0 : index
    %83 = vector.load %arg3[%82, %c0_38, %c0_39] : memref<8x2x100xf32, #tpu.memory_space<vmem>>, vector<1x2x100xf32>
    %84 = vector.shape_cast %83 : vector<1x2x100xf32> to vector<2x100xf32>
    %85 = arith.mulf %72, %63 : vector<2x100xf32>
    %86 = arith.addf %84, %85 : vector<2x100xf32>
    %87 = math.tanh %86 : vector<2x100xf32>
    %cst_40 = arith.constant 1.000000e+00 : f32
    %88 = vector.broadcast %cst_40 : f32 to vector<2x100xf32>
    %89 = arith.subf %88, %81 : vector<2x100xf32>
    %90 = arith.mulf %89, %87 : vector<2x100xf32>
    %91 = arith.mulf %81, %50 : vector<2x100xf32>
    %92 = arith.addf %90, %91 : vector<2x100xf32>
    %93 = arith.index_cast %c1_i32 : i32 to index
    %c0_41 = arith.constant 0 : index
    %c0_42 = arith.constant 0 : index
    %94 = vector.load %arg6[%93, %c0_41, %c0_42] : memref<8x2x100xf32, #tpu.memory_space<vmem>>, vector<1x2x100xf32>
    %95 = vector.shape_cast %94 : vector<1x2x100xf32> to vector<2x100xf32>
    %96 = vector.shape_cast %92 : vector<2x100xf32> to vector<1x2x100xf32>
    tpu.vector_store %arg6[%93, %c0_41, %c0_42], %96 {strides = array<i32>} : memref<8x2x100xf32, #tpu.memory_space<vmem>>, vector<1x2x100xf32>,
    %c2_i32 = arith.constant 2 : i32
    %cst_43 = arith.constant dense<0.000000e+00> : vector<2x100xf32>
    %97 = tpu.matmul %92, %1, %cst_43 {dimension_numbers = #tpu.dot_dimension_numbers<[1], [0], [0], [1], [0, 0, 1, 1], [], []>} : vector<2x100xf32>, vector<100x100xf32>, vector<2x100xf32> -> vector<2x100xf32>
    %98 = vector.broadcast %7 : vector<1x100xf32> to vector<2x100xf32>
    %99 = arith.addf %97, %98 : vector<2x100xf32>
    %cst_44 = arith.constant dense<0.000000e+00> : vector<2x100xf32>
    %100 = tpu.matmul %92, %3, %cst_44 {dimension_numbers = #tpu.dot_dimension_numbers<[1], [0], [0], [1], [0, 0, 1, 1], [], []>} : vector<2x100xf32>, vector<100x100xf32>, vector<2x100xf32> -> vector<2x100xf32>
    %101 = vector.broadcast %9 : vector<1x100xf32> to vector<2x100xf32>
    %102 = arith.addf %100, %101 : vector<2x100xf32>
    %cst_45 = arith.constant dense<0.000000e+00> : vector<2x100xf32>
    %103 = tpu.matmul %92, %5, %cst_45 {dimension_numbers = #tpu.dot_dimension_numbers<[1], [0], [0], [1], [0, 0, 1, 1], [], []>} : vector<2x100xf32>, vector<100x100xf32>, vector<2x100xf32> -> vector<2x100xf32>
    %104 = vector.broadcast %11 : vector<1x100xf32> to vector<2x100xf32>
    %105 = arith.addf %103, %104 : vector<2x100xf32>
    %106 = arith.index_cast %c2_i32 : i32 to index
    %c0_46 = arith.constant 0 : index
    %c0_47 = arith.constant 0 : index
    %107 = vector.load %arg1[%106, %c0_46, %c0_47] : memref<8x2x100xf32, #tpu.memory_space<vmem>>, vector<1x2x100xf32>
    %108 = vector.shape_cast %107 : vector<1x2x100xf32> to vector<2x100xf32>
    %109 = arith.addf %108, %99 : vector<2x100xf32>
    %110 = arith.negf %109 : vector<2x100xf32>
    %111 = math.exp %110 : vector<2x100xf32>
    %cst_48 = arith.constant 1.000000e+00 : f32
    %112 = vector.broadcast %cst_48 : f32 to vector<2x100xf32>
    %113 = arith.addf %112, %111 : vector<2x100xf32>
    %114 = arith.divf %112, %113 : vector<2x100xf32>
    %115 = arith.index_cast %c2_i32 : i32 to index
    %c0_49 = arith.constant 0 : index
    %c0_50 = arith.constant 0 : index
    %116 = vector.load %arg2[%115, %c0_49, %c0_50] : memref<8x2x100xf32, #tpu.memory_space<vmem>>, vector<1x2x100xf32>
    %117 = vector.shape_cast %116 : vector<1x2x100xf32> to vector<2x100xf32>
    %118 = arith.addf %117, %102 : vector<2x100xf32>
    %119 = arith.negf %118 : vector<2x100xf32>
    %120 = math.exp %119 : vector<2x100xf32>
    %cst_51 = arith.constant 1.000000e+00 : f32
    %121 = vector.broadcast %cst_51 : f32 to vector<2x100xf32>
    %122 = arith.addf %121, %120 : vector<2x100xf32>
    %123 = arith.divf %121, %122 : vector<2x100xf32>
    %124 = arith.index_cast %c2_i32 : i32 to index
    %c0_52 = arith.constant 0 : index
    %c0_53 = arith.constant 0 : index
    %125 = vector.load %arg3[%124, %c0_52, %c0_53] : memref<8x2x100xf32, #tpu.memory_space<vmem>>, vector<1x2x100xf32>
    %126 = vector.shape_cast %125 : vector<1x2x100xf32> to vector<2x100xf32>
    %127 = arith.mulf %114, %105 : vector<2x100xf32>
    %128 = arith.addf %126, %127 : vector<2x100xf32>
    %129 = math.tanh %128 : vector<2x100xf32>
    %cst_54 = arith.constant 1.000000e+00 : f32
    %130 = vector.broadcast %cst_54 : f32 to vector<2x100xf32>
    %131 = arith.subf %130, %123 : vector<2x100xf32>
    %132 = arith.mulf %131, %129 : vector<2x100xf32>
    %133 = arith.mulf %123, %92 : vector<2x100xf32>
    %134 = arith.addf %132, %133 : vector<2x100xf32>
    %135 = arith.index_cast %c2_i32 : i32 to index
    %c0_55 = arith.constant 0 : index
    %c0_56 = arith.constant 0 : index
    %136 = vector.load %arg6[%135, %c0_55, %c0_56] : memref<8x2x100xf32, #tpu.memory_space<vmem>>, vector<1x2x100xf32>
    %137 = vector.shape_cast %136 : vector<1x2x100xf32> to vector<2x100xf32>
    %138 = vector.shape_cast %134 : vector<2x100xf32> to vector<1x2x100xf32>
    tpu.vector_store %arg6[%135, %c0_55, %c0_56], %138 {strides = array<i32>} : memref<8x2x100xf32, #tpu.memory_space<vmem>>, vector<1x2x100xf32>,
    %c3_i32 = arith.constant 3 : i32
    %cst_57 = arith.constant dense<0.000000e+00> : vector<2x100xf32>
    %139 = tpu.matmul %134, %1, %cst_57 {dimension_numbers = #tpu.dot_dimension_numbers<[1], [0], [0], [1], [0, 0, 1, 1], [], []>} : vector<2x100xf32>, vector<100x100xf32>, vector<2x100xf32> -> vector<2x100xf32>
    %140 = vector.broadcast %7 : vector<1x100xf32> to vector<2x100xf32>
    %141 = arith.addf %139, %140 : vector<2x100xf32>
    %cst_58 = arith.constant dense<0.000000e+00> : vector<2x100xf32>
    %142 = tpu.matmul %134, %3, %cst_58 {dimension_numbers = #tpu.dot_dimension_numbers<[1], [0], [0], [1], [0, 0, 1, 1], [], []>} : vector<2x100xf32>, vector<100x100xf32>, vector<2x100xf32> -> vector<2x100xf32>
    %143 = vector.broadcast %9 : vector<1x100xf32> to vector<2x100xf32>
    %144 = arith.addf %142, %143 : vector<2x100xf32>
    %cst_59 = arith.constant dense<0.000000e+00> : vector<2x100xf32>
    %145 = tpu.matmul %134, %5, %cst_59 {dimension_numbers = #tpu.dot_dimension_numbers<[1], [0], [0], [1], [0, 0, 1, 1], [], []>} : vector<2x100xf32>, vector<100x100xf32>, vector<2x100xf32> -> vector<2x100xf32>
    %146 = vector.broadcast %11 : vector<1x100xf32> to vector<2x100xf32>
    %147 = arith.addf %145, %146 : vector<2x100xf32>
    %148 = arith.index_cast %c3_i32 : i32 to index
    %c0_60 = arith.constant 0 : index
    %c0_61 = arith.constant 0 : index
    %149 = vector.load %arg1[%148, %c0_60, %c0_61] : memref<8x2x100xf32, #tpu.memory_space<vmem>>, vector<1x2x100xf32>
    %150 = vector.shape_cast %149 : vector<1x2x100xf32> to vector<2x100xf32>
    %151 = arith.addf %150, %141 : vector<2x100xf32>
    %152 = arith.negf %151 : vector<2x100xf32>
    %153 = math.exp %152 : vector<2x100xf32>
    %cst_62 = arith.constant 1.000000e+00 : f32
    %154 = vector.broadcast %cst_62 : f32 to vector<2x100xf32>
    %155 = arith.addf %154, %153 : vector<2x100xf32>
    %156 = arith.divf %154, %155 : vector<2x100xf32>
    %157 = arith.index_cast %c3_i32 : i32 to index
    %c0_63 = arith.constant 0 : index
    %c0_64 = arith.constant 0 : index
    %158 = vector.load %arg2[%157, %c0_63, %c0_64] : memref<8x2x100xf32, #tpu.memory_space<vmem>>, vector<1x2x100xf32>
    %159 = vector.shape_cast %158 : vector<1x2x100xf32> to vector<2x100xf32>
    %160 = arith.addf %159, %144 : vector<2x100xf32>
    %161 = arith.negf %160 : vector<2x100xf32>
    %162 = math.exp %161 : vector<2x100xf32>
    %cst_65 = arith.constant 1.000000e+00 : f32
    %163 = vector.broadcast %cst_65 : f32 to vector<2x100xf32>
    %164 = arith.addf %163, %162 : vector<2x100xf32>
    %165 = arith.divf %163, %164 : vector<2x100xf32>
    %166 = arith.index_cast %c3_i32 : i32 to index
    %c0_66 = arith.constant 0 : index
    %c0_67 = arith.constant 0 : index
    %167 = vector.load %arg3[%166, %c0_66, %c0_67] : memref<8x2x100xf32, #tpu.memory_space<vmem>>, vector<1x2x100xf32>
    %168 = vector.shape_cast %167 : vector<1x2x100xf32> to vector<2x100xf32>
    %169 = arith.mulf %156, %147 : vector<2x100xf32>
    %170 = arith.addf %168, %169 : vector<2x100xf32>
    %171 = math.tanh %170 : vector<2x100xf32>
    %cst_68 = arith.constant 1.000000e+00 : f32
    %172 = vector.broadcast %cst_68 : f32 to vector<2x100xf32>
    %173 = arith.subf %172, %165 : vector<2x100xf32>
    %174 = arith.mulf %173, %171 : vector<2x100xf32>
    %175 = arith.mulf %165, %134 : vector<2x100xf32>
    %176 = arith.addf %174, %175 : vector<2x100xf32>
    %177 = arith.index_cast %c3_i32 : i32 to index
    %c0_69 = arith.constant 0 : index
    %c0_70 = arith.constant 0 : index
    %178 = vector.load %arg6[%177, %c0_69, %c0_70] : memref<8x2x100xf32, #tpu.memory_space<vmem>>, vector<1x2x100xf32>
    %179 = vector.shape_cast %178 : vector<1x2x100xf32> to vector<2x100xf32>
    %180 = vector.shape_cast %176 : vector<2x100xf32> to vector<1x2x100xf32>
    tpu.vector_store %arg6[%177, %c0_69, %c0_70], %180 {strides = array<i32>} : memref<8x2x100xf32, #tpu.memory_space<vmem>>, vector<1x2x100xf32>,
    %c4_i32 = arith.constant 4 : i32
    %cst_71 = arith.constant dense<0.000000e+00> : vector<2x100xf32>
    %181 = tpu.matmul %176, %1, %cst_71 {dimension_numbers = #tpu.dot_dimension_numbers<[1], [0], [0], [1], [0, 0, 1, 1], [], []>} : vector<2x100xf32>, vector<100x100xf32>, vector<2x100xf32> -> vector<2x100xf32>
    %182 = vector.broadcast %7 : vector<1x100xf32> to vector<2x100xf32>
    %183 = arith.addf %181, %182 : vector<2x100xf32>
    %cst_72 = arith.constant dense<0.000000e+00> : vector<2x100xf32>
    %184 = tpu.matmul %176, %3, %cst_72 {dimension_numbers = #tpu.dot_dimension_numbers<[1], [0], [0], [1], [0, 0, 1, 1], [], []>} : vector<2x100xf32>, vector<100x100xf32>, vector<2x100xf32> -> vector<2x100xf32>
    %185 = vector.broadcast %9 : vector<1x100xf32> to vector<2x100xf32>
    %186 = arith.addf %184, %185 : vector<2x100xf32>
    %cst_73 = arith.constant dense<0.000000e+00> : vector<2x100xf32>
    %187 = tpu.matmul %176, %5, %cst_73 {dimension_numbers = #tpu.dot_dimension_numbers<[1], [0], [0], [1], [0, 0, 1, 1], [], []>} : vector<2x100xf32>, vector<100x100xf32>, vector<2x100xf32> -> vector<2x100xf32>
    %188 = vector.broadcast %11 : vector<1x100xf32> to vector<2x100xf32>
    %189 = arith.addf %187, %188 : vector<2x100xf32>
    %190 = arith.index_cast %c4_i32 : i32 to index
    %c0_74 = arith.constant 0 : index
    %c0_75 = arith.constant 0 : index
    %191 = vector.load %arg1[%190, %c0_74, %c0_75] : memref<8x2x100xf32, #tpu.memory_space<vmem>>, vector<1x2x100xf32>
    %192 = vector.shape_cast %191 : vector<1x2x100xf32> to vector<2x100xf32>
    %193 = arith.addf %192, %183 : vector<2x100xf32>
    %194 = arith.negf %193 : vector<2x100xf32>
    %195 = math.exp %194 : vector<2x100xf32>
    %cst_76 = arith.constant 1.000000e+00 : f32
    %196 = vector.broadcast %cst_76 : f32 to vector<2x100xf32>
    %197 = arith.addf %196, %195 : vector<2x100xf32>
    %198 = arith.divf %196, %197 : vector<2x100xf32>
    %199 = arith.index_cast %c4_i32 : i32 to index
    %c0_77 = arith.constant 0 : index
    %c0_78 = arith.constant 0 : index
    %200 = vector.load %arg2[%199, %c0_77, %c0_78] : memref<8x2x100xf32, #tpu.memory_space<vmem>>, vector<1x2x100xf32>
    %201 = vector.shape_cast %200 : vector<1x2x100xf32> to vector<2x100xf32>
    %202 = arith.addf %201, %186 : vector<2x100xf32>
    %203 = arith.negf %202 : vector<2x100xf32>
    %204 = math.exp %203 : vector<2x100xf32>
    %cst_79 = arith.constant 1.000000e+00 : f32
    %205 = vector.broadcast %cst_79 : f32 to vector<2x100xf32>
    %206 = arith.addf %205, %204 : vector<2x100xf32>
    %207 = arith.divf %205, %206 : vector<2x100xf32>
    %208 = arith.index_cast %c4_i32 : i32 to index
    %c0_80 = arith.constant 0 : index
    %c0_81 = arith.constant 0 : index
    %209 = vector.load %arg3[%208, %c0_80, %c0_81] : memref<8x2x100xf32, #tpu.memory_space<vmem>>, vector<1x2x100xf32>
    %210 = vector.shape_cast %209 : vector<1x2x100xf32> to vector<2x100xf32>
    %211 = arith.mulf %198, %189 : vector<2x100xf32>
    %212 = arith.addf %210, %211 : vector<2x100xf32>
    %213 = math.tanh %212 : vector<2x100xf32>
    %cst_82 = arith.constant 1.000000e+00 : f32
    %214 = vector.broadcast %cst_82 : f32 to vector<2x100xf32>
    %215 = arith.subf %214, %207 : vector<2x100xf32>
    %216 = arith.mulf %215, %213 : vector<2x100xf32>
    %217 = arith.mulf %207, %176 : vector<2x100xf32>
    %218 = arith.addf %216, %217 : vector<2x100xf32>
    %219 = arith.index_cast %c4_i32 : i32 to index
    %c0_83 = arith.constant 0 : index
    %c0_84 = arith.constant 0 : index
    %220 = vector.load %arg6[%219, %c0_83, %c0_84] : memref<8x2x100xf32, #tpu.memory_space<vmem>>, vector<1x2x100xf32>
    %221 = vector.shape_cast %220 : vector<1x2x100xf32> to vector<2x100xf32>
    %222 = vector.shape_cast %218 : vector<2x100xf32> to vector<1x2x100xf32>
    tpu.vector_store %arg6[%219, %c0_83, %c0_84], %222 {strides = array<i32>} : memref<8x2x100xf32, #tpu.memory_space<vmem>>, vector<1x2x100xf32>,
    %c5_i32 = arith.constant 5 : i32
    %cst_85 = arith.constant dense<0.000000e+00> : vector<2x100xf32>
    %223 = tpu.matmul %218, %1, %cst_85 {dimension_numbers = #tpu.dot_dimension_numbers<[1], [0], [0], [1], [0, 0, 1, 1], [], []>} : vector<2x100xf32>, vector<100x100xf32>, vector<2x100xf32> -> vector<2x100xf32>
    %224 = vector.broadcast %7 : vector<1x100xf32> to vector<2x100xf32>
    %225 = arith.addf %223, %224 : vector<2x100xf32>
    %cst_86 = arith.constant dense<0.000000e+00> : vector<2x100xf32>
    %226 = tpu.matmul %218, %3, %cst_86 {dimension_numbers = #tpu.dot_dimension_numbers<[1], [0], [0], [1], [0, 0, 1, 1], [], []>} : vector<2x100xf32>, vector<100x100xf32>, vector<2x100xf32> -> vector<2x100xf32>
    %227 = vector.broadcast %9 : vector<1x100xf32> to vector<2x100xf32>
    %228 = arith.addf %226, %227 : vector<2x100xf32>
    %cst_87 = arith.constant dense<0.000000e+00> : vector<2x100xf32>
    %229 = tpu.matmul %218, %5, %cst_87 {dimension_numbers = #tpu.dot_dimension_numbers<[1], [0], [0], [1], [0, 0, 1, 1], [], []>} : vector<2x100xf32>, vector<100x100xf32>, vector<2x100xf32> -> vector<2x100xf32>
    %230 = vector.broadcast %11 : vector<1x100xf32> to vector<2x100xf32>
    %231 = arith.addf %229, %230 : vector<2x100xf32>
    %232 = arith.index_cast %c5_i32 : i32 to index
    %c0_88 = arith.constant 0 : index
    %c0_89 = arith.constant 0 : index
    %233 = vector.load %arg1[%232, %c0_88, %c0_89] : memref<8x2x100xf32, #tpu.memory_space<vmem>>, vector<1x2x100xf32>
    %234 = vector.shape_cast %233 : vector<1x2x100xf32> to vector<2x100xf32>
    %235 = arith.addf %234, %225 : vector<2x100xf32>
    %236 = arith.negf %235 : vector<2x100xf32>
    %237 = math.exp %236 : vector<2x100xf32>
    %cst_90 = arith.constant 1.000000e+00 : f32
    %238 = vector.broadcast %cst_90 : f32 to vector<2x100xf32>
    %239 = arith.addf %238, %237 : vector<2x100xf32>
    %240 = arith.divf %238, %239 : vector<2x100xf32>
    %241 = arith.index_cast %c5_i32 : i32 to index
    %c0_91 = arith.constant 0 : index
    %c0_92 = arith.constant 0 : index
    %242 = vector.load %arg2[%241, %c0_91, %c0_92] : memref<8x2x100xf32, #tpu.memory_space<vmem>>, vector<1x2x100xf32>
    %243 = vector.shape_cast %242 : vector<1x2x100xf32> to vector<2x100xf32>
    %244 = arith.addf %243, %228 : vector<2x100xf32>
    %245 = arith.negf %244 : vector<2x100xf32>
    %246 = math.exp %245 : vector<2x100xf32>
    %cst_93 = arith.constant 1.000000e+00 : f32
    %247 = vector.broadcast %cst_93 : f32 to vector<2x100xf32>
    %248 = arith.addf %247, %246 : vector<2x100xf32>
    %249 = arith.divf %247, %248 : vector<2x100xf32>
    %250 = arith.index_cast %c5_i32 : i32 to index
    %c0_94 = arith.constant 0 : index
    %c0_95 = arith.constant 0 : index
    %251 = vector.load %arg3[%250, %c0_94, %c0_95] : memref<8x2x100xf32, #tpu.memory_space<vmem>>, vector<1x2x100xf32>
    %252 = vector.shape_cast %251 : vector<1x2x100xf32> to vector<2x100xf32>
    %253 = arith.mulf %240, %231 : vector<2x100xf32>
    %254 = arith.addf %252, %253 : vector<2x100xf32>
    %255 = math.tanh %254 : vector<2x100xf32>
    %cst_96 = arith.constant 1.000000e+00 : f32
    %256 = vector.broadcast %cst_96 : f32 to vector<2x100xf32>
    %257 = arith.subf %256, %249 : vector<2x100xf32>
    %258 = arith.mulf %257, %255 : vector<2x100xf32>
    %259 = arith.mulf %249, %218 : vector<2x100xf32>
    %260 = arith.addf %258, %259 : vector<2x100xf32>
    %261 = arith.index_cast %c5_i32 : i32 to index
    %c0_97 = arith.constant 0 : index
    %c0_98 = arith.constant 0 : index
    %262 = vector.load %arg6[%261, %c0_97, %c0_98] : memref<8x2x100xf32, #tpu.memory_space<vmem>>, vector<1x2x100xf32>
    %263 = vector.shape_cast %262 : vector<1x2x100xf32> to vector<2x100xf32>
    %264 = vector.shape_cast %260 : vector<2x100xf32> to vector<1x2x100xf32>
    tpu.vector_store %arg6[%261, %c0_97, %c0_98], %264 {strides = array<i32>} : memref<8x2x100xf32, #tpu.memory_space<vmem>>, vector<1x2x100xf32>,
    %c6_i32 = arith.constant 6 : i32
    %cst_99 = arith.constant dense<0.000000e+00> : vector<2x100xf32>
    %265 = tpu.matmul %260, %1, %cst_99 {dimension_numbers = #tpu.dot_dimension_numbers<[1], [0], [0], [1], [0, 0, 1, 1], [], []>} : vector<2x100xf32>, vector<100x100xf32>, vector<2x100xf32> -> vector<2x100xf32>
    %266 = vector.broadcast %7 : vector<1x100xf32> to vector<2x100xf32>
    %267 = arith.addf %265, %266 : vector<2x100xf32>
    %cst_100 = arith.constant dense<0.000000e+00> : vector<2x100xf32>
    %268 = tpu.matmul %260, %3, %cst_100 {dimension_numbers = #tpu.dot_dimension_numbers<[1], [0], [0], [1], [0, 0, 1, 1], [], []>} : vector<2x100xf32>, vector<100x100xf32>, vector<2x100xf32> -> vector<2x100xf32>
    %269 = vector.broadcast %9 : vector<1x100xf32> to vector<2x100xf32>
    %270 = arith.addf %268, %269 : vector<2x100xf32>
    %cst_101 = arith.constant dense<0.000000e+00> : vector<2x100xf32>
    %271 = tpu.matmul %260, %5, %cst_101 {dimension_numbers = #tpu.dot_dimension_numbers<[1], [0], [0], [1], [0, 0, 1, 1], [], []>} : vector<2x100xf32>, vector<100x100xf32>, vector<2x100xf32> -> vector<2x100xf32>
    %272 = vector.broadcast %11 : vector<1x100xf32> to vector<2x100xf32>
    %273 = arith.addf %271, %272 : vector<2x100xf32>
    %274 = arith.index_cast %c6_i32 : i32 to index
    %c0_102 = arith.constant 0 : index
    %c0_103 = arith.constant 0 : index
    %275 = vector.load %arg1[%274, %c0_102, %c0_103] : memref<8x2x100xf32, #tpu.memory_space<vmem>>, vector<1x2x100xf32>
    %276 = vector.shape_cast %275 : vector<1x2x100xf32> to vector<2x100xf32>
    %277 = arith.addf %276, %267 : vector<2x100xf32>
    %278 = arith.negf %277 : vector<2x100xf32>
    %279 = math.exp %278 : vector<2x100xf32>
    %cst_104 = arith.constant 1.000000e+00 : f32
    %280 = vector.broadcast %cst_104 : f32 to vector<2x100xf32>
    %281 = arith.addf %280, %279 : vector<2x100xf32>
    %282 = arith.divf %280, %281 : vector<2x100xf32>
    %283 = arith.index_cast %c6_i32 : i32 to index
    %c0_105 = arith.constant 0 : index
    %c0_106 = arith.constant 0 : index
    %284 = vector.load %arg2[%283, %c0_105, %c0_106] : memref<8x2x100xf32, #tpu.memory_space<vmem>>, vector<1x2x100xf32>
    %285 = vector.shape_cast %284 : vector<1x2x100xf32> to vector<2x100xf32>
    %286 = arith.addf %285, %270 : vector<2x100xf32>
    %287 = arith.negf %286 : vector<2x100xf32>
    %288 = math.exp %287 : vector<2x100xf32>
    %cst_107 = arith.constant 1.000000e+00 : f32
    %289 = vector.broadcast %cst_107 : f32 to vector<2x100xf32>
    %290 = arith.addf %289, %288 : vector<2x100xf32>
    %291 = arith.divf %289, %290 : vector<2x100xf32>
    %292 = arith.index_cast %c6_i32 : i32 to index
    %c0_108 = arith.constant 0 : index
    %c0_109 = arith.constant 0 : index
    %293 = vector.load %arg3[%292, %c0_108, %c0_109] : memref<8x2x100xf32, #tpu.memory_space<vmem>>, vector<1x2x100xf32>
    %294 = vector.shape_cast %293 : vector<1x2x100xf32> to vector<2x100xf32>
    %295 = arith.mulf %282, %273 : vector<2x100xf32>
    %296 = arith.addf %294, %295 : vector<2x100xf32>
    %297 = math.tanh %296 : vector<2x100xf32>
    %cst_110 = arith.constant 1.000000e+00 : f32
    %298 = vector.broadcast %cst_110 : f32 to vector<2x100xf32>
    %299 = arith.subf %298, %291 : vector<2x100xf32>
    %300 = arith.mulf %299, %297 : vector<2x100xf32>
    %301 = arith.mulf %291, %260 : vector<2x100xf32>
    %302 = arith.addf %300, %301 : vector<2x100xf32>
    %303 = arith.index_cast %c6_i32 : i32 to index
    %c0_111 = arith.constant 0 : index
    %c0_112 = arith.constant 0 : index
    %304 = vector.load %arg6[%303, %c0_111, %c0_112] : memref<8x2x100xf32, #tpu.memory_space<vmem>>, vector<1x2x100xf32>
    %305 = vector.shape_cast %304 : vector<1x2x100xf32> to vector<2x100xf32>
    %306 = vector.shape_cast %302 : vector<2x100xf32> to vector<1x2x100xf32>
    tpu.vector_store %arg6[%303, %c0_111, %c0_112], %306 {strides = array<i32>} : memref<8x2x100xf32, #tpu.memory_space<vmem>>, vector<1x2x100xf32>,
    %c7_i32 = arith.constant 7 : i32
    %cst_113 = arith.constant dense<0.000000e+00> : vector<2x100xf32>
    %307 = tpu.matmul %302, %1, %cst_113 {dimension_numbers = #tpu.dot_dimension_numbers<[1], [0], [0], [1], [0, 0, 1, 1], [], []>} : vector<2x100xf32>, vector<100x100xf32>, vector<2x100xf32> -> vector<2x100xf32>
    %308 = vector.broadcast %7 : vector<1x100xf32> to vector<2x100xf32>
    %309 = arith.addf %307, %308 : vector<2x100xf32>
    %cst_114 = arith.constant dense<0.000000e+00> : vector<2x100xf32>
    %310 = tpu.matmul %302, %3, %cst_114 {dimension_numbers = #tpu.dot_dimension_numbers<[1], [0], [0], [1], [0, 0, 1, 1], [], []>} : vector<2x100xf32>, vector<100x100xf32>, vector<2x100xf32> -> vector<2x100xf32>
    %311 = vector.broadcast %9 : vector<1x100xf32> to vector<2x100xf32>
    %312 = arith.addf %310, %311 : vector<2x100xf32>
    %cst_115 = arith.constant dense<0.000000e+00> : vector<2x100xf32>
    %313 = tpu.matmul %302, %5, %cst_115 {dimension_numbers = #tpu.dot_dimension_numbers<[1], [0], [0], [1], [0, 0, 1, 1], [], []>} : vector<2x100xf32>, vector<100x100xf32>, vector<2x100xf32> -> vector<2x100xf32>
    %314 = vector.broadcast %11 : vector<1x100xf32> to vector<2x100xf32>
    %315 = arith.addf %313, %314 : vector<2x100xf32>
    %316 = arith.index_cast %c7_i32 : i32 to index
    %c0_116 = arith.constant 0 : index
    %c0_117 = arith.constant 0 : index
    %317 = vector.load %arg1[%316, %c0_116, %c0_117] : memref<8x2x100xf32, #tpu.memory_space<vmem>>, vector<1x2x100xf32>
    %318 = vector.shape_cast %317 : vector<1x2x100xf32> to vector<2x100xf32>
    %319 = arith.addf %318, %309 : vector<2x100xf32>
    %320 = arith.negf %319 : vector<2x100xf32>
    %321 = math.exp %320 : vector<2x100xf32>
    %cst_118 = arith.constant 1.000000e+00 : f32
    %322 = vector.broadcast %cst_118 : f32 to vector<2x100xf32>
    %323 = arith.addf %322, %321 : vector<2x100xf32>
    %324 = arith.divf %322, %323 : vector<2x100xf32>
    %325 = arith.index_cast %c7_i32 : i32 to index
    %c0_119 = arith.constant 0 : index
    %c0_120 = arith.constant 0 : index
    %326 = vector.load %arg2[%325, %c0_119, %c0_120] : memref<8x2x100xf32, #tpu.memory_space<vmem>>, vector<1x2x100xf32>
    %327 = vector.shape_cast %326 : vector<1x2x100xf32> to vector<2x100xf32>
    %328 = arith.addf %327, %312 : vector<2x100xf32>
    %329 = arith.negf %328 : vector<2x100xf32>
    %330 = math.exp %329 : vector<2x100xf32>
    %cst_121 = arith.constant 1.000000e+00 : f32
    %331 = vector.broadcast %cst_121 : f32 to vector<2x100xf32>
    %332 = arith.addf %331, %330 : vector<2x100xf32>
    %333 = arith.divf %331, %332 : vector<2x100xf32>
    %334 = arith.index_cast %c7_i32 : i32 to index
    %c0_122 = arith.constant 0 : index
    %c0_123 = arith.constant 0 : index
    %335 = vector.load %arg3[%334, %c0_122, %c0_123] : memref<8x2x100xf32, #tpu.memory_space<vmem>>, vector<1x2x100xf32>
    %336 = vector.shape_cast %335 : vector<1x2x100xf32> to vector<2x100xf32>
    %337 = arith.mulf %324, %315 : vector<2x100xf32>
    %338 = arith.addf %336, %337 : vector<2x100xf32>
    %339 = math.tanh %338 : vector<2x100xf32>
    %cst_124 = arith.constant 1.000000e+00 : f32
    %340 = vector.broadcast %cst_124 : f32 to vector<2x100xf32>
    %341 = arith.subf %340, %333 : vector<2x100xf32>
    %342 = arith.mulf %341, %339 : vector<2x100xf32>
    %343 = arith.mulf %333, %302 : vector<2x100xf32>
    %344 = arith.addf %342, %343 : vector<2x100xf32>
    %345 = arith.index_cast %c7_i32 : i32 to index
    %c0_125 = arith.constant 0 : index
    %c0_126 = arith.constant 0 : index
    %346 = vector.load %arg6[%345, %c0_125, %c0_126] : memref<8x2x100xf32, #tpu.memory_space<vmem>>, vector<1x2x100xf32>
    %347 = vector.shape_cast %346 : vector<1x2x100xf32> to vector<2x100xf32>
    %348 = vector.shape_cast %344 : vector<2x100xf32> to vector<1x2x100xf32>
    tpu.vector_store %arg6[%345, %c0_125, %c0_126], %348 {strides = array<i32>} : memref<8x2x100xf32, #tpu.memory_space<vmem>>, vector<1x2x100xf32>,
    %c8_i32 = arith.constant 8 : i32
    return
  }
  func.func @transform_0(%arg0: i32) -> (i32, i32, i32) {
    %c0_i32 = arith.constant 0 : i32
    %c0_i32_0 = arith.constant 0 : i32
    %c0_i32_1 = arith.constant 0 : i32
    %c0_i32_2 = arith.constant 0 : i32
    return %c0_i32, %c0_i32_0, %c0_i32_1 : i32, i32, i32
  }
  func.func @transform_1(%arg0: i32) -> (i32, i32, i32) {
    %c0_i32 = arith.constant 0 : i32
    %c0_i32_0 = arith.constant 0 : i32
    %c0_i32_1 = arith.constant 0 : i32
    %c0_i32_2 = arith.constant 0 : i32
    return %c0_i32, %c0_i32_0, %c0_i32_1 : i32, i32, i32
  }
  func.func @transform_2(%arg0: i32) -> (i32, i32, i32) {
    %c0_i32 = arith.constant 0 : i32
    %c0_i32_0 = arith.constant 0 : i32
    %c0_i32_1 = arith.constant 0 : i32
    %c0_i32_2 = arith.constant 0 : i32
    return %c0_i32, %c0_i32_0, %c0_i32_1 : i32, i32, i32
  }
  func.func @transform_3(%arg0: i32) -> (i32, i32, i32) {
    %c0_i32 = arith.constant 0 : i32
    %c0_i32_0 = arith.constant 0 : i32
    %c0_i32_1 = arith.constant 0 : i32
    %c0_i32_2 = arith.constant 0 : i32
    return %c0_i32, %c0_i32_0, %c0_i32_1 : i32, i32, i32
  }
  func.func @transform_4(%arg0: i32) -> (i32, i32, i32) {
    %c0_i32 = arith.constant 0 : i32
    %c0_i32_0 = arith.constant 0 : i32
    %c0_i32_1 = arith.constant 0 : i32
    %c0_i32_2 = arith.constant 0 : i32
    return %c0_i32, %c0_i32_0, %c0_i32_1 : i32, i32, i32
  }
  func.func @transform_5(%arg0: i32) -> (i32, i32, i32) {
    %c0_i32 = arith.constant 0 : i32
    %c0_i32_0 = arith.constant 0 : i32
    %c0_i32_1 = arith.constant 0 : i32
    %c0_i32_2 = arith.constant 0 : i32
    return %c0_i32, %c0_i32_0, %c0_i32_1 : i32, i32, i32
  }
}

module attributes {stable_mosaic.version = 11 : i64} {
  func.func @_ca_fx_kernel(%arg0: i32, %arg1: memref<2x8x100xf32, #tpu.memory_space<vmem>>, %arg2: memref<2x100x80xf32, #tpu.memory_space<vmem>>, %arg3: memref<3x80x80xf32, #tpu.memory_space<vmem>>, %arg4: memref<3x1x80xf32, #tpu.memory_space<vmem>>, %arg5: memref<2x3x8x80xf32, #tpu.memory_space<vmem>>) attributes {dimension_semantics = [#tpu.dimension_semantics<arbitrary>], iteration_bounds = array<i64: 1>, scalar_prefetch = 0 : i64, scratch_operands = 0 : i64, tpu.core_type = #tpu.core_type<tc>, window_params = [{pipeline_mode = #tpu.pipeline_mode<synchronous>, transform_indices = @transform_0, window_bounds = array<i64: 2, 8, 100>}, {pipeline_mode = #tpu.pipeline_mode<synchronous>, transform_indices = @transform_1, window_bounds = array<i64: 2, 100, 80>}, {pipeline_mode = #tpu.pipeline_mode<synchronous>, transform_indices = @transform_2, window_bounds = array<i64: 3, 80, 80>}, {pipeline_mode = #tpu.pipeline_mode<synchronous>, transform_indices = @transform_3, window_bounds = array<i64: 3, 1, 80>}, {pipeline_mode = #tpu.pipeline_mode<synchronous>, transform_indices = @transform_4, window_bounds = array<i64: 2, 3, 8, 80>}]} {
    %c0 = arith.constant 0 : index
    %c0_0 = arith.constant 0 : index
    %c0_1 = arith.constant 0 : index
    %0 = vector.load %arg3[%c0, %c0_0, %c0_1] : memref<3x80x80xf32, #tpu.memory_space<vmem>>, vector<1x80x80xf32>
    %1 = vector.shape_cast %0 : vector<1x80x80xf32> to vector<80x80xf32>
    %c1 = arith.constant 1 : index
    %c0_2 = arith.constant 0 : index
    %c0_3 = arith.constant 0 : index
    %2 = vector.load %arg3[%c1, %c0_2, %c0_3] : memref<3x80x80xf32, #tpu.memory_space<vmem>>, vector<1x80x80xf32>
    %3 = vector.shape_cast %2 : vector<1x80x80xf32> to vector<80x80xf32>
    %c2 = arith.constant 2 : index
    %c0_4 = arith.constant 0 : index
    %c0_5 = arith.constant 0 : index
    %4 = vector.load %arg3[%c2, %c0_4, %c0_5] : memref<3x80x80xf32, #tpu.memory_space<vmem>>, vector<1x80x80xf32>
    %5 = vector.shape_cast %4 : vector<1x80x80xf32> to vector<80x80xf32>
    %c0_6 = arith.constant 0 : index
    %c0_7 = arith.constant 0 : index
    %c0_8 = arith.constant 0 : index
    %6 = vector.load %arg4[%c0_6, %c0_7, %c0_8] : memref<3x1x80xf32, #tpu.memory_space<vmem>>, vector<1x1x80xf32>
    %7 = vector.shape_cast %6 : vector<1x1x80xf32> to vector<1x80xf32>
    %c1_9 = arith.constant 1 : index
    %c0_10 = arith.constant 0 : index
    %c0_11 = arith.constant 0 : index
    %8 = vector.load %arg4[%c1_9, %c0_10, %c0_11] : memref<3x1x80xf32, #tpu.memory_space<vmem>>, vector<1x1x80xf32>
    %9 = vector.shape_cast %8 : vector<1x1x80xf32> to vector<1x80xf32>
    %c2_12 = arith.constant 2 : index
    %c0_13 = arith.constant 0 : index
    %c0_14 = arith.constant 0 : index
    %10 = vector.load %arg4[%c2_12, %c0_13, %c0_14] : memref<3x1x80xf32, #tpu.memory_space<vmem>>, vector<1x1x80xf32>
    %11 = vector.shape_cast %10 : vector<1x1x80xf32> to vector<1x80xf32>
    %c0_15 = arith.constant 0 : index
    %c0_16 = arith.constant 0 : index
    %c0_17 = arith.constant 0 : index
    %12 = vector.load %arg1[%c0_15, %c0_16, %c0_17] : memref<2x8x100xf32, #tpu.memory_space<vmem>>, vector<1x8x100xf32>
    %13 = vector.shape_cast %12 : vector<1x8x100xf32> to vector<8x100xf32>
    %c0_18 = arith.constant 0 : index
    %c0_19 = arith.constant 0 : index
    %c0_20 = arith.constant 0 : index
    %14 = vector.load %arg2[%c0_18, %c0_19, %c0_20] : memref<2x100x80xf32, #tpu.memory_space<vmem>>, vector<1x100x80xf32>
    %15 = vector.shape_cast %14 : vector<1x100x80xf32> to vector<100x80xf32>
    %cst = arith.constant dense<0.000000e+00> : vector<8x80xf32>
    %16 = tpu.matmul %13, %15, %cst {dimension_numbers = #tpu.dot_dimension_numbers<[1], [0], [0], [1], [0, 0, 1, 1], [], []>} : vector<8x100xf32>, vector<100x80xf32>, vector<8x80xf32> -> vector<8x80xf32>
    %17 = math.tanh %16 : vector<8x80xf32>
    %cst_21 = arith.constant dense<0.000000e+00> : vector<8x80xf32>
    %18 = tpu.matmul %17, %1, %cst_21 {dimension_numbers = #tpu.dot_dimension_numbers<[1], [0], [0], [1], [0, 0, 1, 1], [], []>} : vector<8x80xf32>, vector<80x80xf32>, vector<8x80xf32> -> vector<8x80xf32>
    %19 = vector.broadcast %7 : vector<1x80xf32> to vector<8x80xf32>
    %20 = arith.addf %18, %19 : vector<8x80xf32>
    %c0_22 = arith.constant 0 : index
    %c0_23 = arith.constant 0 : index
    %c0_24 = arith.constant 0 : index
    %c0_25 = arith.constant 0 : index
    %21 = vector.load %arg5[%c0_22, %c0_23, %c0_24, %c0_25] : memref<2x3x8x80xf32, #tpu.memory_space<vmem>>, vector<1x1x8x80xf32>
    %22 = vector.shape_cast %21 : vector<1x1x8x80xf32> to vector<8x80xf32>
    %23 = vector.shape_cast %20 : vector<8x80xf32> to vector<1x1x8x80xf32>
    tpu.vector_store %arg5[%c0_22, %c0_23, %c0_24, %c0_25], %23 {strides = array<i32>} : memref<2x3x8x80xf32, #tpu.memory_space<vmem>>, vector<1x1x8x80xf32>,
    %cst_26 = arith.constant dense<0.000000e+00> : vector<8x80xf32>
    %24 = tpu.matmul %17, %3, %cst_26 {dimension_numbers = #tpu.dot_dimension_numbers<[1], [0], [0], [1], [0, 0, 1, 1], [], []>} : vector<8x80xf32>, vector<80x80xf32>, vector<8x80xf32> -> vector<8x80xf32>
    %25 = vector.broadcast %9 : vector<1x80xf32> to vector<8x80xf32>
    %26 = arith.addf %24, %25 : vector<8x80xf32>
    %c0_27 = arith.constant 0 : index
    %c1_28 = arith.constant 1 : index
    %c0_29 = arith.constant 0 : index
    %c0_30 = arith.constant 0 : index
    %27 = vector.load %arg5[%c0_27, %c1_28, %c0_29, %c0_30] : memref<2x3x8x80xf32, #tpu.memory_space<vmem>>, vector<1x1x8x80xf32>
    %28 = vector.shape_cast %27 : vector<1x1x8x80xf32> to vector<8x80xf32>
    %29 = vector.shape_cast %26 : vector<8x80xf32> to vector<1x1x8x80xf32>
    tpu.vector_store %arg5[%c0_27, %c1_28, %c0_29, %c0_30], %29 {strides = array<i32>} : memref<2x3x8x80xf32, #tpu.memory_space<vmem>>, vector<1x1x8x80xf32>,
    %cst_31 = arith.constant dense<0.000000e+00> : vector<8x80xf32>
    %30 = tpu.matmul %17, %5, %cst_31 {dimension_numbers = #tpu.dot_dimension_numbers<[1], [0], [0], [1], [0, 0, 1, 1], [], []>} : vector<8x80xf32>, vector<80x80xf32>, vector<8x80xf32> -> vector<8x80xf32>
    %31 = vector.broadcast %11 : vector<1x80xf32> to vector<8x80xf32>
    %32 = arith.addf %30, %31 : vector<8x80xf32>
    %c0_32 = arith.constant 0 : index
    %c2_33 = arith.constant 2 : index
    %c0_34 = arith.constant 0 : index
    %c0_35 = arith.constant 0 : index
    %33 = vector.load %arg5[%c0_32, %c2_33, %c0_34, %c0_35] : memref<2x3x8x80xf32, #tpu.memory_space<vmem>>, vector<1x1x8x80xf32>
    %34 = vector.shape_cast %33 : vector<1x1x8x80xf32> to vector<8x80xf32>
    %35 = vector.shape_cast %32 : vector<8x80xf32> to vector<1x1x8x80xf32>
    tpu.vector_store %arg5[%c0_32, %c2_33, %c0_34, %c0_35], %35 {strides = array<i32>} : memref<2x3x8x80xf32, #tpu.memory_space<vmem>>, vector<1x1x8x80xf32>,
    %c1_36 = arith.constant 1 : index
    %c0_37 = arith.constant 0 : index
    %c0_38 = arith.constant 0 : index
    %36 = vector.load %arg1[%c1_36, %c0_37, %c0_38] : memref<2x8x100xf32, #tpu.memory_space<vmem>>, vector<1x8x100xf32>
    %37 = vector.shape_cast %36 : vector<1x8x100xf32> to vector<8x100xf32>
    %c1_39 = arith.constant 1 : index
    %c0_40 = arith.constant 0 : index
    %c0_41 = arith.constant 0 : index
    %38 = vector.load %arg2[%c1_39, %c0_40, %c0_41] : memref<2x100x80xf32, #tpu.memory_space<vmem>>, vector<1x100x80xf32>
    %39 = vector.shape_cast %38 : vector<1x100x80xf32> to vector<100x80xf32>
    %cst_42 = arith.constant dense<0.000000e+00> : vector<8x80xf32>
    %40 = tpu.matmul %37, %39, %cst_42 {dimension_numbers = #tpu.dot_dimension_numbers<[1], [0], [0], [1], [0, 0, 1, 1], [], []>} : vector<8x100xf32>, vector<100x80xf32>, vector<8x80xf32> -> vector<8x80xf32>
    %41 = math.tanh %40 : vector<8x80xf32>
    %cst_43 = arith.constant dense<0.000000e+00> : vector<8x80xf32>
    %42 = tpu.matmul %41, %1, %cst_43 {dimension_numbers = #tpu.dot_dimension_numbers<[1], [0], [0], [1], [0, 0, 1, 1], [], []>} : vector<8x80xf32>, vector<80x80xf32>, vector<8x80xf32> -> vector<8x80xf32>
    %43 = vector.broadcast %7 : vector<1x80xf32> to vector<8x80xf32>
    %44 = arith.addf %42, %43 : vector<8x80xf32>
    %c1_44 = arith.constant 1 : index
    %c0_45 = arith.constant 0 : index
    %c0_46 = arith.constant 0 : index
    %c0_47 = arith.constant 0 : index
    %45 = vector.load %arg5[%c1_44, %c0_45, %c0_46, %c0_47] : memref<2x3x8x80xf32, #tpu.memory_space<vmem>>, vector<1x1x8x80xf32>
    %46 = vector.shape_cast %45 : vector<1x1x8x80xf32> to vector<8x80xf32>
    %47 = vector.shape_cast %44 : vector<8x80xf32> to vector<1x1x8x80xf32>
    tpu.vector_store %arg5[%c1_44, %c0_45, %c0_46, %c0_47], %47 {strides = array<i32>} : memref<2x3x8x80xf32, #tpu.memory_space<vmem>>, vector<1x1x8x80xf32>,
    %cst_48 = arith.constant dense<0.000000e+00> : vector<8x80xf32>
    %48 = tpu.matmul %41, %3, %cst_48 {dimension_numbers = #tpu.dot_dimension_numbers<[1], [0], [0], [1], [0, 0, 1, 1], [], []>} : vector<8x80xf32>, vector<80x80xf32>, vector<8x80xf32> -> vector<8x80xf32>
    %49 = vector.broadcast %9 : vector<1x80xf32> to vector<8x80xf32>
    %50 = arith.addf %48, %49 : vector<8x80xf32>
    %c1_49 = arith.constant 1 : index
    %c1_50 = arith.constant 1 : index
    %c0_51 = arith.constant 0 : index
    %c0_52 = arith.constant 0 : index
    %51 = vector.load %arg5[%c1_49, %c1_50, %c0_51, %c0_52] : memref<2x3x8x80xf32, #tpu.memory_space<vmem>>, vector<1x1x8x80xf32>
    %52 = vector.shape_cast %51 : vector<1x1x8x80xf32> to vector<8x80xf32>
    %53 = vector.shape_cast %50 : vector<8x80xf32> to vector<1x1x8x80xf32>
    tpu.vector_store %arg5[%c1_49, %c1_50, %c0_51, %c0_52], %53 {strides = array<i32>} : memref<2x3x8x80xf32, #tpu.memory_space<vmem>>, vector<1x1x8x80xf32>,
    %cst_53 = arith.constant dense<0.000000e+00> : vector<8x80xf32>
    %54 = tpu.matmul %41, %5, %cst_53 {dimension_numbers = #tpu.dot_dimension_numbers<[1], [0], [0], [1], [0, 0, 1, 1], [], []>} : vector<8x80xf32>, vector<80x80xf32>, vector<8x80xf32> -> vector<8x80xf32>
    %55 = vector.broadcast %11 : vector<1x80xf32> to vector<8x80xf32>
    %56 = arith.addf %54, %55 : vector<8x80xf32>
    %c1_54 = arith.constant 1 : index
    %c2_55 = arith.constant 2 : index
    %c0_56 = arith.constant 0 : index
    %c0_57 = arith.constant 0 : index
    %57 = vector.load %arg5[%c1_54, %c2_55, %c0_56, %c0_57] : memref<2x3x8x80xf32, #tpu.memory_space<vmem>>, vector<1x1x8x80xf32>
    %58 = vector.shape_cast %57 : vector<1x1x8x80xf32> to vector<8x80xf32>
    %59 = vector.shape_cast %56 : vector<8x80xf32> to vector<1x1x8x80xf32>
    tpu.vector_store %arg5[%c1_54, %c2_55, %c0_56, %c0_57], %59 {strides = array<i32>} : memref<2x3x8x80xf32, #tpu.memory_space<vmem>>, vector<1x1x8x80xf32>,
    return
  }
  func.func @transform_0(%arg0: i32) -> (i32, i32, i32) {
    %c0_i32 = arith.constant 0 : i32
    %c0_i32_0 = arith.constant 0 : i32
    %c0_i32_1 = arith.constant 0 : i32
    %c0_i32_2 = arith.constant 0 : i32
    return %c0_i32, %c0_i32_0, %c0_i32_1 : i32, i32, i32
  }
  func.func @transform_1(%arg0: i32) -> (i32, i32, i32) {
    %c0_i32 = arith.constant 0 : i32
    %c0_i32_0 = arith.constant 0 : i32
    %c0_i32_1 = arith.constant 0 : i32
    %c0_i32_2 = arith.constant 0 : i32
    return %c0_i32, %c0_i32_0, %c0_i32_1 : i32, i32, i32
  }
  func.func @transform_2(%arg0: i32) -> (i32, i32, i32) {
    %c0_i32 = arith.constant 0 : i32
    %c0_i32_0 = arith.constant 0 : i32
    %c0_i32_1 = arith.constant 0 : i32
    %c0_i32_2 = arith.constant 0 : i32
    return %c0_i32, %c0_i32_0, %c0_i32_1 : i32, i32, i32
  }
  func.func @transform_3(%arg0: i32) -> (i32, i32, i32) {
    %c0_i32 = arith.constant 0 : i32
    %c0_i32_0 = arith.constant 0 : i32
    %c0_i32_1 = arith.constant 0 : i32
    %c0_i32_2 = arith.constant 0 : i32
    return %c0_i32, %c0_i32_0, %c0_i32_1 : i32, i32, i32
  }
  func.func @transform_4(%arg0: i32) -> (i32, i32, i32, i32) {
    %c0_i32 = arith.constant 0 : i32
    %c0_i32_0 = arith.constant 0 : i32
    %c0_i32_1 = arith.constant 0 : i32
    %c0_i32_2 = arith.constant 0 : i32
    %c0_i32_3 = arith.constant 0 : i32
    return %c0_i32, %c0_i32_0, %c0_i32_1, %c0_i32_2 : i32, i32, i32, i32
  }
}

module attributes {stable_mosaic.version = 11 : i64} {
  func.func @_gru_kernel(%arg0: i32, %arg1: memref<8x2x80xf32, #tpu.memory_space<vmem>>, %arg2: memref<8x2x80xf32, #tpu.memory_space<vmem>>, %arg3: memref<8x2x80xf32, #tpu.memory_space<vmem>>, %arg4: memref<3x80x80xf32, #tpu.memory_space<vmem>>, %arg5: memref<3x1x80xf32, #tpu.memory_space<vmem>>, %arg6: memref<8x2x80xf32, #tpu.memory_space<vmem>>) attributes {dimension_semantics = [#tpu.dimension_semantics<arbitrary>], iteration_bounds = array<i64: 1>, scalar_prefetch = 0 : i64, scratch_operands = 0 : i64, tpu.core_type = #tpu.core_type<tc>, window_params = [{pipeline_mode = #tpu.pipeline_mode<synchronous>, transform_indices = @transform_0, window_bounds = array<i64: 8, 2, 80>}, {pipeline_mode = #tpu.pipeline_mode<synchronous>, transform_indices = @transform_1, window_bounds = array<i64: 8, 2, 80>}, {pipeline_mode = #tpu.pipeline_mode<synchronous>, transform_indices = @transform_2, window_bounds = array<i64: 8, 2, 80>}, {pipeline_mode = #tpu.pipeline_mode<synchronous>, transform_indices = @transform_3, window_bounds = array<i64: 3, 80, 80>}, {pipeline_mode = #tpu.pipeline_mode<synchronous>, transform_indices = @transform_4, window_bounds = array<i64: 3, 1, 80>}, {pipeline_mode = #tpu.pipeline_mode<synchronous>, transform_indices = @transform_5, window_bounds = array<i64: 8, 2, 80>}]} {
    %c0 = arith.constant 0 : index
    %c0_0 = arith.constant 0 : index
    %c0_1 = arith.constant 0 : index
    %0 = vector.load %arg4[%c0, %c0_0, %c0_1] : memref<3x80x80xf32, #tpu.memory_space<vmem>>, vector<1x80x80xf32>
    %1 = vector.shape_cast %0 : vector<1x80x80xf32> to vector<80x80xf32>
    %c1 = arith.constant 1 : index
    %c0_2 = arith.constant 0 : index
    %c0_3 = arith.constant 0 : index
    %2 = vector.load %arg4[%c1, %c0_2, %c0_3] : memref<3x80x80xf32, #tpu.memory_space<vmem>>, vector<1x80x80xf32>
    %3 = vector.shape_cast %2 : vector<1x80x80xf32> to vector<80x80xf32>
    %c2 = arith.constant 2 : index
    %c0_4 = arith.constant 0 : index
    %c0_5 = arith.constant 0 : index
    %4 = vector.load %arg4[%c2, %c0_4, %c0_5] : memref<3x80x80xf32, #tpu.memory_space<vmem>>, vector<1x80x80xf32>
    %5 = vector.shape_cast %4 : vector<1x80x80xf32> to vector<80x80xf32>
    %c0_6 = arith.constant 0 : index
    %c0_7 = arith.constant 0 : index
    %c0_8 = arith.constant 0 : index
    %6 = vector.load %arg5[%c0_6, %c0_7, %c0_8] : memref<3x1x80xf32, #tpu.memory_space<vmem>>, vector<1x1x80xf32>
    %7 = vector.shape_cast %6 : vector<1x1x80xf32> to vector<1x80xf32>
    %c1_9 = arith.constant 1 : index
    %c0_10 = arith.constant 0 : index
    %c0_11 = arith.constant 0 : index
    %8 = vector.load %arg5[%c1_9, %c0_10, %c0_11] : memref<3x1x80xf32, #tpu.memory_space<vmem>>, vector<1x1x80xf32>
    %9 = vector.shape_cast %8 : vector<1x1x80xf32> to vector<1x80xf32>
    %c2_12 = arith.constant 2 : index
    %c0_13 = arith.constant 0 : index
    %c0_14 = arith.constant 0 : index
    %10 = vector.load %arg5[%c2_12, %c0_13, %c0_14] : memref<3x1x80xf32, #tpu.memory_space<vmem>>, vector<1x1x80xf32>
    %11 = vector.shape_cast %10 : vector<1x1x80xf32> to vector<1x80xf32>
    %cst = arith.constant 0.000000e+00 : f32
    %12 = vector.broadcast %cst : f32 to vector<2x80xf32>
    %c0_i32 = arith.constant 0 : i32
    %cst_15 = arith.constant dense<0.000000e+00> : vector<2x80xf32>
    %13 = tpu.matmul %12, %1, %cst_15 {dimension_numbers = #tpu.dot_dimension_numbers<[1], [0], [0], [1], [0, 0, 1, 1], [], []>} : vector<2x80xf32>, vector<80x80xf32>, vector<2x80xf32> -> vector<2x80xf32>
    %14 = vector.broadcast %7 : vector<1x80xf32> to vector<2x80xf32>
    %15 = arith.addf %13, %14 : vector<2x80xf32>
    %cst_16 = arith.constant dense<0.000000e+00> : vector<2x80xf32>
    %16 = tpu.matmul %12, %3, %cst_16 {dimension_numbers = #tpu.dot_dimension_numbers<[1], [0], [0], [1], [0, 0, 1, 1], [], []>} : vector<2x80xf32>, vector<80x80xf32>, vector<2x80xf32> -> vector<2x80xf32>
    %17 = vector.broadcast %9 : vector<1x80xf32> to vector<2x80xf32>
    %18 = arith.addf %16, %17 : vector<2x80xf32>
    %cst_17 = arith.constant dense<0.000000e+00> : vector<2x80xf32>
    %19 = tpu.matmul %12, %5, %cst_17 {dimension_numbers = #tpu.dot_dimension_numbers<[1], [0], [0], [1], [0, 0, 1, 1], [], []>} : vector<2x80xf32>, vector<80x80xf32>, vector<2x80xf32> -> vector<2x80xf32>
    %20 = vector.broadcast %11 : vector<1x80xf32> to vector<2x80xf32>
    %21 = arith.addf %19, %20 : vector<2x80xf32>
    %22 = arith.index_cast %c0_i32 : i32 to index
    %c0_18 = arith.constant 0 : index
    %c0_19 = arith.constant 0 : index
    %23 = vector.load %arg1[%22, %c0_18, %c0_19] : memref<8x2x80xf32, #tpu.memory_space<vmem>>, vector<1x2x80xf32>
    %24 = vector.shape_cast %23 : vector<1x2x80xf32> to vector<2x80xf32>
    %25 = arith.addf %24, %15 : vector<2x80xf32>
    %26 = arith.negf %25 : vector<2x80xf32>
    %27 = math.exp %26 : vector<2x80xf32>
    %cst_20 = arith.constant 1.000000e+00 : f32
    %28 = vector.broadcast %cst_20 : f32 to vector<2x80xf32>
    %29 = arith.addf %28, %27 : vector<2x80xf32>
    %30 = arith.divf %28, %29 : vector<2x80xf32>
    %31 = arith.index_cast %c0_i32 : i32 to index
    %c0_21 = arith.constant 0 : index
    %c0_22 = arith.constant 0 : index
    %32 = vector.load %arg2[%31, %c0_21, %c0_22] : memref<8x2x80xf32, #tpu.memory_space<vmem>>, vector<1x2x80xf32>
    %33 = vector.shape_cast %32 : vector<1x2x80xf32> to vector<2x80xf32>
    %34 = arith.addf %33, %18 : vector<2x80xf32>
    %35 = arith.negf %34 : vector<2x80xf32>
    %36 = math.exp %35 : vector<2x80xf32>
    %cst_23 = arith.constant 1.000000e+00 : f32
    %37 = vector.broadcast %cst_23 : f32 to vector<2x80xf32>
    %38 = arith.addf %37, %36 : vector<2x80xf32>
    %39 = arith.divf %37, %38 : vector<2x80xf32>
    %40 = arith.index_cast %c0_i32 : i32 to index
    %c0_24 = arith.constant 0 : index
    %c0_25 = arith.constant 0 : index
    %41 = vector.load %arg3[%40, %c0_24, %c0_25] : memref<8x2x80xf32, #tpu.memory_space<vmem>>, vector<1x2x80xf32>
    %42 = vector.shape_cast %41 : vector<1x2x80xf32> to vector<2x80xf32>
    %43 = arith.mulf %30, %21 : vector<2x80xf32>
    %44 = arith.addf %42, %43 : vector<2x80xf32>
    %45 = math.tanh %44 : vector<2x80xf32>
    %cst_26 = arith.constant 1.000000e+00 : f32
    %46 = vector.broadcast %cst_26 : f32 to vector<2x80xf32>
    %47 = arith.subf %46, %39 : vector<2x80xf32>
    %48 = arith.mulf %47, %45 : vector<2x80xf32>
    %49 = arith.mulf %39, %12 : vector<2x80xf32>
    %50 = arith.addf %48, %49 : vector<2x80xf32>
    %51 = arith.index_cast %c0_i32 : i32 to index
    %c0_27 = arith.constant 0 : index
    %c0_28 = arith.constant 0 : index
    %52 = vector.load %arg6[%51, %c0_27, %c0_28] : memref<8x2x80xf32, #tpu.memory_space<vmem>>, vector<1x2x80xf32>
    %53 = vector.shape_cast %52 : vector<1x2x80xf32> to vector<2x80xf32>
    %54 = vector.shape_cast %50 : vector<2x80xf32> to vector<1x2x80xf32>
    tpu.vector_store %arg6[%51, %c0_27, %c0_28], %54 {strides = array<i32>} : memref<8x2x80xf32, #tpu.memory_space<vmem>>, vector<1x2x80xf32>,
    %c1_i32 = arith.constant 1 : i32
    %cst_29 = arith.constant dense<0.000000e+00> : vector<2x80xf32>
    %55 = tpu.matmul %50, %1, %cst_29 {dimension_numbers = #tpu.dot_dimension_numbers<[1], [0], [0], [1], [0, 0, 1, 1], [], []>} : vector<2x80xf32>, vector<80x80xf32>, vector<2x80xf32> -> vector<2x80xf32>
    %56 = vector.broadcast %7 : vector<1x80xf32> to vector<2x80xf32>
    %57 = arith.addf %55, %56 : vector<2x80xf32>
    %cst_30 = arith.constant dense<0.000000e+00> : vector<2x80xf32>
    %58 = tpu.matmul %50, %3, %cst_30 {dimension_numbers = #tpu.dot_dimension_numbers<[1], [0], [0], [1], [0, 0, 1, 1], [], []>} : vector<2x80xf32>, vector<80x80xf32>, vector<2x80xf32> -> vector<2x80xf32>
    %59 = vector.broadcast %9 : vector<1x80xf32> to vector<2x80xf32>
    %60 = arith.addf %58, %59 : vector<2x80xf32>
    %cst_31 = arith.constant dense<0.000000e+00> : vector<2x80xf32>
    %61 = tpu.matmul %50, %5, %cst_31 {dimension_numbers = #tpu.dot_dimension_numbers<[1], [0], [0], [1], [0, 0, 1, 1], [], []>} : vector<2x80xf32>, vector<80x80xf32>, vector<2x80xf32> -> vector<2x80xf32>
    %62 = vector.broadcast %11 : vector<1x80xf32> to vector<2x80xf32>
    %63 = arith.addf %61, %62 : vector<2x80xf32>
    %64 = arith.index_cast %c1_i32 : i32 to index
    %c0_32 = arith.constant 0 : index
    %c0_33 = arith.constant 0 : index
    %65 = vector.load %arg1[%64, %c0_32, %c0_33] : memref<8x2x80xf32, #tpu.memory_space<vmem>>, vector<1x2x80xf32>
    %66 = vector.shape_cast %65 : vector<1x2x80xf32> to vector<2x80xf32>
    %67 = arith.addf %66, %57 : vector<2x80xf32>
    %68 = arith.negf %67 : vector<2x80xf32>
    %69 = math.exp %68 : vector<2x80xf32>
    %cst_34 = arith.constant 1.000000e+00 : f32
    %70 = vector.broadcast %cst_34 : f32 to vector<2x80xf32>
    %71 = arith.addf %70, %69 : vector<2x80xf32>
    %72 = arith.divf %70, %71 : vector<2x80xf32>
    %73 = arith.index_cast %c1_i32 : i32 to index
    %c0_35 = arith.constant 0 : index
    %c0_36 = arith.constant 0 : index
    %74 = vector.load %arg2[%73, %c0_35, %c0_36] : memref<8x2x80xf32, #tpu.memory_space<vmem>>, vector<1x2x80xf32>
    %75 = vector.shape_cast %74 : vector<1x2x80xf32> to vector<2x80xf32>
    %76 = arith.addf %75, %60 : vector<2x80xf32>
    %77 = arith.negf %76 : vector<2x80xf32>
    %78 = math.exp %77 : vector<2x80xf32>
    %cst_37 = arith.constant 1.000000e+00 : f32
    %79 = vector.broadcast %cst_37 : f32 to vector<2x80xf32>
    %80 = arith.addf %79, %78 : vector<2x80xf32>
    %81 = arith.divf %79, %80 : vector<2x80xf32>
    %82 = arith.index_cast %c1_i32 : i32 to index
    %c0_38 = arith.constant 0 : index
    %c0_39 = arith.constant 0 : index
    %83 = vector.load %arg3[%82, %c0_38, %c0_39] : memref<8x2x80xf32, #tpu.memory_space<vmem>>, vector<1x2x80xf32>
    %84 = vector.shape_cast %83 : vector<1x2x80xf32> to vector<2x80xf32>
    %85 = arith.mulf %72, %63 : vector<2x80xf32>
    %86 = arith.addf %84, %85 : vector<2x80xf32>
    %87 = math.tanh %86 : vector<2x80xf32>
    %cst_40 = arith.constant 1.000000e+00 : f32
    %88 = vector.broadcast %cst_40 : f32 to vector<2x80xf32>
    %89 = arith.subf %88, %81 : vector<2x80xf32>
    %90 = arith.mulf %89, %87 : vector<2x80xf32>
    %91 = arith.mulf %81, %50 : vector<2x80xf32>
    %92 = arith.addf %90, %91 : vector<2x80xf32>
    %93 = arith.index_cast %c1_i32 : i32 to index
    %c0_41 = arith.constant 0 : index
    %c0_42 = arith.constant 0 : index
    %94 = vector.load %arg6[%93, %c0_41, %c0_42] : memref<8x2x80xf32, #tpu.memory_space<vmem>>, vector<1x2x80xf32>
    %95 = vector.shape_cast %94 : vector<1x2x80xf32> to vector<2x80xf32>
    %96 = vector.shape_cast %92 : vector<2x80xf32> to vector<1x2x80xf32>
    tpu.vector_store %arg6[%93, %c0_41, %c0_42], %96 {strides = array<i32>} : memref<8x2x80xf32, #tpu.memory_space<vmem>>, vector<1x2x80xf32>,
    %c2_i32 = arith.constant 2 : i32
    %cst_43 = arith.constant dense<0.000000e+00> : vector<2x80xf32>
    %97 = tpu.matmul %92, %1, %cst_43 {dimension_numbers = #tpu.dot_dimension_numbers<[1], [0], [0], [1], [0, 0, 1, 1], [], []>} : vector<2x80xf32>, vector<80x80xf32>, vector<2x80xf32> -> vector<2x80xf32>
    %98 = vector.broadcast %7 : vector<1x80xf32> to vector<2x80xf32>
    %99 = arith.addf %97, %98 : vector<2x80xf32>
    %cst_44 = arith.constant dense<0.000000e+00> : vector<2x80xf32>
    %100 = tpu.matmul %92, %3, %cst_44 {dimension_numbers = #tpu.dot_dimension_numbers<[1], [0], [0], [1], [0, 0, 1, 1], [], []>} : vector<2x80xf32>, vector<80x80xf32>, vector<2x80xf32> -> vector<2x80xf32>
    %101 = vector.broadcast %9 : vector<1x80xf32> to vector<2x80xf32>
    %102 = arith.addf %100, %101 : vector<2x80xf32>
    %cst_45 = arith.constant dense<0.000000e+00> : vector<2x80xf32>
    %103 = tpu.matmul %92, %5, %cst_45 {dimension_numbers = #tpu.dot_dimension_numbers<[1], [0], [0], [1], [0, 0, 1, 1], [], []>} : vector<2x80xf32>, vector<80x80xf32>, vector<2x80xf32> -> vector<2x80xf32>
    %104 = vector.broadcast %11 : vector<1x80xf32> to vector<2x80xf32>
    %105 = arith.addf %103, %104 : vector<2x80xf32>
    %106 = arith.index_cast %c2_i32 : i32 to index
    %c0_46 = arith.constant 0 : index
    %c0_47 = arith.constant 0 : index
    %107 = vector.load %arg1[%106, %c0_46, %c0_47] : memref<8x2x80xf32, #tpu.memory_space<vmem>>, vector<1x2x80xf32>
    %108 = vector.shape_cast %107 : vector<1x2x80xf32> to vector<2x80xf32>
    %109 = arith.addf %108, %99 : vector<2x80xf32>
    %110 = arith.negf %109 : vector<2x80xf32>
    %111 = math.exp %110 : vector<2x80xf32>
    %cst_48 = arith.constant 1.000000e+00 : f32
    %112 = vector.broadcast %cst_48 : f32 to vector<2x80xf32>
    %113 = arith.addf %112, %111 : vector<2x80xf32>
    %114 = arith.divf %112, %113 : vector<2x80xf32>
    %115 = arith.index_cast %c2_i32 : i32 to index
    %c0_49 = arith.constant 0 : index
    %c0_50 = arith.constant 0 : index
    %116 = vector.load %arg2[%115, %c0_49, %c0_50] : memref<8x2x80xf32, #tpu.memory_space<vmem>>, vector<1x2x80xf32>
    %117 = vector.shape_cast %116 : vector<1x2x80xf32> to vector<2x80xf32>
    %118 = arith.addf %117, %102 : vector<2x80xf32>
    %119 = arith.negf %118 : vector<2x80xf32>
    %120 = math.exp %119 : vector<2x80xf32>
    %cst_51 = arith.constant 1.000000e+00 : f32
    %121 = vector.broadcast %cst_51 : f32 to vector<2x80xf32>
    %122 = arith.addf %121, %120 : vector<2x80xf32>
    %123 = arith.divf %121, %122 : vector<2x80xf32>
    %124 = arith.index_cast %c2_i32 : i32 to index
    %c0_52 = arith.constant 0 : index
    %c0_53 = arith.constant 0 : index
    %125 = vector.load %arg3[%124, %c0_52, %c0_53] : memref<8x2x80xf32, #tpu.memory_space<vmem>>, vector<1x2x80xf32>
    %126 = vector.shape_cast %125 : vector<1x2x80xf32> to vector<2x80xf32>
    %127 = arith.mulf %114, %105 : vector<2x80xf32>
    %128 = arith.addf %126, %127 : vector<2x80xf32>
    %129 = math.tanh %128 : vector<2x80xf32>
    %cst_54 = arith.constant 1.000000e+00 : f32
    %130 = vector.broadcast %cst_54 : f32 to vector<2x80xf32>
    %131 = arith.subf %130, %123 : vector<2x80xf32>
    %132 = arith.mulf %131, %129 : vector<2x80xf32>
    %133 = arith.mulf %123, %92 : vector<2x80xf32>
    %134 = arith.addf %132, %133 : vector<2x80xf32>
    %135 = arith.index_cast %c2_i32 : i32 to index
    %c0_55 = arith.constant 0 : index
    %c0_56 = arith.constant 0 : index
    %136 = vector.load %arg6[%135, %c0_55, %c0_56] : memref<8x2x80xf32, #tpu.memory_space<vmem>>, vector<1x2x80xf32>
    %137 = vector.shape_cast %136 : vector<1x2x80xf32> to vector<2x80xf32>
    %138 = vector.shape_cast %134 : vector<2x80xf32> to vector<1x2x80xf32>
    tpu.vector_store %arg6[%135, %c0_55, %c0_56], %138 {strides = array<i32>} : memref<8x2x80xf32, #tpu.memory_space<vmem>>, vector<1x2x80xf32>,
    %c3_i32 = arith.constant 3 : i32
    %cst_57 = arith.constant dense<0.000000e+00> : vector<2x80xf32>
    %139 = tpu.matmul %134, %1, %cst_57 {dimension_numbers = #tpu.dot_dimension_numbers<[1], [0], [0], [1], [0, 0, 1, 1], [], []>} : vector<2x80xf32>, vector<80x80xf32>, vector<2x80xf32> -> vector<2x80xf32>
    %140 = vector.broadcast %7 : vector<1x80xf32> to vector<2x80xf32>
    %141 = arith.addf %139, %140 : vector<2x80xf32>
    %cst_58 = arith.constant dense<0.000000e+00> : vector<2x80xf32>
    %142 = tpu.matmul %134, %3, %cst_58 {dimension_numbers = #tpu.dot_dimension_numbers<[1], [0], [0], [1], [0, 0, 1, 1], [], []>} : vector<2x80xf32>, vector<80x80xf32>, vector<2x80xf32> -> vector<2x80xf32>
    %143 = vector.broadcast %9 : vector<1x80xf32> to vector<2x80xf32>
    %144 = arith.addf %142, %143 : vector<2x80xf32>
    %cst_59 = arith.constant dense<0.000000e+00> : vector<2x80xf32>
    %145 = tpu.matmul %134, %5, %cst_59 {dimension_numbers = #tpu.dot_dimension_numbers<[1], [0], [0], [1], [0, 0, 1, 1], [], []>} : vector<2x80xf32>, vector<80x80xf32>, vector<2x80xf32> -> vector<2x80xf32>
    %146 = vector.broadcast %11 : vector<1x80xf32> to vector<2x80xf32>
    %147 = arith.addf %145, %146 : vector<2x80xf32>
    %148 = arith.index_cast %c3_i32 : i32 to index
    %c0_60 = arith.constant 0 : index
    %c0_61 = arith.constant 0 : index
    %149 = vector.load %arg1[%148, %c0_60, %c0_61] : memref<8x2x80xf32, #tpu.memory_space<vmem>>, vector<1x2x80xf32>
    %150 = vector.shape_cast %149 : vector<1x2x80xf32> to vector<2x80xf32>
    %151 = arith.addf %150, %141 : vector<2x80xf32>
    %152 = arith.negf %151 : vector<2x80xf32>
    %153 = math.exp %152 : vector<2x80xf32>
    %cst_62 = arith.constant 1.000000e+00 : f32
    %154 = vector.broadcast %cst_62 : f32 to vector<2x80xf32>
    %155 = arith.addf %154, %153 : vector<2x80xf32>
    %156 = arith.divf %154, %155 : vector<2x80xf32>
    %157 = arith.index_cast %c3_i32 : i32 to index
    %c0_63 = arith.constant 0 : index
    %c0_64 = arith.constant 0 : index
    %158 = vector.load %arg2[%157, %c0_63, %c0_64] : memref<8x2x80xf32, #tpu.memory_space<vmem>>, vector<1x2x80xf32>
    %159 = vector.shape_cast %158 : vector<1x2x80xf32> to vector<2x80xf32>
    %160 = arith.addf %159, %144 : vector<2x80xf32>
    %161 = arith.negf %160 : vector<2x80xf32>
    %162 = math.exp %161 : vector<2x80xf32>
    %cst_65 = arith.constant 1.000000e+00 : f32
    %163 = vector.broadcast %cst_65 : f32 to vector<2x80xf32>
    %164 = arith.addf %163, %162 : vector<2x80xf32>
    %165 = arith.divf %163, %164 : vector<2x80xf32>
    %166 = arith.index_cast %c3_i32 : i32 to index
    %c0_66 = arith.constant 0 : index
    %c0_67 = arith.constant 0 : index
    %167 = vector.load %arg3[%166, %c0_66, %c0_67] : memref<8x2x80xf32, #tpu.memory_space<vmem>>, vector<1x2x80xf32>
    %168 = vector.shape_cast %167 : vector<1x2x80xf32> to vector<2x80xf32>
    %169 = arith.mulf %156, %147 : vector<2x80xf32>
    %170 = arith.addf %168, %169 : vector<2x80xf32>
    %171 = math.tanh %170 : vector<2x80xf32>
    %cst_68 = arith.constant 1.000000e+00 : f32
    %172 = vector.broadcast %cst_68 : f32 to vector<2x80xf32>
    %173 = arith.subf %172, %165 : vector<2x80xf32>
    %174 = arith.mulf %173, %171 : vector<2x80xf32>
    %175 = arith.mulf %165, %134 : vector<2x80xf32>
    %176 = arith.addf %174, %175 : vector<2x80xf32>
    %177 = arith.index_cast %c3_i32 : i32 to index
    %c0_69 = arith.constant 0 : index
    %c0_70 = arith.constant 0 : index
    %178 = vector.load %arg6[%177, %c0_69, %c0_70] : memref<8x2x80xf32, #tpu.memory_space<vmem>>, vector<1x2x80xf32>
    %179 = vector.shape_cast %178 : vector<1x2x80xf32> to vector<2x80xf32>
    %180 = vector.shape_cast %176 : vector<2x80xf32> to vector<1x2x80xf32>
    tpu.vector_store %arg6[%177, %c0_69, %c0_70], %180 {strides = array<i32>} : memref<8x2x80xf32, #tpu.memory_space<vmem>>, vector<1x2x80xf32>,
    %c4_i32 = arith.constant 4 : i32
    %cst_71 = arith.constant dense<0.000000e+00> : vector<2x80xf32>
    %181 = tpu.matmul %176, %1, %cst_71 {dimension_numbers = #tpu.dot_dimension_numbers<[1], [0], [0], [1], [0, 0, 1, 1], [], []>} : vector<2x80xf32>, vector<80x80xf32>, vector<2x80xf32> -> vector<2x80xf32>
    %182 = vector.broadcast %7 : vector<1x80xf32> to vector<2x80xf32>
    %183 = arith.addf %181, %182 : vector<2x80xf32>
    %cst_72 = arith.constant dense<0.000000e+00> : vector<2x80xf32>
    %184 = tpu.matmul %176, %3, %cst_72 {dimension_numbers = #tpu.dot_dimension_numbers<[1], [0], [0], [1], [0, 0, 1, 1], [], []>} : vector<2x80xf32>, vector<80x80xf32>, vector<2x80xf32> -> vector<2x80xf32>
    %185 = vector.broadcast %9 : vector<1x80xf32> to vector<2x80xf32>
    %186 = arith.addf %184, %185 : vector<2x80xf32>
    %cst_73 = arith.constant dense<0.000000e+00> : vector<2x80xf32>
    %187 = tpu.matmul %176, %5, %cst_73 {dimension_numbers = #tpu.dot_dimension_numbers<[1], [0], [0], [1], [0, 0, 1, 1], [], []>} : vector<2x80xf32>, vector<80x80xf32>, vector<2x80xf32> -> vector<2x80xf32>
    %188 = vector.broadcast %11 : vector<1x80xf32> to vector<2x80xf32>
    %189 = arith.addf %187, %188 : vector<2x80xf32>
    %190 = arith.index_cast %c4_i32 : i32 to index
    %c0_74 = arith.constant 0 : index
    %c0_75 = arith.constant 0 : index
    %191 = vector.load %arg1[%190, %c0_74, %c0_75] : memref<8x2x80xf32, #tpu.memory_space<vmem>>, vector<1x2x80xf32>
    %192 = vector.shape_cast %191 : vector<1x2x80xf32> to vector<2x80xf32>
    %193 = arith.addf %192, %183 : vector<2x80xf32>
    %194 = arith.negf %193 : vector<2x80xf32>
    %195 = math.exp %194 : vector<2x80xf32>
    %cst_76 = arith.constant 1.000000e+00 : f32
    %196 = vector.broadcast %cst_76 : f32 to vector<2x80xf32>
    %197 = arith.addf %196, %195 : vector<2x80xf32>
    %198 = arith.divf %196, %197 : vector<2x80xf32>
    %199 = arith.index_cast %c4_i32 : i32 to index
    %c0_77 = arith.constant 0 : index
    %c0_78 = arith.constant 0 : index
    %200 = vector.load %arg2[%199, %c0_77, %c0_78] : memref<8x2x80xf32, #tpu.memory_space<vmem>>, vector<1x2x80xf32>
    %201 = vector.shape_cast %200 : vector<1x2x80xf32> to vector<2x80xf32>
    %202 = arith.addf %201, %186 : vector<2x80xf32>
    %203 = arith.negf %202 : vector<2x80xf32>
    %204 = math.exp %203 : vector<2x80xf32>
    %cst_79 = arith.constant 1.000000e+00 : f32
    %205 = vector.broadcast %cst_79 : f32 to vector<2x80xf32>
    %206 = arith.addf %205, %204 : vector<2x80xf32>
    %207 = arith.divf %205, %206 : vector<2x80xf32>
    %208 = arith.index_cast %c4_i32 : i32 to index
    %c0_80 = arith.constant 0 : index
    %c0_81 = arith.constant 0 : index
    %209 = vector.load %arg3[%208, %c0_80, %c0_81] : memref<8x2x80xf32, #tpu.memory_space<vmem>>, vector<1x2x80xf32>
    %210 = vector.shape_cast %209 : vector<1x2x80xf32> to vector<2x80xf32>
    %211 = arith.mulf %198, %189 : vector<2x80xf32>
    %212 = arith.addf %210, %211 : vector<2x80xf32>
    %213 = math.tanh %212 : vector<2x80xf32>
    %cst_82 = arith.constant 1.000000e+00 : f32
    %214 = vector.broadcast %cst_82 : f32 to vector<2x80xf32>
    %215 = arith.subf %214, %207 : vector<2x80xf32>
    %216 = arith.mulf %215, %213 : vector<2x80xf32>
    %217 = arith.mulf %207, %176 : vector<2x80xf32>
    %218 = arith.addf %216, %217 : vector<2x80xf32>
    %219 = arith.index_cast %c4_i32 : i32 to index
    %c0_83 = arith.constant 0 : index
    %c0_84 = arith.constant 0 : index
    %220 = vector.load %arg6[%219, %c0_83, %c0_84] : memref<8x2x80xf32, #tpu.memory_space<vmem>>, vector<1x2x80xf32>
    %221 = vector.shape_cast %220 : vector<1x2x80xf32> to vector<2x80xf32>
    %222 = vector.shape_cast %218 : vector<2x80xf32> to vector<1x2x80xf32>
    tpu.vector_store %arg6[%219, %c0_83, %c0_84], %222 {strides = array<i32>} : memref<8x2x80xf32, #tpu.memory_space<vmem>>, vector<1x2x80xf32>,
    %c5_i32 = arith.constant 5 : i32
    %cst_85 = arith.constant dense<0.000000e+00> : vector<2x80xf32>
    %223 = tpu.matmul %218, %1, %cst_85 {dimension_numbers = #tpu.dot_dimension_numbers<[1], [0], [0], [1], [0, 0, 1, 1], [], []>} : vector<2x80xf32>, vector<80x80xf32>, vector<2x80xf32> -> vector<2x80xf32>
    %224 = vector.broadcast %7 : vector<1x80xf32> to vector<2x80xf32>
    %225 = arith.addf %223, %224 : vector<2x80xf32>
    %cst_86 = arith.constant dense<0.000000e+00> : vector<2x80xf32>
    %226 = tpu.matmul %218, %3, %cst_86 {dimension_numbers = #tpu.dot_dimension_numbers<[1], [0], [0], [1], [0, 0, 1, 1], [], []>} : vector<2x80xf32>, vector<80x80xf32>, vector<2x80xf32> -> vector<2x80xf32>
    %227 = vector.broadcast %9 : vector<1x80xf32> to vector<2x80xf32>
    %228 = arith.addf %226, %227 : vector<2x80xf32>
    %cst_87 = arith.constant dense<0.000000e+00> : vector<2x80xf32>
    %229 = tpu.matmul %218, %5, %cst_87 {dimension_numbers = #tpu.dot_dimension_numbers<[1], [0], [0], [1], [0, 0, 1, 1], [], []>} : vector<2x80xf32>, vector<80x80xf32>, vector<2x80xf32> -> vector<2x80xf32>
    %230 = vector.broadcast %11 : vector<1x80xf32> to vector<2x80xf32>
    %231 = arith.addf %229, %230 : vector<2x80xf32>
    %232 = arith.index_cast %c5_i32 : i32 to index
    %c0_88 = arith.constant 0 : index
    %c0_89 = arith.constant 0 : index
    %233 = vector.load %arg1[%232, %c0_88, %c0_89] : memref<8x2x80xf32, #tpu.memory_space<vmem>>, vector<1x2x80xf32>
    %234 = vector.shape_cast %233 : vector<1x2x80xf32> to vector<2x80xf32>
    %235 = arith.addf %234, %225 : vector<2x80xf32>
    %236 = arith.negf %235 : vector<2x80xf32>
    %237 = math.exp %236 : vector<2x80xf32>
    %cst_90 = arith.constant 1.000000e+00 : f32
    %238 = vector.broadcast %cst_90 : f32 to vector<2x80xf32>
    %239 = arith.addf %238, %237 : vector<2x80xf32>
    %240 = arith.divf %238, %239 : vector<2x80xf32>
    %241 = arith.index_cast %c5_i32 : i32 to index
    %c0_91 = arith.constant 0 : index
    %c0_92 = arith.constant 0 : index
    %242 = vector.load %arg2[%241, %c0_91, %c0_92] : memref<8x2x80xf32, #tpu.memory_space<vmem>>, vector<1x2x80xf32>
    %243 = vector.shape_cast %242 : vector<1x2x80xf32> to vector<2x80xf32>
    %244 = arith.addf %243, %228 : vector<2x80xf32>
    %245 = arith.negf %244 : vector<2x80xf32>
    %246 = math.exp %245 : vector<2x80xf32>
    %cst_93 = arith.constant 1.000000e+00 : f32
    %247 = vector.broadcast %cst_93 : f32 to vector<2x80xf32>
    %248 = arith.addf %247, %246 : vector<2x80xf32>
    %249 = arith.divf %247, %248 : vector<2x80xf32>
    %250 = arith.index_cast %c5_i32 : i32 to index
    %c0_94 = arith.constant 0 : index
    %c0_95 = arith.constant 0 : index
    %251 = vector.load %arg3[%250, %c0_94, %c0_95] : memref<8x2x80xf32, #tpu.memory_space<vmem>>, vector<1x2x80xf32>
    %252 = vector.shape_cast %251 : vector<1x2x80xf32> to vector<2x80xf32>
    %253 = arith.mulf %240, %231 : vector<2x80xf32>
    %254 = arith.addf %252, %253 : vector<2x80xf32>
    %255 = math.tanh %254 : vector<2x80xf32>
    %cst_96 = arith.constant 1.000000e+00 : f32
    %256 = vector.broadcast %cst_96 : f32 to vector<2x80xf32>
    %257 = arith.subf %256, %249 : vector<2x80xf32>
    %258 = arith.mulf %257, %255 : vector<2x80xf32>
    %259 = arith.mulf %249, %218 : vector<2x80xf32>
    %260 = arith.addf %258, %259 : vector<2x80xf32>
    %261 = arith.index_cast %c5_i32 : i32 to index
    %c0_97 = arith.constant 0 : index
    %c0_98 = arith.constant 0 : index
    %262 = vector.load %arg6[%261, %c0_97, %c0_98] : memref<8x2x80xf32, #tpu.memory_space<vmem>>, vector<1x2x80xf32>
    %263 = vector.shape_cast %262 : vector<1x2x80xf32> to vector<2x80xf32>
    %264 = vector.shape_cast %260 : vector<2x80xf32> to vector<1x2x80xf32>
    tpu.vector_store %arg6[%261, %c0_97, %c0_98], %264 {strides = array<i32>} : memref<8x2x80xf32, #tpu.memory_space<vmem>>, vector<1x2x80xf32>,
    %c6_i32 = arith.constant 6 : i32
    %cst_99 = arith.constant dense<0.000000e+00> : vector<2x80xf32>
    %265 = tpu.matmul %260, %1, %cst_99 {dimension_numbers = #tpu.dot_dimension_numbers<[1], [0], [0], [1], [0, 0, 1, 1], [], []>} : vector<2x80xf32>, vector<80x80xf32>, vector<2x80xf32> -> vector<2x80xf32>
    %266 = vector.broadcast %7 : vector<1x80xf32> to vector<2x80xf32>
    %267 = arith.addf %265, %266 : vector<2x80xf32>
    %cst_100 = arith.constant dense<0.000000e+00> : vector<2x80xf32>
    %268 = tpu.matmul %260, %3, %cst_100 {dimension_numbers = #tpu.dot_dimension_numbers<[1], [0], [0], [1], [0, 0, 1, 1], [], []>} : vector<2x80xf32>, vector<80x80xf32>, vector<2x80xf32> -> vector<2x80xf32>
    %269 = vector.broadcast %9 : vector<1x80xf32> to vector<2x80xf32>
    %270 = arith.addf %268, %269 : vector<2x80xf32>
    %cst_101 = arith.constant dense<0.000000e+00> : vector<2x80xf32>
    %271 = tpu.matmul %260, %5, %cst_101 {dimension_numbers = #tpu.dot_dimension_numbers<[1], [0], [0], [1], [0, 0, 1, 1], [], []>} : vector<2x80xf32>, vector<80x80xf32>, vector<2x80xf32> -> vector<2x80xf32>
    %272 = vector.broadcast %11 : vector<1x80xf32> to vector<2x80xf32>
    %273 = arith.addf %271, %272 : vector<2x80xf32>
    %274 = arith.index_cast %c6_i32 : i32 to index
    %c0_102 = arith.constant 0 : index
    %c0_103 = arith.constant 0 : index
    %275 = vector.load %arg1[%274, %c0_102, %c0_103] : memref<8x2x80xf32, #tpu.memory_space<vmem>>, vector<1x2x80xf32>
    %276 = vector.shape_cast %275 : vector<1x2x80xf32> to vector<2x80xf32>
    %277 = arith.addf %276, %267 : vector<2x80xf32>
    %278 = arith.negf %277 : vector<2x80xf32>
    %279 = math.exp %278 : vector<2x80xf32>
    %cst_104 = arith.constant 1.000000e+00 : f32
    %280 = vector.broadcast %cst_104 : f32 to vector<2x80xf32>
    %281 = arith.addf %280, %279 : vector<2x80xf32>
    %282 = arith.divf %280, %281 : vector<2x80xf32>
    %283 = arith.index_cast %c6_i32 : i32 to index
    %c0_105 = arith.constant 0 : index
    %c0_106 = arith.constant 0 : index
    %284 = vector.load %arg2[%283, %c0_105, %c0_106] : memref<8x2x80xf32, #tpu.memory_space<vmem>>, vector<1x2x80xf32>
    %285 = vector.shape_cast %284 : vector<1x2x80xf32> to vector<2x80xf32>
    %286 = arith.addf %285, %270 : vector<2x80xf32>
    %287 = arith.negf %286 : vector<2x80xf32>
    %288 = math.exp %287 : vector<2x80xf32>
    %cst_107 = arith.constant 1.000000e+00 : f32
    %289 = vector.broadcast %cst_107 : f32 to vector<2x80xf32>
    %290 = arith.addf %289, %288 : vector<2x80xf32>
    %291 = arith.divf %289, %290 : vector<2x80xf32>
    %292 = arith.index_cast %c6_i32 : i32 to index
    %c0_108 = arith.constant 0 : index
    %c0_109 = arith.constant 0 : index
    %293 = vector.load %arg3[%292, %c0_108, %c0_109] : memref<8x2x80xf32, #tpu.memory_space<vmem>>, vector<1x2x80xf32>
    %294 = vector.shape_cast %293 : vector<1x2x80xf32> to vector<2x80xf32>
    %295 = arith.mulf %282, %273 : vector<2x80xf32>
    %296 = arith.addf %294, %295 : vector<2x80xf32>
    %297 = math.tanh %296 : vector<2x80xf32>
    %cst_110 = arith.constant 1.000000e+00 : f32
    %298 = vector.broadcast %cst_110 : f32 to vector<2x80xf32>
    %299 = arith.subf %298, %291 : vector<2x80xf32>
    %300 = arith.mulf %299, %297 : vector<2x80xf32>
    %301 = arith.mulf %291, %260 : vector<2x80xf32>
    %302 = arith.addf %300, %301 : vector<2x80xf32>
    %303 = arith.index_cast %c6_i32 : i32 to index
    %c0_111 = arith.constant 0 : index
    %c0_112 = arith.constant 0 : index
    %304 = vector.load %arg6[%303, %c0_111, %c0_112] : memref<8x2x80xf32, #tpu.memory_space<vmem>>, vector<1x2x80xf32>
    %305 = vector.shape_cast %304 : vector<1x2x80xf32> to vector<2x80xf32>
    %306 = vector.shape_cast %302 : vector<2x80xf32> to vector<1x2x80xf32>
    tpu.vector_store %arg6[%303, %c0_111, %c0_112], %306 {strides = array<i32>} : memref<8x2x80xf32, #tpu.memory_space<vmem>>, vector<1x2x80xf32>,
    %c7_i32 = arith.constant 7 : i32
    %cst_113 = arith.constant dense<0.000000e+00> : vector<2x80xf32>
    %307 = tpu.matmul %302, %1, %cst_113 {dimension_numbers = #tpu.dot_dimension_numbers<[1], [0], [0], [1], [0, 0, 1, 1], [], []>} : vector<2x80xf32>, vector<80x80xf32>, vector<2x80xf32> -> vector<2x80xf32>
    %308 = vector.broadcast %7 : vector<1x80xf32> to vector<2x80xf32>
    %309 = arith.addf %307, %308 : vector<2x80xf32>
    %cst_114 = arith.constant dense<0.000000e+00> : vector<2x80xf32>
    %310 = tpu.matmul %302, %3, %cst_114 {dimension_numbers = #tpu.dot_dimension_numbers<[1], [0], [0], [1], [0, 0, 1, 1], [], []>} : vector<2x80xf32>, vector<80x80xf32>, vector<2x80xf32> -> vector<2x80xf32>
    %311 = vector.broadcast %9 : vector<1x80xf32> to vector<2x80xf32>
    %312 = arith.addf %310, %311 : vector<2x80xf32>
    %cst_115 = arith.constant dense<0.000000e+00> : vector<2x80xf32>
    %313 = tpu.matmul %302, %5, %cst_115 {dimension_numbers = #tpu.dot_dimension_numbers<[1], [0], [0], [1], [0, 0, 1, 1], [], []>} : vector<2x80xf32>, vector<80x80xf32>, vector<2x80xf32> -> vector<2x80xf32>
    %314 = vector.broadcast %11 : vector<1x80xf32> to vector<2x80xf32>
    %315 = arith.addf %313, %314 : vector<2x80xf32>
    %316 = arith.index_cast %c7_i32 : i32 to index
    %c0_116 = arith.constant 0 : index
    %c0_117 = arith.constant 0 : index
    %317 = vector.load %arg1[%316, %c0_116, %c0_117] : memref<8x2x80xf32, #tpu.memory_space<vmem>>, vector<1x2x80xf32>
    %318 = vector.shape_cast %317 : vector<1x2x80xf32> to vector<2x80xf32>
    %319 = arith.addf %318, %309 : vector<2x80xf32>
    %320 = arith.negf %319 : vector<2x80xf32>
    %321 = math.exp %320 : vector<2x80xf32>
    %cst_118 = arith.constant 1.000000e+00 : f32
    %322 = vector.broadcast %cst_118 : f32 to vector<2x80xf32>
    %323 = arith.addf %322, %321 : vector<2x80xf32>
    %324 = arith.divf %322, %323 : vector<2x80xf32>
    %325 = arith.index_cast %c7_i32 : i32 to index
    %c0_119 = arith.constant 0 : index
    %c0_120 = arith.constant 0 : index
    %326 = vector.load %arg2[%325, %c0_119, %c0_120] : memref<8x2x80xf32, #tpu.memory_space<vmem>>, vector<1x2x80xf32>
    %327 = vector.shape_cast %326 : vector<1x2x80xf32> to vector<2x80xf32>
    %328 = arith.addf %327, %312 : vector<2x80xf32>
    %329 = arith.negf %328 : vector<2x80xf32>
    %330 = math.exp %329 : vector<2x80xf32>
    %cst_121 = arith.constant 1.000000e+00 : f32
    %331 = vector.broadcast %cst_121 : f32 to vector<2x80xf32>
    %332 = arith.addf %331, %330 : vector<2x80xf32>
    %333 = arith.divf %331, %332 : vector<2x80xf32>
    %334 = arith.index_cast %c7_i32 : i32 to index
    %c0_122 = arith.constant 0 : index
    %c0_123 = arith.constant 0 : index
    %335 = vector.load %arg3[%334, %c0_122, %c0_123] : memref<8x2x80xf32, #tpu.memory_space<vmem>>, vector<1x2x80xf32>
    %336 = vector.shape_cast %335 : vector<1x2x80xf32> to vector<2x80xf32>
    %337 = arith.mulf %324, %315 : vector<2x80xf32>
    %338 = arith.addf %336, %337 : vector<2x80xf32>
    %339 = math.tanh %338 : vector<2x80xf32>
    %cst_124 = arith.constant 1.000000e+00 : f32
    %340 = vector.broadcast %cst_124 : f32 to vector<2x80xf32>
    %341 = arith.subf %340, %333 : vector<2x80xf32>
    %342 = arith.mulf %341, %339 : vector<2x80xf32>
    %343 = arith.mulf %333, %302 : vector<2x80xf32>
    %344 = arith.addf %342, %343 : vector<2x80xf32>
    %345 = arith.index_cast %c7_i32 : i32 to index
    %c0_125 = arith.constant 0 : index
    %c0_126 = arith.constant 0 : index
    %346 = vector.load %arg6[%345, %c0_125, %c0_126] : memref<8x2x80xf32, #tpu.memory_space<vmem>>, vector<1x2x80xf32>
    %347 = vector.shape_cast %346 : vector<1x2x80xf32> to vector<2x80xf32>
    %348 = vector.shape_cast %344 : vector<2x80xf32> to vector<1x2x80xf32>
    tpu.vector_store %arg6[%345, %c0_125, %c0_126], %348 {strides = array<i32>} : memref<8x2x80xf32, #tpu.memory_space<vmem>>, vector<1x2x80xf32>,
    %c8_i32 = arith.constant 8 : i32
    return
  }
  func.func @transform_0(%arg0: i32) -> (i32, i32, i32) {
    %c0_i32 = arith.constant 0 : i32
    %c0_i32_0 = arith.constant 0 : i32
    %c0_i32_1 = arith.constant 0 : i32
    %c0_i32_2 = arith.constant 0 : i32
    return %c0_i32, %c0_i32_0, %c0_i32_1 : i32, i32, i32
  }
  func.func @transform_1(%arg0: i32) -> (i32, i32, i32) {
    %c0_i32 = arith.constant 0 : i32
    %c0_i32_0 = arith.constant 0 : i32
    %c0_i32_1 = arith.constant 0 : i32
    %c0_i32_2 = arith.constant 0 : i32
    return %c0_i32, %c0_i32_0, %c0_i32_1 : i32, i32, i32
  }
  func.func @transform_2(%arg0: i32) -> (i32, i32, i32) {
    %c0_i32 = arith.constant 0 : i32
    %c0_i32_0 = arith.constant 0 : i32
    %c0_i32_1 = arith.constant 0 : i32
    %c0_i32_2 = arith.constant 0 : i32
    return %c0_i32, %c0_i32_0, %c0_i32_1 : i32, i32, i32
  }
  func.func @transform_3(%arg0: i32) -> (i32, i32, i32) {
    %c0_i32 = arith.constant 0 : i32
    %c0_i32_0 = arith.constant 0 : i32
    %c0_i32_1 = arith.constant 0 : i32
    %c0_i32_2 = arith.constant 0 : i32
    return %c0_i32, %c0_i32_0, %c0_i32_1 : i32, i32, i32
  }
  func.func @transform_4(%arg0: i32) -> (i32, i32, i32) {
    %c0_i32 = arith.constant 0 : i32
    %c0_i32_0 = arith.constant 0 : i32
    %c0_i32_1 = arith.constant 0 : i32
    %c0_i32_2 = arith.constant 0 : i32
    return %c0_i32, %c0_i32_0, %c0_i32_1 : i32, i32, i32
  }
  func.func @transform_5(%arg0: i32) -> (i32, i32, i32) {
    %c0_i32 = arith.constant 0 : i32
    %c0_i32_0 = arith.constant 0 : i32
    %c0_i32_1 = arith.constant 0 : i32
    %c0_i32_2 = arith.constant 0 : i32
    return %c0_i32, %c0_i32_0, %c0_i32_1 : i32, i32, i32
  }
}

module attributes {stable_mosaic.version = 11 : i64} {
  func.func @_attn_pool_kernel(%arg0: i32, %arg1: memref<2x8x100xf32, #tpu.memory_space<vmem>>, %arg2: memref<2x8x80xf32, #tpu.memory_space<vmem>>, %arg3: memref<2x80xf32, #tpu.memory_space<vmem>>, %arg4: memref<2x2x100xf32, #tpu.memory_space<vmem>>) attributes {dimension_semantics = [#tpu.dimension_semantics<arbitrary>], iteration_bounds = array<i64: 1>, scalar_prefetch = 0 : i64, scratch_operands = 0 : i64, tpu.core_type = #tpu.core_type<tc>, window_params = [{pipeline_mode = #tpu.pipeline_mode<synchronous>, transform_indices = @transform_0, window_bounds = array<i64: 2, 8, 100>}, {pipeline_mode = #tpu.pipeline_mode<synchronous>, transform_indices = @transform_1, window_bounds = array<i64: 2, 8, 80>}, {pipeline_mode = #tpu.pipeline_mode<synchronous>, transform_indices = @transform_2, window_bounds = array<i64: 2, 80>}, {pipeline_mode = #tpu.pipeline_mode<synchronous>, transform_indices = @transform_3, window_bounds = array<i64: 2, 2, 100>}]} {
    %c0 = arith.constant 0 : index
    %c0_0 = arith.constant 0 : index
    %0 = vector.load %arg3[%c0, %c0_0] : memref<2x80xf32, #tpu.memory_space<vmem>>, vector<2x80xf32>
    %c0_1 = arith.constant 0 : index
    %c0_2 = arith.constant 0 : index
    %c0_3 = arith.constant 0 : index
    %1 = vector.load %arg2[%c0_1, %c0_2, %c0_3] : memref<2x8x80xf32, #tpu.memory_space<vmem>>, vector<1x8x80xf32>
    %2 = vector.shape_cast %1 : vector<1x8x80xf32> to vector<8x80xf32>
    %cst = arith.constant dense<0.000000e+00> : vector<2x8xf32>
    %3 = tpu.matmul %0, %2, %cst {dimension_numbers = #tpu.dot_dimension_numbers<[1], [1], [0], [0], [0, 0, 1, 0], [], []>} : vector<2x80xf32>, vector<8x80xf32>, vector<2x8xf32> -> vector<2x8xf32>
    %cst_4 = arith.constant dense<0xFF800000> : vector<2xf32>
    %4 = vector.multi_reduction <maximumf>, %3, %cst_4 [1] : vector<2x8xf32> to vector<2xf32>
    %5 = vector.shape_cast %4 : vector<2xf32> to vector<2x1xf32>
    %6 = vector.broadcast %5 : vector<2x1xf32> to vector<2x8xf32>
    %7 = arith.subf %3, %6 : vector<2x8xf32>
    %8 = math.exp %7 : vector<2x8xf32>
    %cst_5 = arith.constant dense<0.000000e+00> : vector<2xf32>
    %9 = vector.multi_reduction <add>, %8, %cst_5 [1] : vector<2x8xf32> to vector<2xf32>
    %10 = vector.shape_cast %9 : vector<2xf32> to vector<2x1xf32>
    %11 = vector.broadcast %10 : vector<2x1xf32> to vector<2x8xf32>
    %12 = arith.divf %8, %11 : vector<2x8xf32>
    %c0_6 = arith.constant 0 : index
    %c0_7 = arith.constant 0 : index
    %c0_8 = arith.constant 0 : index
    %13 = vector.load %arg1[%c0_6, %c0_7, %c0_8] : memref<2x8x100xf32, #tpu.memory_space<vmem>>, vector<1x8x100xf32>
    %14 = vector.shape_cast %13 : vector<1x8x100xf32> to vector<8x100xf32>
    %cst_9 = arith.constant dense<0.000000e+00> : vector<2x100xf32>
    %15 = tpu.matmul %12, %14, %cst_9 {dimension_numbers = #tpu.dot_dimension_numbers<[1], [0], [0], [1], [0, 0, 1, 1], [], []>} : vector<2x8xf32>, vector<8x100xf32>, vector<2x100xf32> -> vector<2x100xf32>
    %c0_10 = arith.constant 0 : index
    %c0_11 = arith.constant 0 : index
    %c0_12 = arith.constant 0 : index
    %16 = vector.load %arg4[%c0_10, %c0_11, %c0_12] : memref<2x2x100xf32, #tpu.memory_space<vmem>>, vector<1x2x100xf32>
    %17 = vector.shape_cast %16 : vector<1x2x100xf32> to vector<2x100xf32>
    %18 = vector.shape_cast %15 : vector<2x100xf32> to vector<1x2x100xf32>
    tpu.vector_store %arg4[%c0_10, %c0_11, %c0_12], %18 {strides = array<i32>} : memref<2x2x100xf32, #tpu.memory_space<vmem>>, vector<1x2x100xf32>,
    %c1 = arith.constant 1 : index
    %c0_13 = arith.constant 0 : index
    %c0_14 = arith.constant 0 : index
    %19 = vector.load %arg2[%c1, %c0_13, %c0_14] : memref<2x8x80xf32, #tpu.memory_space<vmem>>, vector<1x8x80xf32>
    %20 = vector.shape_cast %19 : vector<1x8x80xf32> to vector<8x80xf32>
    %cst_15 = arith.constant dense<0.000000e+00> : vector<2x8xf32>
    %21 = tpu.matmul %0, %20, %cst_15 {dimension_numbers = #tpu.dot_dimension_numbers<[1], [1], [0], [0], [0, 0, 1, 0], [], []>} : vector<2x80xf32>, vector<8x80xf32>, vector<2x8xf32> -> vector<2x8xf32>
    %cst_16 = arith.constant dense<0xFF800000> : vector<2xf32>
    %22 = vector.multi_reduction <maximumf>, %21, %cst_16 [1] : vector<2x8xf32> to vector<2xf32>
    %23 = vector.shape_cast %22 : vector<2xf32> to vector<2x1xf32>
    %24 = vector.broadcast %23 : vector<2x1xf32> to vector<2x8xf32>
    %25 = arith.subf %21, %24 : vector<2x8xf32>
    %26 = math.exp %25 : vector<2x8xf32>
    %cst_17 = arith.constant dense<0.000000e+00> : vector<2xf32>
    %27 = vector.multi_reduction <add>, %26, %cst_17 [1] : vector<2x8xf32> to vector<2xf32>
    %28 = vector.shape_cast %27 : vector<2xf32> to vector<2x1xf32>
    %29 = vector.broadcast %28 : vector<2x1xf32> to vector<2x8xf32>
    %30 = arith.divf %26, %29 : vector<2x8xf32>
    %c1_18 = arith.constant 1 : index
    %c0_19 = arith.constant 0 : index
    %c0_20 = arith.constant 0 : index
    %31 = vector.load %arg1[%c1_18, %c0_19, %c0_20] : memref<2x8x100xf32, #tpu.memory_space<vmem>>, vector<1x8x100xf32>
    %32 = vector.shape_cast %31 : vector<1x8x100xf32> to vector<8x100xf32>
    %cst_21 = arith.constant dense<0.000000e+00> : vector<2x100xf32>
    %33 = tpu.matmul %30, %32, %cst_21 {dimension_numbers = #tpu.dot_dimension_numbers<[1], [0], [0], [1], [0, 0, 1, 1], [], []>} : vector<2x8xf32>, vector<8x100xf32>, vector<2x100xf32> -> vector<2x100xf32>
    %c1_22 = arith.constant 1 : index
    %c0_23 = arith.constant 0 : index
    %c0_24 = arith.constant 0 : index
    %34 = vector.load %arg4[%c1_22, %c0_23, %c0_24] : memref<2x2x100xf32, #tpu.memory_space<vmem>>, vector<1x2x100xf32>
    %35 = vector.shape_cast %34 : vector<1x2x100xf32> to vector<2x100xf32>
    %36 = vector.shape_cast %33 : vector<2x100xf32> to vector<1x2x100xf32>
    tpu.vector_store %arg4[%c1_22, %c0_23, %c0_24], %36 {strides = array<i32>} : memref<2x2x100xf32, #tpu.memory_space<vmem>>, vector<1x2x100xf32>,
    return
  }
  func.func @transform_0(%arg0: i32) -> (i32, i32, i32) {
    %c0_i32 = arith.constant 0 : i32
    %c0_i32_0 = arith.constant 0 : i32
    %c0_i32_1 = arith.constant 0 : i32
    %c0_i32_2 = arith.constant 0 : i32
    return %c0_i32, %c0_i32_0, %c0_i32_1 : i32, i32, i32
  }
  func.func @transform_1(%arg0: i32) -> (i32, i32, i32) {
    %c0_i32 = arith.constant 0 : i32
    %c0_i32_0 = arith.constant 0 : i32
    %c0_i32_1 = arith.constant 0 : i32
    %c0_i32_2 = arith.constant 0 : i32
    return %c0_i32, %c0_i32_0, %c0_i32_1 : i32, i32, i32
  }
  func.func @transform_2(%arg0: i32) -> (i32, i32) {
    %c0_i32 = arith.constant 0 : i32
    %c0_i32_0 = arith.constant 0 : i32
    %c0_i32_1 = arith.constant 0 : i32
    return %c0_i32, %c0_i32_0 : i32, i32
  }
  func.func @transform_3(%arg0: i32) -> (i32, i32, i32) {
    %c0_i32 = arith.constant 0 : i32
    %c0_i32_0 = arith.constant 0 : i32
    %c0_i32_1 = arith.constant 0 : i32
    %c0_i32_2 = arith.constant 0 : i32
    return %c0_i32, %c0_i32_0, %c0_i32_1 : i32, i32, i32
  }
}

module attributes {stable_mosaic.version = 11 : i64} {
  func.func @_ca_fx_kernel(%arg0: i32, %arg1: memref<2x8x100xf32, #tpu.memory_space<vmem>>, %arg2: memref<2x100x80xf32, #tpu.memory_space<vmem>>, %arg3: memref<3x80x80xf32, #tpu.memory_space<vmem>>, %arg4: memref<3x1x80xf32, #tpu.memory_space<vmem>>, %arg5: memref<2x3x8x80xf32, #tpu.memory_space<vmem>>) attributes {dimension_semantics = [#tpu.dimension_semantics<arbitrary>], iteration_bounds = array<i64: 1>, scalar_prefetch = 0 : i64, scratch_operands = 0 : i64, tpu.core_type = #tpu.core_type<tc>, window_params = [{pipeline_mode = #tpu.pipeline_mode<synchronous>, transform_indices = @transform_0, window_bounds = array<i64: 2, 8, 100>}, {pipeline_mode = #tpu.pipeline_mode<synchronous>, transform_indices = @transform_1, window_bounds = array<i64: 2, 100, 80>}, {pipeline_mode = #tpu.pipeline_mode<synchronous>, transform_indices = @transform_2, window_bounds = array<i64: 3, 80, 80>}, {pipeline_mode = #tpu.pipeline_mode<synchronous>, transform_indices = @transform_3, window_bounds = array<i64: 3, 1, 80>}, {pipeline_mode = #tpu.pipeline_mode<synchronous>, transform_indices = @transform_4, window_bounds = array<i64: 2, 3, 8, 80>}]} {
    %c0 = arith.constant 0 : index
    %c0_0 = arith.constant 0 : index
    %c0_1 = arith.constant 0 : index
    %0 = vector.load %arg3[%c0, %c0_0, %c0_1] : memref<3x80x80xf32, #tpu.memory_space<vmem>>, vector<1x80x80xf32>
    %1 = vector.shape_cast %0 : vector<1x80x80xf32> to vector<80x80xf32>
    %c1 = arith.constant 1 : index
    %c0_2 = arith.constant 0 : index
    %c0_3 = arith.constant 0 : index
    %2 = vector.load %arg3[%c1, %c0_2, %c0_3] : memref<3x80x80xf32, #tpu.memory_space<vmem>>, vector<1x80x80xf32>
    %3 = vector.shape_cast %2 : vector<1x80x80xf32> to vector<80x80xf32>
    %c2 = arith.constant 2 : index
    %c0_4 = arith.constant 0 : index
    %c0_5 = arith.constant 0 : index
    %4 = vector.load %arg3[%c2, %c0_4, %c0_5] : memref<3x80x80xf32, #tpu.memory_space<vmem>>, vector<1x80x80xf32>
    %5 = vector.shape_cast %4 : vector<1x80x80xf32> to vector<80x80xf32>
    %c0_6 = arith.constant 0 : index
    %c0_7 = arith.constant 0 : index
    %c0_8 = arith.constant 0 : index
    %6 = vector.load %arg4[%c0_6, %c0_7, %c0_8] : memref<3x1x80xf32, #tpu.memory_space<vmem>>, vector<1x1x80xf32>
    %7 = vector.shape_cast %6 : vector<1x1x80xf32> to vector<1x80xf32>
    %c1_9 = arith.constant 1 : index
    %c0_10 = arith.constant 0 : index
    %c0_11 = arith.constant 0 : index
    %8 = vector.load %arg4[%c1_9, %c0_10, %c0_11] : memref<3x1x80xf32, #tpu.memory_space<vmem>>, vector<1x1x80xf32>
    %9 = vector.shape_cast %8 : vector<1x1x80xf32> to vector<1x80xf32>
    %c2_12 = arith.constant 2 : index
    %c0_13 = arith.constant 0 : index
    %c0_14 = arith.constant 0 : index
    %10 = vector.load %arg4[%c2_12, %c0_13, %c0_14] : memref<3x1x80xf32, #tpu.memory_space<vmem>>, vector<1x1x80xf32>
    %11 = vector.shape_cast %10 : vector<1x1x80xf32> to vector<1x80xf32>
    %c0_15 = arith.constant 0 : index
    %c0_16 = arith.constant 0 : index
    %c0_17 = arith.constant 0 : index
    %12 = vector.load %arg1[%c0_15, %c0_16, %c0_17] : memref<2x8x100xf32, #tpu.memory_space<vmem>>, vector<1x8x100xf32>
    %13 = vector.shape_cast %12 : vector<1x8x100xf32> to vector<8x100xf32>
    %c0_18 = arith.constant 0 : index
    %c0_19 = arith.constant 0 : index
    %c0_20 = arith.constant 0 : index
    %14 = vector.load %arg2[%c0_18, %c0_19, %c0_20] : memref<2x100x80xf32, #tpu.memory_space<vmem>>, vector<1x100x80xf32>
    %15 = vector.shape_cast %14 : vector<1x100x80xf32> to vector<100x80xf32>
    %cst = arith.constant dense<0.000000e+00> : vector<8x80xf32>
    %16 = tpu.matmul %13, %15, %cst {dimension_numbers = #tpu.dot_dimension_numbers<[1], [0], [0], [1], [0, 0, 1, 1], [], []>} : vector<8x100xf32>, vector<100x80xf32>, vector<8x80xf32> -> vector<8x80xf32>
    %17 = math.tanh %16 : vector<8x80xf32>
    %cst_21 = arith.constant dense<0.000000e+00> : vector<8x80xf32>
    %18 = tpu.matmul %17, %1, %cst_21 {dimension_numbers = #tpu.dot_dimension_numbers<[1], [0], [0], [1], [0, 0, 1, 1], [], []>} : vector<8x80xf32>, vector<80x80xf32>, vector<8x80xf32> -> vector<8x80xf32>
    %19 = vector.broadcast %7 : vector<1x80xf32> to vector<8x80xf32>
    %20 = arith.addf %18, %19 : vector<8x80xf32>
    %c0_22 = arith.constant 0 : index
    %c0_23 = arith.constant 0 : index
    %c0_24 = arith.constant 0 : index
    %c0_25 = arith.constant 0 : index
    %21 = vector.load %arg5[%c0_22, %c0_23, %c0_24, %c0_25] : memref<2x3x8x80xf32, #tpu.memory_space<vmem>>, vector<1x1x8x80xf32>
    %22 = vector.shape_cast %21 : vector<1x1x8x80xf32> to vector<8x80xf32>
    %23 = vector.shape_cast %20 : vector<8x80xf32> to vector<1x1x8x80xf32>
    tpu.vector_store %arg5[%c0_22, %c0_23, %c0_24, %c0_25], %23 {strides = array<i32>} : memref<2x3x8x80xf32, #tpu.memory_space<vmem>>, vector<1x1x8x80xf32>,
    %cst_26 = arith.constant dense<0.000000e+00> : vector<8x80xf32>
    %24 = tpu.matmul %17, %3, %cst_26 {dimension_numbers = #tpu.dot_dimension_numbers<[1], [0], [0], [1], [0, 0, 1, 1], [], []>} : vector<8x80xf32>, vector<80x80xf32>, vector<8x80xf32> -> vector<8x80xf32>
    %25 = vector.broadcast %9 : vector<1x80xf32> to vector<8x80xf32>
    %26 = arith.addf %24, %25 : vector<8x80xf32>
    %c0_27 = arith.constant 0 : index
    %c1_28 = arith.constant 1 : index
    %c0_29 = arith.constant 0 : index
    %c0_30 = arith.constant 0 : index
    %27 = vector.load %arg5[%c0_27, %c1_28, %c0_29, %c0_30] : memref<2x3x8x80xf32, #tpu.memory_space<vmem>>, vector<1x1x8x80xf32>
    %28 = vector.shape_cast %27 : vector<1x1x8x80xf32> to vector<8x80xf32>
    %29 = vector.shape_cast %26 : vector<8x80xf32> to vector<1x1x8x80xf32>
    tpu.vector_store %arg5[%c0_27, %c1_28, %c0_29, %c0_30], %29 {strides = array<i32>} : memref<2x3x8x80xf32, #tpu.memory_space<vmem>>, vector<1x1x8x80xf32>,
    %cst_31 = arith.constant dense<0.000000e+00> : vector<8x80xf32>
    %30 = tpu.matmul %17, %5, %cst_31 {dimension_numbers = #tpu.dot_dimension_numbers<[1], [0], [0], [1], [0, 0, 1, 1], [], []>} : vector<8x80xf32>, vector<80x80xf32>, vector<8x80xf32> -> vector<8x80xf32>
    %31 = vector.broadcast %11 : vector<1x80xf32> to vector<8x80xf32>
    %32 = arith.addf %30, %31 : vector<8x80xf32>
    %c0_32 = arith.constant 0 : index
    %c2_33 = arith.constant 2 : index
    %c0_34 = arith.constant 0 : index
    %c0_35 = arith.constant 0 : index
    %33 = vector.load %arg5[%c0_32, %c2_33, %c0_34, %c0_35] : memref<2x3x8x80xf32, #tpu.memory_space<vmem>>, vector<1x1x8x80xf32>
    %34 = vector.shape_cast %33 : vector<1x1x8x80xf32> to vector<8x80xf32>
    %35 = vector.shape_cast %32 : vector<8x80xf32> to vector<1x1x8x80xf32>
    tpu.vector_store %arg5[%c0_32, %c2_33, %c0_34, %c0_35], %35 {strides = array<i32>} : memref<2x3x8x80xf32, #tpu.memory_space<vmem>>, vector<1x1x8x80xf32>,
    %c1_36 = arith.constant 1 : index
    %c0_37 = arith.constant 0 : index
    %c0_38 = arith.constant 0 : index
    %36 = vector.load %arg1[%c1_36, %c0_37, %c0_38] : memref<2x8x100xf32, #tpu.memory_space<vmem>>, vector<1x8x100xf32>
    %37 = vector.shape_cast %36 : vector<1x8x100xf32> to vector<8x100xf32>
    %c1_39 = arith.constant 1 : index
    %c0_40 = arith.constant 0 : index
    %c0_41 = arith.constant 0 : index
    %38 = vector.load %arg2[%c1_39, %c0_40, %c0_41] : memref<2x100x80xf32, #tpu.memory_space<vmem>>, vector<1x100x80xf32>
    %39 = vector.shape_cast %38 : vector<1x100x80xf32> to vector<100x80xf32>
    %cst_42 = arith.constant dense<0.000000e+00> : vector<8x80xf32>
    %40 = tpu.matmul %37, %39, %cst_42 {dimension_numbers = #tpu.dot_dimension_numbers<[1], [0], [0], [1], [0, 0, 1, 1], [], []>} : vector<8x100xf32>, vector<100x80xf32>, vector<8x80xf32> -> vector<8x80xf32>
    %41 = math.tanh %40 : vector<8x80xf32>
    %cst_43 = arith.constant dense<0.000000e+00> : vector<8x80xf32>
    %42 = tpu.matmul %41, %1, %cst_43 {dimension_numbers = #tpu.dot_dimension_numbers<[1], [0], [0], [1], [0, 0, 1, 1], [], []>} : vector<8x80xf32>, vector<80x80xf32>, vector<8x80xf32> -> vector<8x80xf32>
    %43 = vector.broadcast %7 : vector<1x80xf32> to vector<8x80xf32>
    %44 = arith.addf %42, %43 : vector<8x80xf32>
    %c1_44 = arith.constant 1 : index
    %c0_45 = arith.constant 0 : index
    %c0_46 = arith.constant 0 : index
    %c0_47 = arith.constant 0 : index
    %45 = vector.load %arg5[%c1_44, %c0_45, %c0_46, %c0_47] : memref<2x3x8x80xf32, #tpu.memory_space<vmem>>, vector<1x1x8x80xf32>
    %46 = vector.shape_cast %45 : vector<1x1x8x80xf32> to vector<8x80xf32>
    %47 = vector.shape_cast %44 : vector<8x80xf32> to vector<1x1x8x80xf32>
    tpu.vector_store %arg5[%c1_44, %c0_45, %c0_46, %c0_47], %47 {strides = array<i32>} : memref<2x3x8x80xf32, #tpu.memory_space<vmem>>, vector<1x1x8x80xf32>,
    %cst_48 = arith.constant dense<0.000000e+00> : vector<8x80xf32>
    %48 = tpu.matmul %41, %3, %cst_48 {dimension_numbers = #tpu.dot_dimension_numbers<[1], [0], [0], [1], [0, 0, 1, 1], [], []>} : vector<8x80xf32>, vector<80x80xf32>, vector<8x80xf32> -> vector<8x80xf32>
    %49 = vector.broadcast %9 : vector<1x80xf32> to vector<8x80xf32>
    %50 = arith.addf %48, %49 : vector<8x80xf32>
    %c1_49 = arith.constant 1 : index
    %c1_50 = arith.constant 1 : index
    %c0_51 = arith.constant 0 : index
    %c0_52 = arith.constant 0 : index
    %51 = vector.load %arg5[%c1_49, %c1_50, %c0_51, %c0_52] : memref<2x3x8x80xf32, #tpu.memory_space<vmem>>, vector<1x1x8x80xf32>
    %52 = vector.shape_cast %51 : vector<1x1x8x80xf32> to vector<8x80xf32>
    %53 = vector.shape_cast %50 : vector<8x80xf32> to vector<1x1x8x80xf32>
    tpu.vector_store %arg5[%c1_49, %c1_50, %c0_51, %c0_52], %53 {strides = array<i32>} : memref<2x3x8x80xf32, #tpu.memory_space<vmem>>, vector<1x1x8x80xf32>,
    %cst_53 = arith.constant dense<0.000000e+00> : vector<8x80xf32>
    %54 = tpu.matmul %41, %5, %cst_53 {dimension_numbers = #tpu.dot_dimension_numbers<[1], [0], [0], [1], [0, 0, 1, 1], [], []>} : vector<8x80xf32>, vector<80x80xf32>, vector<8x80xf32> -> vector<8x80xf32>
    %55 = vector.broadcast %11 : vector<1x80xf32> to vector<8x80xf32>
    %56 = arith.addf %54, %55 : vector<8x80xf32>
    %c1_54 = arith.constant 1 : index
    %c2_55 = arith.constant 2 : index
    %c0_56 = arith.constant 0 : index
    %c0_57 = arith.constant 0 : index
    %57 = vector.load %arg5[%c1_54, %c2_55, %c0_56, %c0_57] : memref<2x3x8x80xf32, #tpu.memory_space<vmem>>, vector<1x1x8x80xf32>
    %58 = vector.shape_cast %57 : vector<1x1x8x80xf32> to vector<8x80xf32>
    %59 = vector.shape_cast %56 : vector<8x80xf32> to vector<1x1x8x80xf32>
    tpu.vector_store %arg5[%c1_54, %c2_55, %c0_56, %c0_57], %59 {strides = array<i32>} : memref<2x3x8x80xf32, #tpu.memory_space<vmem>>, vector<1x1x8x80xf32>,
    return
  }
  func.func @transform_0(%arg0: i32) -> (i32, i32, i32) {
    %c0_i32 = arith.constant 0 : i32
    %c0_i32_0 = arith.constant 0 : i32
    %c0_i32_1 = arith.constant 0 : i32
    %c0_i32_2 = arith.constant 0 : i32
    return %c0_i32, %c0_i32_0, %c0_i32_1 : i32, i32, i32
  }
  func.func @transform_1(%arg0: i32) -> (i32, i32, i32) {
    %c0_i32 = arith.constant 0 : i32
    %c0_i32_0 = arith.constant 0 : i32
    %c0_i32_1 = arith.constant 0 : i32
    %c0_i32_2 = arith.constant 0 : i32
    return %c0_i32, %c0_i32_0, %c0_i32_1 : i32, i32, i32
  }
  func.func @transform_2(%arg0: i32) -> (i32, i32, i32) {
    %c0_i32 = arith.constant 0 : i32
    %c0_i32_0 = arith.constant 0 : i32
    %c0_i32_1 = arith.constant 0 : i32
    %c0_i32_2 = arith.constant 0 : i32
    return %c0_i32, %c0_i32_0, %c0_i32_1 : i32, i32, i32
  }
  func.func @transform_3(%arg0: i32) -> (i32, i32, i32) {
    %c0_i32 = arith.constant 0 : i32
    %c0_i32_0 = arith.constant 0 : i32
    %c0_i32_1 = arith.constant 0 : i32
    %c0_i32_2 = arith.constant 0 : i32
    return %c0_i32, %c0_i32_0, %c0_i32_1 : i32, i32, i32
  }
  func.func @transform_4(%arg0: i32) -> (i32, i32, i32, i32) {
    %c0_i32 = arith.constant 0 : i32
    %c0_i32_0 = arith.constant 0 : i32
    %c0_i32_1 = arith.constant 0 : i32
    %c0_i32_2 = arith.constant 0 : i32
    %c0_i32_3 = arith.constant 0 : i32
    return %c0_i32, %c0_i32_0, %c0_i32_1, %c0_i32_2 : i32, i32, i32, i32
  }
}

module attributes {stable_mosaic.version = 11 : i64} {
  func.func @_gru_kernel(%arg0: i32, %arg1: memref<8x2x80xf32, #tpu.memory_space<vmem>>, %arg2: memref<8x2x80xf32, #tpu.memory_space<vmem>>, %arg3: memref<8x2x80xf32, #tpu.memory_space<vmem>>, %arg4: memref<3x80x80xf32, #tpu.memory_space<vmem>>, %arg5: memref<3x1x80xf32, #tpu.memory_space<vmem>>, %arg6: memref<8x2x80xf32, #tpu.memory_space<vmem>>) attributes {dimension_semantics = [#tpu.dimension_semantics<arbitrary>], iteration_bounds = array<i64: 1>, scalar_prefetch = 0 : i64, scratch_operands = 0 : i64, tpu.core_type = #tpu.core_type<tc>, window_params = [{pipeline_mode = #tpu.pipeline_mode<synchronous>, transform_indices = @transform_0, window_bounds = array<i64: 8, 2, 80>}, {pipeline_mode = #tpu.pipeline_mode<synchronous>, transform_indices = @transform_1, window_bounds = array<i64: 8, 2, 80>}, {pipeline_mode = #tpu.pipeline_mode<synchronous>, transform_indices = @transform_2, window_bounds = array<i64: 8, 2, 80>}, {pipeline_mode = #tpu.pipeline_mode<synchronous>, transform_indices = @transform_3, window_bounds = array<i64: 3, 80, 80>}, {pipeline_mode = #tpu.pipeline_mode<synchronous>, transform_indices = @transform_4, window_bounds = array<i64: 3, 1, 80>}, {pipeline_mode = #tpu.pipeline_mode<synchronous>, transform_indices = @transform_5, window_bounds = array<i64: 8, 2, 80>}]} {
    %c0 = arith.constant 0 : index
    %c0_0 = arith.constant 0 : index
    %c0_1 = arith.constant 0 : index
    %0 = vector.load %arg4[%c0, %c0_0, %c0_1] : memref<3x80x80xf32, #tpu.memory_space<vmem>>, vector<1x80x80xf32>
    %1 = vector.shape_cast %0 : vector<1x80x80xf32> to vector<80x80xf32>
    %c1 = arith.constant 1 : index
    %c0_2 = arith.constant 0 : index
    %c0_3 = arith.constant 0 : index
    %2 = vector.load %arg4[%c1, %c0_2, %c0_3] : memref<3x80x80xf32, #tpu.memory_space<vmem>>, vector<1x80x80xf32>
    %3 = vector.shape_cast %2 : vector<1x80x80xf32> to vector<80x80xf32>
    %c2 = arith.constant 2 : index
    %c0_4 = arith.constant 0 : index
    %c0_5 = arith.constant 0 : index
    %4 = vector.load %arg4[%c2, %c0_4, %c0_5] : memref<3x80x80xf32, #tpu.memory_space<vmem>>, vector<1x80x80xf32>
    %5 = vector.shape_cast %4 : vector<1x80x80xf32> to vector<80x80xf32>
    %c0_6 = arith.constant 0 : index
    %c0_7 = arith.constant 0 : index
    %c0_8 = arith.constant 0 : index
    %6 = vector.load %arg5[%c0_6, %c0_7, %c0_8] : memref<3x1x80xf32, #tpu.memory_space<vmem>>, vector<1x1x80xf32>
    %7 = vector.shape_cast %6 : vector<1x1x80xf32> to vector<1x80xf32>
    %c1_9 = arith.constant 1 : index
    %c0_10 = arith.constant 0 : index
    %c0_11 = arith.constant 0 : index
    %8 = vector.load %arg5[%c1_9, %c0_10, %c0_11] : memref<3x1x80xf32, #tpu.memory_space<vmem>>, vector<1x1x80xf32>
    %9 = vector.shape_cast %8 : vector<1x1x80xf32> to vector<1x80xf32>
    %c2_12 = arith.constant 2 : index
    %c0_13 = arith.constant 0 : index
    %c0_14 = arith.constant 0 : index
    %10 = vector.load %arg5[%c2_12, %c0_13, %c0_14] : memref<3x1x80xf32, #tpu.memory_space<vmem>>, vector<1x1x80xf32>
    %11 = vector.shape_cast %10 : vector<1x1x80xf32> to vector<1x80xf32>
    %cst = arith.constant 0.000000e+00 : f32
    %12 = vector.broadcast %cst : f32 to vector<2x80xf32>
    %c0_i32 = arith.constant 0 : i32
    %cst_15 = arith.constant dense<0.000000e+00> : vector<2x80xf32>
    %13 = tpu.matmul %12, %1, %cst_15 {dimension_numbers = #tpu.dot_dimension_numbers<[1], [0], [0], [1], [0, 0, 1, 1], [], []>} : vector<2x80xf32>, vector<80x80xf32>, vector<2x80xf32> -> vector<2x80xf32>
    %14 = vector.broadcast %7 : vector<1x80xf32> to vector<2x80xf32>
    %15 = arith.addf %13, %14 : vector<2x80xf32>
    %cst_16 = arith.constant dense<0.000000e+00> : vector<2x80xf32>
    %16 = tpu.matmul %12, %3, %cst_16 {dimension_numbers = #tpu.dot_dimension_numbers<[1], [0], [0], [1], [0, 0, 1, 1], [], []>} : vector<2x80xf32>, vector<80x80xf32>, vector<2x80xf32> -> vector<2x80xf32>
    %17 = vector.broadcast %9 : vector<1x80xf32> to vector<2x80xf32>
    %18 = arith.addf %16, %17 : vector<2x80xf32>
    %cst_17 = arith.constant dense<0.000000e+00> : vector<2x80xf32>
    %19 = tpu.matmul %12, %5, %cst_17 {dimension_numbers = #tpu.dot_dimension_numbers<[1], [0], [0], [1], [0, 0, 1, 1], [], []>} : vector<2x80xf32>, vector<80x80xf32>, vector<2x80xf32> -> vector<2x80xf32>
    %20 = vector.broadcast %11 : vector<1x80xf32> to vector<2x80xf32>
    %21 = arith.addf %19, %20 : vector<2x80xf32>
    %22 = arith.index_cast %c0_i32 : i32 to index
    %c0_18 = arith.constant 0 : index
    %c0_19 = arith.constant 0 : index
    %23 = vector.load %arg1[%22, %c0_18, %c0_19] : memref<8x2x80xf32, #tpu.memory_space<vmem>>, vector<1x2x80xf32>
    %24 = vector.shape_cast %23 : vector<1x2x80xf32> to vector<2x80xf32>
    %25 = arith.addf %24, %15 : vector<2x80xf32>
    %26 = arith.negf %25 : vector<2x80xf32>
    %27 = math.exp %26 : vector<2x80xf32>
    %cst_20 = arith.constant 1.000000e+00 : f32
    %28 = vector.broadcast %cst_20 : f32 to vector<2x80xf32>
    %29 = arith.addf %28, %27 : vector<2x80xf32>
    %30 = arith.divf %28, %29 : vector<2x80xf32>
    %31 = arith.index_cast %c0_i32 : i32 to index
    %c0_21 = arith.constant 0 : index
    %c0_22 = arith.constant 0 : index
    %32 = vector.load %arg2[%31, %c0_21, %c0_22] : memref<8x2x80xf32, #tpu.memory_space<vmem>>, vector<1x2x80xf32>
    %33 = vector.shape_cast %32 : vector<1x2x80xf32> to vector<2x80xf32>
    %34 = arith.addf %33, %18 : vector<2x80xf32>
    %35 = arith.negf %34 : vector<2x80xf32>
    %36 = math.exp %35 : vector<2x80xf32>
    %cst_23 = arith.constant 1.000000e+00 : f32
    %37 = vector.broadcast %cst_23 : f32 to vector<2x80xf32>
    %38 = arith.addf %37, %36 : vector<2x80xf32>
    %39 = arith.divf %37, %38 : vector<2x80xf32>
    %40 = arith.index_cast %c0_i32 : i32 to index
    %c0_24 = arith.constant 0 : index
    %c0_25 = arith.constant 0 : index
    %41 = vector.load %arg3[%40, %c0_24, %c0_25] : memref<8x2x80xf32, #tpu.memory_space<vmem>>, vector<1x2x80xf32>
    %42 = vector.shape_cast %41 : vector<1x2x80xf32> to vector<2x80xf32>
    %43 = arith.mulf %30, %21 : vector<2x80xf32>
    %44 = arith.addf %42, %43 : vector<2x80xf32>
    %45 = math.tanh %44 : vector<2x80xf32>
    %cst_26 = arith.constant 1.000000e+00 : f32
    %46 = vector.broadcast %cst_26 : f32 to vector<2x80xf32>
    %47 = arith.subf %46, %39 : vector<2x80xf32>
    %48 = arith.mulf %47, %45 : vector<2x80xf32>
    %49 = arith.mulf %39, %12 : vector<2x80xf32>
    %50 = arith.addf %48, %49 : vector<2x80xf32>
    %51 = arith.index_cast %c0_i32 : i32 to index
    %c0_27 = arith.constant 0 : index
    %c0_28 = arith.constant 0 : index
    %52 = vector.load %arg6[%51, %c0_27, %c0_28] : memref<8x2x80xf32, #tpu.memory_space<vmem>>, vector<1x2x80xf32>
    %53 = vector.shape_cast %52 : vector<1x2x80xf32> to vector<2x80xf32>
    %54 = vector.shape_cast %50 : vector<2x80xf32> to vector<1x2x80xf32>
    tpu.vector_store %arg6[%51, %c0_27, %c0_28], %54 {strides = array<i32>} : memref<8x2x80xf32, #tpu.memory_space<vmem>>, vector<1x2x80xf32>,
    %c1_i32 = arith.constant 1 : i32
    %cst_29 = arith.constant dense<0.000000e+00> : vector<2x80xf32>
    %55 = tpu.matmul %50, %1, %cst_29 {dimension_numbers = #tpu.dot_dimension_numbers<[1], [0], [0], [1], [0, 0, 1, 1], [], []>} : vector<2x80xf32>, vector<80x80xf32>, vector<2x80xf32> -> vector<2x80xf32>
    %56 = vector.broadcast %7 : vector<1x80xf32> to vector<2x80xf32>
    %57 = arith.addf %55, %56 : vector<2x80xf32>
    %cst_30 = arith.constant dense<0.000000e+00> : vector<2x80xf32>
    %58 = tpu.matmul %50, %3, %cst_30 {dimension_numbers = #tpu.dot_dimension_numbers<[1], [0], [0], [1], [0, 0, 1, 1], [], []>} : vector<2x80xf32>, vector<80x80xf32>, vector<2x80xf32> -> vector<2x80xf32>
    %59 = vector.broadcast %9 : vector<1x80xf32> to vector<2x80xf32>
    %60 = arith.addf %58, %59 : vector<2x80xf32>
    %cst_31 = arith.constant dense<0.000000e+00> : vector<2x80xf32>
    %61 = tpu.matmul %50, %5, %cst_31 {dimension_numbers = #tpu.dot_dimension_numbers<[1], [0], [0], [1], [0, 0, 1, 1], [], []>} : vector<2x80xf32>, vector<80x80xf32>, vector<2x80xf32> -> vector<2x80xf32>
    %62 = vector.broadcast %11 : vector<1x80xf32> to vector<2x80xf32>
    %63 = arith.addf %61, %62 : vector<2x80xf32>
    %64 = arith.index_cast %c1_i32 : i32 to index
    %c0_32 = arith.constant 0 : index
    %c0_33 = arith.constant 0 : index
    %65 = vector.load %arg1[%64, %c0_32, %c0_33] : memref<8x2x80xf32, #tpu.memory_space<vmem>>, vector<1x2x80xf32>
    %66 = vector.shape_cast %65 : vector<1x2x80xf32> to vector<2x80xf32>
    %67 = arith.addf %66, %57 : vector<2x80xf32>
    %68 = arith.negf %67 : vector<2x80xf32>
    %69 = math.exp %68 : vector<2x80xf32>
    %cst_34 = arith.constant 1.000000e+00 : f32
    %70 = vector.broadcast %cst_34 : f32 to vector<2x80xf32>
    %71 = arith.addf %70, %69 : vector<2x80xf32>
    %72 = arith.divf %70, %71 : vector<2x80xf32>
    %73 = arith.index_cast %c1_i32 : i32 to index
    %c0_35 = arith.constant 0 : index
    %c0_36 = arith.constant 0 : index
    %74 = vector.load %arg2[%73, %c0_35, %c0_36] : memref<8x2x80xf32, #tpu.memory_space<vmem>>, vector<1x2x80xf32>
    %75 = vector.shape_cast %74 : vector<1x2x80xf32> to vector<2x80xf32>
    %76 = arith.addf %75, %60 : vector<2x80xf32>
    %77 = arith.negf %76 : vector<2x80xf32>
    %78 = math.exp %77 : vector<2x80xf32>
    %cst_37 = arith.constant 1.000000e+00 : f32
    %79 = vector.broadcast %cst_37 : f32 to vector<2x80xf32>
    %80 = arith.addf %79, %78 : vector<2x80xf32>
    %81 = arith.divf %79, %80 : vector<2x80xf32>
    %82 = arith.index_cast %c1_i32 : i32 to index
    %c0_38 = arith.constant 0 : index
    %c0_39 = arith.constant 0 : index
    %83 = vector.load %arg3[%82, %c0_38, %c0_39] : memref<8x2x80xf32, #tpu.memory_space<vmem>>, vector<1x2x80xf32>
    %84 = vector.shape_cast %83 : vector<1x2x80xf32> to vector<2x80xf32>
    %85 = arith.mulf %72, %63 : vector<2x80xf32>
    %86 = arith.addf %84, %85 : vector<2x80xf32>
    %87 = math.tanh %86 : vector<2x80xf32>
    %cst_40 = arith.constant 1.000000e+00 : f32
    %88 = vector.broadcast %cst_40 : f32 to vector<2x80xf32>
    %89 = arith.subf %88, %81 : vector<2x80xf32>
    %90 = arith.mulf %89, %87 : vector<2x80xf32>
    %91 = arith.mulf %81, %50 : vector<2x80xf32>
    %92 = arith.addf %90, %91 : vector<2x80xf32>
    %93 = arith.index_cast %c1_i32 : i32 to index
    %c0_41 = arith.constant 0 : index
    %c0_42 = arith.constant 0 : index
    %94 = vector.load %arg6[%93, %c0_41, %c0_42] : memref<8x2x80xf32, #tpu.memory_space<vmem>>, vector<1x2x80xf32>
    %95 = vector.shape_cast %94 : vector<1x2x80xf32> to vector<2x80xf32>
    %96 = vector.shape_cast %92 : vector<2x80xf32> to vector<1x2x80xf32>
    tpu.vector_store %arg6[%93, %c0_41, %c0_42], %96 {strides = array<i32>} : memref<8x2x80xf32, #tpu.memory_space<vmem>>, vector<1x2x80xf32>,
    %c2_i32 = arith.constant 2 : i32
    %cst_43 = arith.constant dense<0.000000e+00> : vector<2x80xf32>
    %97 = tpu.matmul %92, %1, %cst_43 {dimension_numbers = #tpu.dot_dimension_numbers<[1], [0], [0], [1], [0, 0, 1, 1], [], []>} : vector<2x80xf32>, vector<80x80xf32>, vector<2x80xf32> -> vector<2x80xf32>
    %98 = vector.broadcast %7 : vector<1x80xf32> to vector<2x80xf32>
    %99 = arith.addf %97, %98 : vector<2x80xf32>
    %cst_44 = arith.constant dense<0.000000e+00> : vector<2x80xf32>
    %100 = tpu.matmul %92, %3, %cst_44 {dimension_numbers = #tpu.dot_dimension_numbers<[1], [0], [0], [1], [0, 0, 1, 1], [], []>} : vector<2x80xf32>, vector<80x80xf32>, vector<2x80xf32> -> vector<2x80xf32>
    %101 = vector.broadcast %9 : vector<1x80xf32> to vector<2x80xf32>
    %102 = arith.addf %100, %101 : vector<2x80xf32>
    %cst_45 = arith.constant dense<0.000000e+00> : vector<2x80xf32>
    %103 = tpu.matmul %92, %5, %cst_45 {dimension_numbers = #tpu.dot_dimension_numbers<[1], [0], [0], [1], [0, 0, 1, 1], [], []>} : vector<2x80xf32>, vector<80x80xf32>, vector<2x80xf32> -> vector<2x80xf32>
    %104 = vector.broadcast %11 : vector<1x80xf32> to vector<2x80xf32>
    %105 = arith.addf %103, %104 : vector<2x80xf32>
    %106 = arith.index_cast %c2_i32 : i32 to index
    %c0_46 = arith.constant 0 : index
    %c0_47 = arith.constant 0 : index
    %107 = vector.load %arg1[%106, %c0_46, %c0_47] : memref<8x2x80xf32, #tpu.memory_space<vmem>>, vector<1x2x80xf32>
    %108 = vector.shape_cast %107 : vector<1x2x80xf32> to vector<2x80xf32>
    %109 = arith.addf %108, %99 : vector<2x80xf32>
    %110 = arith.negf %109 : vector<2x80xf32>
    %111 = math.exp %110 : vector<2x80xf32>
    %cst_48 = arith.constant 1.000000e+00 : f32
    %112 = vector.broadcast %cst_48 : f32 to vector<2x80xf32>
    %113 = arith.addf %112, %111 : vector<2x80xf32>
    %114 = arith.divf %112, %113 : vector<2x80xf32>
    %115 = arith.index_cast %c2_i32 : i32 to index
    %c0_49 = arith.constant 0 : index
    %c0_50 = arith.constant 0 : index
    %116 = vector.load %arg2[%115, %c0_49, %c0_50] : memref<8x2x80xf32, #tpu.memory_space<vmem>>, vector<1x2x80xf32>
    %117 = vector.shape_cast %116 : vector<1x2x80xf32> to vector<2x80xf32>
    %118 = arith.addf %117, %102 : vector<2x80xf32>
    %119 = arith.negf %118 : vector<2x80xf32>
    %120 = math.exp %119 : vector<2x80xf32>
    %cst_51 = arith.constant 1.000000e+00 : f32
    %121 = vector.broadcast %cst_51 : f32 to vector<2x80xf32>
    %122 = arith.addf %121, %120 : vector<2x80xf32>
    %123 = arith.divf %121, %122 : vector<2x80xf32>
    %124 = arith.index_cast %c2_i32 : i32 to index
    %c0_52 = arith.constant 0 : index
    %c0_53 = arith.constant 0 : index
    %125 = vector.load %arg3[%124, %c0_52, %c0_53] : memref<8x2x80xf32, #tpu.memory_space<vmem>>, vector<1x2x80xf32>
    %126 = vector.shape_cast %125 : vector<1x2x80xf32> to vector<2x80xf32>
    %127 = arith.mulf %114, %105 : vector<2x80xf32>
    %128 = arith.addf %126, %127 : vector<2x80xf32>
    %129 = math.tanh %128 : vector<2x80xf32>
    %cst_54 = arith.constant 1.000000e+00 : f32
    %130 = vector.broadcast %cst_54 : f32 to vector<2x80xf32>
    %131 = arith.subf %130, %123 : vector<2x80xf32>
    %132 = arith.mulf %131, %129 : vector<2x80xf32>
    %133 = arith.mulf %123, %92 : vector<2x80xf32>
    %134 = arith.addf %132, %133 : vector<2x80xf32>
    %135 = arith.index_cast %c2_i32 : i32 to index
    %c0_55 = arith.constant 0 : index
    %c0_56 = arith.constant 0 : index
    %136 = vector.load %arg6[%135, %c0_55, %c0_56] : memref<8x2x80xf32, #tpu.memory_space<vmem>>, vector<1x2x80xf32>
    %137 = vector.shape_cast %136 : vector<1x2x80xf32> to vector<2x80xf32>
    %138 = vector.shape_cast %134 : vector<2x80xf32> to vector<1x2x80xf32>
    tpu.vector_store %arg6[%135, %c0_55, %c0_56], %138 {strides = array<i32>} : memref<8x2x80xf32, #tpu.memory_space<vmem>>, vector<1x2x80xf32>,
    %c3_i32 = arith.constant 3 : i32
    %cst_57 = arith.constant dense<0.000000e+00> : vector<2x80xf32>
    %139 = tpu.matmul %134, %1, %cst_57 {dimension_numbers = #tpu.dot_dimension_numbers<[1], [0], [0], [1], [0, 0, 1, 1], [], []>} : vector<2x80xf32>, vector<80x80xf32>, vector<2x80xf32> -> vector<2x80xf32>
    %140 = vector.broadcast %7 : vector<1x80xf32> to vector<2x80xf32>
    %141 = arith.addf %139, %140 : vector<2x80xf32>
    %cst_58 = arith.constant dense<0.000000e+00> : vector<2x80xf32>
    %142 = tpu.matmul %134, %3, %cst_58 {dimension_numbers = #tpu.dot_dimension_numbers<[1], [0], [0], [1], [0, 0, 1, 1], [], []>} : vector<2x80xf32>, vector<80x80xf32>, vector<2x80xf32> -> vector<2x80xf32>
    %143 = vector.broadcast %9 : vector<1x80xf32> to vector<2x80xf32>
    %144 = arith.addf %142, %143 : vector<2x80xf32>
    %cst_59 = arith.constant dense<0.000000e+00> : vector<2x80xf32>
    %145 = tpu.matmul %134, %5, %cst_59 {dimension_numbers = #tpu.dot_dimension_numbers<[1], [0], [0], [1], [0, 0, 1, 1], [], []>} : vector<2x80xf32>, vector<80x80xf32>, vector<2x80xf32> -> vector<2x80xf32>
    %146 = vector.broadcast %11 : vector<1x80xf32> to vector<2x80xf32>
    %147 = arith.addf %145, %146 : vector<2x80xf32>
    %148 = arith.index_cast %c3_i32 : i32 to index
    %c0_60 = arith.constant 0 : index
    %c0_61 = arith.constant 0 : index
    %149 = vector.load %arg1[%148, %c0_60, %c0_61] : memref<8x2x80xf32, #tpu.memory_space<vmem>>, vector<1x2x80xf32>
    %150 = vector.shape_cast %149 : vector<1x2x80xf32> to vector<2x80xf32>
    %151 = arith.addf %150, %141 : vector<2x80xf32>
    %152 = arith.negf %151 : vector<2x80xf32>
    %153 = math.exp %152 : vector<2x80xf32>
    %cst_62 = arith.constant 1.000000e+00 : f32
    %154 = vector.broadcast %cst_62 : f32 to vector<2x80xf32>
    %155 = arith.addf %154, %153 : vector<2x80xf32>
    %156 = arith.divf %154, %155 : vector<2x80xf32>
    %157 = arith.index_cast %c3_i32 : i32 to index
    %c0_63 = arith.constant 0 : index
    %c0_64 = arith.constant 0 : index
    %158 = vector.load %arg2[%157, %c0_63, %c0_64] : memref<8x2x80xf32, #tpu.memory_space<vmem>>, vector<1x2x80xf32>
    %159 = vector.shape_cast %158 : vector<1x2x80xf32> to vector<2x80xf32>
    %160 = arith.addf %159, %144 : vector<2x80xf32>
    %161 = arith.negf %160 : vector<2x80xf32>
    %162 = math.exp %161 : vector<2x80xf32>
    %cst_65 = arith.constant 1.000000e+00 : f32
    %163 = vector.broadcast %cst_65 : f32 to vector<2x80xf32>
    %164 = arith.addf %163, %162 : vector<2x80xf32>
    %165 = arith.divf %163, %164 : vector<2x80xf32>
    %166 = arith.index_cast %c3_i32 : i32 to index
    %c0_66 = arith.constant 0 : index
    %c0_67 = arith.constant 0 : index
    %167 = vector.load %arg3[%166, %c0_66, %c0_67] : memref<8x2x80xf32, #tpu.memory_space<vmem>>, vector<1x2x80xf32>
    %168 = vector.shape_cast %167 : vector<1x2x80xf32> to vector<2x80xf32>
    %169 = arith.mulf %156, %147 : vector<2x80xf32>
    %170 = arith.addf %168, %169 : vector<2x80xf32>
    %171 = math.tanh %170 : vector<2x80xf32>
    %cst_68 = arith.constant 1.000000e+00 : f32
    %172 = vector.broadcast %cst_68 : f32 to vector<2x80xf32>
    %173 = arith.subf %172, %165 : vector<2x80xf32>
    %174 = arith.mulf %173, %171 : vector<2x80xf32>
    %175 = arith.mulf %165, %134 : vector<2x80xf32>
    %176 = arith.addf %174, %175 : vector<2x80xf32>
    %177 = arith.index_cast %c3_i32 : i32 to index
    %c0_69 = arith.constant 0 : index
    %c0_70 = arith.constant 0 : index
    %178 = vector.load %arg6[%177, %c0_69, %c0_70] : memref<8x2x80xf32, #tpu.memory_space<vmem>>, vector<1x2x80xf32>
    %179 = vector.shape_cast %178 : vector<1x2x80xf32> to vector<2x80xf32>
    %180 = vector.shape_cast %176 : vector<2x80xf32> to vector<1x2x80xf32>
    tpu.vector_store %arg6[%177, %c0_69, %c0_70], %180 {strides = array<i32>} : memref<8x2x80xf32, #tpu.memory_space<vmem>>, vector<1x2x80xf32>,
    %c4_i32 = arith.constant 4 : i32
    %cst_71 = arith.constant dense<0.000000e+00> : vector<2x80xf32>
    %181 = tpu.matmul %176, %1, %cst_71 {dimension_numbers = #tpu.dot_dimension_numbers<[1], [0], [0], [1], [0, 0, 1, 1], [], []>} : vector<2x80xf32>, vector<80x80xf32>, vector<2x80xf32> -> vector<2x80xf32>
    %182 = vector.broadcast %7 : vector<1x80xf32> to vector<2x80xf32>
    %183 = arith.addf %181, %182 : vector<2x80xf32>
    %cst_72 = arith.constant dense<0.000000e+00> : vector<2x80xf32>
    %184 = tpu.matmul %176, %3, %cst_72 {dimension_numbers = #tpu.dot_dimension_numbers<[1], [0], [0], [1], [0, 0, 1, 1], [], []>} : vector<2x80xf32>, vector<80x80xf32>, vector<2x80xf32> -> vector<2x80xf32>
    %185 = vector.broadcast %9 : vector<1x80xf32> to vector<2x80xf32>
    %186 = arith.addf %184, %185 : vector<2x80xf32>
    %cst_73 = arith.constant dense<0.000000e+00> : vector<2x80xf32>
    %187 = tpu.matmul %176, %5, %cst_73 {dimension_numbers = #tpu.dot_dimension_numbers<[1], [0], [0], [1], [0, 0, 1, 1], [], []>} : vector<2x80xf32>, vector<80x80xf32>, vector<2x80xf32> -> vector<2x80xf32>
    %188 = vector.broadcast %11 : vector<1x80xf32> to vector<2x80xf32>
    %189 = arith.addf %187, %188 : vector<2x80xf32>
    %190 = arith.index_cast %c4_i32 : i32 to index
    %c0_74 = arith.constant 0 : index
    %c0_75 = arith.constant 0 : index
    %191 = vector.load %arg1[%190, %c0_74, %c0_75] : memref<8x2x80xf32, #tpu.memory_space<vmem>>, vector<1x2x80xf32>
    %192 = vector.shape_cast %191 : vector<1x2x80xf32> to vector<2x80xf32>
    %193 = arith.addf %192, %183 : vector<2x80xf32>
    %194 = arith.negf %193 : vector<2x80xf32>
    %195 = math.exp %194 : vector<2x80xf32>
    %cst_76 = arith.constant 1.000000e+00 : f32
    %196 = vector.broadcast %cst_76 : f32 to vector<2x80xf32>
    %197 = arith.addf %196, %195 : vector<2x80xf32>
    %198 = arith.divf %196, %197 : vector<2x80xf32>
    %199 = arith.index_cast %c4_i32 : i32 to index
    %c0_77 = arith.constant 0 : index
    %c0_78 = arith.constant 0 : index
    %200 = vector.load %arg2[%199, %c0_77, %c0_78] : memref<8x2x80xf32, #tpu.memory_space<vmem>>, vector<1x2x80xf32>
    %201 = vector.shape_cast %200 : vector<1x2x80xf32> to vector<2x80xf32>
    %202 = arith.addf %201, %186 : vector<2x80xf32>
    %203 = arith.negf %202 : vector<2x80xf32>
    %204 = math.exp %203 : vector<2x80xf32>
    %cst_79 = arith.constant 1.000000e+00 : f32
    %205 = vector.broadcast %cst_79 : f32 to vector<2x80xf32>
    %206 = arith.addf %205, %204 : vector<2x80xf32>
    %207 = arith.divf %205, %206 : vector<2x80xf32>
    %208 = arith.index_cast %c4_i32 : i32 to index
    %c0_80 = arith.constant 0 : index
    %c0_81 = arith.constant 0 : index
    %209 = vector.load %arg3[%208, %c0_80, %c0_81] : memref<8x2x80xf32, #tpu.memory_space<vmem>>, vector<1x2x80xf32>
    %210 = vector.shape_cast %209 : vector<1x2x80xf32> to vector<2x80xf32>
    %211 = arith.mulf %198, %189 : vector<2x80xf32>
    %212 = arith.addf %210, %211 : vector<2x80xf32>
    %213 = math.tanh %212 : vector<2x80xf32>
    %cst_82 = arith.constant 1.000000e+00 : f32
    %214 = vector.broadcast %cst_82 : f32 to vector<2x80xf32>
    %215 = arith.subf %214, %207 : vector<2x80xf32>
    %216 = arith.mulf %215, %213 : vector<2x80xf32>
    %217 = arith.mulf %207, %176 : vector<2x80xf32>
    %218 = arith.addf %216, %217 : vector<2x80xf32>
    %219 = arith.index_cast %c4_i32 : i32 to index
    %c0_83 = arith.constant 0 : index
    %c0_84 = arith.constant 0 : index
    %220 = vector.load %arg6[%219, %c0_83, %c0_84] : memref<8x2x80xf32, #tpu.memory_space<vmem>>, vector<1x2x80xf32>
    %221 = vector.shape_cast %220 : vector<1x2x80xf32> to vector<2x80xf32>
    %222 = vector.shape_cast %218 : vector<2x80xf32> to vector<1x2x80xf32>
    tpu.vector_store %arg6[%219, %c0_83, %c0_84], %222 {strides = array<i32>} : memref<8x2x80xf32, #tpu.memory_space<vmem>>, vector<1x2x80xf32>,
    %c5_i32 = arith.constant 5 : i32
    %cst_85 = arith.constant dense<0.000000e+00> : vector<2x80xf32>
    %223 = tpu.matmul %218, %1, %cst_85 {dimension_numbers = #tpu.dot_dimension_numbers<[1], [0], [0], [1], [0, 0, 1, 1], [], []>} : vector<2x80xf32>, vector<80x80xf32>, vector<2x80xf32> -> vector<2x80xf32>
    %224 = vector.broadcast %7 : vector<1x80xf32> to vector<2x80xf32>
    %225 = arith.addf %223, %224 : vector<2x80xf32>
    %cst_86 = arith.constant dense<0.000000e+00> : vector<2x80xf32>
    %226 = tpu.matmul %218, %3, %cst_86 {dimension_numbers = #tpu.dot_dimension_numbers<[1], [0], [0], [1], [0, 0, 1, 1], [], []>} : vector<2x80xf32>, vector<80x80xf32>, vector<2x80xf32> -> vector<2x80xf32>
    %227 = vector.broadcast %9 : vector<1x80xf32> to vector<2x80xf32>
    %228 = arith.addf %226, %227 : vector<2x80xf32>
    %cst_87 = arith.constant dense<0.000000e+00> : vector<2x80xf32>
    %229 = tpu.matmul %218, %5, %cst_87 {dimension_numbers = #tpu.dot_dimension_numbers<[1], [0], [0], [1], [0, 0, 1, 1], [], []>} : vector<2x80xf32>, vector<80x80xf32>, vector<2x80xf32> -> vector<2x80xf32>
    %230 = vector.broadcast %11 : vector<1x80xf32> to vector<2x80xf32>
    %231 = arith.addf %229, %230 : vector<2x80xf32>
    %232 = arith.index_cast %c5_i32 : i32 to index
    %c0_88 = arith.constant 0 : index
    %c0_89 = arith.constant 0 : index
    %233 = vector.load %arg1[%232, %c0_88, %c0_89] : memref<8x2x80xf32, #tpu.memory_space<vmem>>, vector<1x2x80xf32>
    %234 = vector.shape_cast %233 : vector<1x2x80xf32> to vector<2x80xf32>
    %235 = arith.addf %234, %225 : vector<2x80xf32>
    %236 = arith.negf %235 : vector<2x80xf32>
    %237 = math.exp %236 : vector<2x80xf32>
    %cst_90 = arith.constant 1.000000e+00 : f32
    %238 = vector.broadcast %cst_90 : f32 to vector<2x80xf32>
    %239 = arith.addf %238, %237 : vector<2x80xf32>
    %240 = arith.divf %238, %239 : vector<2x80xf32>
    %241 = arith.index_cast %c5_i32 : i32 to index
    %c0_91 = arith.constant 0 : index
    %c0_92 = arith.constant 0 : index
    %242 = vector.load %arg2[%241, %c0_91, %c0_92] : memref<8x2x80xf32, #tpu.memory_space<vmem>>, vector<1x2x80xf32>
    %243 = vector.shape_cast %242 : vector<1x2x80xf32> to vector<2x80xf32>
    %244 = arith.addf %243, %228 : vector<2x80xf32>
    %245 = arith.negf %244 : vector<2x80xf32>
    %246 = math.exp %245 : vector<2x80xf32>
    %cst_93 = arith.constant 1.000000e+00 : f32
    %247 = vector.broadcast %cst_93 : f32 to vector<2x80xf32>
    %248 = arith.addf %247, %246 : vector<2x80xf32>
    %249 = arith.divf %247, %248 : vector<2x80xf32>
    %250 = arith.index_cast %c5_i32 : i32 to index
    %c0_94 = arith.constant 0 : index
    %c0_95 = arith.constant 0 : index
    %251 = vector.load %arg3[%250, %c0_94, %c0_95] : memref<8x2x80xf32, #tpu.memory_space<vmem>>, vector<1x2x80xf32>
    %252 = vector.shape_cast %251 : vector<1x2x80xf32> to vector<2x80xf32>
    %253 = arith.mulf %240, %231 : vector<2x80xf32>
    %254 = arith.addf %252, %253 : vector<2x80xf32>
    %255 = math.tanh %254 : vector<2x80xf32>
    %cst_96 = arith.constant 1.000000e+00 : f32
    %256 = vector.broadcast %cst_96 : f32 to vector<2x80xf32>
    %257 = arith.subf %256, %249 : vector<2x80xf32>
    %258 = arith.mulf %257, %255 : vector<2x80xf32>
    %259 = arith.mulf %249, %218 : vector<2x80xf32>
    %260 = arith.addf %258, %259 : vector<2x80xf32>
    %261 = arith.index_cast %c5_i32 : i32 to index
    %c0_97 = arith.constant 0 : index
    %c0_98 = arith.constant 0 : index
    %262 = vector.load %arg6[%261, %c0_97, %c0_98] : memref<8x2x80xf32, #tpu.memory_space<vmem>>, vector<1x2x80xf32>
    %263 = vector.shape_cast %262 : vector<1x2x80xf32> to vector<2x80xf32>
    %264 = vector.shape_cast %260 : vector<2x80xf32> to vector<1x2x80xf32>
    tpu.vector_store %arg6[%261, %c0_97, %c0_98], %264 {strides = array<i32>} : memref<8x2x80xf32, #tpu.memory_space<vmem>>, vector<1x2x80xf32>,
    %c6_i32 = arith.constant 6 : i32
    %cst_99 = arith.constant dense<0.000000e+00> : vector<2x80xf32>
    %265 = tpu.matmul %260, %1, %cst_99 {dimension_numbers = #tpu.dot_dimension_numbers<[1], [0], [0], [1], [0, 0, 1, 1], [], []>} : vector<2x80xf32>, vector<80x80xf32>, vector<2x80xf32> -> vector<2x80xf32>
    %266 = vector.broadcast %7 : vector<1x80xf32> to vector<2x80xf32>
    %267 = arith.addf %265, %266 : vector<2x80xf32>
    %cst_100 = arith.constant dense<0.000000e+00> : vector<2x80xf32>
    %268 = tpu.matmul %260, %3, %cst_100 {dimension_numbers = #tpu.dot_dimension_numbers<[1], [0], [0], [1], [0, 0, 1, 1], [], []>} : vector<2x80xf32>, vector<80x80xf32>, vector<2x80xf32> -> vector<2x80xf32>
    %269 = vector.broadcast %9 : vector<1x80xf32> to vector<2x80xf32>
    %270 = arith.addf %268, %269 : vector<2x80xf32>
    %cst_101 = arith.constant dense<0.000000e+00> : vector<2x80xf32>
    %271 = tpu.matmul %260, %5, %cst_101 {dimension_numbers = #tpu.dot_dimension_numbers<[1], [0], [0], [1], [0, 0, 1, 1], [], []>} : vector<2x80xf32>, vector<80x80xf32>, vector<2x80xf32> -> vector<2x80xf32>
    %272 = vector.broadcast %11 : vector<1x80xf32> to vector<2x80xf32>
    %273 = arith.addf %271, %272 : vector<2x80xf32>
    %274 = arith.index_cast %c6_i32 : i32 to index
    %c0_102 = arith.constant 0 : index
    %c0_103 = arith.constant 0 : index
    %275 = vector.load %arg1[%274, %c0_102, %c0_103] : memref<8x2x80xf32, #tpu.memory_space<vmem>>, vector<1x2x80xf32>
    %276 = vector.shape_cast %275 : vector<1x2x80xf32> to vector<2x80xf32>
    %277 = arith.addf %276, %267 : vector<2x80xf32>
    %278 = arith.negf %277 : vector<2x80xf32>
    %279 = math.exp %278 : vector<2x80xf32>
    %cst_104 = arith.constant 1.000000e+00 : f32
    %280 = vector.broadcast %cst_104 : f32 to vector<2x80xf32>
    %281 = arith.addf %280, %279 : vector<2x80xf32>
    %282 = arith.divf %280, %281 : vector<2x80xf32>
    %283 = arith.index_cast %c6_i32 : i32 to index
    %c0_105 = arith.constant 0 : index
    %c0_106 = arith.constant 0 : index
    %284 = vector.load %arg2[%283, %c0_105, %c0_106] : memref<8x2x80xf32, #tpu.memory_space<vmem>>, vector<1x2x80xf32>
    %285 = vector.shape_cast %284 : vector<1x2x80xf32> to vector<2x80xf32>
    %286 = arith.addf %285, %270 : vector<2x80xf32>
    %287 = arith.negf %286 : vector<2x80xf32>
    %288 = math.exp %287 : vector<2x80xf32>
    %cst_107 = arith.constant 1.000000e+00 : f32
    %289 = vector.broadcast %cst_107 : f32 to vector<2x80xf32>
    %290 = arith.addf %289, %288 : vector<2x80xf32>
    %291 = arith.divf %289, %290 : vector<2x80xf32>
    %292 = arith.index_cast %c6_i32 : i32 to index
    %c0_108 = arith.constant 0 : index
    %c0_109 = arith.constant 0 : index
    %293 = vector.load %arg3[%292, %c0_108, %c0_109] : memref<8x2x80xf32, #tpu.memory_space<vmem>>, vector<1x2x80xf32>
    %294 = vector.shape_cast %293 : vector<1x2x80xf32> to vector<2x80xf32>
    %295 = arith.mulf %282, %273 : vector<2x80xf32>
    %296 = arith.addf %294, %295 : vector<2x80xf32>
    %297 = math.tanh %296 : vector<2x80xf32>
    %cst_110 = arith.constant 1.000000e+00 : f32
    %298 = vector.broadcast %cst_110 : f32 to vector<2x80xf32>
    %299 = arith.subf %298, %291 : vector<2x80xf32>
    %300 = arith.mulf %299, %297 : vector<2x80xf32>
    %301 = arith.mulf %291, %260 : vector<2x80xf32>
    %302 = arith.addf %300, %301 : vector<2x80xf32>
    %303 = arith.index_cast %c6_i32 : i32 to index
    %c0_111 = arith.constant 0 : index
    %c0_112 = arith.constant 0 : index
    %304 = vector.load %arg6[%303, %c0_111, %c0_112] : memref<8x2x80xf32, #tpu.memory_space<vmem>>, vector<1x2x80xf32>
    %305 = vector.shape_cast %304 : vector<1x2x80xf32> to vector<2x80xf32>
    %306 = vector.shape_cast %302 : vector<2x80xf32> to vector<1x2x80xf32>
    tpu.vector_store %arg6[%303, %c0_111, %c0_112], %306 {strides = array<i32>} : memref<8x2x80xf32, #tpu.memory_space<vmem>>, vector<1x2x80xf32>,
    %c7_i32 = arith.constant 7 : i32
    %cst_113 = arith.constant dense<0.000000e+00> : vector<2x80xf32>
    %307 = tpu.matmul %302, %1, %cst_113 {dimension_numbers = #tpu.dot_dimension_numbers<[1], [0], [0], [1], [0, 0, 1, 1], [], []>} : vector<2x80xf32>, vector<80x80xf32>, vector<2x80xf32> -> vector<2x80xf32>
    %308 = vector.broadcast %7 : vector<1x80xf32> to vector<2x80xf32>
    %309 = arith.addf %307, %308 : vector<2x80xf32>
    %cst_114 = arith.constant dense<0.000000e+00> : vector<2x80xf32>
    %310 = tpu.matmul %302, %3, %cst_114 {dimension_numbers = #tpu.dot_dimension_numbers<[1], [0], [0], [1], [0, 0, 1, 1], [], []>} : vector<2x80xf32>, vector<80x80xf32>, vector<2x80xf32> -> vector<2x80xf32>
    %311 = vector.broadcast %9 : vector<1x80xf32> to vector<2x80xf32>
    %312 = arith.addf %310, %311 : vector<2x80xf32>
    %cst_115 = arith.constant dense<0.000000e+00> : vector<2x80xf32>
    %313 = tpu.matmul %302, %5, %cst_115 {dimension_numbers = #tpu.dot_dimension_numbers<[1], [0], [0], [1], [0, 0, 1, 1], [], []>} : vector<2x80xf32>, vector<80x80xf32>, vector<2x80xf32> -> vector<2x80xf32>
    %314 = vector.broadcast %11 : vector<1x80xf32> to vector<2x80xf32>
    %315 = arith.addf %313, %314 : vector<2x80xf32>
    %316 = arith.index_cast %c7_i32 : i32 to index
    %c0_116 = arith.constant 0 : index
    %c0_117 = arith.constant 0 : index
    %317 = vector.load %arg1[%316, %c0_116, %c0_117] : memref<8x2x80xf32, #tpu.memory_space<vmem>>, vector<1x2x80xf32>
    %318 = vector.shape_cast %317 : vector<1x2x80xf32> to vector<2x80xf32>
    %319 = arith.addf %318, %309 : vector<2x80xf32>
    %320 = arith.negf %319 : vector<2x80xf32>
    %321 = math.exp %320 : vector<2x80xf32>
    %cst_118 = arith.constant 1.000000e+00 : f32
    %322 = vector.broadcast %cst_118 : f32 to vector<2x80xf32>
    %323 = arith.addf %322, %321 : vector<2x80xf32>
    %324 = arith.divf %322, %323 : vector<2x80xf32>
    %325 = arith.index_cast %c7_i32 : i32 to index
    %c0_119 = arith.constant 0 : index
    %c0_120 = arith.constant 0 : index
    %326 = vector.load %arg2[%325, %c0_119, %c0_120] : memref<8x2x80xf32, #tpu.memory_space<vmem>>, vector<1x2x80xf32>
    %327 = vector.shape_cast %326 : vector<1x2x80xf32> to vector<2x80xf32>
    %328 = arith.addf %327, %312 : vector<2x80xf32>
    %329 = arith.negf %328 : vector<2x80xf32>
    %330 = math.exp %329 : vector<2x80xf32>
    %cst_121 = arith.constant 1.000000e+00 : f32
    %331 = vector.broadcast %cst_121 : f32 to vector<2x80xf32>
    %332 = arith.addf %331, %330 : vector<2x80xf32>
    %333 = arith.divf %331, %332 : vector<2x80xf32>
    %334 = arith.index_cast %c7_i32 : i32 to index
    %c0_122 = arith.constant 0 : index
    %c0_123 = arith.constant 0 : index
    %335 = vector.load %arg3[%334, %c0_122, %c0_123] : memref<8x2x80xf32, #tpu.memory_space<vmem>>, vector<1x2x80xf32>
    %336 = vector.shape_cast %335 : vector<1x2x80xf32> to vector<2x80xf32>
    %337 = arith.mulf %324, %315 : vector<2x80xf32>
    %338 = arith.addf %336, %337 : vector<2x80xf32>
    %339 = math.tanh %338 : vector<2x80xf32>
    %cst_124 = arith.constant 1.000000e+00 : f32
    %340 = vector.broadcast %cst_124 : f32 to vector<2x80xf32>
    %341 = arith.subf %340, %333 : vector<2x80xf32>
    %342 = arith.mulf %341, %339 : vector<2x80xf32>
    %343 = arith.mulf %333, %302 : vector<2x80xf32>
    %344 = arith.addf %342, %343 : vector<2x80xf32>
    %345 = arith.index_cast %c7_i32 : i32 to index
    %c0_125 = arith.constant 0 : index
    %c0_126 = arith.constant 0 : index
    %346 = vector.load %arg6[%345, %c0_125, %c0_126] : memref<8x2x80xf32, #tpu.memory_space<vmem>>, vector<1x2x80xf32>
    %347 = vector.shape_cast %346 : vector<1x2x80xf32> to vector<2x80xf32>
    %348 = vector.shape_cast %344 : vector<2x80xf32> to vector<1x2x80xf32>
    tpu.vector_store %arg6[%345, %c0_125, %c0_126], %348 {strides = array<i32>} : memref<8x2x80xf32, #tpu.memory_space<vmem>>, vector<1x2x80xf32>,
    %c8_i32 = arith.constant 8 : i32
    return
  }
  func.func @transform_0(%arg0: i32) -> (i32, i32, i32) {
    %c0_i32 = arith.constant 0 : i32
    %c0_i32_0 = arith.constant 0 : i32
    %c0_i32_1 = arith.constant 0 : i32
    %c0_i32_2 = arith.constant 0 : i32
    return %c0_i32, %c0_i32_0, %c0_i32_1 : i32, i32, i32
  }
  func.func @transform_1(%arg0: i32) -> (i32, i32, i32) {
    %c0_i32 = arith.constant 0 : i32
    %c0_i32_0 = arith.constant 0 : i32
    %c0_i32_1 = arith.constant 0 : i32
    %c0_i32_2 = arith.constant 0 : i32
    return %c0_i32, %c0_i32_0, %c0_i32_1 : i32, i32, i32
  }
  func.func @transform_2(%arg0: i32) -> (i32, i32, i32) {
    %c0_i32 = arith.constant 0 : i32
    %c0_i32_0 = arith.constant 0 : i32
    %c0_i32_1 = arith.constant 0 : i32
    %c0_i32_2 = arith.constant 0 : i32
    return %c0_i32, %c0_i32_0, %c0_i32_1 : i32, i32, i32
  }
  func.func @transform_3(%arg0: i32) -> (i32, i32, i32) {
    %c0_i32 = arith.constant 0 : i32
    %c0_i32_0 = arith.constant 0 : i32
    %c0_i32_1 = arith.constant 0 : i32
    %c0_i32_2 = arith.constant 0 : i32
    return %c0_i32, %c0_i32_0, %c0_i32_1 : i32, i32, i32
  }
  func.func @transform_4(%arg0: i32) -> (i32, i32, i32) {
    %c0_i32 = arith.constant 0 : i32
    %c0_i32_0 = arith.constant 0 : i32
    %c0_i32_1 = arith.constant 0 : i32
    %c0_i32_2 = arith.constant 0 : i32
    return %c0_i32, %c0_i32_0, %c0_i32_1 : i32, i32, i32
  }
  func.func @transform_5(%arg0: i32) -> (i32, i32, i32) {
    %c0_i32 = arith.constant 0 : i32
    %c0_i32_0 = arith.constant 0 : i32
    %c0_i32_1 = arith.constant 0 : i32
    %c0_i32_2 = arith.constant 0 : i32
    return %c0_i32, %c0_i32_0, %c0_i32_1 : i32, i32, i32
  }
}

module attributes {stable_mosaic.version = 11 : i64} {
  func.func @_bmm_nt_kernel(%arg0: i32, %arg1: memref<2x8x40xf32, #tpu.memory_space<vmem>>, %arg2: memref<2x32x40xf32, #tpu.memory_space<vmem>>, %arg3: memref<2x8x32xf32, #tpu.memory_space<vmem>>) attributes {dimension_semantics = [#tpu.dimension_semantics<arbitrary>], iteration_bounds = array<i64: 1>, scalar_prefetch = 0 : i64, scratch_operands = 0 : i64, tpu.core_type = #tpu.core_type<tc>, window_params = [{pipeline_mode = #tpu.pipeline_mode<synchronous>, transform_indices = @transform_0, window_bounds = array<i64: 2, 8, 40>}, {pipeline_mode = #tpu.pipeline_mode<synchronous>, transform_indices = @transform_1, window_bounds = array<i64: 2, 32, 40>}, {pipeline_mode = #tpu.pipeline_mode<synchronous>, transform_indices = @transform_2, window_bounds = array<i64: 2, 8, 32>}]} {
    %c0 = arith.constant 0 : index
    %c0_0 = arith.constant 0 : index
    %c0_1 = arith.constant 0 : index
    %0 = vector.load %arg1[%c0, %c0_0, %c0_1] : memref<2x8x40xf32, #tpu.memory_space<vmem>>, vector<1x8x40xf32>
    %1 = vector.shape_cast %0 : vector<1x8x40xf32> to vector<8x40xf32>
    %c0_2 = arith.constant 0 : index
    %c0_3 = arith.constant 0 : index
    %c0_4 = arith.constant 0 : index
    %2 = vector.load %arg2[%c0_2, %c0_3, %c0_4] : memref<2x32x40xf32, #tpu.memory_space<vmem>>, vector<1x32x40xf32>
    %3 = vector.shape_cast %2 : vector<1x32x40xf32> to vector<32x40xf32>
    %cst = arith.constant dense<0.000000e+00> : vector<8x32xf32>
    %4 = tpu.matmul %1, %3, %cst {dimension_numbers = #tpu.dot_dimension_numbers<[1], [1], [0], [0], [0, 0, 1, 0], [], []>} : vector<8x40xf32>, vector<32x40xf32>, vector<8x32xf32> -> vector<8x32xf32>
    %c0_5 = arith.constant 0 : index
    %c0_6 = arith.constant 0 : index
    %c0_7 = arith.constant 0 : index
    %5 = vector.load %arg3[%c0_5, %c0_6, %c0_7] : memref<2x8x32xf32, #tpu.memory_space<vmem>>, vector<1x8x32xf32>
    %6 = vector.shape_cast %5 : vector<1x8x32xf32> to vector<8x32xf32>
    %7 = vector.shape_cast %4 : vector<8x32xf32> to vector<1x8x32xf32>
    tpu.vector_store %arg3[%c0_5, %c0_6, %c0_7], %7 {strides = array<i32>} : memref<2x8x32xf32, #tpu.memory_space<vmem>>, vector<1x8x32xf32>,
    %c1 = arith.constant 1 : index
    %c0_8 = arith.constant 0 : index
    %c0_9 = arith.constant 0 : index
    %8 = vector.load %arg1[%c1, %c0_8, %c0_9] : memref<2x8x40xf32, #tpu.memory_space<vmem>>, vector<1x8x40xf32>
    %9 = vector.shape_cast %8 : vector<1x8x40xf32> to vector<8x40xf32>
    %c1_10 = arith.constant 1 : index
    %c0_11 = arith.constant 0 : index
    %c0_12 = arith.constant 0 : index
    %10 = vector.load %arg2[%c1_10, %c0_11, %c0_12] : memref<2x32x40xf32, #tpu.memory_space<vmem>>, vector<1x32x40xf32>
    %11 = vector.shape_cast %10 : vector<1x32x40xf32> to vector<32x40xf32>
    %cst_13 = arith.constant dense<0.000000e+00> : vector<8x32xf32>
    %12 = tpu.matmul %9, %11, %cst_13 {dimension_numbers = #tpu.dot_dimension_numbers<[1], [1], [0], [0], [0, 0, 1, 0], [], []>} : vector<8x40xf32>, vector<32x40xf32>, vector<8x32xf32> -> vector<8x32xf32>
    %c1_14 = arith.constant 1 : index
    %c0_15 = arith.constant 0 : index
    %c0_16 = arith.constant 0 : index
    %13 = vector.load %arg3[%c1_14, %c0_15, %c0_16] : memref<2x8x32xf32, #tpu.memory_space<vmem>>, vector<1x8x32xf32>
    %14 = vector.shape_cast %13 : vector<1x8x32xf32> to vector<8x32xf32>
    %15 = vector.shape_cast %12 : vector<8x32xf32> to vector<1x8x32xf32>
    tpu.vector_store %arg3[%c1_14, %c0_15, %c0_16], %15 {strides = array<i32>} : memref<2x8x32xf32, #tpu.memory_space<vmem>>, vector<1x8x32xf32>,
    return
  }
  func.func @transform_0(%arg0: i32) -> (i32, i32, i32) {
    %c0_i32 = arith.constant 0 : i32
    %c0_i32_0 = arith.constant 0 : i32
    %c0_i32_1 = arith.constant 0 : i32
    %c0_i32_2 = arith.constant 0 : i32
    return %c0_i32, %c0_i32_0, %c0_i32_1 : i32, i32, i32
  }
  func.func @transform_1(%arg0: i32) -> (i32, i32, i32) {
    %c0_i32 = arith.constant 0 : i32
    %c0_i32_0 = arith.constant 0 : i32
    %c0_i32_1 = arith.constant 0 : i32
    %c0_i32_2 = arith.constant 0 : i32
    return %c0_i32, %c0_i32_0, %c0_i32_1 : i32, i32, i32
  }
  func.func @transform_2(%arg0: i32) -> (i32, i32, i32) {
    %c0_i32 = arith.constant 0 : i32
    %c0_i32_0 = arith.constant 0 : i32
    %c0_i32_1 = arith.constant 0 : i32
    %c0_i32_2 = arith.constant 0 : i32
    return %c0_i32, %c0_i32_0, %c0_i32_1 : i32, i32, i32
  }
}

</mosaic_0001>

<bundles_post_ra>
// kernel: cmla_forward.11
= control target key start
LH: loop header
LB: loop body
LE: loop exit
PB: predicated region body
PF: predicated region fallthrough
CT: control target
= control target key end

     0   :  { %9 = vsyncpa [#allocation3], 0  ;;  %s638_s0 = inlined_call_operand.vmem [shape: f32[2,8,100], index: 0, kind: input, shape index: {}]   ;;  %s639_s1 = inlined_call_operand.vmem [shape: f32[2,100,80], index: 1, kind: input, shape index: {}]   ;;  %s640_s2 = inlined_call_operand.hbm [shape: f32[3,80,80], index: 2, kind: input, shape index: {}]   ;;  %s641_s3 = inlined_call_operand.hbm [shape: f32[3,1,80], index: 3, kind: input, shape index: {}]   ;;  %s642_s4 = inlined_call_operand.vmem [shape: f32[2,3,8,80], index: 4, kind: output, shape index: {}]  }
   0x1   :  { %s19_s17 = sshll.u32 %s640_s2, 4  ;;  %s20_s17 = int_to_ptr.hbm [resolvable:$true] %s19_s17 }
   0x2   :  { %10 = vsyncpa [#allocation5], 0  ;;  %s419_s18 = smov [#allocation2]   ;;  %s32_s22 = sshll.u32 %s641_s3, 4  ;;  %s33_s22 = int_to_ptr.hbm [resolvable:$true] %s32_s22 }
   0x3   :  { %s21_s19 = sshll.u32 %s419_s18, 4  ;;  %s420_s23 = smov 128   ;;  %s22_s19 = int_to_ptr.vmem [resolvable:$true] %s21_s19 }
   0x4   :  { %s421_s24 = smov 8   ;;  %s422_s25 = smov [#allocation4]  }
   0x5   :  { %27 = dma.hbm_to_vmem [thread:$0]  %s20_s17, 3840, %s22_s19, [#allocation3], %s420_s23, %s420_s23, %s421_s24  }
   0x6   :  { %s34_s26 = sshll.u32 %s422_s25, 4  ;;  %s423_s27 = smov 16   ;;  %s35_s26 = int_to_ptr.vmem [resolvable:$true] %s34_s26 }
   0x7   :  { %s424_s28 = smov 1  }
   0x8   :  { %40 = dma.hbm_to_vmem [thread:$0]  %s33_s22, 48, %s35_s26, [#allocation5], %s423_s27, %s423_s27, %s424_s28  }
   0x9   :  { %415 = dma.done.wait [#allocation3], 3840  }
   0xa   :  { %416 = vsyncadd [#allocation3], 4294963456 }
   0xb   :  { %417 = dma.done.wait [#allocation5], 48  }
   0xc   :  { %418 = vsyncadd [#allocation5], 4294967248  ;;  %vm104_vm0 = vcmask 1043456   ;;  %v99_v0 = vld [vmem:[%s639_s1 + $0x60] sm:$0xf]  ;;  %v98_v1 = vld [vmem:[%s639_s1 + $0x58] sm:$0xff] }
   0xd   :  { %325 = vmatpush.msk.msra.mxu0 %vm104_vm0, %v99_v0  ;;  %v97_v2 = vld [vmem:[%s639_s1 + $0x50] sm:$0xff]  ;;  %v96_v3 = vld [vmem:[%s639_s1 + $0x48] sm:$0xff]  ;;  %v472_v5 = vld [vmem:[#allocation2 + $0x40] sm:$0xff]  ;;  %vm100_vm1 = vcmask 818176   ;;  %vm132_vm2 = vcmask 654336  }
   0xe   :  { %v469_v4 = vld [vmem:[#allocation2 + $0x48] sm:$0xff]  ;;  %v95_v6 = vld [vmem:[%s639_s1 + $0x40] sm:$0xff]  ;;  %v477_v7 = vld [vmem:[#allocation2 + $0x38] sm:$0xff] }
   0xf   :  { %112 = vmatpush.msra.mxu0 %v98_v1  ;;  %142 = vmatpush.msra.mxu1 %v469_v4  ;;  %v94_v8 = vld [vmem:[%s639_s1 + $0x38] sm:$0xff]  ;;  %v485_v10 = vld [vmem:[#allocation2 + $0x30] sm:$0xff]  ;;  %v80_v11 = vld [vmem:[#allocation2 + $0xe8] sm:$0xff] }
  0x10   :  { %v483_v9 = vld [vmem:[#allocation2 + $0x98] sm:$0xff]  ;;  %v488_v12 = vld [vmem:[#allocation2 + $0x90] sm:$0xff]  ;;  %v79_v13 = vld [vmem:[#allocation2 + $0xe0] sm:$0xff]  ;;  %191 = vmatpush.msra.mxu3 %v80_v11 }
  0x11   :  { %113 = vmatpush.msra.mxu0 %v97_v2  ;;  %143 = vmatpush.msra.mxu1 %v472_v5  ;;  %v491_v14 = vld [vmem:[#allocation2 + $0x88] sm:$0xff]  ;;  %v93_v15 = vld [vmem:[%s639_s1 + $0x30] sm:$0xff]  ;;  %v78_v17 = vld [vmem:[#allocation2 + $0xd8] sm:$0xff] }
  0x12   :  { %166 = vmatpush.msra.mxu2 %v483_v9  ;;  %v496_v16 = vld [vmem:[#allocation2 + $0x28] sm:$0xff]  ;;  %v500_v18 = vld [vmem:[#allocation2 + $0x80] sm:$0xff]  ;;  %192 = vmatpush.msra.mxu3 %v79_v13  ;;  %v77_v22 = vld [vmem:[#allocation2 + $0xd0] sm:$0xff] }
  0x13   :  { %114 = vmatpush.msra.mxu0 %v96_v3  ;;  %144 = vmatpush.msra.mxu1 %v477_v7  ;;  %v92_v19 = vld [vmem:[%s639_s1 + $0x28] sm:$0xff]  ;;  %v91_v20 = vld [vmem:[%s639_s1 + $0x20] sm:$0xff]  ;;  %v512_v23 = vld [vmem:[#allocation2 + $0x78] sm:$0xff] }
  0x14   :  { %167 = vmatpush.msra.mxu2 %v488_v12  ;;  %v508_v21 = vld [vmem:[#allocation2 + $0x20] sm:$0xff]  ;;  %v514_v24 = vld [vmem:[#allocation2 + $0x18] sm:$0xff]  ;;  %193 = vmatpush.msra.mxu3 %v78_v17  ;;  %v76_v25 = vld [vmem:[#allocation2 + $0xc8] sm:$0xff] }
  0x15   :  { %115 = vmatpush.msra.mxu0 %v95_v6  ;;  %145 = vmatpush.msra.mxu1 %v485_v10  ;;  %v518_v26 = vld [vmem:[#allocation2 + $0x70] sm:$0xff]  ;;  %v90_v27 = vld [vmem:[%s639_s1 + $0x18] sm:$0xff]  ;;  %v75_v29 = vld [vmem:[#allocation2 + $0xc0] sm:$0xff] }
  0x16   :  { %168 = vmatpush.msra.mxu2 %v491_v14  ;;  %v523_v28 = vld [vmem:[#allocation2 + $0x10] sm:$0xff]  ;;  %194 = vmatpush.msra.mxu3 %v77_v22  ;;  %v530_v31 = vld [vmem:[#allocation2 + $0x8] sm:$0xff]  ;;  %v537_v33 = vld [vmem:[#allocation2] sm:$0xff] }
  0x17   :  { %116 = vmatpush.msra.mxu0 %v94_v8  ;;  %146 = vmatpush.msra.mxu1 %v496_v16  ;;  %v89_v30 = vld [vmem:[%s639_s1 + $0x10] sm:$0xff]  ;;  %v88_v32 = vld [vmem:[%s639_s1 + $0x8] sm:$0xff]  ;;  %v87_v35 = vld [vmem:[%s639_s1] sm:$0xff] }
  0x18   :  { %169 = vmatpush.msra.mxu2 %v500_v18  ;;  %195 = vmatpush.msra.mxu3 %v76_v25  ;;  %v345_v34 = vld [vmem:[%s639_s1 + $0xc8] sm:$0xf]  ;;  %v86_v36 = vld [vmem:[%s638_s0] sm:$0xff]  ;;  %v343_v38 = vld [vmem:[%s639_s1 + $0xb8] sm:$0xff] }
  0x19   :  { %117 = vmatpush.msra.mxu0 %v93_v15  ;;  %147 = vmatpush.msra.mxu1 %v508_v21  ;;  %v344_v37 = vld [vmem:[%s639_s1 + $0xc0] sm:$0xff]  ;;  %v342_v39 = vld [vmem:[%s639_s1 + $0xb0] sm:$0xff]  ;;  %v341_v40 = vld [vmem:[%s639_s1 + $0xa8] sm:$0xff] }
  0x1a   :  { %170 = vmatpush.msra.mxu2 %v512_v23  ;;  %196 = vmatpush.msra.mxu3 %v75_v29  ;;  %v63_v41 = vld [vmem:[#allocation2 + $0x68] sm:$0xff]  ;;  %v74_v42 = vld [vmem:[#allocation2 + $0xb8] sm:$0xff]  ;;  %v340_v43 = vld [vmem:[%s639_s1 + $0xa0] sm:$0xff] }
  0x1b   :  { %118 = vmatpush.msra.mxu0 %v92_v19  ;;  %148 = vmatpush.msra.mxu1 %v514_v24  ;;  %v62_v44 = vld [vmem:[#allocation2 + $0x60] sm:$0xff]  ;;  %v73_v45 = vld [vmem:[#allocation2 + $0xb0] sm:$0xff]  ;;  %v339_v46 = vld [vmem:[%s639_s1 + $0x98] sm:$0xff] }
  0x1c   :  { %171 = vmatpush.msra.mxu2 %v518_v26  ;;  %197 = vmatpush.msra.mxu3 %v74_v42  ;;  %v61_v47 = vld [vmem:[#allocation2 + $0x58] sm:$0xff]  ;;  %v72_v48 = vld [vmem:[#allocation2 + $0xa8] sm:$0xff]  ;;  %v338_v49 = vld [vmem:[%s639_s1 + $0x90] sm:$0xff] }
  0x1d   :  { %119 = vmatpush.msra.mxu0 %v91_v20  ;;  %149 = vmatpush.msra.mxu1 %v523_v28  ;;  %v60_v50 = vld [vmem:[#allocation2 + $0x50] sm:$0xff]  ;;  %v71_v51 = vld [vmem:[#allocation2 + $0xa0] sm:$0xff]  ;;  %v337_v52 = vld [vmem:[%s639_s1 + $0x88] sm:$0xff] }
  0x1e   :  { %172 = vmatpush.msra.mxu2 %v63_v41  ;;  %198 = vmatpush.msra.mxu3 %v73_v45  ;;  %v336_v53 = vld [vmem:[%s639_s1 + $0x80] sm:$0xff]  ;;  %v335_v54 = vld [vmem:[%s639_s1 + $0x78] sm:$0xff]  ;;  %v334_v55 = vld [vmem:[%s639_s1 + $0x70] sm:$0xff] }
  0x1f   :  { %120 = vmatpush.msra.mxu0 %v90_v27  ;;  %150 = vmatpush.msra.mxu1 %v530_v31  ;;  %v333_v56 = vld [vmem:[%s639_s1 + $0x68] sm:$0xff]  ;;  %v360_v60 = vld [vmem:[#allocation4] ss:$0 sm:$0xff]  ;;  %v361_v63 = vld [vmem:[#allocation4 + $0x1] ss:$0 sm:$0xff] }
  0x20   :  { %173 = vmatpush.msra.mxu2 %v62_v44  ;;  %199 = vmatpush.msra.mxu3 %v72_v48  ;;  %v332_v59 = vld [vmem:[%s638_s0 + $0x8] sm:$0xff]  ;;  %v362_v0 = vld [vmem:[#allocation4 + $0x2] ss:$0 sm:$0xff] }
  0x21   :  { %121 = vmatpush.msra.mxu0 %v89_v30  ;;  %151 = vmatpush.msra.mxu1 %v537_v33 }
  0x22   :  { %174 = vmatpush.msra.mxu2 %v61_v47  ;;  %200 = vmatpush.msra.mxu3 %v71_v51 }
  0x23   :  { %122 = vmatpush.msra.mxu0 %v88_v32  ;;  %346 = vmatpush.msk.msrb.mxu1 %vm104_vm0, %v345_v34 }
  0x24   :  { %175 = vmatpush.msra.mxu2 %v60_v50  ;;  %281 = vmatpush.msrb.mxu3 %v483_v9 }
  0x25   :  { %123 = vmatpush.msra.mxu0 %v87_v35  ;;  %233 = vmatpush.msrb.mxu1 %v344_v37 }
  0x26   :  { %326 = vmatmul.msk.f32.vlgmr.msra.gmra.mxu0 %vm100_vm1, %v86_v36  ;;  %259 = vmatpush.msrb.mxu2 %v469_v4 }
  0x27   :  { %303 = vmatpush.msrb.mxu0 %v80_v11  ;;  %234 = vmatpush.msrb.mxu1 %v343_v38 }
  0x28   :  { %260 = vmatpush.msrb.mxu2 %v472_v5  ;;  %282 = vmatpush.msrb.mxu3 %v488_v12 }
  0x29   :  { %304 = vmatpush.msrb.mxu0 %v79_v13  ;;  %235 = vmatpush.msrb.mxu1 %v342_v39 }
  0x2a   :  { %261 = vmatpush.msrb.mxu2 %v477_v7  ;;  %283 = vmatpush.msrb.mxu3 %v491_v14 }
  0x2b   :  { %305 = vmatpush.msrb.mxu0 %v78_v17  ;;  %236 = vmatpush.msrb.mxu1 %v341_v40 }
  0x2c   :  { %262 = vmatpush.msrb.mxu2 %v485_v10  ;;  %284 = vmatpush.msrb.mxu3 %v500_v18 }
  0x2d   :  { %306 = vmatpush.msrb.mxu0 %v77_v22  ;;  %237 = vmatpush.msrb.mxu1 %v340_v43 }
  0x2e   :  { %263 = vmatpush.msrb.mxu2 %v496_v16  ;;  %285 = vmatpush.msrb.mxu3 %v512_v23 }
  0x2f   :  { %307 = vmatpush.msrb.mxu0 %v76_v25  ;;  %238 = vmatpush.msrb.mxu1 %v339_v46 }
  0x30   :  { %264 = vmatpush.msrb.mxu2 %v508_v21  ;;  %286 = vmatpush.msrb.mxu3 %v518_v26 }
  0x31   :  { %308 = vmatpush.msrb.mxu0 %v75_v29  ;;  %239 = vmatpush.msrb.mxu1 %v338_v49 }
  0x32   :  { %265 = vmatpush.msrb.mxu2 %v514_v24  ;;  %287 = vmatpush.msrb.mxu3 %v63_v41 }
  0x33   :  { %309 = vmatpush.msrb.mxu0 %v74_v42  ;;  %240 = vmatpush.msrb.mxu1 %v337_v52 }
  0x34   :  { %266 = vmatpush.msrb.mxu2 %v523_v28  ;;  %288 = vmatpush.msrb.mxu3 %v62_v44 }
  0x35   :  { %310 = vmatpush.msrb.mxu0 %v73_v45  ;;  %241 = vmatpush.msrb.mxu1 %v336_v53 }
  0x36   :  { %267 = vmatpush.msrb.mxu2 %v530_v31  ;;  %289 = vmatpush.msrb.mxu3 %v61_v47 }
  0x37   :  { %311 = vmatpush.msrb.mxu0 %v72_v48  ;;  %242 = vmatpush.msrb.mxu1 %v335_v54 }
  0x38   :  { %268 = vmatpush.msrb.mxu2 %v537_v33  ;;  %290 = vmatpush.msrb.mxu3 %v60_v50 }
  0x39   :  { %312 = vmatpush.msrb.mxu0 %v71_v51  ;;  %243 = vmatpush.msrb.mxu1 %v334_v55 }
  0x3b   :  { %244 = vmatpush.msrb.mxu1 %v333_v56 }
  0xa3   :  { %v125_v57 = vpop.f32.mrf.mxu0 }
  0xa4   :  { %363 = vtanh.f32 %v125_v57 }
  0xaa   :  { %v364_v58 = vpop.eup %363 }
  0xab   :  { %327 = vmatmul.msk.f32.vlgmr.msra.gmra.mxu1 %vm132_vm2, %v364_v58  ;;  %328 = vmatmul.msk.f32.vlgmr.msra.gmra.mxu2 %vm132_vm2, %v364_v58 }
  0xac   :  { %330 = vmatmul.msk.f32.vlgmr.msra.gmra.mxu3 %vm132_vm2, %v364_v58 }
  0xb3   :  { %347 = vmatmul.msk.f32.vlgmr.msrb.gmra.mxu1 %vm100_vm1, %v332_v59 }
 0x128   :  { %v153_v61 = vpop.f32.mrf.mxu1 }
 0x129   :  { %v154_v62 = vadd.f32 %v360_v60, %v153_v61 }
 0x12b   :  { %156 = vst.msk [vmem:[%s642_s4] sm:$0xff] %vm132_vm2, %v154_v62 }
 0x12e   :  { %v177_v1 = vpop.f32.mrf.mxu2 }
 0x12f   :  { %v178_v2 = vadd.f32 %v361_v63, %v177_v1  ;;  %v202_v3 = vpop.f32.mrf.mxu3 }
 0x130   :  { %v203_v4 = vadd.f32 %v362_v0, %v202_v3  ;;  %v246_v5 = vpop.f32.mrf.mxu1 }
 0x131   :  { %329 = vst.msk [vmem:[%s642_s4 + $0x8] sm:$0xff] %vm132_vm2, %v178_v2  ;;  %365 = vtanh.f32 %v246_v5 }
 0x132   :  { %331 = vst.msk [vmem:[%s642_s4 + $0x10] sm:$0xff] %vm132_vm2, %v203_v4 }
 0x137   :  { %v366_v6 = vpop.eup %365 }
 0x138   :  { %348 = vmatmul.msk.f32.vlgmr.msrb.gmra.mxu2 %vm132_vm2, %v366_v6  ;;  %350 = vmatmul.msk.f32.vlgmr.msrb.gmra.mxu3 %vm132_vm2, %v366_v6 }
 0x139   :  { %352 = vmatmul.msk.f32.vlgmr.msrb.gmra.mxu0 %vm132_vm2, %v366_v6 }
 0x1b6   :  { %v314_v7 = vpop.f32.mrf.mxu0 }
 0x1b7   :  { %v315_v8 = vadd.f32 %v362_v0, %v314_v7 }
 0x1b9   :  { %353 = vst.msk [vmem:[%s642_s4 + $0x28] sm:$0xff] %vm132_vm2, %v315_v8 }
 0x1bb   :  { %v270_v9 = vpop.f32.mrf.mxu2  ;;  %v292_v10 = vpop.f32.mrf.mxu3 }
 0x1bc   :  { %v271_v11 = vadd.f32 %v360_v60, %v270_v9  ;;  %v293_v12 = vadd.f32 %v361_v63, %v292_v10 }
 0x1be   :  { %349 = vst.msk [vmem:[%s642_s4 + $0x18] sm:$0xff] %vm132_vm2, %v271_v11 }
 0x1bf   :  { %351 = vst.msk [vmem:[%s642_s4 + $0x20] sm:$0xff] %vm132_vm2, %v293_v12 }
 0x1c0   :  { %323 = vsyncpa [#allocation3], 1 }
 0x1c1   :  { %324 = vsyncpa [#allocation5], 1 }

// kernel: cmla_forward.9
= control target key start
LH: loop header
LB: loop body
LE: loop exit
PB: predicated region body
PF: predicated region fallthrough
CT: control target
= control target key end

     0   :  { %10 = vsyncpa [#allocation3], 0  ;;  %s1969_s0 = inlined_call_operand.vmem [shape: f32[8,2,100], index: 0, kind: input, shape index: {}]   ;;  %s1970_s1 = inlined_call_operand.vmem [shape: f32[8,2,100], index: 1, kind: input, shape index: {}]   ;;  %s1971_s2 = inlined_call_operand.vmem [shape: f32[8,2,100], index: 2, kind: input, shape index: {}]   ;;  %s1972_s3 = inlined_call_operand.hbm [shape: f32[3,100,100], index: 3, kind: input, shape index: {}]   ;;  %s1973_s4 = inlined_call_operand.hbm [shape: f32[3,1,100], index: 4, kind: input, shape index: {}]   ;;  %s1974_s5 = inlined_call_operand.vmem [shape: f32[8,2,100], index: 5, kind: output, shape index: {}]  }
   0x1   :  { %s22_s20 = sshll.u32 %s1972_s3, 4  ;;  %s23_s20 = int_to_ptr.hbm [resolvable:$true] %s22_s20 }
   0x2   :  { %11 = vsyncpa [#allocation5], 0  ;;  %s1338_s21 = smov [#allocation2]   ;;  %s35_s25 = sshll.u32 %s1973_s4, 4  ;;  %s36_s25 = int_to_ptr.hbm [resolvable:$true] %s35_s25 }
   0x3   :  { %s24_s22 = sshll.u32 %s1338_s21, 4  ;;  %s1339_s26 = smov 128   ;;  %s25_s22 = int_to_ptr.vmem [resolvable:$true] %s24_s22 }
   0x4   :  { %s1340_s27 = smov 8   ;;  %s1341_s28 = smov [#allocation4]  }
   0x5   :  { %30 = dma.hbm_to_vmem [thread:$0]  %s23_s20, 4992, %s25_s22, [#allocation3], %s1339_s26, %s1339_s26, %s1340_s27  }
   0x6   :  { %s37_s29 = sshll.u32 %s1341_s28, 4  ;;  %s1342_s30 = smov 16   ;;  %s38_s29 = int_to_ptr.vmem [resolvable:$true] %s37_s29 }
   0x7   :  { %s1343_s6 = smov 1  }
   0x8   :  { %43 = dma.hbm_to_vmem [thread:$0]  %s36_s25, 48, %s38_s29, [#allocation5], %s1342_s30, %s1342_s30, %s1343_s6  }
   0x9   :  { %1334 = dma.done.wait [#allocation3], 4992  }
   0xa   :  { %1335 = vsyncadd [#allocation3], 4294962304 }
   0xb   :  { %1336 = dma.done.wait [#allocation5], 48  }
   0xc   :  { %1337 = vsyncadd [#allocation5], 4294967248  ;;  %vm105_vm0 = vcmask 1043456   ;;  %v1381_v0 = vld [vmem:[#allocation2 + $0x60] sm:$0xf]  ;;  %v1385_v2 = vld [vmem:[#allocation2 + $0x58] sm:$0xff] }
   0xd   :  { %v1383_v1 = vld [vmem:[#allocation2 + $0xc8] sm:$0xf]  ;;  %1065 = vmatpush.msk.msra.mxu0 %vm105_vm0, %v1381_v0  ;;  %v1391_v3 = vld [vmem:[#allocation2 + $0xc0] sm:$0xff]  ;;  %v1393_v4 = vld [vmem:[#allocation2 + $0x50] sm:$0xff]  ;;  %1070 = vmatpush.msk.msra.mxu3 %vm105_vm0, %v1381_v0  ;;  %v1344_v35 = vmov 0.0   ;;  %vm101_vm9 = vcmask 818176  }
   0xe   :  { %1066 = vmatpush.msk.msra.mxu1 %vm105_vm0, %v1383_v1  ;;  %v1395_v5 = vld [vmem:[#allocation2 + $0xb8] sm:$0xff]  ;;  %v1401_v6 = vld [vmem:[#allocation2 + $0x48] sm:$0xff]  ;;  %v1403_v7 = vld [vmem:[#allocation2 + $0xb0] sm:$0xff]  ;;  %vm231_vm10 = vcmask 812032  }
   0xf   :  { %113 = vmatpush.msra.mxu0 %v1385_v2  ;;  %240 = vmatpush.msra.mxu3 %v1385_v2  ;;  %v1408_v8 = vld [vmem:[#allocation2 + $0x40] sm:$0xff]  ;;  %v1410_v9 = vld [vmem:[#allocation2 + $0xa8] sm:$0xff]  ;;  %v1415_v10 = vld [vmem:[#allocation2 + $0x38] sm:$0xff] }
  0x10   :  { %139 = vmatpush.msra.mxu1 %v1391_v3  ;;  %v1417_v11 = vld [vmem:[#allocation2 + $0xa0] sm:$0xff]  ;;  %v1419_v12 = vld [vmem:[#allocation2 + $0x130] sm:$0xf]  ;;  %v1424_v13 = vld [vmem:[#allocation2 + $0x128] sm:$0xff] }
  0x11   :  { %114 = vmatpush.msra.mxu0 %v1393_v4  ;;  %241 = vmatpush.msra.mxu3 %v1393_v4  ;;  %v1426_v14 = vld [vmem:[#allocation2 + $0x30] sm:$0xff]  ;;  %v1428_v15 = vld [vmem:[#allocation2 + $0x98] sm:$0xff]  ;;  %v1435_v16 = vld [vmem:[#allocation2 + $0x120] sm:$0xff] }
  0x12   :  { %140 = vmatpush.msra.mxu1 %v1395_v5  ;;  %1067 = vmatpush.msk.msra.mxu2 %vm105_vm0, %v1419_v12  ;;  %v1437_v17 = vld [vmem:[#allocation2 + $0x28] sm:$0xff]  ;;  %v1439_v18 = vld [vmem:[#allocation2 + $0x90] sm:$0xff]  ;;  %v1445_v19 = vld [vmem:[#allocation2 + $0x118] sm:$0xff] }
  0x13   :  { %115 = vmatpush.msra.mxu0 %v1401_v6  ;;  %242 = vmatpush.msra.mxu3 %v1401_v6  ;;  %v1447_v20 = vld [vmem:[#allocation2 + $0x20] sm:$0xff]  ;;  %v1449_v21 = vld [vmem:[#allocation2 + $0x88] sm:$0xff]  ;;  %v1455_v22 = vld [vmem:[#allocation2 + $0x110] sm:$0xff] }
  0x14   :  { %141 = vmatpush.msra.mxu1 %v1403_v7  ;;  %165 = vmatpush.msra.mxu2 %v1424_v13  ;;  %v1457_v23 = vld [vmem:[#allocation2 + $0x18] sm:$0xff]  ;;  %v1459_v24 = vld [vmem:[#allocation2 + $0x80] sm:$0xff]  ;;  %v1465_v25 = vld [vmem:[#allocation2 + $0x108] sm:$0xff] }
  0x15   :  { %116 = vmatpush.msra.mxu0 %v1408_v8  ;;  %243 = vmatpush.msra.mxu3 %v1408_v8  ;;  %v1467_v26 = vld [vmem:[#allocation2 + $0x10] sm:$0xff]  ;;  %v1469_v27 = vld [vmem:[#allocation2 + $0x78] sm:$0xff]  ;;  %v1475_v28 = vld [vmem:[#allocation2 + $0x100] sm:$0xff] }
  0x16   :  { %142 = vmatpush.msra.mxu1 %v1410_v9  ;;  %166 = vmatpush.msra.mxu2 %v1435_v16  ;;  %v1477_v29 = vld [vmem:[#allocation2 + $0x8] sm:$0xff]  ;;  %v1479_v30 = vld [vmem:[#allocation2 + $0x70] sm:$0xff]  ;;  %v1485_v31 = vld [vmem:[#allocation2 + $0xf8] sm:$0xff] }
  0x17   :  { %117 = vmatpush.msra.mxu0 %v1415_v10  ;;  %244 = vmatpush.msra.mxu3 %v1415_v10  ;;  %v1487_v32 = vld [vmem:[#allocation2] sm:$0xff]  ;;  %v1489_v33 = vld [vmem:[#allocation2 + $0x68] sm:$0xff]  ;;  %v1496_v34 = vld [vmem:[#allocation2 + $0xf0] sm:$0xff] }
  0x18   :  { %143 = vmatpush.msra.mxu1 %v1417_v11  ;;  %167 = vmatpush.msra.mxu2 %v1445_v19  ;;  %v1501_v36 = vld [vmem:[#allocation2 + $0xe8] sm:$0xff]  ;;  %v1506_v37 = vld [vmem:[#allocation2 + $0xe0] sm:$0xff]  ;;  %v1513_v38 = vld [vmem:[#allocation2 + $0xd8] sm:$0xff] }
  0x19   :  { %118 = vmatpush.msra.mxu0 %v1426_v14  ;;  %245 = vmatpush.msra.mxu3 %v1426_v14  ;;  %v1520_v39 = vld [vmem:[#allocation2 + $0xd0] sm:$0xff]  ;;  %v1613_v40 = vld [vmem:[#allocation4] ss:$0 sm:$0xff]  ;;  %v1615_v41 = vld [vmem:[#allocation4 + $0x1] ss:$0 sm:$0xff] }
  0x1a   :  { %144 = vmatpush.msra.mxu1 %v1428_v15  ;;  %168 = vmatpush.msra.mxu2 %v1455_v22  ;;  %v181_v43 = vld [vmem:[%s1969_s0] sm:$0x3]  ;;  %v1625_v60 = vld [vmem:[#allocation4 + $0x2] ss:$0 sm:$0xff] }
  0x1b   :  { %119 = vmatpush.msra.mxu0 %v1437_v17  ;;  %246 = vmatpush.msra.mxu3 %v1437_v17  ;;  %v202_v45 = vld [vmem:[%s1970_s1] sm:$0x3] }
  0x1c   :  { %145 = vmatpush.msra.mxu1 %v1439_v18  ;;  %169 = vmatpush.msra.mxu2 %v1465_v25 }
  0x1d   :  { %120 = vmatpush.msra.mxu0 %v1447_v20  ;;  %247 = vmatpush.msra.mxu3 %v1447_v20 }
  0x1e   :  { %146 = vmatpush.msra.mxu1 %v1449_v21  ;;  %170 = vmatpush.msra.mxu2 %v1475_v28 }
  0x1f   :  { %121 = vmatpush.msra.mxu0 %v1457_v23  ;;  %248 = vmatpush.msra.mxu3 %v1457_v23 }
  0x20   :  { %147 = vmatpush.msra.mxu1 %v1459_v24  ;;  %171 = vmatpush.msra.mxu2 %v1485_v31 }
  0x21   :  { %122 = vmatpush.msra.mxu0 %v1467_v26  ;;  %249 = vmatpush.msra.mxu3 %v1467_v26 }
  0x22   :  { %148 = vmatpush.msra.mxu1 %v1469_v27  ;;  %172 = vmatpush.msra.mxu2 %v1496_v34 }
  0x23   :  { %123 = vmatpush.msra.mxu0 %v1477_v29  ;;  %250 = vmatpush.msra.mxu3 %v1477_v29 }
  0x24   :  { %149 = vmatpush.msra.mxu1 %v1479_v30  ;;  %173 = vmatpush.msra.mxu2 %v1501_v36 }
  0x25   :  { %124 = vmatpush.msra.mxu0 %v1487_v32  ;;  %251 = vmatpush.msra.mxu3 %v1487_v32 }
  0x26   :  { %150 = vmatpush.msra.mxu1 %v1489_v33  ;;  %125 = vmatmul.f32.vlgmr.msra.gmra.mxu0 %v1344_v35 }
  0x27   :  { %151 = vmatmul.f32.vlgmr.msra.gmra.mxu1 %v1344_v35  ;;  %1072 = vmatpush.msk.msrb.mxu0 %vm105_vm0, %v1383_v1 }
  0x28   :  { %1074 = vmatpush.msk.msrb.mxu1 %vm105_vm0, %v1419_v12  ;;  %1084 = vmatpush.msk.msrb.mxu3 %vm105_vm0, %v1383_v1 }
  0x29   :  { %260 = vmatpush.msrb.mxu0 %v1391_v3  ;;  %174 = vmatpush.msra.mxu2 %v1506_v37 }
  0x2a   :  { %280 = vmatpush.msrb.mxu1 %v1424_v13  ;;  %378 = vmatpush.msrb.mxu3 %v1391_v3 }
  0x2b   :  { %261 = vmatpush.msrb.mxu0 %v1395_v5  ;;  %175 = vmatpush.msra.mxu2 %v1513_v38 }
  0x2c   :  { %281 = vmatpush.msrb.mxu1 %v1435_v16  ;;  %379 = vmatpush.msrb.mxu3 %v1395_v5 }
  0x2d   :  { %262 = vmatpush.msrb.mxu0 %v1403_v7  ;;  %176 = vmatpush.msra.mxu2 %v1520_v39 }
  0x2e   :  { %282 = vmatpush.msrb.mxu1 %v1445_v19  ;;  %177 = vmatmul.f32.vlgmr.msra.gmra.mxu2 %v1344_v35 }
  0x2f   :  { %263 = vmatpush.msrb.mxu0 %v1410_v9  ;;  %1082 = vmatpush.msk.msrb.mxu2 %vm105_vm0, %v1381_v0 }
  0x30   :  { %283 = vmatpush.msrb.mxu1 %v1455_v22  ;;  %380 = vmatpush.msrb.mxu3 %v1403_v7 }
  0x31   :  { %264 = vmatpush.msrb.mxu0 %v1417_v11  ;;  %358 = vmatpush.msrb.mxu2 %v1385_v2 }
  0x32   :  { %284 = vmatpush.msrb.mxu1 %v1465_v25  ;;  %381 = vmatpush.msrb.mxu3 %v1410_v9 }
  0x33   :  { %265 = vmatpush.msrb.mxu0 %v1428_v15  ;;  %359 = vmatpush.msrb.mxu2 %v1393_v4 }
  0x34   :  { %285 = vmatpush.msrb.mxu1 %v1475_v28  ;;  %382 = vmatpush.msrb.mxu3 %v1417_v11 }
  0x35   :  { %266 = vmatpush.msrb.mxu0 %v1439_v18  ;;  %360 = vmatpush.msrb.mxu2 %v1401_v6 }
  0x36   :  { %286 = vmatpush.msrb.mxu1 %v1485_v31  ;;  %383 = vmatpush.msrb.mxu3 %v1428_v15 }
  0x37   :  { %267 = vmatpush.msrb.mxu0 %v1449_v21  ;;  %361 = vmatpush.msrb.mxu2 %v1408_v8 }
  0x38   :  { %287 = vmatpush.msrb.mxu1 %v1496_v34  ;;  %384 = vmatpush.msrb.mxu3 %v1439_v18 }
  0x39   :  { %268 = vmatpush.msrb.mxu0 %v1459_v24  ;;  %362 = vmatpush.msrb.mxu2 %v1415_v10 }
  0x3a   :  { %288 = vmatpush.msrb.mxu1 %v1501_v36  ;;  %385 = vmatpush.msrb.mxu3 %v1449_v21 }
  0x3b   :  { %269 = vmatpush.msrb.mxu0 %v1469_v27  ;;  %363 = vmatpush.msrb.mxu2 %v1426_v14 }
  0x3c   :  { %289 = vmatpush.msrb.mxu1 %v1506_v37  ;;  %386 = vmatpush.msrb.mxu3 %v1459_v24 }
  0x3d   :  { %270 = vmatpush.msrb.mxu0 %v1479_v30  ;;  %364 = vmatpush.msrb.mxu2 %v1437_v17 }
  0x3e   :  { %290 = vmatpush.msrb.mxu1 %v1513_v38  ;;  %387 = vmatpush.msrb.mxu3 %v1469_v27 }
  0x3f   :  { %271 = vmatpush.msrb.mxu0 %v1489_v33  ;;  %365 = vmatpush.msrb.mxu2 %v1447_v20 }
  0x40   :  { %291 = vmatpush.msrb.mxu1 %v1520_v39  ;;  %388 = vmatpush.msrb.mxu3 %v1479_v30 }
  0x41   :  { %1086 = vmatpush.msk.msra.mxu0 %vm105_vm0, %v1419_v12  ;;  %366 = vmatpush.msrb.mxu2 %v1457_v23 }
  0x42   :  { %1094 = vmatpush.msk.msra.mxu1 %vm105_vm0, %v1381_v0  ;;  %389 = vmatpush.msrb.mxu3 %v1489_v33 }
  0x43   :  { %398 = vmatpush.msra.mxu0 %v1424_v13  ;;  %367 = vmatpush.msrb.mxu2 %v1467_v26 }
  0x44   :  { %476 = vmatpush.msra.mxu1 %v1385_v2 }
  0x45   :  { %399 = vmatpush.msra.mxu0 %v1435_v16  ;;  %368 = vmatpush.msrb.mxu2 %v1477_v29 }
  0x46   :  { %477 = vmatpush.msra.mxu1 %v1393_v4 }
  0x47   :  { %400 = vmatpush.msra.mxu0 %v1445_v19  ;;  %369 = vmatpush.msrb.mxu2 %v1487_v32 }
  0x48   :  { %478 = vmatpush.msra.mxu1 %v1401_v6 }
  0x49   :  { %401 = vmatpush.msra.mxu0 %v1455_v22  ;;  %1096 = vmatpush.msk.msra.mxu2 %vm105_vm0, %v1383_v1 }
  0x4a   :  { %479 = vmatpush.msra.mxu1 %v1408_v8 }
  0x4b   :  { %402 = vmatpush.msra.mxu0 %v1465_v25  ;;  %496 = vmatpush.msra.mxu2 %v1391_v3 }
  0x4c   :  { %480 = vmatpush.msra.mxu1 %v1415_v10 }
  0x4d   :  { %403 = vmatpush.msra.mxu0 %v1475_v28  ;;  %497 = vmatpush.msra.mxu2 %v1395_v5 }
  0x4e   :  { %481 = vmatpush.msra.mxu1 %v1426_v14 }
  0x4f   :  { %404 = vmatpush.msra.mxu0 %v1485_v31  ;;  %498 = vmatpush.msra.mxu2 %v1403_v7 }
  0x50   :  { %482 = vmatpush.msra.mxu1 %v1437_v17 }
  0x51   :  { %405 = vmatpush.msra.mxu0 %v1496_v34  ;;  %499 = vmatpush.msra.mxu2 %v1410_v9 }
  0x52   :  { %483 = vmatpush.msra.mxu1 %v1447_v20 }
  0x53   :  { %406 = vmatpush.msra.mxu0 %v1501_v36  ;;  %500 = vmatpush.msra.mxu2 %v1417_v11 }
  0x54   :  { %484 = vmatpush.msra.mxu1 %v1457_v23 }
  0x55   :  { %407 = vmatpush.msra.mxu0 %v1506_v37  ;;  %501 = vmatpush.msra.mxu2 %v1428_v15 }
  0x56   :  { %485 = vmatpush.msra.mxu1 %v1467_v26 }
  0x57   :  { %408 = vmatpush.msra.mxu0 %v1513_v38  ;;  %502 = vmatpush.msra.mxu2 %v1439_v18 }
  0x58   :  { %486 = vmatpush.msra.mxu1 %v1477_v29 }
  0x59   :  { %409 = vmatpush.msra.mxu0 %v1520_v39  ;;  %503 = vmatpush.msra.mxu2 %v1449_v21 }
  0x5a   :  { %487 = vmatpush.msra.mxu1 %v1487_v32 }
  0x5b   :  { %504 = vmatpush.msra.mxu2 %v1459_v24 }
  0x5d   :  { %505 = vmatpush.msra.mxu2 %v1469_v27 }
  0x5f   :  { %506 = vmatpush.msra.mxu2 %v1479_v30 }
  0x61   :  { %507 = vmatpush.msra.mxu2 %v1489_v33 }
  0xa3   :  { %v126_v42 = vpop.f32.mrf.mxu0 }
  0xa4   :  { %v152_v44 = vpop.f32.mrf.mxu1  ;;  %v127_v46 = vadd.f32 %v1613_v40, %v126_v42 }
  0xa5   :  { %v153_v47 = vadd.f32 %v1615_v41, %v152_v44 }
  0xa6   :  { %v182_v48 = vadd.f32 %v181_v43, %v127_v46 }
  0xa7   :  { %v203_v49 = vadd.f32 %v202_v45, %v153_v47 }
  0xa8   :  { %v1068_v50 = vmul.f32 -1.442695, %v182_v48 }
  0xa9   :  { %v1069_v51 = vmul.f32 -1.442695, %v203_v49 }
  0xaa   :  { %1164 = vpow2.f32 %v1068_v50 }
  0xab   :  { %1166 = vpow2.f32 %v1069_v51  ;;  %v223_v51 = vld [vmem:[%s1971_s2] sm:$0x3] }
  0xb0   :  { %v1165_v52 = vpop.eup %1164 }
  0xb1   :  { %v1167_v53 = vpop.eup %1166  ;;  %v186_v54 = vadd.f32 1.0, %v1165_v52  ;;  %v178_v63 = vpop.f32.mrf.mxu2 }
  0xb2   :  { %v207_v55 = vadd.f32 1.0, %v1167_v53  ;;  %v179_v45 = vadd.f32 %v1625_v60, %v178_v63 }
  0xb3   :  { %1168 = vrcp.f32 %v186_v54  ;;  %v198_v35 = vand.u32 2147483648, %v186_v54  ;;  %v196_v43 = vand.u32 2147483647, %v186_v54  ;;  %vm192_vm2 = vweird.f32 %v186_v54 }
  0xb4   :  { %1170 = vrcp.f32 %v207_v55  ;;  %vm213_vm5 = vweird.f32 %v207_v55  ;;  %v219_v52 = vand.u32 2147483648, %v207_v55 }
  0xb5   :  { %v199_v47 = vor.u32 1.1754944e-38, %v198_v35  ;;  %vm197_vm4 = vcmp.eq.f32.partialorder %v196_v43, 8.507059e+37 }
  0xb9   :  { %v1169_v56 = vpop.eup %1168 }
  0xba   :  { %v1171_v57 = vpop.eup %1170  ;;  %v188_v58 = vmul.f32 %v1169_v56, %v186_v54  ;;  %vm193_vm1 = vweird.f32 %v1169_v56 }
  0xbb   :  { %v209_v59 = vmul.f32 %v1171_v57, %v207_v55  ;;  %vm194_vm3 = vmor %vm192_vm2, %vm193_vm1  ;;  %vm214_vm6 = vweird.f32 %v1171_v57 }
  0xbc   :  { %v189_v61 = vsub.f32 1.0, %v188_v58  ;;  %v217_v58 = vand.u32 2147483647, %v207_v55  ;;  %vm215_vm7 = vmor %vm213_vm5, %vm214_vm6 }
  0xbd   :  { %v210_v62 = vsub.f32 1.0, %v209_v59 }
  0xbe   :  { %v190_v42 = vmul.f32 %v1169_v56, %v189_v61  ;;  %vm218_vm8 = vcmp.eq.f32.partialorder %v217_v58, 8.507059e+37 }
  0xbf   :  { %v211_v44 = vmul.f32 %v1171_v57, %v210_v62  ;;  %v220_v62 = vor.u32 1.1754944e-38, %v219_v52 }
  0xc0   :  { %v191_v46 = vadd.f32 %v1169_v56, %v190_v42 }
  0xc1   :  { %v212_v50 = vadd.f32 %v1171_v57, %v211_v44 }
  0xc2   :  { %v195_v48 = vsel %vm194_vm3, %v1169_v56, %v191_v46 }
  0xc3   :  { %v200_v49 = vsel %vm197_vm4, %v199_v47, %v195_v48  ;;  %v216_v61 = vsel %vm215_vm7, %v1171_v57, %v212_v50  ;;  %v1078_v57 = vld [vmem:[%s1970_s1 + $0x2] sm:$0x3] }
  0xc4   :  { %v224_v53 = vmul.f32 %v200_v49, %v179_v45  ;;  %v221_v54 = vsel %vm218_vm8, %v220_v62, %v216_v61  ;;  %v1076_v48 = vld [vmem:[%s1969_s0 + $0x2] sm:$0x3] }
  0xc5   :  { %v227_v56 = vsub.f32 1.0, %v221_v54  ;;  %v229_v42 = vmul.f32 0.0, %v221_v54 }
  0xc6   :  { %v225_v59 = vadd.f32 %v224_v53, %v223_v51 }
  0xc8   :  { %1172 = vtanh.f32 %v225_v59 }
  0xce   :  { %v1173_v63 = vpop.eup %1172 }
  0xcf   :  { %v228_v35 = vmul.f32 %v1173_v63, %v227_v56 }
  0xd1   :  { %v1631_v43 = vadd.f32 %v229_v42, %v228_v35 }
  0xd3   :  { %232 = vst.msk [vmem:[%s1974_s5] sm:$0x3] %vm231_vm10, %v1631_v43  ;;  %1071 = vmatmul.msk.f32.vlgmr.msra.gmra.mxu3 %vm101_vm9, %v1631_v43  ;;  %1073 = vmatmul.msk.f32.vlgmr.msrb.gmra.mxu0 %vm101_vm9, %v1631_v43 }
  0xd4   :  { %1075 = vmatmul.msk.f32.vlgmr.msrb.gmra.mxu1 %vm101_vm9, %v1631_v43  ;;  %1098 = vmatpush.msk.msra.mxu3 %vm105_vm0, %v1419_v12 }
  0xd5   :  { %1106 = vmatpush.msk.msrb.mxu0 %vm105_vm0, %v1381_v0  ;;  %1108 = vmatpush.msk.msrb.mxu1 %vm105_vm0, %v1383_v1 }
  0xd6   :  { %516 = vmatpush.msra.mxu3 %v1424_v13 }
  0xd7   :  { %594 = vmatpush.msrb.mxu0 %v1385_v2  ;;  %614 = vmatpush.msrb.mxu1 %v1391_v3 }
  0xd8   :  { %517 = vmatpush.msra.mxu3 %v1435_v16 }
  0xd9   :  { %595 = vmatpush.msrb.mxu0 %v1393_v4  ;;  %615 = vmatpush.msrb.mxu1 %v1395_v5 }
  0xda   :  { %518 = vmatpush.msra.mxu3 %v1445_v19 }
  0xdb   :  { %596 = vmatpush.msrb.mxu0 %v1401_v6  ;;  %616 = vmatpush.msrb.mxu1 %v1403_v7 }
  0xdc   :  { %519 = vmatpush.msra.mxu3 %v1455_v22 }
  0xdd   :  { %597 = vmatpush.msrb.mxu0 %v1408_v8  ;;  %617 = vmatpush.msrb.mxu1 %v1410_v9 }
  0xde   :  { %520 = vmatpush.msra.mxu3 %v1465_v25 }
  0xdf   :  { %598 = vmatpush.msrb.mxu0 %v1415_v10  ;;  %618 = vmatpush.msrb.mxu1 %v1417_v11 }
  0xe0   :  { %521 = vmatpush.msra.mxu3 %v1475_v28 }
  0xe1   :  { %599 = vmatpush.msrb.mxu0 %v1426_v14  ;;  %619 = vmatpush.msrb.mxu1 %v1428_v15 }
  0xe2   :  { %522 = vmatpush.msra.mxu3 %v1485_v31 }
  0xe3   :  { %600 = vmatpush.msrb.mxu0 %v1437_v17  ;;  %620 = vmatpush.msrb.mxu1 %v1439_v18 }
  0xe4   :  { %523 = vmatpush.msra.mxu3 %v1496_v34 }
  0xe5   :  { %601 = vmatpush.msrb.mxu0 %v1447_v20  ;;  %621 = vmatpush.msrb.mxu1 %v1449_v21 }
  0xe6   :  { %524 = vmatpush.msra.mxu3 %v1501_v36 }
  0xe7   :  { %602 = vmatpush.msrb.mxu0 %v1457_v23  ;;  %622 = vmatpush.msrb.mxu1 %v1459_v24 }
  0xe8   :  { %525 = vmatpush.msra.mxu3 %v1506_v37 }
  0xe9   :  { %603 = vmatpush.msrb.mxu0 %v1467_v26  ;;  %623 = vmatpush.msrb.mxu1 %v1469_v27 }
  0xea   :  { %526 = vmatpush.msra.mxu3 %v1513_v38 }
  0xeb   :  { %604 = vmatpush.msrb.mxu0 %v1477_v29  ;;  %624 = vmatpush.msrb.mxu1 %v1479_v30 }
  0xec   :  { %527 = vmatpush.msra.mxu3 %v1520_v39 }
  0xed   :  { %605 = vmatpush.msrb.mxu0 %v1487_v32  ;;  %625 = vmatpush.msrb.mxu1 %v1489_v33 }
 0x150   :  { %v273_v55 = vpop.f32.mrf.mxu0 }
 0x151   :  { %v274_v44 = vadd.f32 %v1615_v41, %v273_v55 }
 0x153   :  { %v320_v45 = vadd.f32 %v1078_v57, %v274_v44 }
 0x155   :  { %v1079_v46 = vmul.f32 -1.442695, %v320_v45  ;;  %v293_v45 = vpop.f32.mrf.mxu1 }
 0x156   :  { %v253_v47 = vpop.f32.mrf.mxu3 }
 0x157   :  { %1174 = vpow2.f32 %v1079_v46  ;;  %v254_v49 = vadd.f32 %v1613_v40, %v253_v47 }
 0x159   :  { %v298_v50 = vadd.f32 %v1076_v48, %v254_v49  ;;  %v294_v48 = vadd.f32 %v1625_v60, %v293_v45 }
 0x15b   :  { %v1077_v51 = vmul.f32 -1.442695, %v298_v50 }
 0x15d   :  { %v1175_v52 = vpop.eup %1174  ;;  %1176 = vpow2.f32 %v1077_v51 }
 0x15e   :  { %v324_v53 = vadd.f32 1.0, %v1175_v52  ;;  %v1080_v52 = vld [vmem:[%s1971_s2 + $0x2] sm:$0x3] }
 0x160   :  { %1178 = vrcp.f32 %v324_v53  ;;  %vm330_vm1 = vweird.f32 %v324_v53 }
 0x163   :  { %v1177_v58 = vpop.eup %1176 }
 0x164   :  { %v302_v59 = vadd.f32 1.0, %v1177_v58  ;;  %v336_v58 = vand.u32 2147483648, %v324_v53 }
 0x166   :  { %1180 = vrcp.f32 %v302_v59  ;;  %v1179_v61 = vpop.eup %1178  ;;  %v314_v42 = vand.u32 2147483648, %v302_v59  ;;  %v312_v57 = vand.u32 2147483647, %v302_v59  ;;  %vm308_vm12 = vweird.f32 %v302_v59 }
 0x167   :  { %v326_v62 = vmul.f32 %v1179_v61, %v324_v53  ;;  %vm331_vm15 = vweird.f32 %v1179_v61 }
 0x168   :  { %v315_v47 = vor.u32 1.1754944e-38, %v314_v42  ;;  %vm313_vm14 = vcmp.eq.f32.partialorder %v312_v57, 8.507059e+37  ;;  %vm332_vm2 = vmor %vm330_vm1, %vm331_vm15 }
 0x169   :  { %v327_v63 = vsub.f32 1.0, %v326_v62 }
 0x16b   :  { %v328_v44 = vmul.f32 %v1179_v61, %v327_v63 }
 0x16c   :  { %v1181_v54 = vpop.eup %1180 }
 0x16d   :  { %v304_v56 = vmul.f32 %v1181_v54, %v302_v59  ;;  %vm309_vm11 = vweird.f32 %v1181_v54  ;;  %v329_v51 = vadd.f32 %v1179_v61, %v328_v44 }
 0x16e   :  { %vm310_vm13 = vmor %vm308_vm12, %vm309_vm11 }
 0x16f   :  { %v305_v35 = vsub.f32 1.0, %v304_v56  ;;  %v334_v56 = vand.u32 2147483647, %v324_v53  ;;  %v333_v59 = vsel %vm332_vm2, %v1179_v61, %v329_v51  ;;  %v1088_v53 = vld [vmem:[%s1969_s0 + $0x4] sm:$0x3] }
 0x171   :  { %v306_v55 = vmul.f32 %v1181_v54, %v305_v35  ;;  %v337_v35 = vor.u32 1.1754944e-38, %v336_v58  ;;  %vm335_vm3 = vcmp.eq.f32.partialorder %v334_v56, 8.507059e+37 }
 0x173   :  { %v307_v46 = vadd.f32 %v1181_v54, %v306_v55  ;;  %v338_v42 = vsel %vm335_vm3, %v337_v35, %v333_v59 }
 0x174   :  { %v347_v44 = vmul.f32 %v338_v42, %v1631_v43 }
 0x175   :  { %v311_v49 = vsel %vm310_vm13, %v1181_v54, %v307_v46  ;;  %v345_v54 = vsub.f32 1.0, %v338_v42  ;;  %v1090_v46 = vld [vmem:[%s1970_s1 + $0x4] sm:$0x3] }
 0x176   :  { %v316_v50 = vsel %vm313_vm14, %v315_v47, %v311_v49 }
 0x177   :  { %v342_v62 = vmul.f32 %v316_v50, %v294_v48 }
 0x179   :  { %v343_v63 = vadd.f32 %v1080_v52, %v342_v62 }
 0x17b   :  { %1182 = vtanh.f32 %v343_v63 }
 0x181   :  { %v1183_v55 = vpop.eup %1182 }
 0x182   :  { %v346_v57 = vmul.f32 %v1183_v55, %v345_v54 }
 0x184   :  { %v1699_v45 = vadd.f32 %v347_v44, %v346_v57 }
 0x186   :  { %1081 = vst.msk [vmem:[%s1974_s5 + $0x2] sm:$0x3] %vm231_vm10, %v1699_v45  ;;  %1083 = vmatmul.msk.f32.vlgmr.msrb.gmra.mxu2 %vm101_vm9, %v1699_v45  ;;  %1085 = vmatmul.msk.f32.vlgmr.msrb.gmra.mxu3 %vm101_vm9, %v1699_v45 }
 0x187   :  { %1087 = vmatmul.msk.f32.vlgmr.msra.gmra.mxu0 %vm101_vm9, %v1699_v45  ;;  %1110 = vmatpush.msk.msrb.mxu2 %vm105_vm0, %v1419_v12 }
 0x188   :  { %1118 = vmatpush.msk.msrb.mxu3 %vm105_vm0, %v1381_v0  ;;  %1120 = vmatpush.msk.msra.mxu0 %vm105_vm0, %v1383_v1 }
 0x189   :  { %634 = vmatpush.msrb.mxu2 %v1424_v13 }
 0x18a   :  { %712 = vmatpush.msrb.mxu3 %v1385_v2  ;;  %732 = vmatpush.msra.mxu0 %v1391_v3 }
 0x18b   :  { %635 = vmatpush.msrb.mxu2 %v1435_v16 }
 0x18c   :  { %713 = vmatpush.msrb.mxu3 %v1393_v4  ;;  %733 = vmatpush.msra.mxu0 %v1395_v5 }
 0x18d   :  { %636 = vmatpush.msrb.mxu2 %v1445_v19 }
 0x18e   :  { %714 = vmatpush.msrb.mxu3 %v1401_v6  ;;  %734 = vmatpush.msra.mxu0 %v1403_v7 }
 0x18f   :  { %637 = vmatpush.msrb.mxu2 %v1455_v22 }
 0x190   :  { %715 = vmatpush.msrb.mxu3 %v1408_v8  ;;  %735 = vmatpush.msra.mxu0 %v1410_v9 }
 0x191   :  { %638 = vmatpush.msrb.mxu2 %v1465_v25 }
 0x192   :  { %716 = vmatpush.msrb.mxu3 %v1415_v10  ;;  %736 = vmatpush.msra.mxu0 %v1417_v11 }
 0x193   :  { %639 = vmatpush.msrb.mxu2 %v1475_v28 }
 0x194   :  { %717 = vmatpush.msrb.mxu3 %v1426_v14  ;;  %737 = vmatpush.msra.mxu0 %v1428_v15 }
 0x195   :  { %640 = vmatpush.msrb.mxu2 %v1485_v31 }
 0x196   :  { %718 = vmatpush.msrb.mxu3 %v1437_v17  ;;  %738 = vmatpush.msra.mxu0 %v1439_v18 }
 0x197   :  { %641 = vmatpush.msrb.mxu2 %v1496_v34 }
 0x198   :  { %719 = vmatpush.msrb.mxu3 %v1447_v20  ;;  %739 = vmatpush.msra.mxu0 %v1449_v21 }
 0x199   :  { %642 = vmatpush.msrb.mxu2 %v1501_v36 }
 0x19a   :  { %720 = vmatpush.msrb.mxu3 %v1457_v23  ;;  %740 = vmatpush.msra.mxu0 %v1459_v24 }
 0x19b   :  { %643 = vmatpush.msrb.mxu2 %v1506_v37 }
 0x19c   :  { %721 = vmatpush.msrb.mxu3 %v1467_v26  ;;  %741 = vmatpush.msra.mxu0 %v1469_v27 }
 0x19d   :  { %644 = vmatpush.msrb.mxu2 %v1513_v38 }
 0x19e   :  { %722 = vmatpush.msrb.mxu3 %v1477_v29  ;;  %742 = vmatpush.msra.mxu0 %v1479_v30 }
 0x19f   :  { %645 = vmatpush.msrb.mxu2 %v1520_v39 }
 0x1a0   :  { %723 = vmatpush.msrb.mxu3 %v1487_v32  ;;  %743 = vmatpush.msra.mxu0 %v1489_v33 }
 0x209   :  { %v371_v43 = vpop.f32.mrf.mxu2  ;;  %v391_v61 = vpop.f32.mrf.mxu3 }
 0x20a   :  { %v372_v47 = vadd.f32 %v1613_v40, %v371_v43  ;;  %v392_v48 = vadd.f32 %v1615_v41, %v391_v61  ;;  %v411_v61 = vpop.f32.mrf.mxu0 }
 0x20c   :  { %v416_v49 = vadd.f32 %v1088_v53, %v372_v47  ;;  %v438_v50 = vadd.f32 %v1090_v46, %v392_v48 }
 0x20e   :  { %v1089_v51 = vmul.f32 -1.442695, %v416_v49  ;;  %v1091_v52 = vmul.f32 -1.442695, %v438_v50  ;;  %v412_v49 = vadd.f32 %v1625_v60, %v411_v61 }
 0x210   :  { %1184 = vpow2.f32 %v1089_v51 }
 0x211   :  { %1186 = vpow2.f32 %v1091_v52 }
 0x216   :  { %v1185_v58 = vpop.eup %1184 }
 0x217   :  { %v1187_v62 = vpop.eup %1186  ;;  %v420_v56 = vadd.f32 1.0, %v1185_v58  ;;  %v1092_v58 = vld [vmem:[%s1971_s2 + $0x4] sm:$0x3] }
 0x218   :  { %v442_v63 = vadd.f32 1.0, %v1187_v62 }
 0x219   :  { %1188 = vrcp.f32 %v420_v56  ;;  %v432_v57 = vand.u32 2147483648, %v420_v56  ;;  %v430_v53 = vand.u32 2147483647, %v420_v56  ;;  %vm426_vm5 = vweird.f32 %v420_v56 }
 0x21a   :  { %1190 = vrcp.f32 %v442_v63  ;;  %vm448_vm11 = vweird.f32 %v442_v63 }
 0x21b   :  { %v433_v48 = vor.u32 1.1754944e-38, %v432_v57  ;;  %vm431_vm7 = vcmp.eq.f32.partialorder %v430_v53, 8.507059e+37 }
 0x21f   :  { %v1189_v59 = vpop.eup %1188 }
 0x220   :  { %v1191_v35 = vpop.eup %1190  ;;  %v422_v42 = vmul.f32 %v1189_v59, %v420_v56  ;;  %vm427_vm4 = vweird.f32 %v1189_v59 }
 0x221   :  { %v444_v54 = vmul.f32 %v1191_v35, %v442_v63  ;;  %vm428_vm6 = vmor %vm426_vm5, %vm427_vm4  ;;  %vm449_vm8 = vweird.f32 %v1191_v35 }
 0x222   :  { %v423_v55 = vsub.f32 1.0, %v422_v42  ;;  %v454_v42 = vand.u32 2147483648, %v442_v63  ;;  %vm450_vm12 = vmor %vm448_vm11, %vm449_vm8 }
 0x223   :  { %v445_v44 = vsub.f32 1.0, %v444_v54  ;;  %v452_v54 = vand.u32 2147483647, %v442_v63 }
 0x224   :  { %v424_v43 = vmul.f32 %v1189_v59, %v423_v55 }
 0x225   :  { %v446_v46 = vmul.f32 %v1191_v35, %v445_v44  ;;  %v455_v44 = vor.u32 1.1754944e-38, %v454_v42  ;;  %vm453_vm13 = vcmp.eq.f32.partialorder %v452_v54, 8.507059e+37  ;;  %v1848_v54 = vld [vmem:[#allocation2 + $0x130] sm:$0xf] }
 0x226   :  { %v425_v47 = vadd.f32 %v1189_v59, %v424_v43 }
 0x227   :  { %v447_v52 = vadd.f32 %v1191_v35, %v446_v46 }
 0x228   :  { %v429_v50 = vsel %vm428_vm6, %v1189_v59, %v425_v47 }
 0x229   :  { %v434_v51 = vsel %vm431_vm7, %v433_v48, %v429_v50  ;;  %v451_v56 = vsel %vm450_vm12, %v1191_v35, %v447_v52 }
 0x22a   :  { %v460_v62 = vmul.f32 %v434_v51, %v412_v49  ;;  %v456_v57 = vsel %vm453_vm13, %v455_v44, %v451_v56  ;;  %v1246_v56 = vld [vmem:[#allocation2 + $0xc8] sm:$0xf] }
 0x22b   :  { %v463_v59 = vsub.f32 1.0, %v456_v57  ;;  %v465_v61 = vmul.f32 %v456_v57, %v1699_v45  ;;  %v1854_v44 = vld [vmem:[#allocation2 + $0x128] sm:$0xff]  ;;  %v1248_v57 = vld [vmem:[#allocation2 + $0x58] sm:$0xff] }
 0x22c   :  { %v461_v55 = vadd.f32 %v1092_v58, %v460_v62 }
 0x22e   :  { %1192 = vtanh.f32 %v461_v55  ;;  %v1245_v55 = vld [vmem:[#allocation2 + $0x60] sm:$0xf] }
 0x234   :  { %v1193_v43 = vpop.eup %1192 }
 0x235   :  { %v464_v53 = vmul.f32 %v1193_v43, %v463_v59  ;;  %v1249_v59 = vld [vmem:[#allocation2 + $0xc0] sm:$0xff] }
 0x236   :  { %v1857_v43 = vld [vmem:[#allocation2 + $0x120] sm:$0xff] }
 0x237   :  { %v1767_v46 = vadd.f32 %v465_v61, %v464_v53  ;;  %v1251_v53 = vld [vmem:[#allocation2 + $0x50] sm:$0xff]  ;;  %v1252_v61 = vld [vmem:[#allocation2 + $0xb8] sm:$0xff] }
 0x239   :  { %1093 = vst.msk [vmem:[%s1974_s5 + $0x4] sm:$0x3] %vm231_vm10, %v1767_v46  ;;  %1095 = vmatmul.msk.f32.vlgmr.msra.gmra.mxu1 %vm101_vm9, %v1767_v46  ;;  %1097 = vmatmul.msk.f32.vlgmr.msra.gmra.mxu2 %vm101_vm9, %v1767_v46 }
 0x23a   :  { %1099 = vmatmul.msk.f32.vlgmr.msra.gmra.mxu3 %vm101_vm9, %v1767_v46  ;;  %1122 = vmatpush.msk.msra.mxu1 %vm105_vm0, %v1419_v12 }
 0x23b   :  { %1130 = vmatpush.msk.msra.mxu2 %vm105_vm0, %v1381_v0  ;;  %1132 = vmatpush.msk.msra.mxu3 %vm105_vm0, %v1383_v1  ;;  %v1100_v1 = vld [vmem:[%s1969_s0 + $0x6] sm:$0x3] }
 0x23c   :  { %752 = vmatpush.msra.mxu1 %v1424_v13 }
 0x23d   :  { %830 = vmatpush.msra.mxu2 %v1385_v2  ;;  %850 = vmatpush.msra.mxu3 %v1391_v3 }
 0x23e   :  { %753 = vmatpush.msra.mxu1 %v1435_v16 }
 0x23f   :  { %831 = vmatpush.msra.mxu2 %v1393_v4  ;;  %851 = vmatpush.msra.mxu3 %v1395_v5 }
 0x240   :  { %754 = vmatpush.msra.mxu1 %v1445_v19 }
 0x241   :  { %832 = vmatpush.msra.mxu2 %v1401_v6  ;;  %852 = vmatpush.msra.mxu3 %v1403_v7  ;;  %v1102_v6 = vld [vmem:[%s1970_s1 + $0x6] sm:$0x3] }
 0x242   :  { %755 = vmatpush.msra.mxu1 %v1455_v22 }
 0x243   :  { %833 = vmatpush.msra.mxu2 %v1408_v8  ;;  %853 = vmatpush.msra.mxu3 %v1410_v9 }
 0x244   :  { %756 = vmatpush.msra.mxu1 %v1465_v25 }
 0x245   :  { %834 = vmatpush.msra.mxu2 %v1415_v10  ;;  %854 = vmatpush.msra.mxu3 %v1417_v11 }
 0x246   :  { %757 = vmatpush.msra.mxu1 %v1475_v28 }
 0x247   :  { %835 = vmatpush.msra.mxu2 %v1426_v14  ;;  %855 = vmatpush.msra.mxu3 %v1428_v15 }
 0x248   :  { %758 = vmatpush.msra.mxu1 %v1485_v31 }
 0x249   :  { %836 = vmatpush.msra.mxu2 %v1437_v17  ;;  %856 = vmatpush.msra.mxu3 %v1439_v18 }
 0x24a   :  { %759 = vmatpush.msra.mxu1 %v1496_v34 }
 0x24b   :  { %837 = vmatpush.msra.mxu2 %v1447_v20  ;;  %857 = vmatpush.msra.mxu3 %v1449_v21 }
 0x24c   :  { %760 = vmatpush.msra.mxu1 %v1501_v36 }
 0x24d   :  { %838 = vmatpush.msra.mxu2 %v1457_v23  ;;  %858 = vmatpush.msra.mxu3 %v1459_v24 }
 0x24e   :  { %761 = vmatpush.msra.mxu1 %v1506_v37 }
 0x24f   :  { %839 = vmatpush.msra.mxu2 %v1467_v26  ;;  %859 = vmatpush.msra.mxu3 %v1469_v27 }
 0x250   :  { %762 = vmatpush.msra.mxu1 %v1513_v38 }
 0x251   :  { %840 = vmatpush.msra.mxu2 %v1477_v29  ;;  %860 = vmatpush.msra.mxu3 %v1479_v30  ;;  %v1104_v30 = vld [vmem:[%s1971_s2 + $0x6] sm:$0x3] }
 0x252   :  { %763 = vmatpush.msra.mxu1 %v1520_v39 }
 0x253   :  { %841 = vmatpush.msra.mxu2 %v1487_v32  ;;  %861 = vmatpush.msra.mxu3 %v1489_v33 }
 0x2b6   :  { %v489_v0 = vpop.f32.mrf.mxu1 }
 0x2b7   :  { %v490_v2 = vadd.f32 %v1613_v40, %v489_v0  ;;  %v1254_v0 = vld [vmem:[#allocation2 + $0x48] sm:$0xff] }
 0x2b9   :  { %v534_v3 = vadd.f32 %v1100_v1, %v490_v2  ;;  %v1255_v1 = vld [vmem:[#allocation2 + $0xb0] sm:$0xff] }
 0x2ba   :  { %v1863_v2 = vld [vmem:[#allocation2 + $0x110] sm:$0xff] }
 0x2bb   :  { %v1101_v4 = vmul.f32 -1.442695, %v534_v3  ;;  %v1257_v3 = vld [vmem:[#allocation2 + $0x40] sm:$0xff] }
 0x2bc   :  { %v509_v5 = vpop.f32.mrf.mxu2 }
 0x2bd   :  { %1194 = vpow2.f32 %v1101_v4  ;;  %v510_v7 = vadd.f32 %v1615_v41, %v509_v5  ;;  %v529_v21 = vpop.f32.mrf.mxu3  ;;  %v1258_v4 = vld [vmem:[#allocation2 + $0xa8] sm:$0xff] }
 0x2be   :  { %v530_v26 = vadd.f32 %v1625_v60, %v529_v21  ;;  %v1866_v5 = vld [vmem:[#allocation2 + $0x108] sm:$0xff] }
 0x2bf   :  { %v556_v8 = vadd.f32 %v1102_v6, %v510_v7  ;;  %v1260_v6 = vld [vmem:[#allocation2 + $0x38] sm:$0xff]  ;;  %v1261_v7 = vld [vmem:[#allocation2 + $0xa0] sm:$0xff] }
 0x2c1   :  { %v1103_v9 = vmul.f32 -1.442695, %v556_v8  ;;  %v1262_v8 = vld [vmem:[#allocation2 + $0x30] sm:$0xff] }
 0x2c3   :  { %v1195_v10 = vpop.eup %1194  ;;  %1196 = vpow2.f32 %v1103_v9  ;;  %v1263_v9 = vld [vmem:[#allocation2 + $0x98] sm:$0xff] }
 0x2c4   :  { %v538_v11 = vadd.f32 1.0, %v1195_v10  ;;  %v1264_v10 = vld [vmem:[#allocation2 + $0x28] sm:$0xff] }
 0x2c6   :  { %1198 = vrcp.f32 %v538_v11  ;;  %v550_v17 = vand.u32 2147483648, %v538_v11  ;;  %v548_v19 = vand.u32 2147483647, %v538_v11  ;;  %vm544_vm15 = vweird.f32 %v538_v11 }
 0x2c8   :  { %v551_v24 = vor.u32 1.1754944e-38, %v550_v17  ;;  %vm549_vm2 = vcmp.eq.f32.partialorder %v548_v19, 8.507059e+37  ;;  %v1274_v17 = vld [vmem:[#allocation2] sm:$0xff] }
 0x2c9   :  { %v1197_v12 = vpop.eup %1196 }
 0x2ca   :  { %v560_v13 = vadd.f32 1.0, %v1197_v12  ;;  %v1266_v12 = vld [vmem:[#allocation2 + $0x20] sm:$0xff] }
 0x2cc   :  { %v1199_v14 = vpop.eup %1198  ;;  %1200 = vrcp.f32 %v560_v13  ;;  %v572_v33 = vand.u32 2147483648, %v560_v13  ;;  %v570_v63 = vand.u32 2147483647, %v560_v13  ;;  %vm566_vm4 = vweird.f32 %v560_v13 }
 0x2cd   :  { %v540_v15 = vmul.f32 %v1199_v14, %v538_v11  ;;  %vm545_vm14 = vweird.f32 %v1199_v14  ;;  %v1265_v11 = vld [vmem:[#allocation2 + $0x90] sm:$0xff] }
 0x2ce   :  { %vm546_vm1 = vmor %vm544_vm15, %vm545_vm14  ;;  %v573_v48 = vor.u32 1.1754944e-38, %v572_v33  ;;  %vm571_vm6 = vcmp.eq.f32.partialorder %v570_v63, 8.507059e+37 }
 0x2cf   :  { %v541_v16 = vsub.f32 1.0, %v540_v15  ;;  %v1270_v15 = vld [vmem:[#allocation2 + $0x10] sm:$0xff] }
 0x2d1   :  { %v542_v18 = vmul.f32 %v1199_v14, %v541_v16  ;;  %v1272_v16 = vld [vmem:[#allocation2 + $0x8] sm:$0xff] }
 0x2d2   :  { %v1201_v20 = vpop.eup %1200 }
 0x2d3   :  { %v562_v22 = vmul.f32 %v1201_v20, %v560_v13  ;;  %v543_v23 = vadd.f32 %v1199_v14, %v542_v18  ;;  %vm567_vm3 = vweird.f32 %v1201_v20  ;;  %v1267_v13 = vld [vmem:[#allocation2 + $0x88] sm:$0xff] }
 0x2d4   :  { %vm568_vm5 = vmor %vm566_vm4, %vm567_vm3 }
 0x2d5   :  { %v563_v25 = vsub.f32 1.0, %v562_v22  ;;  %v547_v27 = vsel %vm546_vm1, %v1199_v14, %v543_v23  ;;  %v1268_v14 = vld [vmem:[#allocation2 + $0x18] sm:$0xff] }
 0x2d6   :  { %v552_v29 = vsel %vm549_vm2, %v551_v24, %v547_v27 }
 0x2d7   :  { %v564_v32 = vmul.f32 %v1201_v20, %v563_v25  ;;  %v578_v45 = vmul.f32 %v552_v29, %v530_v26 }
 0x2d9   :  { %v565_v35 = vadd.f32 %v1201_v20, %v564_v32  ;;  %v579_v47 = vadd.f32 %v1104_v30, %v578_v45 }
 0x2db   :  { %v569_v49 = vsel %vm568_vm5, %v1201_v20, %v565_v35  ;;  %1202 = vtanh.f32 %v579_v47 }
 0x2dc   :  { %v574_v50 = vsel %vm571_vm6, %v573_v48, %v569_v49 }
 0x2dd   :  { %v581_v51 = vsub.f32 1.0, %v574_v50  ;;  %v583_v62 = vmul.f32 %v574_v50, %v1767_v46  ;;  %v1860_v46 = vld [vmem:[#allocation2 + $0x118] sm:$0xff] }
 0x2e1   :  { %v1203_v52 = vpop.eup %1202 }
 0x2e2   :  { %v582_v58 = vmul.f32 %v1203_v52, %v581_v51 }
 0x2e4   :  { %v1835_v42 = vadd.f32 %v583_v62, %v582_v58 }
 0x2e6   :  { %1105 = vst.msk [vmem:[%s1974_s5 + $0x6] sm:$0x3] %vm231_vm10, %v1835_v42  ;;  %1107 = vmatmul.msk.f32.vlgmr.msrb.gmra.mxu0 %vm101_vm9, %v1835_v42  ;;  %1109 = vmatmul.msk.f32.vlgmr.msrb.gmra.mxu1 %vm101_vm9, %v1835_v42 }
 0x2e7   :  { %1111 = vmatmul.msk.f32.vlgmr.msrb.gmra.mxu2 %vm101_vm9, %v1835_v42  ;;  %1134 = vmatpush.msk.msrb.mxu0 %vm105_vm0, %v1848_v54 }
 0x2e8   :  { %1142 = vmatpush.msk.msrb.mxu1 %vm105_vm0, %v1245_v55  ;;  %1144 = vmatpush.msk.msrb.mxu2 %vm105_vm0, %v1246_v56 }
 0x2e9   :  { %870 = vmatpush.msrb.mxu0 %v1854_v44 }
 0x2ea   :  { %948 = vmatpush.msrb.mxu1 %v1248_v57  ;;  %968 = vmatpush.msrb.mxu2 %v1249_v59  ;;  %v1116_v59 = vld [vmem:[%s1971_s2 + $0x8] sm:$0x3] }
 0x2eb   :  { %871 = vmatpush.msrb.mxu0 %v1857_v43 }
 0x2ec   :  { %949 = vmatpush.msrb.mxu1 %v1251_v53  ;;  %969 = vmatpush.msrb.mxu2 %v1252_v61 }
 0x2ed   :  { %872 = vmatpush.msrb.mxu0 %v1860_v46 }
 0x2ee   :  { %950 = vmatpush.msrb.mxu1 %v1254_v0  ;;  %970 = vmatpush.msrb.mxu2 %v1255_v1 }
 0x2ef   :  { %873 = vmatpush.msrb.mxu0 %v1863_v2 }
 0x2f0   :  { %951 = vmatpush.msrb.mxu1 %v1257_v3  ;;  %971 = vmatpush.msrb.mxu2 %v1258_v4 }
 0x2f1   :  { %874 = vmatpush.msrb.mxu0 %v1866_v5 }
 0x2f2   :  { %952 = vmatpush.msrb.mxu1 %v1260_v6  ;;  %972 = vmatpush.msrb.mxu2 %v1261_v7 }
 0x2f3   :  { %875 = vmatpush.msrb.mxu0 %v1475_v28  ;;  %v1269_v28 = vld [vmem:[#allocation2 + $0x80] sm:$0xff] }
 0x2f4   :  { %953 = vmatpush.msrb.mxu1 %v1262_v8  ;;  %973 = vmatpush.msrb.mxu2 %v1263_v9 }
 0x2f5   :  { %876 = vmatpush.msrb.mxu0 %v1485_v31  ;;  %v1271_v31 = vld [vmem:[#allocation2 + $0x78] sm:$0xff] }
 0x2f6   :  { %954 = vmatpush.msrb.mxu1 %v1264_v10  ;;  %974 = vmatpush.msrb.mxu2 %v1265_v11 }
 0x2f7   :  { %877 = vmatpush.msrb.mxu0 %v1496_v34  ;;  %v1273_v34 = vld [vmem:[#allocation2 + $0x70] sm:$0xff] }
 0x2f8   :  { %955 = vmatpush.msrb.mxu1 %v1266_v12  ;;  %975 = vmatpush.msrb.mxu2 %v1267_v13  ;;  %v1277_v12 = vld [vmem:[#allocation2 + $0xf8] sm:$0xff]  ;;  %v1278_v13 = vld [vmem:[#allocation2 + $0xf0] sm:$0xff] }
 0x2f9   :  { %878 = vmatpush.msrb.mxu0 %v1501_v36  ;;  %v1275_v36 = vld [vmem:[#allocation2 + $0x68] sm:$0xff] }
 0x2fa   :  { %956 = vmatpush.msrb.mxu1 %v1268_v14  ;;  %976 = vmatpush.msrb.mxu2 %v1269_v28  ;;  %v1279_v14 = vld [vmem:[#allocation2 + $0xe8] sm:$0xff]  ;;  %v1280_v28 = vld [vmem:[#allocation2 + $0xe0] sm:$0xff] }
 0x2fb   :  { %879 = vmatpush.msrb.mxu0 %v1506_v37  ;;  %v1112_v37 = vld [vmem:[%s1969_s0 + $0x8] sm:$0x3] }
 0x2fc   :  { %957 = vmatpush.msrb.mxu1 %v1270_v15  ;;  %977 = vmatpush.msrb.mxu2 %v1271_v31 }
 0x2fd   :  { %880 = vmatpush.msrb.mxu0 %v1513_v38  ;;  %v1114_v38 = vld [vmem:[%s1970_s1 + $0x8] sm:$0x3] }
 0x2fe   :  { %958 = vmatpush.msrb.mxu1 %v1272_v16  ;;  %978 = vmatpush.msrb.mxu2 %v1273_v34  ;;  %v1124_v16 = vld [vmem:[%s1969_s0 + $0xa] sm:$0x3] }
 0x2ff   :  { %881 = vmatpush.msrb.mxu0 %v1520_v39 }
 0x300   :  { %959 = vmatpush.msrb.mxu1 %v1274_v17  ;;  %979 = vmatpush.msrb.mxu2 %v1275_v36 }
 0x363   :  { %v607_v18 = vpop.f32.mrf.mxu0  ;;  %v627_v19 = vpop.f32.mrf.mxu1 }
 0x364   :  { %v608_v20 = vadd.f32 %v1613_v40, %v607_v18  ;;  %v628_v21 = vadd.f32 %v1615_v41, %v627_v19 }
 0x366   :  { %v652_v22 = vadd.f32 %v1112_v37, %v608_v20  ;;  %v674_v39 = vadd.f32 %v1114_v38, %v628_v21 }
 0x368   :  { %v1113_v23 = vmul.f32 -1.442695, %v652_v22  ;;  %v1115_v24 = vmul.f32 -1.442695, %v674_v39 }
 0x36a   :  { %1204 = vpow2.f32 %v1113_v23  ;;  %v647_v51 = vpop.f32.mrf.mxu2 }
 0x36b   :  { %1206 = vpow2.f32 %v1115_v24  ;;  %v648_v62 = vadd.f32 %v1625_v60, %v647_v51 }
 0x370   :  { %v1205_v25 = vpop.eup %1204 }
 0x371   :  { %v1207_v26 = vpop.eup %1206  ;;  %v656_v27 = vadd.f32 1.0, %v1205_v25 }
 0x372   :  { %v678_v29 = vadd.f32 1.0, %v1207_v26 }
 0x373   :  { %1208 = vrcp.f32 %v656_v27  ;;  %v668_v47 = vand.u32 2147483648, %v656_v27  ;;  %v666_v49 = vand.u32 2147483647, %v656_v27  ;;  %vm662_vm8 = vweird.f32 %v656_v27 }
 0x374   :  { %1210 = vrcp.f32 %v678_v29  ;;  %v690_v53 = vand.u32 2147483648, %v678_v29  ;;  %vm684_vm14 = vweird.f32 %v678_v29  ;;  %v688_v0 = vand.u32 2147483647, %v678_v29 }
 0x375   :  { %v669_v58 = vor.u32 1.1754944e-38, %v668_v47  ;;  %vm667_vm12 = vcmp.eq.f32.partialorder %v666_v49, 8.507059e+37 }
 0x376   :  { %v691_v4 = vor.u32 1.1754944e-38, %v690_v53  ;;  %vm689_vm1 = vcmp.eq.f32.partialorder %v688_v0, 8.507059e+37  ;;  %v1136_v53 = vld [vmem:[%s1969_s0 + $0xc] sm:$0x3] }
 0x377   :  { %v1138_v0 = vld [vmem:[%s1970_s1 + $0xc] sm:$0x3] }
 0x379   :  { %v1209_v30 = vpop.eup %1208 }
 0x37a   :  { %v1211_v32 = vpop.eup %1210  ;;  %v658_v33 = vmul.f32 %v1209_v30, %v656_v27  ;;  %vm663_vm7 = vweird.f32 %v1209_v30 }
 0x37b   :  { %v680_v45 = vmul.f32 %v1211_v32, %v678_v29  ;;  %vm664_vm11 = vmor %vm662_vm8, %vm663_vm7  ;;  %vm685_vm13 = vweird.f32 %v1211_v32 }
 0x37c   :  { %v659_v63 = vsub.f32 1.0, %v658_v33  ;;  %vm686_vm15 = vmor %vm684_vm14, %vm685_vm13 }
 0x37d   :  { %v681_v35 = vsub.f32 1.0, %v680_v45 }
 0x37e   :  { %v660_v48 = vmul.f32 %v1209_v30, %v659_v63 }
 0x37f   :  { %v682_v50 = vmul.f32 %v1211_v32, %v681_v35  ;;  %v1128_v35 = vld [vmem:[%s1971_s2 + $0xa] sm:$0x3] }
 0x380   :  { %v661_v52 = vadd.f32 %v1209_v30, %v660_v48 }
 0x381   :  { %v683_v57 = vadd.f32 %v1211_v32, %v682_v50 }
 0x382   :  { %v665_v55 = vsel %vm664_vm11, %v1209_v30, %v661_v52 }
 0x383   :  { %v670_v56 = vsel %vm667_vm12, %v669_v58, %v665_v55  ;;  %v687_v3 = vsel %vm686_vm15, %v1211_v32, %v683_v57 }
 0x384   :  { %v696_v61 = vmul.f32 %v670_v56, %v648_v62  ;;  %v692_v6 = vsel %vm689_vm1, %v691_v4, %v687_v3  ;;  %v1941_v4 = vld [vmem:[#allocation4 + $0x1] ss:$0 sm:$0xff] }
 0x385   :  { %v699_v7 = vsub.f32 1.0, %v692_v6  ;;  %v701_v10 = vmul.f32 %v692_v6, %v1835_v42  ;;  %v1276_v42 = vld [vmem:[#allocation2 + $0x100] sm:$0xff] }
 0x386   :  { %v697_v1 = vadd.f32 %v1116_v59, %v696_v61 }
 0x388   :  { %1212 = vtanh.f32 %v697_v1  ;;  %v1283_v1 = vld [vmem:[#allocation4] ss:$0 sm:$0xff] }
 0x38e   :  { %v1213_v8 = vpop.eup %1212 }
 0x38f   :  { %v700_v9 = vmul.f32 %v1213_v8, %v699_v7 }
 0x391   :  { %v1889_v11 = vadd.f32 %v701_v10, %v700_v9 }
 0x393   :  { %1117 = vst.msk [vmem:[%s1974_s5 + $0x8] sm:$0x3] %vm231_vm10, %v1889_v11  ;;  %1119 = vmatmul.msk.f32.vlgmr.msrb.gmra.mxu3 %vm101_vm9, %v1889_v11  ;;  %1121 = vmatmul.msk.f32.vlgmr.msra.gmra.mxu0 %vm101_vm9, %v1889_v11 }
 0x394   :  { %1123 = vmatmul.msk.f32.vlgmr.msra.gmra.mxu1 %vm101_vm9, %v1889_v11  ;;  %1146 = vmatpush.msk.msrb.mxu3 %vm105_vm0, %v1848_v54  ;;  %v1281_v54 = vld [vmem:[#allocation2 + $0xd8] sm:$0xff] }
 0x396   :  { %988 = vmatpush.msrb.mxu3 %v1854_v44  ;;  %v1282_v44 = vld [vmem:[#allocation2 + $0xd0] sm:$0xff] }
 0x398   :  { %989 = vmatpush.msrb.mxu3 %v1857_v43 }
 0x39a   :  { %990 = vmatpush.msrb.mxu3 %v1860_v46  ;;  %v1126_v46 = vld [vmem:[%s1970_s1 + $0xa] sm:$0x3] }
 0x39c   :  { %991 = vmatpush.msrb.mxu3 %v1863_v2 }
 0x39e   :  { %992 = vmatpush.msrb.mxu3 %v1866_v5 }
 0x3a0   :  { %993 = vmatpush.msrb.mxu3 %v1276_v42 }
 0x3a2   :  { %994 = vmatpush.msrb.mxu3 %v1277_v12 }
 0x3a4   :  { %995 = vmatpush.msrb.mxu3 %v1278_v13 }
 0x3a6   :  { %996 = vmatpush.msrb.mxu3 %v1279_v14 }
 0x3a8   :  { %997 = vmatpush.msrb.mxu3 %v1280_v28 }
 0x3aa   :  { %998 = vmatpush.msrb.mxu3 %v1281_v54 }
 0x3ac   :  { %999 = vmatpush.msrb.mxu3 %v1282_v44 }
 0x410   :  { %v745_v43 = vpop.f32.mrf.mxu0 }
 0x411   :  { %v746_v2 = vadd.f32 %v1615_v41, %v745_v43  ;;  %v765_v27 = vpop.f32.mrf.mxu1 }
 0x412   :  { %v766_v32 = vadd.f32 %v1625_v60, %v765_v27 }
 0x413   :  { %v792_v5 = vadd.f32 %v1126_v46, %v746_v2 }
 0x415   :  { %v1127_v15 = vmul.f32 -1.442695, %v792_v5 }
 0x416   :  { %v725_v31 = vpop.f32.mrf.mxu3 }
 0x417   :  { %1214 = vpow2.f32 %v1127_v15  ;;  %v726_v34 = vadd.f32 %v1613_v40, %v725_v31 }
 0x419   :  { %v770_v17 = vadd.f32 %v1124_v16, %v726_v34 }
 0x41b   :  { %v1125_v36 = vmul.f32 -1.442695, %v770_v17 }
 0x41d   :  { %v1215_v18 = vpop.eup %1214  ;;  %1216 = vpow2.f32 %v1125_v36  ;;  %v1285_v36 = vld [vmem:[#allocation4 + $0x2] ss:$0 sm:$0xff] }
 0x41e   :  { %v796_v37 = vadd.f32 1.0, %v1215_v18 }
 0x420   :  { %1218 = vrcp.f32 %v796_v37  ;;  %v808_v47 = vand.u32 2147483648, %v796_v37  ;;  %vm802_vm6 = vweird.f32 %v796_v37  ;;  %v806_v49 = vand.u32 2147483647, %v796_v37 }
 0x422   :  { %v809_v52 = vor.u32 1.1754944e-38, %v808_v47  ;;  %vm807_vm8 = vcmp.eq.f32.partialorder %v806_v49, 8.507059e+37 }
 0x423   :  { %v1217_v19 = vpop.eup %1216 }
 0x424   :  { %v774_v38 = vadd.f32 1.0, %v1217_v19 }
 0x426   :  { %1220 = vrcp.f32 %v774_v38  ;;  %v1219_v41 = vpop.eup %1218  ;;  %v786_v24 = vand.u32 2147483648, %v774_v38  ;;  %v784_v26 = vand.u32 2147483647, %v774_v38  ;;  %vm780_vm2 = vweird.f32 %v774_v38 }
 0x427   :  { %v798_v20 = vmul.f32 %v1219_v41, %v796_v37  ;;  %vm803_vm5 = vweird.f32 %v1219_v41 }
 0x428   :  { %v787_v30 = vor.u32 1.1754944e-38, %v786_v24  ;;  %vm785_vm4 = vcmp.eq.f32.partialorder %v784_v26, 8.507059e+37  ;;  %vm804_vm7 = vmor %vm802_vm6, %vm803_vm5 }
 0x429   :  { %v799_v39 = vsub.f32 1.0, %v798_v20 }
 0x42b   :  { %v800_v40 = vmul.f32 %v1219_v41, %v799_v39 }
 0x42c   :  { %v1221_v21 = vpop.eup %1220 }
 0x42d   :  { %v776_v22 = vmul.f32 %v1221_v21, %v774_v38  ;;  %vm781_vm0 = vweird.f32 %v1221_v21  ;;  %v801_v63 = vadd.f32 %v1219_v41, %v800_v40 }
 0x42e   :  { %vm782_vm3 = vmor %vm780_vm2, %vm781_vm0 }
 0x42f   :  { %v777_v23 = vsub.f32 1.0, %v776_v22  ;;  %v805_v51 = vsel %vm804_vm7, %v1219_v41, %v801_v63  ;;  %v1140_v41 = vld [vmem:[%s1971_s2 + $0xc] sm:$0x3] }
 0x430   :  { %v810_v60 = vsel %vm807_vm8, %v809_v52, %v805_v51 }
 0x431   :  { %v778_v25 = vmul.f32 %v1221_v21, %v777_v23  ;;  %v817_v58 = vsub.f32 1.0, %v810_v60  ;;  %v819_v56 = vmul.f32 %v810_v60, %v1889_v11 }
 0x433   :  { %v779_v29 = vadd.f32 %v1221_v21, %v778_v25 }
 0x435   :  { %v783_v33 = vsel %vm782_vm3, %v1221_v21, %v779_v29 }
 0x436   :  { %v788_v45 = vsel %vm785_vm4, %v787_v30, %v783_v33  ;;  %v1148_v33 = vld [vmem:[%s1969_s0 + $0xe] sm:$0x3] }
 0x437   :  { %v814_v48 = vmul.f32 %v788_v45, %v766_v32 }
 0x439   :  { %v815_v50 = vadd.f32 %v1128_v35, %v814_v48  ;;  %v1150_v48 = vld [vmem:[%s1970_s1 + $0xe] sm:$0x3] }
 0x43b   :  { %1222 = vtanh.f32 %v815_v50 }
 0x441   :  { %v1223_v62 = vpop.eup %1222 }
 0x442   :  { %v818_v55 = vmul.f32 %v1223_v62, %v817_v58 }
 0x444   :  { %v1922_v57 = vadd.f32 %v819_v56, %v818_v55 }
 0x446   :  { %1129 = vst.msk [vmem:[%s1974_s5 + $0xa] sm:$0x3] %vm231_vm10, %v1922_v57  ;;  %1131 = vmatmul.msk.f32.vlgmr.msra.gmra.mxu2 %vm101_vm9, %v1922_v57  ;;  %1133 = vmatmul.msk.f32.vlgmr.msra.gmra.mxu3 %vm101_vm9, %v1922_v57 }
 0x447   :  { %1135 = vmatmul.msk.f32.vlgmr.msrb.gmra.mxu0 %vm101_vm9, %v1922_v57 }
 0x4c4   :  { %v883_v31 = vpop.f32.mrf.mxu0 }
 0x4c5   :  { %v884_v18 = vadd.f32 %v1285_v36, %v883_v31 }
 0x4c9   :  { %v843_v59 = vpop.f32.mrf.mxu2  ;;  %v863_v61 = vpop.f32.mrf.mxu3 }
 0x4ca   :  { %v844_v3 = vadd.f32 %v1283_v1, %v843_v59  ;;  %v864_v6 = vadd.f32 %v1941_v4, %v863_v61 }
 0x4cc   :  { %v888_v7 = vadd.f32 %v1136_v53, %v844_v3  ;;  %v910_v8 = vadd.f32 %v1138_v0, %v864_v6 }
 0x4ce   :  { %v1137_v9 = vmul.f32 -1.442695, %v888_v7  ;;  %v1139_v10 = vmul.f32 -1.442695, %v910_v8 }
 0x4d0   :  { %1224 = vpow2.f32 %v1137_v9 }
 0x4d1   :  { %1226 = vpow2.f32 %v1139_v10 }
 0x4d6   :  { %v1225_v11 = vpop.eup %1224 }
 0x4d7   :  { %v1227_v42 = vpop.eup %1226  ;;  %v892_v12 = vadd.f32 1.0, %v1225_v11  ;;  %v1152_v11 = vld [vmem:[%s1971_s2 + $0xe] sm:$0x3] }
 0x4d8   :  { %v914_v13 = vadd.f32 1.0, %v1227_v42 }
 0x4d9   :  { %1228 = vrcp.f32 %v892_v12  ;;  %v904_v46 = vand.u32 2147483648, %v892_v12  ;;  %v902_v15 = vand.u32 2147483647, %v892_v12  ;;  %vm898_vm12 = vweird.f32 %v892_v12 }
 0x4da   :  { %1230 = vrcp.f32 %v914_v13  ;;  %v926_v21 = vand.u32 2147483648, %v914_v13  ;;  %vm920_vm1 = vweird.f32 %v914_v13  ;;  %v924_v22 = vand.u32 2147483647, %v914_v13 }
 0x4db   :  { %v905_v17 = vor.u32 1.1754944e-38, %v904_v46  ;;  %vm903_vm14 = vcmp.eq.f32.partialorder %v902_v15, 8.507059e+37 }
 0x4dc   :  { %v927_v24 = vor.u32 1.1754944e-38, %v926_v21  ;;  %vm925_vm2 = vcmp.eq.f32.partialorder %v924_v22, 8.507059e+37 }
 0x4df   :  { %v1229_v14 = vpop.eup %1228 }
 0x4e0   :  { %v1231_v28 = vpop.eup %1230  ;;  %v894_v54 = vmul.f32 %v1229_v14, %v892_v12  ;;  %vm899_vm11 = vweird.f32 %v1229_v14 }
 0x4e1   :  { %v916_v44 = vmul.f32 %v1231_v28, %v914_v13  ;;  %vm900_vm13 = vmor %vm898_vm12, %vm899_vm11  ;;  %vm921_vm15 = vweird.f32 %v1231_v28 }
 0x4e2   :  { %v895_v43 = vsub.f32 1.0, %v894_v54  ;;  %vm922_vm0 = vmor %vm920_vm1, %vm921_vm15 }
 0x4e3   :  { %v917_v2 = vsub.f32 1.0, %v916_v44 }
 0x4e4   :  { %v896_v5 = vmul.f32 %v1229_v14, %v895_v43 }
 0x4e5   :  { %v918_v16 = vmul.f32 %v1231_v28, %v917_v2 }
 0x4e6   :  { %v897_v34 = vadd.f32 %v1229_v14, %v896_v5 }
 0x4e7   :  { %v919_v38 = vadd.f32 %v1231_v28, %v918_v16 }
 0x4e8   :  { %v901_v37 = vsel %vm900_vm13, %v1229_v14, %v897_v34 }
 0x4e9   :  { %v906_v19 = vsel %vm903_vm14, %v905_v17, %v901_v37  ;;  %v923_v23 = vsel %vm922_vm0, %v1231_v28, %v919_v38 }
 0x4ea   :  { %v932_v20 = vmul.f32 %v906_v19, %v884_v18  ;;  %v928_v25 = vsel %vm925_vm2, %v927_v24, %v923_v23 }
 0x4eb   :  { %v935_v26 = vsub.f32 1.0, %v928_v25  ;;  %v937_v29 = vmul.f32 %v928_v25, %v1922_v57 }
 0x4ec   :  { %v933_v39 = vadd.f32 %v1140_v41, %v932_v20 }
 0x4ee   :  { %1232 = vtanh.f32 %v933_v39 }
 0x4f4   :  { %v1233_v40 = vpop.eup %1232 }
 0x4f5   :  { %v936_v27 = vmul.f32 %v1233_v40, %v935_v26 }
 0x4f7   :  { %v938_v30 = vadd.f32 %v937_v29, %v936_v27 }
 0x4f9   :  { %1141 = vst.msk [vmem:[%s1974_s5 + $0xc] sm:$0x3] %vm231_vm10, %v938_v30  ;;  %1143 = vmatmul.msk.f32.vlgmr.msrb.gmra.mxu1 %vm101_vm9, %v938_v30  ;;  %1145 = vmatmul.msk.f32.vlgmr.msrb.gmra.mxu2 %vm101_vm9, %v938_v30 }
 0x4fa   :  { %1147 = vmatmul.msk.f32.vlgmr.msrb.gmra.mxu3 %vm101_vm9, %v938_v30 }
 0x576   :  { %v961_v32 = vpop.f32.mrf.mxu1 }
 0x577   :  { %v962_v45 = vadd.f32 %v1283_v1, %v961_v32 }
 0x579   :  { %v1006_v63 = vadd.f32 %v1148_v33, %v962_v45 }
 0x57b   :  { %v1149_v35 = vmul.f32 -1.442695, %v1006_v63 }
 0x57c   :  { %v981_v47 = vpop.f32.mrf.mxu2 }
 0x57d   :  { %1234 = vpow2.f32 %v1149_v35  ;;  %v982_v49 = vadd.f32 %v1941_v4, %v981_v47  ;;  %v1001_v1 = vpop.f32.mrf.mxu3 }
 0x57e   :  { %v1002_v8 = vadd.f32 %v1285_v36, %v1001_v1 }
 0x57f   :  { %v1028_v50 = vadd.f32 %v1150_v48, %v982_v49 }
 0x581   :  { %v1151_v51 = vmul.f32 -1.442695, %v1028_v50 }
 0x583   :  { %v1235_v52 = vpop.eup %1234  ;;  %1236 = vpow2.f32 %v1151_v51 }
 0x584   :  { %v1010_v60 = vadd.f32 1.0, %v1235_v52 }
 0x586   :  { %1238 = vrcp.f32 %v1010_v60  ;;  %v1022_v59 = vand.u32 2147483648, %v1010_v60  ;;  %v1020_v61 = vand.u32 2147483647, %v1010_v60  ;;  %vm1016_vm3 = vweird.f32 %v1010_v60 }
 0x588   :  { %v1023_v6 = vor.u32 1.1754944e-38, %v1022_v59  ;;  %vm1021_vm5 = vcmp.eq.f32.partialorder %v1020_v61, 8.507059e+37 }
 0x589   :  { %v1237_v58 = vpop.eup %1236 }
 0x58a   :  { %v1032_v62 = vadd.f32 1.0, %v1237_v58 }
 0x58c   :  { %v1239_v55 = vpop.eup %1238  ;;  %1240 = vrcp.f32 %v1032_v62  ;;  %v1044_v12 = vand.u32 2147483648, %v1032_v62  ;;  %v1042_v14 = vand.u32 2147483647, %v1032_v62  ;;  %vm1038_vm7 = vweird.f32 %v1032_v62 }
 0x58d   :  { %v1012_v56 = vmul.f32 %v1239_v55, %v1010_v60  ;;  %vm1017_vm9 = vweird.f32 %v1239_v55 }
 0x58e   :  { %vm1018_vm4 = vmor %vm1016_vm3, %vm1017_vm9  ;;  %v1045_v44 = vor.u32 1.1754944e-38, %v1044_v12  ;;  %vm1043_vm11 = vcmp.eq.f32.partialorder %v1042_v14, 8.507059e+37 }
 0x58f   :  { %v1013_v57 = vsub.f32 1.0, %v1012_v56 }
 0x591   :  { %v1014_v53 = vmul.f32 %v1239_v55, %v1013_v57 }
 0x592   :  { %v1241_v0 = vpop.eup %1240 }
 0x593   :  { %v1034_v3 = vmul.f32 %v1241_v0, %v1032_v62  ;;  %v1015_v4 = vadd.f32 %v1239_v55, %v1014_v53  ;;  %vm1039_vm6 = vweird.f32 %v1241_v0 }
 0x594   :  { %vm1040_vm8 = vmor %vm1038_vm7, %vm1039_vm6 }
 0x595   :  { %v1035_v7 = vsub.f32 1.0, %v1034_v3  ;;  %v1019_v9 = vsel %vm1018_vm4, %v1239_v55, %v1015_v4 }
 0x596   :  { %v1024_v10 = vsel %vm1021_vm5, %v1023_v6, %v1019_v9 }
 0x597   :  { %v1036_v42 = vmul.f32 %v1241_v0, %v1035_v7  ;;  %v1050_v13 = vmul.f32 %v1024_v10, %v1002_v8 }
 0x599   :  { %v1037_v28 = vadd.f32 %v1241_v0, %v1036_v42  ;;  %v1051_v54 = vadd.f32 %v1152_v11, %v1050_v13 }
 0x59b   :  { %v1041_v43 = vsel %vm1040_vm8, %v1241_v0, %v1037_v28  ;;  %1242 = vtanh.f32 %v1051_v54 }
 0x59c   :  { %v1046_v46 = vsel %vm1043_vm11, %v1045_v44, %v1041_v43 }
 0x59d   :  { %v1053_v2 = vsub.f32 1.0, %v1046_v46  ;;  %v1055_v31 = vmul.f32 %v1046_v46, %v938_v30 }
 0x5a1   :  { %v1243_v5 = vpop.eup %1242 }
 0x5a2   :  { %v1054_v15 = vmul.f32 %v1243_v5, %v1053_v2 }
 0x5a4   :  { %v1056_v16 = vadd.f32 %v1055_v31, %v1054_v15 }
 0x5a6   :  { %1153 = vst.msk [vmem:[%s1974_s5 + $0xe] sm:$0x3] %vm231_vm10, %v1056_v16 }
 0x5a7   :  { %1063 = vsyncpa [#allocation3], 1 }
 0x5a8   :  { %1064 = vsyncpa [#allocation5], 1 }

// kernel: cmla_forward.12
= control target key start
LH: loop header
LB: loop body
LE: loop exit
PB: predicated region body
PF: predicated region fallthrough
CT: control target
= control target key end

     0   :  { %10 = vsyncpa [#allocation3], 0  ;;  %s1793_s0 = inlined_call_operand.vmem [shape: f32[8,2,80], index: 0, kind: input, shape index: {}]   ;;  %s1794_s1 = inlined_call_operand.vmem [shape: f32[8,2,80], index: 1, kind: input, shape index: {}]   ;;  %s1795_s2 = inlined_call_operand.vmem [shape: f32[8,2,80], index: 2, kind: input, shape index: {}]   ;;  %s1796_s3 = inlined_call_operand.hbm [shape: f32[3,80,80], index: 3, kind: input, shape index: {}]   ;;  %s1797_s4 = inlined_call_operand.hbm [shape: f32[3,1,80], index: 4, kind: input, shape index: {}]   ;;  %s1798_s5 = inlined_call_operand.vmem [shape: f32[8,2,80], index: 5, kind: output, shape index: {}]  }
   0x1   :  { %s22_s20 = sshll.u32 %s1796_s3, 4  ;;  %s23_s20 = int_to_ptr.hbm [resolvable:$true] %s22_s20 }
   0x2   :  { %11 = vsyncpa [#allocation5], 0  ;;  %s1265_s21 = smov [#allocation2]   ;;  %s35_s25 = sshll.u32 %s1797_s4, 4  ;;  %s36_s25 = int_to_ptr.hbm [resolvable:$true] %s35_s25 }
   0x3   :  { %s24_s22 = sshll.u32 %s1265_s21, 4  ;;  %s1266_s26 = smov 128   ;;  %s25_s22 = int_to_ptr.vmem [resolvable:$true] %s24_s22 }
   0x4   :  { %s1267_s27 = smov 8   ;;  %s1268_s28 = smov [#allocation4]  }
   0x5   :  { %30 = dma.hbm_to_vmem [thread:$0]  %s23_s20, 3840, %s25_s22, [#allocation3], %s1266_s26, %s1266_s26, %s1267_s27  }
   0x6   :  { %s37_s29 = sshll.u32 %s1268_s28, 4  ;;  %s1269_s30 = smov 16   ;;  %s38_s29 = int_to_ptr.vmem [resolvable:$true] %s37_s29 }
   0x7   :  { %s1270_s6 = smov 1  }
   0x8   :  { %43 = dma.hbm_to_vmem [thread:$0]  %s36_s25, 48, %s38_s29, [#allocation5], %s1269_s30, %s1269_s30, %s1270_s6  }
   0x9   :  { %1261 = dma.done.wait [#allocation3], 3840  }
   0xa   :  { %1262 = vsyncadd [#allocation3], 4294963456 }
   0xb   :  { %1263 = dma.done.wait [#allocation5], 48  }
   0xc   :  { %1264 = vsyncadd [#allocation5], 4294967248  ;;  %v1308_v0 = vld [vmem:[#allocation2 + $0x48] sm:$0xff]  ;;  %v1310_v1 = vld [vmem:[#allocation2 + $0x98] sm:$0xff]  ;;  %v1271_v27 = vmov 0.0   ;;  %vm92_vm8 = vcmask 654336  }
   0xd   :  { %v1312_v2 = vld [vmem:[#allocation2 + $0x40] sm:$0xff]  ;;  %102 = vmatpush.msra.mxu0 %v1308_v0  ;;  %125 = vmatpush.msra.mxu1 %v1310_v1  ;;  %v1316_v3 = vld [vmem:[#allocation2 + $0x90] sm:$0xff]  ;;  %v1318_v4 = vld [vmem:[#allocation2 + $0x38] sm:$0xff]  ;;  %vm212_vm9 = vcmask 648192  }
   0xe   :  { %v1320_v5 = vld [vmem:[#allocation2 + $0x88] sm:$0xff]  ;;  %223 = vmatpush.msra.mxu3 %v1308_v0  ;;  %v1325_v6 = vld [vmem:[#allocation2 + $0x30] sm:$0xff]  ;;  %v1327_v7 = vld [vmem:[#allocation2 + $0x80] sm:$0xff] }
   0xf   :  { %103 = vmatpush.msra.mxu0 %v1312_v2  ;;  %126 = vmatpush.msra.mxu1 %v1316_v3  ;;  %v1332_v8 = vld [vmem:[#allocation2 + $0x28] sm:$0xff]  ;;  %v1334_v9 = vld [vmem:[#allocation2 + $0x78] sm:$0xff]  ;;  %v1341_v11 = vld [vmem:[#allocation2 + $0xe0] sm:$0xff] }
  0x10   :  { %224 = vmatpush.msra.mxu3 %v1312_v2  ;;  %v1336_v10 = vld [vmem:[#allocation2 + $0xe8] sm:$0xff]  ;;  %v1343_v12 = vld [vmem:[#allocation2 + $0x20] sm:$0xff]  ;;  %v1345_v13 = vld [vmem:[#allocation2 + $0x70] sm:$0xff] }
  0x11   :  { %104 = vmatpush.msra.mxu0 %v1318_v4  ;;  %127 = vmatpush.msra.mxu1 %v1320_v5  ;;  %v1351_v14 = vld [vmem:[#allocation2 + $0x18] sm:$0xff]  ;;  %v1355_v16 = vld [vmem:[#allocation2 + $0x68] sm:$0xff]  ;;  %v1361_v17 = vld [vmem:[#allocation2 + $0xd0] sm:$0xff] }
  0x12   :  { %225 = vmatpush.msra.mxu3 %v1318_v4  ;;  %148 = vmatpush.msra.mxu2 %v1336_v10  ;;  %v1353_v15 = vld [vmem:[#allocation2 + $0xd8] sm:$0xff]  ;;  %v1363_v18 = vld [vmem:[#allocation2 + $0x10] sm:$0xff]  ;;  %v1365_v19 = vld [vmem:[#allocation2 + $0x60] sm:$0xff] }
  0x13   :  { %105 = vmatpush.msra.mxu0 %v1325_v6  ;;  %128 = vmatpush.msra.mxu1 %v1327_v7  ;;  %v1371_v20 = vld [vmem:[#allocation2 + $0xc8] sm:$0xff]  ;;  %v1375_v22 = vld [vmem:[#allocation2 + $0x58] sm:$0xff]  ;;  %v1381_v23 = vld [vmem:[#allocation2 + $0xc0] sm:$0xff] }
  0x14   :  { %226 = vmatpush.msra.mxu3 %v1325_v6  ;;  %149 = vmatpush.msra.mxu2 %v1341_v11  ;;  %v1373_v21 = vld [vmem:[#allocation2 + $0x8] sm:$0xff]  ;;  %v1383_v24 = vld [vmem:[#allocation2] sm:$0xff]  ;;  %v1385_v25 = vld [vmem:[#allocation2 + $0x50] sm:$0xff] }
  0x15   :  { %106 = vmatpush.msra.mxu0 %v1332_v8  ;;  %129 = vmatpush.msra.mxu1 %v1334_v9  ;;  %v1392_v26 = vld [vmem:[#allocation2 + $0xb8] sm:$0xff]  ;;  %v1397_v28 = vld [vmem:[#allocation2 + $0xb0] sm:$0xff]  ;;  %v1401_v29 = vld [vmem:[#allocation2 + $0xa8] sm:$0xff] }
  0x16   :  { %227 = vmatpush.msra.mxu3 %v1332_v8  ;;  %150 = vmatpush.msra.mxu2 %v1353_v15  ;;  %v1407_v30 = vld [vmem:[#allocation2 + $0xa0] sm:$0xff]  ;;  %v1478_v31 = vld [vmem:[#allocation4] ss:$0 sm:$0xff]  ;;  %v1480_v32 = vld [vmem:[#allocation4 + $0x1] ss:$0 sm:$0xff] }
  0x17   :  { %107 = vmatpush.msra.mxu0 %v1343_v12  ;;  %130 = vmatpush.msra.mxu1 %v1345_v13  ;;  %v162_v34 = vld [vmem:[%s1793_s0] sm:$0x3]  ;;  %v1490_v51 = vld [vmem:[#allocation4 + $0x2] ss:$0 sm:$0xff] }
  0x18   :  { %228 = vmatpush.msra.mxu3 %v1343_v12  ;;  %151 = vmatpush.msra.mxu2 %v1361_v17  ;;  %v183_v36 = vld [vmem:[%s1794_s1] sm:$0x3] }
  0x19   :  { %108 = vmatpush.msra.mxu0 %v1351_v14  ;;  %131 = vmatpush.msra.mxu1 %v1355_v16 }
  0x1a   :  { %229 = vmatpush.msra.mxu3 %v1351_v14  ;;  %152 = vmatpush.msra.mxu2 %v1371_v20 }
  0x1b   :  { %109 = vmatpush.msra.mxu0 %v1363_v18  ;;  %132 = vmatpush.msra.mxu1 %v1365_v19 }
  0x1c   :  { %230 = vmatpush.msra.mxu3 %v1363_v18  ;;  %153 = vmatpush.msra.mxu2 %v1381_v23 }
  0x1d   :  { %110 = vmatpush.msra.mxu0 %v1373_v21  ;;  %133 = vmatpush.msra.mxu1 %v1375_v22 }
  0x1e   :  { %231 = vmatpush.msra.mxu3 %v1373_v21  ;;  %154 = vmatpush.msra.mxu2 %v1392_v26 }
  0x1f   :  { %111 = vmatpush.msra.mxu0 %v1383_v24  ;;  %134 = vmatpush.msra.mxu1 %v1385_v25 }
  0x20   :  { %112 = vmatmul.f32.vlgmr.msra.gmra.mxu0 %v1271_v27  ;;  %135 = vmatmul.f32.vlgmr.msra.gmra.mxu1 %v1271_v27 }
  0x21   :  { %243 = vmatpush.msrb.mxu0 %v1310_v1  ;;  %263 = vmatpush.msrb.mxu1 %v1336_v10 }
  0x22   :  { %232 = vmatpush.msra.mxu3 %v1383_v24  ;;  %155 = vmatpush.msra.mxu2 %v1397_v28 }
  0x23   :  { %244 = vmatpush.msrb.mxu0 %v1316_v3  ;;  %264 = vmatpush.msrb.mxu1 %v1341_v11 }
  0x24   :  { %361 = vmatpush.msrb.mxu3 %v1310_v1  ;;  %156 = vmatpush.msra.mxu2 %v1401_v29 }
  0x25   :  { %245 = vmatpush.msrb.mxu0 %v1320_v5  ;;  %265 = vmatpush.msrb.mxu1 %v1353_v15 }
  0x26   :  { %362 = vmatpush.msrb.mxu3 %v1316_v3  ;;  %157 = vmatpush.msra.mxu2 %v1407_v30 }
  0x27   :  { %246 = vmatpush.msrb.mxu0 %v1327_v7  ;;  %158 = vmatmul.f32.vlgmr.msra.gmra.mxu2 %v1271_v27 }
  0x28   :  { %266 = vmatpush.msrb.mxu1 %v1361_v17  ;;  %341 = vmatpush.msrb.mxu2 %v1308_v0 }
  0x29   :  { %247 = vmatpush.msrb.mxu0 %v1334_v9  ;;  %363 = vmatpush.msrb.mxu3 %v1320_v5 }
  0x2a   :  { %267 = vmatpush.msrb.mxu1 %v1371_v20  ;;  %342 = vmatpush.msrb.mxu2 %v1312_v2 }
  0x2b   :  { %248 = vmatpush.msrb.mxu0 %v1345_v13  ;;  %364 = vmatpush.msrb.mxu3 %v1327_v7 }
  0x2c   :  { %268 = vmatpush.msrb.mxu1 %v1381_v23  ;;  %343 = vmatpush.msrb.mxu2 %v1318_v4 }
  0x2d   :  { %249 = vmatpush.msrb.mxu0 %v1355_v16  ;;  %365 = vmatpush.msrb.mxu3 %v1334_v9 }
  0x2e   :  { %269 = vmatpush.msrb.mxu1 %v1392_v26  ;;  %344 = vmatpush.msrb.mxu2 %v1325_v6 }
  0x2f   :  { %250 = vmatpush.msrb.mxu0 %v1365_v19  ;;  %366 = vmatpush.msrb.mxu3 %v1345_v13 }
  0x30   :  { %270 = vmatpush.msrb.mxu1 %v1397_v28  ;;  %345 = vmatpush.msrb.mxu2 %v1332_v8 }
  0x31   :  { %251 = vmatpush.msrb.mxu0 %v1375_v22  ;;  %367 = vmatpush.msrb.mxu3 %v1355_v16 }
  0x32   :  { %271 = vmatpush.msrb.mxu1 %v1401_v29  ;;  %346 = vmatpush.msrb.mxu2 %v1343_v12 }
  0x33   :  { %252 = vmatpush.msrb.mxu0 %v1385_v25  ;;  %368 = vmatpush.msrb.mxu3 %v1365_v19 }
  0x34   :  { %272 = vmatpush.msrb.mxu1 %v1407_v30  ;;  %347 = vmatpush.msrb.mxu2 %v1351_v14 }
  0x35   :  { %381 = vmatpush.msra.mxu0 %v1336_v10  ;;  %369 = vmatpush.msrb.mxu3 %v1375_v22 }
  0x36   :  { %459 = vmatpush.msra.mxu1 %v1308_v0  ;;  %348 = vmatpush.msrb.mxu2 %v1363_v18 }
  0x37   :  { %382 = vmatpush.msra.mxu0 %v1341_v11  ;;  %370 = vmatpush.msrb.mxu3 %v1385_v25 }
  0x38   :  { %460 = vmatpush.msra.mxu1 %v1312_v2  ;;  %349 = vmatpush.msrb.mxu2 %v1373_v21 }
  0x39   :  { %383 = vmatpush.msra.mxu0 %v1353_v15 }
  0x3a   :  { %461 = vmatpush.msra.mxu1 %v1318_v4  ;;  %350 = vmatpush.msrb.mxu2 %v1383_v24 }
  0x3b   :  { %384 = vmatpush.msra.mxu0 %v1361_v17 }
  0x3c   :  { %479 = vmatpush.msra.mxu2 %v1310_v1  ;;  %462 = vmatpush.msra.mxu1 %v1325_v6 }
  0x3d   :  { %385 = vmatpush.msra.mxu0 %v1371_v20 }
  0x3e   :  { %480 = vmatpush.msra.mxu2 %v1316_v3  ;;  %463 = vmatpush.msra.mxu1 %v1332_v8 }
  0x3f   :  { %386 = vmatpush.msra.mxu0 %v1381_v23 }
  0x40   :  { %481 = vmatpush.msra.mxu2 %v1320_v5  ;;  %464 = vmatpush.msra.mxu1 %v1343_v12 }
  0x41   :  { %387 = vmatpush.msra.mxu0 %v1392_v26 }
  0x42   :  { %482 = vmatpush.msra.mxu2 %v1327_v7  ;;  %465 = vmatpush.msra.mxu1 %v1351_v14 }
  0x43   :  { %388 = vmatpush.msra.mxu0 %v1397_v28 }
  0x44   :  { %483 = vmatpush.msra.mxu2 %v1334_v9  ;;  %466 = vmatpush.msra.mxu1 %v1363_v18 }
  0x45   :  { %389 = vmatpush.msra.mxu0 %v1401_v29 }
  0x46   :  { %484 = vmatpush.msra.mxu2 %v1345_v13  ;;  %467 = vmatpush.msra.mxu1 %v1373_v21 }
  0x47   :  { %390 = vmatpush.msra.mxu0 %v1407_v30 }
  0x48   :  { %485 = vmatpush.msra.mxu2 %v1355_v16  ;;  %468 = vmatpush.msra.mxu1 %v1383_v24 }
  0x4a   :  { %486 = vmatpush.msra.mxu2 %v1365_v19 }
  0x4c   :  { %487 = vmatpush.msra.mxu2 %v1375_v22 }
  0x4e   :  { %488 = vmatpush.msra.mxu2 %v1385_v25 }
  0x9d   :  { %v113_v33 = vpop.f32.mrf.mxu0  ;;  %v136_v35 = vpop.f32.mrf.mxu1 }
  0x9e   :  { %v114_v37 = vadd.f32 %v1478_v31, %v113_v33  ;;  %v137_v38 = vadd.f32 %v1480_v32, %v136_v35  ;;  %v204_v33 = vld [vmem:[%s1795_s2] sm:$0x3] }
  0xa0   :  { %v163_v39 = vadd.f32 %v162_v34, %v114_v37  ;;  %v184_v40 = vadd.f32 %v183_v36, %v137_v38 }
  0xa2   :  { %v1046_v41 = vmul.f32 -1.442695, %v163_v39  ;;  %v1047_v42 = vmul.f32 -1.442695, %v184_v40 }
  0xa4   :  { %1121 = vpow2.f32 %v1046_v41 }
  0xa5   :  { %1123 = vpow2.f32 %v1047_v42 }
  0xaa   :  { %v1122_v43 = vpop.eup %1121  ;;  %v159_v54 = vpop.f32.mrf.mxu2 }
  0xab   :  { %v1124_v44 = vpop.eup %1123  ;;  %v167_v45 = vadd.f32 1.0, %v1122_v43  ;;  %v160_v59 = vadd.f32 %v1490_v51, %v159_v54 }
  0xac   :  { %v188_v46 = vadd.f32 1.0, %v1124_v44 }
  0xad   :  { %1125 = vrcp.f32 %v167_v45  ;;  %v179_v55 = vand.u32 2147483648, %v167_v45  ;;  %v177_v57 = vand.u32 2147483647, %v167_v45  ;;  %vm173_vm1 = vweird.f32 %v167_v45 }
  0xae   :  { %1127 = vrcp.f32 %v188_v46  ;;  %vm194_vm4 = vweird.f32 %v188_v46  ;;  %v200_v34 = vand.u32 2147483648, %v188_v46  ;;  %v198_v36 = vand.u32 2147483647, %v188_v46 }
  0xaf   :  { %v180_v61 = vor.u32 1.1754944e-38, %v179_v55  ;;  %vm178_vm3 = vcmp.eq.f32.partialorder %v177_v57, 8.507059e+37 }
  0xb0   :  { %v201_v39 = vor.u32 1.1754944e-38, %v200_v34  ;;  %vm199_vm7 = vcmp.eq.f32.partialorder %v198_v36, 8.507059e+37 }
  0xb3   :  { %v1126_v47 = vpop.eup %1125 }
  0xb4   :  { %v1128_v48 = vpop.eup %1127  ;;  %v169_v49 = vmul.f32 %v1126_v47, %v167_v45  ;;  %vm174_vm0 = vweird.f32 %v1126_v47 }
  0xb5   :  { %v190_v50 = vmul.f32 %v1128_v48, %v188_v46  ;;  %vm175_vm2 = vmor %vm173_vm1, %vm174_vm0  ;;  %vm195_vm5 = vweird.f32 %v1128_v48 }
  0xb6   :  { %v170_v52 = vsub.f32 1.0, %v169_v49  ;;  %vm196_vm6 = vmor %vm194_vm4, %vm195_vm5 }
  0xb7   :  { %v191_v53 = vsub.f32 1.0, %v190_v50 }
  0xb8   :  { %v171_v56 = vmul.f32 %v1126_v47, %v170_v52 }
  0xb9   :  { %v192_v58 = vmul.f32 %v1128_v48, %v191_v53  ;;  %v1051_v53 = vld [vmem:[%s1793_s0 + $0x2] sm:$0x3] }
  0xba   :  { %v172_v60 = vadd.f32 %v1126_v47, %v171_v56 }
  0xbb   :  { %v193_v27 = vadd.f32 %v1128_v48, %v192_v58 }
  0xbc   :  { %v176_v62 = vsel %vm175_vm2, %v1126_v47, %v172_v60  ;;  %v1053_v47 = vld [vmem:[%s1794_s1 + $0x2] sm:$0x3] }
  0xbd   :  { %v181_v63 = vsel %vm178_vm3, %v180_v61, %v176_v62  ;;  %v197_v38 = vsel %vm196_vm6, %v1128_v48, %v193_v27 }
  0xbe   :  { %v205_v35 = vmul.f32 %v181_v63, %v160_v59  ;;  %v202_v40 = vsel %vm199_vm7, %v201_v39, %v197_v38 }
  0xbf   :  { %v208_v41 = vsub.f32 1.0, %v202_v40  ;;  %v210_v44 = vmul.f32 0.0, %v202_v40 }
  0xc0   :  { %v206_v37 = vadd.f32 %v205_v35, %v204_v33 }
  0xc2   :  { %1129 = vtanh.f32 %v206_v37 }
  0xc8   :  { %v1130_v42 = vpop.eup %1129 }
  0xc9   :  { %v209_v43 = vmul.f32 %v1130_v42, %v208_v41 }
  0xcb   :  { %v1496_v45 = vadd.f32 %v210_v44, %v209_v43 }
  0xcd   :  { %213 = vst.msk [vmem:[%s1798_s5] sm:$0x3] %vm212_vm9, %v1496_v45  ;;  %1048 = vmatmul.msk.f32.vlgmr.msra.gmra.mxu3 %vm92_vm8, %v1496_v45  ;;  %1049 = vmatmul.msk.f32.vlgmr.msrb.gmra.mxu0 %vm92_vm8, %v1496_v45 }
  0xce   :  { %1050 = vmatmul.msk.f32.vlgmr.msrb.gmra.mxu1 %vm92_vm8, %v1496_v45  ;;  %499 = vmatpush.msra.mxu3 %v1336_v10 }
  0xcf   :  { %577 = vmatpush.msrb.mxu0 %v1308_v0  ;;  %597 = vmatpush.msrb.mxu1 %v1310_v1 }
  0xd0   :  { %500 = vmatpush.msra.mxu3 %v1341_v11 }
  0xd1   :  { %578 = vmatpush.msrb.mxu0 %v1312_v2  ;;  %598 = vmatpush.msrb.mxu1 %v1316_v3 }
  0xd2   :  { %501 = vmatpush.msra.mxu3 %v1353_v15 }
  0xd3   :  { %579 = vmatpush.msrb.mxu0 %v1318_v4  ;;  %599 = vmatpush.msrb.mxu1 %v1320_v5 }
  0xd4   :  { %502 = vmatpush.msra.mxu3 %v1361_v17 }
  0xd5   :  { %580 = vmatpush.msrb.mxu0 %v1325_v6  ;;  %600 = vmatpush.msrb.mxu1 %v1327_v7 }
  0xd6   :  { %503 = vmatpush.msra.mxu3 %v1371_v20 }
  0xd7   :  { %581 = vmatpush.msrb.mxu0 %v1332_v8  ;;  %601 = vmatpush.msrb.mxu1 %v1334_v9 }
  0xd8   :  { %504 = vmatpush.msra.mxu3 %v1381_v23 }
  0xd9   :  { %582 = vmatpush.msrb.mxu0 %v1343_v12  ;;  %602 = vmatpush.msrb.mxu1 %v1345_v13 }
  0xda   :  { %505 = vmatpush.msra.mxu3 %v1392_v26 }
  0xdb   :  { %583 = vmatpush.msrb.mxu0 %v1351_v14  ;;  %603 = vmatpush.msrb.mxu1 %v1355_v16 }
  0xdc   :  { %506 = vmatpush.msra.mxu3 %v1397_v28 }
  0xdd   :  { %584 = vmatpush.msrb.mxu0 %v1363_v18  ;;  %604 = vmatpush.msrb.mxu1 %v1365_v19 }
  0xde   :  { %507 = vmatpush.msra.mxu3 %v1401_v29 }
  0xdf   :  { %585 = vmatpush.msrb.mxu0 %v1373_v21  ;;  %605 = vmatpush.msrb.mxu1 %v1375_v22 }
  0xe0   :  { %508 = vmatpush.msra.mxu3 %v1407_v30 }
  0xe1   :  { %586 = vmatpush.msrb.mxu0 %v1383_v24  ;;  %606 = vmatpush.msrb.mxu1 %v1385_v25 }
 0x14a   :  { %v254_v46 = vpop.f32.mrf.mxu0 }
 0x14b   :  { %v255_v48 = vadd.f32 %v1480_v32, %v254_v46  ;;  %v274_v39 = vpop.f32.mrf.mxu1 }
 0x14c   :  { %v275_v42 = vadd.f32 %v1490_v51, %v274_v39 }
 0x14d   :  { %v301_v49 = vadd.f32 %v1053_v47, %v255_v48  ;;  %v1055_v47 = vld [vmem:[%s1795_s2 + $0x2] sm:$0x3] }
 0x14f   :  { %v1054_v50 = vmul.f32 -1.442695, %v301_v49 }
 0x150   :  { %v234_v52 = vpop.f32.mrf.mxu3 }
 0x151   :  { %1131 = vpow2.f32 %v1054_v50  ;;  %v235_v54 = vadd.f32 %v1478_v31, %v234_v52 }
 0x153   :  { %v279_v55 = vadd.f32 %v1051_v53, %v235_v54 }
 0x155   :  { %v1052_v56 = vmul.f32 -1.442695, %v279_v55 }
 0x157   :  { %v1132_v57 = vpop.eup %1131  ;;  %1133 = vpow2.f32 %v1052_v56 }
 0x158   :  { %v305_v58 = vadd.f32 1.0, %v1132_v57 }
 0x15a   :  { %1135 = vrcp.f32 %v305_v58  ;;  %v317_v48 = vand.u32 2147483648, %v305_v58  ;;  %vm311_vm15 = vweird.f32 %v305_v58  ;;  %v315_v50 = vand.u32 2147483647, %v305_v58 }
 0x15c   :  { %v318_v54 = vor.u32 1.1754944e-38, %v317_v48  ;;  %vm316_vm1 = vcmp.eq.f32.partialorder %v315_v50, 8.507059e+37 }
 0x15d   :  { %v1134_v59 = vpop.eup %1133 }
 0x15e   :  { %v283_v60 = vadd.f32 1.0, %v1134_v59 }
 0x160   :  { %1137 = vrcp.f32 %v283_v60  ;;  %v1136_v61 = vpop.eup %1135  ;;  %v295_v35 = vand.u32 2147483648, %v283_v60  ;;  %v293_v37 = vand.u32 2147483647, %v283_v60  ;;  %vm289_vm11 = vweird.f32 %v283_v60 }
 0x161   :  { %v307_v62 = vmul.f32 %v1136_v61, %v305_v58  ;;  %vm312_vm14 = vweird.f32 %v1136_v61  ;;  %v1060_v58 = vld [vmem:[%s1793_s0 + $0x4] sm:$0x3] }
 0x162   :  { %v296_v41 = vor.u32 1.1754944e-38, %v295_v35  ;;  %vm294_vm13 = vcmp.eq.f32.partialorder %v293_v37, 8.507059e+37  ;;  %vm313_vm0 = vmor %vm311_vm15, %vm312_vm14 }
 0x163   :  { %v308_v33 = vsub.f32 1.0, %v307_v62 }
 0x165   :  { %v309_v38 = vmul.f32 %v1136_v61, %v308_v33 }
 0x166   :  { %v1138_v63 = vpop.eup %1137 }
 0x167   :  { %v285_v27 = vmul.f32 %v1138_v63, %v283_v60  ;;  %vm290_vm10 = vweird.f32 %v1138_v63  ;;  %v310_v46 = vadd.f32 %v1136_v61, %v309_v38 }
 0x168   :  { %vm291_vm12 = vmor %vm289_vm11, %vm290_vm10 }
 0x169   :  { %v286_v34 = vsub.f32 1.0, %v285_v27  ;;  %v314_v53 = vsel %vm313_vm0, %v1136_v61, %v310_v46 }
 0x16a   :  { %v319_v55 = vsel %vm316_vm1, %v318_v54, %v314_v53 }
 0x16b   :  { %v287_v36 = vmul.f32 %v1138_v63, %v286_v34  ;;  %v326_v56 = vsub.f32 1.0, %v319_v55  ;;  %v328_v60 = vmul.f32 %v319_v55, %v1496_v45 }
 0x16d   :  { %v288_v40 = vadd.f32 %v1138_v63, %v287_v36 }
 0x16f   :  { %v292_v43 = vsel %vm291_vm12, %v1138_v63, %v288_v40  ;;  %v1062_v63 = vld [vmem:[%s1794_s1 + $0x4] sm:$0x3] }
 0x170   :  { %v297_v44 = vsel %vm294_vm13, %v296_v41, %v292_v43 }
 0x171   :  { %v323_v49 = vmul.f32 %v297_v44, %v275_v42 }
 0x173   :  { %v324_v52 = vadd.f32 %v1055_v47, %v323_v49 }
 0x175   :  { %1139 = vtanh.f32 %v324_v52 }
 0x17b   :  { %v1140_v57 = vpop.eup %1139 }
 0x17c   :  { %v327_v59 = vmul.f32 %v1140_v57, %v326_v56 }
 0x17e   :  { %v1552_v62 = vadd.f32 %v328_v60, %v327_v59 }
 0x180   :  { %1056 = vst.msk [vmem:[%s1798_s5 + $0x2] sm:$0x3] %vm212_vm9, %v1552_v62  ;;  %1057 = vmatmul.msk.f32.vlgmr.msrb.gmra.mxu2 %vm92_vm8, %v1552_v62  ;;  %1058 = vmatmul.msk.f32.vlgmr.msrb.gmra.mxu3 %vm92_vm8, %v1552_v62 }
 0x181   :  { %1059 = vmatmul.msk.f32.vlgmr.msra.gmra.mxu0 %vm92_vm8, %v1552_v62  ;;  %617 = vmatpush.msrb.mxu2 %v1336_v10 }
 0x182   :  { %695 = vmatpush.msrb.mxu3 %v1308_v0  ;;  %715 = vmatpush.msra.mxu0 %v1310_v1 }
 0x183   :  { %618 = vmatpush.msrb.mxu2 %v1341_v11 }
 0x184   :  { %696 = vmatpush.msrb.mxu3 %v1312_v2  ;;  %716 = vmatpush.msra.mxu0 %v1316_v3 }
 0x185   :  { %619 = vmatpush.msrb.mxu2 %v1353_v15 }
 0x186   :  { %697 = vmatpush.msrb.mxu3 %v1318_v4  ;;  %717 = vmatpush.msra.mxu0 %v1320_v5 }
 0x187   :  { %620 = vmatpush.msrb.mxu2 %v1361_v17 }
 0x188   :  { %698 = vmatpush.msrb.mxu3 %v1325_v6  ;;  %718 = vmatpush.msra.mxu0 %v1327_v7 }
 0x189   :  { %621 = vmatpush.msrb.mxu2 %v1371_v20 }
 0x18a   :  { %699 = vmatpush.msrb.mxu3 %v1332_v8  ;;  %719 = vmatpush.msra.mxu0 %v1334_v9 }
 0x18b   :  { %622 = vmatpush.msrb.mxu2 %v1381_v23 }
 0x18c   :  { %700 = vmatpush.msrb.mxu3 %v1343_v12  ;;  %720 = vmatpush.msra.mxu0 %v1345_v13 }
 0x18d   :  { %623 = vmatpush.msrb.mxu2 %v1392_v26 }
 0x18e   :  { %701 = vmatpush.msrb.mxu3 %v1351_v14  ;;  %721 = vmatpush.msra.mxu0 %v1355_v16 }
 0x18f   :  { %624 = vmatpush.msrb.mxu2 %v1397_v28 }
 0x190   :  { %702 = vmatpush.msrb.mxu3 %v1363_v18  ;;  %722 = vmatpush.msra.mxu0 %v1365_v19 }
 0x191   :  { %625 = vmatpush.msrb.mxu2 %v1401_v29 }
 0x192   :  { %703 = vmatpush.msrb.mxu3 %v1373_v21  ;;  %723 = vmatpush.msra.mxu0 %v1375_v22 }
 0x193   :  { %626 = vmatpush.msrb.mxu2 %v1407_v30 }
 0x194   :  { %704 = vmatpush.msrb.mxu3 %v1383_v24  ;;  %724 = vmatpush.msra.mxu0 %v1385_v25 }
 0x1fe   :  { %v392_v53 = vpop.f32.mrf.mxu0 }
 0x1ff   :  { %v393_v57 = vadd.f32 %v1490_v51, %v392_v53 }
 0x203   :  { %v352_v45 = vpop.f32.mrf.mxu2  ;;  %v372_v61 = vpop.f32.mrf.mxu3 }
 0x204   :  { %v353_v27 = vadd.f32 %v1478_v31, %v352_v45  ;;  %v373_v33 = vadd.f32 %v1480_v32, %v372_v61 }
 0x206   :  { %v397_v34 = vadd.f32 %v1060_v58, %v353_v27  ;;  %v419_v35 = vadd.f32 %v1062_v63, %v373_v33  ;;  %v1064_v58 = vld [vmem:[%s1795_s2 + $0x4] sm:$0x3] }
 0x208   :  { %v1061_v36 = vmul.f32 -1.442695, %v397_v34  ;;  %v1063_v37 = vmul.f32 -1.442695, %v419_v35 }
 0x20a   :  { %1141 = vpow2.f32 %v1061_v36 }
 0x20b   :  { %1143 = vpow2.f32 %v1063_v37 }
 0x210   :  { %v1142_v38 = vpop.eup %1141 }
 0x211   :  { %v1144_v39 = vpop.eup %1143  ;;  %v401_v40 = vadd.f32 1.0, %v1142_v38 }
 0x212   :  { %v423_v41 = vadd.f32 1.0, %v1144_v39 }
 0x213   :  { %1145 = vrcp.f32 %v401_v40  ;;  %v413_v48 = vand.u32 2147483648, %v401_v40  ;;  %v411_v52 = vand.u32 2147483647, %v401_v40  ;;  %vm407_vm3 = vweird.f32 %v401_v40 }
 0x214   :  { %1147 = vrcp.f32 %v423_v41  ;;  %v435_v63 = vand.u32 2147483648, %v423_v41  ;;  %vm429_vm7 = vweird.f32 %v423_v41  ;;  %v433_v27 = vand.u32 2147483647, %v423_v41 }
 0x215   :  { %v414_v56 = vor.u32 1.1754944e-38, %v413_v48  ;;  %vm412_vm5 = vcmp.eq.f32.partialorder %v411_v52, 8.507059e+37  ;;  %v1071_v48 = vld [vmem:[%s1794_s1 + $0x6] sm:$0x3] }
 0x216   :  { %v436_v35 = vor.u32 1.1754944e-38, %v435_v63  ;;  %vm434_vm11 = vcmp.eq.f32.partialorder %v433_v27, 8.507059e+37 }
 0x219   :  { %v1146_v42 = vpop.eup %1145 }
 0x21a   :  { %v1148_v43 = vpop.eup %1147  ;;  %v403_v44 = vmul.f32 %v1146_v42, %v401_v40  ;;  %vm408_vm2 = vweird.f32 %v1146_v42 }
 0x21b   :  { %v425_v46 = vmul.f32 %v1148_v43, %v423_v41  ;;  %vm409_vm4 = vmor %vm407_vm3, %vm408_vm2  ;;  %vm430_vm6 = vweird.f32 %v1148_v43  ;;  %v1069_v41 = vld [vmem:[%s1793_s0 + $0x6] sm:$0x3] }
 0x21c   :  { %v404_v47 = vsub.f32 1.0, %v403_v44  ;;  %vm431_vm10 = vmor %vm429_vm7, %vm430_vm6 }
 0x21d   :  { %v426_v49 = vsub.f32 1.0, %v425_v46 }
 0x21e   :  { %v405_v50 = vmul.f32 %v1146_v42, %v404_v47 }
 0x21f   :  { %v427_v54 = vmul.f32 %v1148_v43, %v426_v49 }
 0x220   :  { %v406_v55 = vadd.f32 %v1146_v42, %v405_v50 }
 0x221   :  { %v428_v45 = vadd.f32 %v1148_v43, %v427_v54 }
 0x222   :  { %v410_v59 = vsel %vm409_vm4, %v1146_v42, %v406_v55 }
 0x223   :  { %v415_v60 = vsel %vm412_vm5, %v414_v56, %v410_v59  ;;  %v432_v34 = vsel %vm431_vm10, %v1148_v43, %v428_v45 }
 0x224   :  { %v441_v61 = vmul.f32 %v415_v60, %v393_v57  ;;  %v437_v36 = vsel %vm434_vm11, %v436_v35, %v432_v34 }
 0x225   :  { %v444_v37 = vsub.f32 1.0, %v437_v36  ;;  %v446_v40 = vmul.f32 %v437_v36, %v1552_v62 }
 0x226   :  { %v442_v33 = vadd.f32 %v1064_v58, %v441_v61 }
 0x228   :  { %1149 = vtanh.f32 %v442_v33 }
 0x22e   :  { %v1150_v38 = vpop.eup %1149 }
 0x22f   :  { %v445_v39 = vmul.f32 %v1150_v38, %v444_v37 }
 0x231   :  { %v1608_v42 = vadd.f32 %v446_v40, %v445_v39  ;;  %v1073_v40 = vld [vmem:[%s1795_s2 + $0x6] sm:$0x3] }
 0x233   :  { %1065 = vst.msk [vmem:[%s1798_s5 + $0x4] sm:$0x3] %vm212_vm9, %v1608_v42  ;;  %1066 = vmatmul.msk.f32.vlgmr.msra.gmra.mxu1 %vm92_vm8, %v1608_v42  ;;  %1067 = vmatmul.msk.f32.vlgmr.msra.gmra.mxu2 %vm92_vm8, %v1608_v42 }
 0x234   :  { %1068 = vmatmul.msk.f32.vlgmr.msra.gmra.mxu3 %vm92_vm8, %v1608_v42  ;;  %735 = vmatpush.msra.mxu1 %v1336_v10 }
 0x235   :  { %813 = vmatpush.msra.mxu2 %v1308_v0  ;;  %833 = vmatpush.msra.mxu3 %v1310_v1 }
 0x236   :  { %736 = vmatpush.msra.mxu1 %v1341_v11 }
 0x237   :  { %814 = vmatpush.msra.mxu2 %v1312_v2  ;;  %834 = vmatpush.msra.mxu3 %v1316_v3 }
 0x238   :  { %737 = vmatpush.msra.mxu1 %v1353_v15 }
 0x239   :  { %815 = vmatpush.msra.mxu2 %v1318_v4  ;;  %835 = vmatpush.msra.mxu3 %v1320_v5 }
 0x23a   :  { %738 = vmatpush.msra.mxu1 %v1361_v17 }
 0x23b   :  { %816 = vmatpush.msra.mxu2 %v1325_v6  ;;  %836 = vmatpush.msra.mxu3 %v1327_v7 }
 0x23c   :  { %739 = vmatpush.msra.mxu1 %v1371_v20 }
 0x23d   :  { %817 = vmatpush.msra.mxu2 %v1332_v8  ;;  %837 = vmatpush.msra.mxu3 %v1334_v9 }
 0x23e   :  { %740 = vmatpush.msra.mxu1 %v1381_v23 }
 0x23f   :  { %818 = vmatpush.msra.mxu2 %v1343_v12  ;;  %838 = vmatpush.msra.mxu3 %v1345_v13 }
 0x240   :  { %741 = vmatpush.msra.mxu1 %v1392_v26 }
 0x241   :  { %819 = vmatpush.msra.mxu2 %v1351_v14  ;;  %839 = vmatpush.msra.mxu3 %v1355_v16 }
 0x242   :  { %742 = vmatpush.msra.mxu1 %v1397_v28 }
 0x243   :  { %820 = vmatpush.msra.mxu2 %v1363_v18  ;;  %840 = vmatpush.msra.mxu3 %v1365_v19 }
 0x244   :  { %743 = vmatpush.msra.mxu1 %v1401_v29 }
 0x245   :  { %821 = vmatpush.msra.mxu2 %v1373_v21  ;;  %841 = vmatpush.msra.mxu3 %v1375_v22 }
 0x246   :  { %744 = vmatpush.msra.mxu1 %v1407_v30 }
 0x247   :  { %822 = vmatpush.msra.mxu2 %v1383_v24  ;;  %842 = vmatpush.msra.mxu3 %v1385_v25 }
 0x2b0   :  { %v470_v62 = vpop.f32.mrf.mxu1 }
 0x2b1   :  { %v471_v43 = vadd.f32 %v1478_v31, %v470_v62 }
 0x2b3   :  { %v515_v44 = vadd.f32 %v1069_v41, %v471_v43 }
 0x2b5   :  { %v1070_v46 = vmul.f32 -1.442695, %v515_v44 }
 0x2b6   :  { %v490_v47 = vpop.f32.mrf.mxu2 }
 0x2b7   :  { %1151 = vpow2.f32 %v1070_v46  ;;  %v491_v49 = vadd.f32 %v1480_v32, %v490_v47  ;;  %v510_v27 = vpop.f32.mrf.mxu3 }
 0x2b8   :  { %v511_v37 = vadd.f32 %v1490_v51, %v510_v27 }
 0x2b9   :  { %v537_v50 = vadd.f32 %v1071_v48, %v491_v49 }
 0x2bb   :  { %v1072_v52 = vmul.f32 -1.442695, %v537_v50 }
 0x2bd   :  { %v1152_v53 = vpop.eup %1151  ;;  %1153 = vpow2.f32 %v1072_v52 }
 0x2be   :  { %v519_v54 = vadd.f32 1.0, %v1152_v53 }
 0x2c0   :  { %1155 = vrcp.f32 %v519_v54  ;;  %v531_v45 = vand.u32 2147483648, %v519_v54  ;;  %v529_v61 = vand.u32 2147483647, %v519_v54  ;;  %vm525_vm13 = vweird.f32 %v519_v54 }
 0x2c2   :  { %v532_v35 = vor.u32 1.1754944e-38, %v531_v45  ;;  %vm530_vm15 = vcmp.eq.f32.partialorder %v529_v61, 8.507059e+37 }
 0x2c3   :  { %v1154_v55 = vpop.eup %1153 }
 0x2c4   :  { %v541_v56 = vadd.f32 1.0, %v1154_v55 }
 0x2c6   :  { %v1156_v57 = vpop.eup %1155  ;;  %1157 = vrcp.f32 %v541_v56  ;;  %v553_v41 = vand.u32 2147483648, %v541_v56  ;;  %v551_v44 = vand.u32 2147483647, %v541_v56  ;;  %vm547_vm1 = vweird.f32 %v541_v56 }
 0x2c7   :  { %v521_v59 = vmul.f32 %v1156_v57, %v519_v54  ;;  %vm526_vm12 = vweird.f32 %v1156_v57 }
 0x2c8   :  { %vm527_vm14 = vmor %vm525_vm13, %vm526_vm12  ;;  %v554_v48 = vor.u32 1.1754944e-38, %v553_v41  ;;  %vm552_vm3 = vcmp.eq.f32.partialorder %v551_v44, 8.507059e+37  ;;  %v1204_v41 = vld [vmem:[#allocation2 + $0xd0] sm:$0xff]  ;;  %v1206_v44 = vld [vmem:[#allocation2 + $0xc0] sm:$0xff] }
 0x2c9   :  { %v522_v60 = vsub.f32 1.0, %v521_v59  ;;  %v1082_v59 = vld [vmem:[%s1795_s2 + $0x8] sm:$0x3] }
 0x2cb   :  { %v523_v58 = vmul.f32 %v1156_v57, %v522_v60 }
 0x2cc   :  { %v1158_v63 = vpop.eup %1157 }
 0x2cd   :  { %v543_v33 = vmul.f32 %v1158_v63, %v541_v56  ;;  %v524_v34 = vadd.f32 %v1156_v57, %v523_v58  ;;  %vm548_vm0 = vweird.f32 %v1158_v63 }
 0x2ce   :  { %vm549_vm2 = vmor %vm547_vm1, %vm548_vm0 }
 0x2cf   :  { %v544_v36 = vsub.f32 1.0, %v543_v33  ;;  %v528_v38 = vsel %vm527_vm14, %v1156_v57, %v524_v34 }
 0x2d0   :  { %v533_v39 = vsel %vm530_vm15, %v532_v35, %v528_v38 }
 0x2d1   :  { %v545_v62 = vmul.f32 %v1158_v63, %v544_v36  ;;  %v559_v43 = vmul.f32 %v533_v39, %v511_v37  ;;  %v1201_v39 = vld [vmem:[#allocation2 + $0xe8] sm:$0xff] }
 0x2d3   :  { %v546_v46 = vadd.f32 %v1158_v63, %v545_v62  ;;  %v560_v47 = vadd.f32 %v1073_v40, %v559_v43  ;;  %v1202_v40 = vld [vmem:[#allocation2 + $0xe0] sm:$0xff]  ;;  %v1203_v62 = vld [vmem:[#allocation2 + $0xd8] sm:$0xff]  ;;  %v1205_v43 = vld [vmem:[#allocation2 + $0xc8] sm:$0xff] }
 0x2d5   :  { %v550_v49 = vsel %vm549_vm2, %v1158_v63, %v546_v46  ;;  %1159 = vtanh.f32 %v560_v47  ;;  %v1207_v46 = vld [vmem:[#allocation2 + $0xb8] sm:$0xff]  ;;  %v1208_v47 = vld [vmem:[#allocation2 + $0xb0] sm:$0xff] }
 0x2d6   :  { %v555_v50 = vsel %vm552_vm3, %v554_v48, %v550_v49  ;;  %v1209_v48 = vld [vmem:[#allocation2 + $0xa8] sm:$0xff] }
 0x2d7   :  { %v562_v52 = vsub.f32 1.0, %v555_v50  ;;  %v564_v55 = vmul.f32 %v555_v50, %v1608_v42  ;;  %v1089_v50 = vld [vmem:[%s1794_s1 + $0xa] sm:$0x3] }
 0x2db   :  { %v1160_v53 = vpop.eup %1159 }
 0x2dc   :  { %v563_v54 = vmul.f32 %v1160_v53, %v562_v52 }
 0x2de   :  { %v1664_v57 = vadd.f32 %v564_v55, %v563_v54 }
 0x2e0   :  { %1074 = vst.msk [vmem:[%s1798_s5 + $0x6] sm:$0x3] %vm212_vm9, %v1664_v57  ;;  %1075 = vmatmul.msk.f32.vlgmr.msrb.gmra.mxu0 %vm92_vm8, %v1664_v57  ;;  %1076 = vmatmul.msk.f32.vlgmr.msrb.gmra.mxu1 %vm92_vm8, %v1664_v57 }
 0x2e1   :  { %1077 = vmatmul.msk.f32.vlgmr.msrb.gmra.mxu2 %vm92_vm8, %v1664_v57  ;;  %853 = vmatpush.msrb.mxu0 %v1336_v10 }
 0x2e2   :  { %931 = vmatpush.msrb.mxu1 %v1308_v0  ;;  %951 = vmatpush.msrb.mxu2 %v1310_v1  ;;  %v1078_v1 = vld [vmem:[%s1793_s0 + $0x8] sm:$0x3] }
 0x2e3   :  { %854 = vmatpush.msrb.mxu0 %v1341_v11 }
 0x2e4   :  { %932 = vmatpush.msrb.mxu1 %v1312_v2  ;;  %952 = vmatpush.msrb.mxu2 %v1316_v3  ;;  %v1080_v3 = vld [vmem:[%s1794_s1 + $0x8] sm:$0x3] }
 0x2e5   :  { %855 = vmatpush.msrb.mxu0 %v1353_v15 }
 0x2e6   :  { %933 = vmatpush.msrb.mxu1 %v1318_v4  ;;  %953 = vmatpush.msrb.mxu2 %v1320_v5 }
 0x2e7   :  { %856 = vmatpush.msrb.mxu0 %v1361_v17 }
 0x2e8   :  { %934 = vmatpush.msrb.mxu1 %v1325_v6  ;;  %954 = vmatpush.msrb.mxu2 %v1327_v7 }
 0x2e9   :  { %857 = vmatpush.msrb.mxu0 %v1371_v20 }
 0x2ea   :  { %935 = vmatpush.msrb.mxu1 %v1332_v8  ;;  %955 = vmatpush.msrb.mxu2 %v1334_v9 }
 0x2eb   :  { %858 = vmatpush.msrb.mxu0 %v1381_v23 }
 0x2ec   :  { %936 = vmatpush.msrb.mxu1 %v1343_v12  ;;  %956 = vmatpush.msrb.mxu2 %v1345_v13 }
 0x2ed   :  { %859 = vmatpush.msrb.mxu0 %v1392_v26 }
 0x2ee   :  { %937 = vmatpush.msrb.mxu1 %v1351_v14  ;;  %957 = vmatpush.msrb.mxu2 %v1355_v16 }
 0x2ef   :  { %860 = vmatpush.msrb.mxu0 %v1397_v28 }
 0x2f0   :  { %938 = vmatpush.msrb.mxu1 %v1363_v18  ;;  %958 = vmatpush.msrb.mxu2 %v1365_v19 }
 0x2f1   :  { %861 = vmatpush.msrb.mxu0 %v1401_v29 }
 0x2f2   :  { %939 = vmatpush.msrb.mxu1 %v1373_v21  ;;  %959 = vmatpush.msrb.mxu2 %v1375_v22 }
 0x2f3   :  { %862 = vmatpush.msrb.mxu0 %v1407_v30 }
 0x2f4   :  { %940 = vmatpush.msrb.mxu1 %v1383_v24  ;;  %960 = vmatpush.msrb.mxu2 %v1385_v25 }
 0x35d   :  { %v588_v0 = vpop.f32.mrf.mxu0  ;;  %v608_v2 = vpop.f32.mrf.mxu1 }
 0x35e   :  { %v589_v4 = vadd.f32 %v1478_v31, %v588_v0  ;;  %v609_v5 = vadd.f32 %v1480_v32, %v608_v2 }
 0x360   :  { %v633_v6 = vadd.f32 %v1078_v1, %v589_v4  ;;  %v655_v7 = vadd.f32 %v1080_v3, %v609_v5 }
 0x362   :  { %v1079_v8 = vmul.f32 -1.442695, %v633_v6  ;;  %v1081_v9 = vmul.f32 -1.442695, %v655_v7 }
 0x364   :  { %1161 = vpow2.f32 %v1079_v8  ;;  %v628_v24 = vpop.f32.mrf.mxu2 }
 0x365   :  { %1163 = vpow2.f32 %v1081_v9  ;;  %v629_v28 = vadd.f32 %v1490_v51, %v628_v24 }
 0x36a   :  { %v1162_v10 = vpop.eup %1161 }
 0x36b   :  { %v1164_v11 = vpop.eup %1163  ;;  %v637_v12 = vadd.f32 1.0, %v1162_v10 }
 0x36c   :  { %v659_v13 = vadd.f32 1.0, %v1164_v11 }
 0x36d   :  { %1165 = vrcp.f32 %v637_v12  ;;  %v649_v20 = vand.u32 2147483648, %v637_v12  ;;  %v647_v22 = vand.u32 2147483647, %v637_v12  ;;  %vm643_vm5 = vweird.f32 %v637_v12 }
 0x36e   :  { %1167 = vrcp.f32 %v659_v13  ;;  %v671_v60 = vand.u32 2147483648, %v659_v13  ;;  %vm665_vm11 = vweird.f32 %v659_v13  ;;  %v669_v58 = vand.u32 2147483647, %v659_v13 }
 0x36f   :  { %v650_v26 = vor.u32 1.1754944e-38, %v649_v20  ;;  %vm648_vm7 = vcmp.eq.f32.partialorder %v647_v22, 8.507059e+37 }
 0x370   :  { %v672_v27 = vor.u32 1.1754944e-38, %v671_v60  ;;  %vm670_vm13 = vcmp.eq.f32.partialorder %v669_v58, 8.507059e+37 }
 0x373   :  { %v1166_v14 = vpop.eup %1165 }
 0x374   :  { %v1168_v15 = vpop.eup %1167  ;;  %v639_v16 = vmul.f32 %v1166_v14, %v637_v12  ;;  %vm644_vm4 = vweird.f32 %v1166_v14 }
 0x375   :  { %v661_v17 = vmul.f32 %v1168_v15, %v659_v13  ;;  %vm645_vm6 = vmor %vm643_vm5, %vm644_vm4  ;;  %vm666_vm10 = vweird.f32 %v1168_v15 }
 0x376   :  { %v640_v18 = vsub.f32 1.0, %v639_v16  ;;  %vm667_vm12 = vmor %vm665_vm11, %vm666_vm10 }
 0x377   :  { %v662_v19 = vsub.f32 1.0, %v661_v17 }
 0x378   :  { %v641_v21 = vmul.f32 %v1166_v14, %v640_v18 }
 0x379   :  { %v663_v23 = vmul.f32 %v1168_v15, %v662_v19 }
 0x37a   :  { %v642_v25 = vadd.f32 %v1166_v14, %v641_v21 }
 0x37b   :  { %v664_v56 = vadd.f32 %v1168_v15, %v663_v23  ;;  %v1091_v23 = vld [vmem:[%s1795_s2 + $0xa] sm:$0x3] }
 0x37c   :  { %v646_v29 = vsel %vm645_vm6, %v1166_v14, %v642_v25 }
 0x37d   :  { %v651_v42 = vsel %vm648_vm7, %v650_v26, %v646_v29  ;;  %v668_v63 = vsel %vm667_vm12, %v1168_v15, %v664_v56 }
 0x37e   :  { %v677_v45 = vmul.f32 %v651_v42, %v629_v28  ;;  %v673_v33 = vsel %vm670_vm13, %v672_v27, %v668_v63  ;;  %v1096_v27 = vld [vmem:[%s1793_s0 + $0xc] sm:$0x3] }
 0x37f   :  { %v680_v34 = vsub.f32 1.0, %v673_v33  ;;  %v682_v37 = vmul.f32 %v673_v33, %v1664_v57  ;;  %v1087_v57 = vld [vmem:[%s1793_s0 + $0xa] sm:$0x3] }
 0x380   :  { %v678_v61 = vadd.f32 %v1082_v59, %v677_v45 }
 0x382   :  { %1169 = vtanh.f32 %v678_v61 }
 0x388   :  { %v1170_v35 = vpop.eup %1169 }
 0x389   :  { %v681_v36 = vmul.f32 %v1170_v35, %v680_v34  ;;  %v1098_v34 = vld [vmem:[%s1794_s1 + $0xc] sm:$0x3] }
 0x38b   :  { %v1720_v38 = vadd.f32 %v682_v37, %v681_v36 }
 0x38d   :  { %1083 = vst.msk [vmem:[%s1798_s5 + $0x8] sm:$0x3] %vm212_vm9, %v1720_v38  ;;  %1084 = vmatmul.msk.f32.vlgmr.msrb.gmra.mxu3 %vm92_vm8, %v1720_v38  ;;  %1085 = vmatmul.msk.f32.vlgmr.msra.gmra.mxu0 %vm92_vm8, %v1720_v38 }
 0x38e   :  { %1086 = vmatmul.msk.f32.vlgmr.msra.gmra.mxu1 %vm92_vm8, %v1720_v38  ;;  %971 = vmatpush.msrb.mxu3 %v1201_v39 }
 0x390   :  { %972 = vmatpush.msrb.mxu3 %v1202_v40 }
 0x392   :  { %973 = vmatpush.msrb.mxu3 %v1203_v62 }
 0x394   :  { %974 = vmatpush.msrb.mxu3 %v1204_v41 }
 0x396   :  { %975 = vmatpush.msrb.mxu3 %v1205_v43 }
 0x398   :  { %976 = vmatpush.msrb.mxu3 %v1206_v44 }
 0x39a   :  { %977 = vmatpush.msrb.mxu3 %v1207_v46 }
 0x39c   :  { %978 = vmatpush.msrb.mxu3 %v1208_v47 }
 0x39e   :  { %979 = vmatpush.msrb.mxu3 %v1209_v48 }
 0x3a0   :  { %980 = vmatpush.msrb.mxu3 %v1407_v30 }
 0x40a   :  { %v726_v49 = vpop.f32.mrf.mxu0 }
 0x40b   :  { %v727_v52 = vadd.f32 %v1480_v32, %v726_v49  ;;  %v746_v16 = vpop.f32.mrf.mxu1 }
 0x40c   :  { %v747_v19 = vadd.f32 %v1490_v51, %v746_v16 }
 0x40d   :  { %v773_v53 = vadd.f32 %v1089_v50, %v727_v52 }
 0x40f   :  { %v1090_v54 = vmul.f32 -1.442695, %v773_v53 }
 0x410   :  { %v706_v55 = vpop.f32.mrf.mxu3 }
 0x411   :  { %1171 = vpow2.f32 %v1090_v54  ;;  %v707_v0 = vadd.f32 %v1478_v31, %v706_v55 }
 0x413   :  { %v751_v1 = vadd.f32 %v1087_v57, %v707_v0 }
 0x415   :  { %v1088_v2 = vmul.f32 -1.442695, %v751_v1 }
 0x417   :  { %v1172_v30 = vpop.eup %1171  ;;  %1173 = vpow2.f32 %v1088_v2 }
 0x418   :  { %v777_v3 = vadd.f32 1.0, %v1172_v30 }
 0x41a   :  { %1175 = vrcp.f32 %v777_v3  ;;  %v789_v24 = vand.u32 2147483648, %v777_v3  ;;  %vm783_vm3 = vweird.f32 %v777_v3  ;;  %v787_v26 = vand.u32 2147483647, %v777_v3 }
 0x41c   :  { %v790_v42 = vor.u32 1.1754944e-38, %v789_v24  ;;  %vm788_vm5 = vcmp.eq.f32.partialorder %v787_v26, 8.507059e+37  ;;  %v1211_v24 = vld [vmem:[#allocation4 + $0x1] ss:$0 sm:$0xff] }
 0x41d   :  { %v1174_v4 = vpop.eup %1173 }
 0x41e   :  { %v755_v5 = vadd.f32 1.0, %v1174_v4  ;;  %v1100_v4 = vld [vmem:[%s1795_s2 + $0xc] sm:$0x3] }
 0x420   :  { %1177 = vrcp.f32 %v755_v5  ;;  %v1176_v6 = vpop.eup %1175  ;;  %v767_v12 = vand.u32 2147483648, %v755_v5  ;;  %v765_v14 = vand.u32 2147483647, %v755_v5  ;;  %vm761_vm15 = vweird.f32 %v755_v5 }
 0x421   :  { %v779_v7 = vmul.f32 %v1176_v6, %v777_v3  ;;  %vm784_vm2 = vweird.f32 %v1176_v6 }
 0x422   :  { %v768_v18 = vor.u32 1.1754944e-38, %v767_v12  ;;  %vm766_vm1 = vcmp.eq.f32.partialorder %v765_v14, 8.507059e+37  ;;  %vm785_vm4 = vmor %vm783_vm3, %vm784_vm2 }
 0x423   :  { %v780_v10 = vsub.f32 1.0, %v779_v7 }
 0x425   :  { %v781_v15 = vmul.f32 %v1176_v6, %v780_v10 }
 0x426   :  { %v1178_v8 = vpop.eup %1177 }
 0x427   :  { %v757_v9 = vmul.f32 %v1178_v8, %v755_v5  ;;  %vm762_vm14 = vweird.f32 %v1178_v8  ;;  %v782_v22 = vadd.f32 %v1176_v6, %v781_v15 }
 0x428   :  { %vm763_vm0 = vmor %vm761_vm15, %vm762_vm14 }
 0x429   :  { %v758_v11 = vsub.f32 1.0, %v757_v9  ;;  %v786_v29 = vsel %vm785_vm4, %v1176_v6, %v782_v22 }
 0x42a   :  { %v791_v56 = vsel %vm788_vm5, %v790_v42, %v786_v29 }
 0x42b   :  { %v759_v13 = vmul.f32 %v1178_v8, %v758_v11  ;;  %v798_v59 = vsub.f32 1.0, %v791_v56  ;;  %v800_v58 = vmul.f32 %v791_v56, %v1720_v38 }
 0x42d   :  { %v760_v17 = vadd.f32 %v1178_v8, %v759_v13 }
 0x42f   :  { %v764_v20 = vsel %vm763_vm0, %v1178_v8, %v760_v17  ;;  %v1105_v17 = vld [vmem:[%s1793_s0 + $0xe] sm:$0x3] }
 0x430   :  { %v769_v21 = vsel %vm766_vm1, %v768_v18, %v764_v20  ;;  %v1210_v18 = vld [vmem:[#allocation4] ss:$0 sm:$0xff] }
 0x431   :  { %v795_v25 = vmul.f32 %v769_v21, %v747_v19 }
 0x433   :  { %v796_v28 = vadd.f32 %v1091_v23, %v795_v25  ;;  %v1107_v23 = vld [vmem:[%s1794_s1 + $0xe] sm:$0x3] }
 0x435   :  { %1179 = vtanh.f32 %v796_v28 }
 0x43b   :  { %v1180_v60 = vpop.eup %1179 }
 0x43c   :  { %v799_v45 = vmul.f32 %v1180_v60, %v798_v59 }
 0x43e   :  { %v801_v61 = vadd.f32 %v800_v58, %v799_v45 }
 0x440   :  { %1092 = vst.msk [vmem:[%s1798_s5 + $0xa] sm:$0x3] %vm212_vm9, %v801_v61  ;;  %1093 = vmatmul.msk.f32.vlgmr.msra.gmra.mxu2 %vm92_vm8, %v801_v61  ;;  %1094 = vmatmul.msk.f32.vlgmr.msra.gmra.mxu3 %vm92_vm8, %v801_v61 }
 0x441   :  { %1095 = vmatmul.msk.f32.vlgmr.msrb.gmra.mxu0 %vm92_vm8, %v801_v61 }
 0x4be   :  { %v864_v54 = vpop.f32.mrf.mxu0 }
 0x4bf   :  { %v865_v1 = vadd.f32 %v1490_v51, %v864_v54 }
 0x4c3   :  { %v824_v63 = vpop.f32.mrf.mxu2  ;;  %v844_v33 = vpop.f32.mrf.mxu3 }
 0x4c4   :  { %v825_v35 = vadd.f32 %v1478_v31, %v824_v63  ;;  %v845_v36 = vadd.f32 %v1480_v32, %v844_v33 }
 0x4c6   :  { %v869_v37 = vadd.f32 %v1096_v27, %v825_v35  ;;  %v891_v38 = vadd.f32 %v1098_v34, %v845_v36 }
 0x4c8   :  { %v1097_v39 = vmul.f32 -1.442695, %v869_v37  ;;  %v1099_v40 = vmul.f32 -1.442695, %v891_v38 }
 0x4ca   :  { %1181 = vpow2.f32 %v1097_v39  ;;  %v1212_v39 = vld [vmem:[#allocation4 + $0x2] ss:$0 sm:$0xff] }
 0x4cb   :  { %1183 = vpow2.f32 %v1099_v40 }
 0x4d0   :  { %v1182_v62 = vpop.eup %1181 }
 0x4d1   :  { %v1184_v41 = vpop.eup %1183  ;;  %v873_v43 = vadd.f32 1.0, %v1182_v62 }
 0x4d2   :  { %v895_v44 = vadd.f32 1.0, %v1184_v41 }
 0x4d3   :  { %1185 = vrcp.f32 %v873_v43  ;;  %v885_v31 = vand.u32 2147483648, %v873_v43  ;;  %v883_v53 = vand.u32 2147483647, %v873_v43  ;;  %vm879_vm7 = vweird.f32 %v873_v43 }
 0x4d4   :  { %1187 = vrcp.f32 %v895_v44  ;;  %v907_v6 = vand.u32 2147483648, %v895_v44  ;;  %vm901_vm13 = vweird.f32 %v895_v44  ;;  %v905_v7 = vand.u32 2147483647, %v895_v44 }
 0x4d5   :  { %v886_v0 = vor.u32 1.1754944e-38, %v885_v31  ;;  %vm884_vm11 = vcmp.eq.f32.partialorder %v883_v53, 8.507059e+37 }
 0x4d6   :  { %v908_v10 = vor.u32 1.1754944e-38, %v907_v6  ;;  %vm906_vm15 = vcmp.eq.f32.partialorder %v905_v7, 8.507059e+37 }
 0x4d9   :  { %v1186_v46 = vpop.eup %1185 }
 0x4da   :  { %v1188_v47 = vpop.eup %1187  ;;  %v875_v48 = vmul.f32 %v1186_v46, %v873_v43  ;;  %vm880_vm6 = vweird.f32 %v1186_v46  ;;  %v1109_v43 = vld [vmem:[%s1795_s2 + $0xe] sm:$0x3] }
 0x4db   :  { %v897_v49 = vmul.f32 %v1188_v47, %v895_v44  ;;  %vm881_vm10 = vmor %vm879_vm7, %vm880_vm6  ;;  %vm902_vm12 = vweird.f32 %v1188_v47 }
 0x4dc   :  { %v876_v50 = vsub.f32 1.0, %v875_v48  ;;  %vm903_vm14 = vmor %vm901_vm13, %vm902_vm12 }
 0x4dd   :  { %v898_v52 = vsub.f32 1.0, %v897_v49 }
 0x4de   :  { %v877_v32 = vmul.f32 %v1186_v46, %v876_v50 }
 0x4df   :  { %v899_v55 = vmul.f32 %v1188_v47, %v898_v52 }
 0x4e0   :  { %v878_v57 = vadd.f32 %v1186_v46, %v877_v32 }
 0x4e1   :  { %v900_v3 = vadd.f32 %v1188_v47, %v899_v55 }
 0x4e2   :  { %v882_v2 = vsel %vm881_vm10, %v1186_v46, %v878_v57 }
 0x4e3   :  { %v887_v30 = vsel %vm884_vm11, %v886_v0, %v882_v2  ;;  %v904_v9 = vsel %vm903_vm14, %v1188_v47, %v900_v3 }
 0x4e4   :  { %v913_v5 = vmul.f32 %v887_v30, %v865_v1  ;;  %v909_v51 = vsel %vm906_vm15, %v908_v10, %v904_v9 }
 0x4e5   :  { %v916_v11 = vsub.f32 1.0, %v909_v51  ;;  %v918_v14 = vmul.f32 %v909_v51, %v801_v61 }
 0x4e6   :  { %v914_v8 = vadd.f32 %v1100_v4, %v913_v5 }
 0x4e8   :  { %1189 = vtanh.f32 %v914_v8 }
 0x4ee   :  { %v1190_v12 = vpop.eup %1189 }
 0x4ef   :  { %v917_v13 = vmul.f32 %v1190_v12, %v916_v11 }
 0x4f1   :  { %v1766_v15 = vadd.f32 %v918_v14, %v917_v13 }
 0x4f3   :  { %1101 = vst.msk [vmem:[%s1798_s5 + $0xc] sm:$0x3] %vm212_vm9, %v1766_v15  ;;  %1102 = vmatmul.msk.f32.vlgmr.msrb.gmra.mxu1 %vm92_vm8, %v1766_v15  ;;  %1103 = vmatmul.msk.f32.vlgmr.msrb.gmra.mxu2 %vm92_vm8, %v1766_v15 }
 0x4f4   :  { %1104 = vmatmul.msk.f32.vlgmr.msrb.gmra.mxu3 %vm92_vm8, %v1766_v15 }
 0x570   :  { %v942_v16 = vpop.f32.mrf.mxu1 }
 0x571   :  { %v943_v19 = vadd.f32 %v1210_v18, %v942_v16 }
 0x573   :  { %v987_v20 = vadd.f32 %v1105_v17, %v943_v19 }
 0x575   :  { %v1106_v21 = vmul.f32 -1.442695, %v987_v20 }
 0x576   :  { %v962_v22 = vpop.f32.mrf.mxu2 }
 0x577   :  { %1191 = vpow2.f32 %v1106_v21  ;;  %v963_v25 = vadd.f32 %v1211_v24, %v962_v22  ;;  %v982_v34 = vpop.f32.mrf.mxu3 }
 0x578   :  { %v983_v40 = vadd.f32 %v1212_v39, %v982_v34 }
 0x579   :  { %v1009_v26 = vadd.f32 %v1107_v23, %v963_v25 }
 0x57b   :  { %v1108_v28 = vmul.f32 -1.442695, %v1009_v26 }
 0x57d   :  { %v1192_v29 = vpop.eup %1191  ;;  %1193 = vpow2.f32 %v1108_v28 }
 0x57e   :  { %v991_v42 = vadd.f32 1.0, %v1192_v29 }
 0x580   :  { %1195 = vrcp.f32 %v991_v42  ;;  %v1003_v61 = vand.u32 2147483648, %v991_v42  ;;  %v1001_v27 = vand.u32 2147483647, %v991_v42  ;;  %vm997_vm0 = vweird.f32 %v991_v42 }
 0x582   :  { %v1004_v37 = vor.u32 1.1754944e-38, %v1003_v61  ;;  %vm1002_vm2 = vcmp.eq.f32.partialorder %v1001_v27, 8.507059e+37 }
 0x583   :  { %v1194_v56 = vpop.eup %1193 }
 0x584   :  { %v1013_v59 = vadd.f32 1.0, %v1194_v56 }
 0x586   :  { %v1196_v60 = vpop.eup %1195  ;;  %1197 = vrcp.f32 %v1013_v59  ;;  %v1025_v46 = vand.u32 2147483648, %v1013_v59  ;;  %v1023_v48 = vand.u32 2147483647, %v1013_v59  ;;  %vm1019_vm4 = vweird.f32 %v1013_v59 }
 0x587   :  { %v993_v45 = vmul.f32 %v1196_v60, %v991_v42  ;;  %vm998_vm8 = vweird.f32 %v1196_v60 }
 0x588   :  { %vm999_vm1 = vmor %vm997_vm0, %vm998_vm8  ;;  %v1026_v31 = vor.u32 1.1754944e-38, %v1025_v46  ;;  %vm1024_vm6 = vcmp.eq.f32.partialorder %v1023_v48, 8.507059e+37 }
 0x589   :  { %v994_v58 = vsub.f32 1.0, %v993_v45 }
 0x58b   :  { %v995_v63 = vmul.f32 %v1196_v60, %v994_v58 }
 0x58c   :  { %v1198_v33 = vpop.eup %1197 }
 0x58d   :  { %v1015_v35 = vmul.f32 %v1198_v33, %v1013_v59  ;;  %v996_v36 = vadd.f32 %v1196_v60, %v995_v63  ;;  %vm1020_vm3 = vweird.f32 %v1198_v33 }
 0x58e   :  { %vm1021_vm5 = vmor %vm1019_vm4, %vm1020_vm3 }
 0x58f   :  { %v1016_v38 = vsub.f32 1.0, %v1015_v35  ;;  %v1000_v62 = vsel %vm999_vm1, %v1196_v60, %v996_v36 }
 0x590   :  { %v1005_v41 = vsel %vm1002_vm2, %v1004_v37, %v1000_v62 }
 0x591   :  { %v1017_v44 = vmul.f32 %v1198_v33, %v1016_v38  ;;  %v1031_v47 = vmul.f32 %v1005_v41, %v983_v40 }
 0x593   :  { %v1018_v49 = vadd.f32 %v1198_v33, %v1017_v44  ;;  %v1032_v50 = vadd.f32 %v1109_v43, %v1031_v47 }
 0x595   :  { %v1022_v52 = vsel %vm1021_vm5, %v1198_v33, %v1018_v49  ;;  %1199 = vtanh.f32 %v1032_v50 }
 0x596   :  { %v1027_v32 = vsel %vm1024_vm6, %v1026_v31, %v1022_v52 }
 0x597   :  { %v1034_v53 = vsub.f32 1.0, %v1027_v32  ;;  %v1036_v57 = vmul.f32 %v1027_v32, %v1766_v15 }
 0x59b   :  { %v1200_v54 = vpop.eup %1199 }
 0x59c   :  { %v1035_v55 = vmul.f32 %v1200_v54, %v1034_v53 }
 0x59e   :  { %v1037_v0 = vadd.f32 %v1036_v57, %v1035_v55 }
 0x5a0   :  { %1110 = vst.msk [vmem:[%s1798_s5 + $0xe] sm:$0x3] %vm212_vm9, %v1037_v0 }
 0x5a1   :  { %1044 = vsyncpa [#allocation3], 1 }
 0x5a2   :  { %1045 = vsyncpa [#allocation5], 1 }

// kernel: cmla_forward.13
= control target key start
LH: loop header
LB: loop body
LE: loop exit
PB: predicated region body
PF: predicated region fallthrough
CT: control target
= control target key end

     0   :  { %8 = vsyncpa [#allocation3], 0  ;;  %s234_s15 = smov [#allocation2]   ;;  %s282_s0 = inlined_call_operand.vmem [shape: f32[2,8,100], index: 0, kind: input, shape index: {}]   ;;  %s283_s1 = inlined_call_operand.vmem [shape: f32[2,8,80], index: 1, kind: input, shape index: {}]   ;;  %s284_s2 = inlined_call_operand.hbm [shape: f32[2,80], index: 2, kind: input, shape index: {}]   ;;  %s285_s3 = inlined_call_operand.vmem [shape: f32[2,2,100], index: 3, kind: output, shape index: {}]  }
   0x1   :  { %s18_s14 = sshll.u32 %s284_s2, 4  ;;  %s20_s16 = sshll.u32 %s234_s15, 4  ;;  %s19_s14 = int_to_ptr.hbm [resolvable:$true] %s18_s14  ;;  %s21_s16 = int_to_ptr.vmem [resolvable:$true] %s20_s16 }
   0x2   :  { %23 = dma.hbm_to_vmem [thread:$0]  %s19_s14, 32, %s21_s16, [#allocation3]  }
   0x3   :  { %232 = dma.done.wait [#allocation3], 32  }
   0x4   :  { %233 = vsyncadd [#allocation3], 4294967264  ;;  %vm30_vm0 = vcmask 654336   ;;  %v193_v0 = vld [vmem:[%s283_s1 + $0x8] sm:$0xff]  ;;  %v29_v1 = vld [vmem:[%s283_s1] sm:$0xff]  ;;  %vm57_vm1 = vcmask 58368  }
   0x5   :  { %194 = vmatpush.xpose.msk.msra.mxu2 %vm30_vm0, %v193_v0  ;;  %v28_v2 = vld [vmem:[#allocation2] sm:$0x3]  ;;  %190 = vmatpush.xpose.msk.msra.mxu0 %vm30_vm0, %v29_v1  ;;  %v196_v17 = vld [vmem:[%s282_s0 + $0x8] sm:$0xff]  ;;  %vm83_vm6 = vcmask 64512   ;;  %vm107_vm11 = vcmask 812032  }
   0x6   :  { %178 = vmatpush.msra.mxu3 %v196_v17  ;;  %v82_v18 = vld [vmem:[%s282_s0] sm:$0xff] }
   0x7   :  { %102 = vmatpush.msra.mxu1 %v82_v18 }
   0x8   :  { %195 = vmatmul.msk.f32.vlgmr.msra.gmra.mxu2 %vm30_vm0, %v28_v2  ;;  %191 = vmatmul.msk.f32.vlgmr.msra.gmra.mxu0 %vm30_vm0, %v28_v2 }
  0x85   :  { %v54_v5 = vpop.f32.mrf.mxu0 }
  0x86   :  { %v58_v6 = vsel %vm57_vm1, %v54_v5, -inf }
  0x8b   :  { %v131_v3 = vpop.f32.mrf.mxu2 }
  0x8c   :  { %v134_v4 = vsel %vm57_vm1, %v131_v3, -inf }
  0x8d   :  { %135 = vmax.xlane.f32.xlu0 %v134_v4 }
  0x95   :  { %59 = vmax.xlane.f32.xlu0 %v58_v6 }
 0x100   :  { %v136_v7 = vpop.xlane.xlu0 %135 }
 0x101   :  { %v137_v8 = vsub.f32 %v131_v3, %v136_v7 }
 0x103   :  { %v138_v9 = vmul.f32 1.442695, %v137_v8 }
 0x105   :  { %200 = vpow2.f32 %v138_v9 }
 0x108   :  { %v60_v10 = vpop.xlane.xlu0 %59 }
 0x109   :  { %v61_v11 = vsub.f32 %v54_v5, %v60_v10 }
 0x10b   :  { %v201_v12 = vpop.eup %200  ;;  %v62_v13 = vmul.f32 1.442695, %v61_v11 }
 0x10c   :  { %v140_v14 = vsel %vm57_vm1, %v201_v12, 0.0 }
 0x10d   :  { %202 = vpow2.f32 %v62_v13  ;;  %141 = vadd.xlane.f32.xlu1 %v140_v14 }
 0x113   :  { %v203_v15 = vpop.eup %202 }
 0x114   :  { %v64_v16 = vsel %vm57_vm1, %v203_v15, 0.0 }
 0x115   :  { %65 = vadd.xlane.f32.xlu1 %v64_v16 }
 0x180   :  { %v142_v19 = vpop.xlane.xlu1 %141 }
 0x181   :  { %204 = vrcp.f32 %v142_v19  ;;  %v154_v24 = vand.u32 2147483648, %v142_v19  ;;  %v152_v26 = vand.u32 2147483647, %v142_v19  ;;  %vm148_vm3 = vweird.f32 %v142_v19 }
 0x183   :  { %v155_v29 = vor.u32 1.1754944e-38, %v154_v24  ;;  %vm153_vm5 = vcmp.eq.f32.partialorder %v152_v26, 8.507059e+37 }
 0x187   :  { %v205_v20 = vpop.eup %204 }
 0x188   :  { %v144_v21 = vmul.f32 %v205_v20, %v142_v19  ;;  %v66_v22 = vpop.xlane.xlu1 %65  ;;  %vm149_vm2 = vweird.f32 %v205_v20 }
 0x189   :  { %206 = vrcp.f32 %v66_v22  ;;  %vm150_vm4 = vmor %vm148_vm3, %vm149_vm2  ;;  %v78_v35 = vand.u32 2147483648, %v66_v22  ;;  %v76_v37 = vand.u32 2147483647, %v66_v22  ;;  %vm72_vm8 = vweird.f32 %v66_v22 }
 0x18a   :  { %v145_v23 = vsub.f32 1.0, %v144_v21 }
 0x18b   :  { %v79_v39 = vor.u32 1.1754944e-38, %v78_v35  ;;  %vm77_vm10 = vcmp.eq.f32.partialorder %v76_v37, 8.507059e+37 }
 0x18c   :  { %v146_v25 = vmul.f32 %v205_v20, %v145_v23 }
 0x18e   :  { %v147_v27 = vadd.f32 %v205_v20, %v146_v25 }
 0x18f   :  { %v207_v28 = vpop.eup %206 }
 0x190   :  { %v68_v30 = vmul.f32 %v207_v28, %v66_v22  ;;  %v151_v31 = vsel %vm150_vm4, %v205_v20, %v147_v27  ;;  %vm73_vm7 = vweird.f32 %v207_v28 }
 0x191   :  { %v156_v32 = vsel %vm153_vm5, %v155_v29, %v151_v31  ;;  %vm74_vm9 = vmor %vm72_vm8, %vm73_vm7 }
 0x192   :  { %v69_v33 = vsub.f32 1.0, %v68_v30  ;;  %v157_v34 = vmul.f32 %v201_v12, %v156_v32 }
 0x194   :  { %v70_v36 = vmul.f32 %v207_v28, %v69_v33  ;;  %197 = vmatmul.msk.f32.vlgmr.msra.gmra.mxu3 %vm83_vm6, %v157_v34 }
 0x196   :  { %v71_v38 = vadd.f32 %v207_v28, %v70_v36 }
 0x198   :  { %v75_v40 = vsel %vm74_vm9, %v207_v28, %v71_v38 }
 0x199   :  { %v80_v41 = vsel %vm77_vm10, %v79_v39, %v75_v40 }
 0x19a   :  { %v81_v42 = vmul.f32 %v203_v15, %v80_v41 }
 0x19c   :  { %192 = vmatmul.msk.f32.vlgmr.msra.gmra.mxu1 %vm83_vm6, %v81_v42 }
 0x217   :  { %v180_v43 = vpop.f32.mrf.mxu3 }
 0x218   :  { %198 = vst.msk [vmem:[%s285_s3 + $0x2] sm:$0x3] %vm107_vm11, %v180_v43 }
 0x219   :  { %v104_v44 = vpop.f32.mrf.mxu1 }
 0x21a   :  { %108 = vst.msk [vmem:[%s285_s3] sm:$0x3] %vm107_vm11, %v104_v44 }
 0x21b   :  { %189 = vsyncpa [#allocation3], 1 }

// kernel: cmla_forward.10
= control target key start
LH: loop header
LB: loop body
LE: loop exit
PB: predicated region body
PF: predicated region fallthrough
CT: control target
= control target key end

     0   :  { %11 = vsyncpa [#allocation3], 0  ;;  %s3131_s0 = inlined_call_operand.vmem [shape: f32[2,100], index: 0, kind: input, shape index: {}]   ;;  %s3132_s1 = inlined_call_operand.vmem [shape: f32[2,100], index: 1, kind: input, shape index: {}]   ;;  %s3133_s2 = inlined_call_operand.hbm [shape: f32[100,4000], index: 2, kind: input, shape index: {}]   ;;  %s3134_s3 = inlined_call_operand.hbm [shape: f32[100,4000], index: 3, kind: input, shape index: {}]   ;;  %s3135_s4 = inlined_call_operand.vmem [shape: f32[2,4000], index: 4, kind: output, shape index: {0}]   ;;  %s3136_s5 = inlined_call_operand.vmem [shape: f32[2,4000], index: 5, kind: output, shape index: {1}]  }
   0x1   :  { %s21_s20 = sshll.u32 %s3133_s2, 4  ;;  %s22_s20 = int_to_ptr.hbm [resolvable:$true] %s21_s20 }
   0x2   :  { %12 = vsyncpa [#allocation5], 0  ;;  %s2760_s21 = smov [#allocation2]   ;;  %s34_s25 = sshll.u32 %s3134_s3, 4  ;;  %s35_s25 = int_to_ptr.hbm [resolvable:$true] %s34_s25 }
   0x3   :  { %s23_s22 = sshll.u32 %s2760_s21, 4  ;;  %s2761_s26 = smov 4096   ;;  %s24_s22 = int_to_ptr.vmem [resolvable:$true] %s23_s22 }
   0x4   :  { %s2762_s27 = smov 256   ;;  %s2763_s28 = smov [#allocation4]  }
   0x5   :  { %29 = dma.hbm_to_vmem [thread:$0]  %s22_s20, 53248, %s24_s22, [#allocation3], %s2761_s26, %s2761_s26, %s2762_s27  }
   0x6   :  { %s36_s29 = sshll.u32 %s2763_s28, 4  ;;  %s37_s29 = int_to_ptr.vmem [resolvable:$true] %s36_s29 }
   0x7   :  { %42 = dma.hbm_to_vmem [thread:$0]  %s35_s25, 53248, %s37_s29, [#allocation5], %s2761_s26, %s2761_s26, %s2762_s27  }
   0x8   :  { %2756 = dma.done.wait [#allocation3], 53248  }
   0x9   :  { %2757 = vsyncadd [#allocation3], 4294914048 }
   0xa   :  { %2758 = dma.done.wait [#allocation5], 53248  }
   0xb   :  { %2759 = vsyncadd [#allocation5], 4294914048  ;;  %vm472_vm0 = vcmask 1043456   ;;  %v438_v0 = vld [vmem:[#allocation2 + $0xc10] sm:$0xf]  ;;  %v407_v3 = vld [vmem:[#allocation2 + $0xb18] sm:$0xff] }
   0xc   :  { %v439_v1 = vld [vmem:[#allocation2 + $0xc18] sm:$0xf]  ;;  %v406_v2 = vld [vmem:[#allocation2 + $0xb10] sm:$0xff]  ;;  %2578 = vmatpush.msk.msra.mxu2 %vm472_vm0, %v438_v0  ;;  %v437_v6 = vld [vmem:[#allocation2 + $0xc08] sm:$0xf]  ;;  %vm468_vm1 = vcmask 818176  }
   0xd   :  { %2580 = vmatpush.msk.msra.mxu3 %vm472_vm0, %v439_v1  ;;  %v374_v4 = vld [vmem:[#allocation2 + $0xa10] sm:$0xff]  ;;  %v375_v5 = vld [vmem:[#allocation2 + $0xa18] sm:$0xff]  ;;  %v436_v7 = vld [vmem:[#allocation2 + $0xc00] sm:$0xf]  ;;  %2576 = vmatpush.msk.msra.mxu1 %vm472_vm0, %v437_v6  ;;  %vm1267_vm2 = vcmask 1045508   ;;  %vm1265_vm3 = vcmask 1041408  }
   0xe   :  { %613 = vmatpush.msra.mxu2 %v406_v2  ;;  %v405_v8 = vld [vmem:[#allocation2 + $0xb08] sm:$0xff]  ;;  %v342_v9 = vld [vmem:[#allocation2 + $0x910] sm:$0xff]  ;;  %v343_v10 = vld [vmem:[#allocation2 + $0x918] sm:$0xff]  ;;  %2574 = vmatpush.msk.msra.mxu0 %vm472_vm0, %v436_v7  ;;  %vm1306_vm4 = vcmask 1043458   ;;  %vm1309_vm7 = vcmask 261126  }
   0xf   :  { %633 = vmatpush.msra.mxu3 %v407_v3  ;;  %v404_v11 = vld [vmem:[#allocation2 + $0xb00] sm:$0xff]  ;;  %v373_v12 = vld [vmem:[#allocation2 + $0xa08] sm:$0xff]  ;;  %593 = vmatpush.msra.mxu1 %v405_v8  ;;  %v310_v14 = vld [vmem:[#allocation2 + $0x810] sm:$0xff] }
  0x10   :  { %614 = vmatpush.msra.mxu2 %v374_v4  ;;  %v372_v13 = vld [vmem:[#allocation2 + $0xa00] sm:$0xff]  ;;  %v311_v15 = vld [vmem:[#allocation2 + $0x818] sm:$0xff]  ;;  %573 = vmatpush.msra.mxu0 %v404_v11  ;;  %v341_v16 = vld [vmem:[#allocation2 + $0x908] sm:$0xff] }
  0x11   :  { %634 = vmatpush.msra.mxu3 %v375_v5  ;;  %v340_v17 = vld [vmem:[#allocation2 + $0x900] sm:$0xff]  ;;  %594 = vmatpush.msra.mxu1 %v373_v12  ;;  %v278_v18 = vld [vmem:[#allocation2 + $0x710] sm:$0xff]  ;;  %v279_v19 = vld [vmem:[#allocation2 + $0x718] sm:$0xff] }
  0x12   :  { %615 = vmatpush.msra.mxu2 %v342_v9  ;;  %574 = vmatpush.msra.mxu0 %v372_v13  ;;  %v309_v20 = vld [vmem:[#allocation2 + $0x808] sm:$0xff]  ;;  %v308_v21 = vld [vmem:[#allocation2 + $0x800] sm:$0xff]  ;;  %v246_v22 = vld [vmem:[#allocation2 + $0x610] sm:$0xff] }
  0x13   :  { %635 = vmatpush.msra.mxu3 %v343_v10  ;;  %595 = vmatpush.msra.mxu1 %v341_v16  ;;  %v247_v23 = vld [vmem:[#allocation2 + $0x618] sm:$0xff]  ;;  %v277_v24 = vld [vmem:[#allocation2 + $0x708] sm:$0xff]  ;;  %v276_v25 = vld [vmem:[#allocation2 + $0x700] sm:$0xff] }
  0x14   :  { %616 = vmatpush.msra.mxu2 %v310_v14  ;;  %575 = vmatpush.msra.mxu0 %v340_v17  ;;  %v214_v26 = vld [vmem:[#allocation2 + $0x510] sm:$0xff]  ;;  %v215_v27 = vld [vmem:[#allocation2 + $0x518] sm:$0xff]  ;;  %v245_v28 = vld [vmem:[#allocation2 + $0x608] sm:$0xff] }
  0x15   :  { %636 = vmatpush.msra.mxu3 %v311_v15  ;;  %596 = vmatpush.msra.mxu1 %v309_v20  ;;  %v244_v29 = vld [vmem:[#allocation2 + $0x600] sm:$0xff]  ;;  %v182_v30 = vld [vmem:[#allocation2 + $0x410] sm:$0xff]  ;;  %v183_v31 = vld [vmem:[#allocation2 + $0x418] sm:$0xff] }
  0x16   :  { %617 = vmatpush.msra.mxu2 %v278_v18  ;;  %576 = vmatpush.msra.mxu0 %v308_v21  ;;  %v213_v32 = vld [vmem:[#allocation2 + $0x508] sm:$0xff]  ;;  %v212_v33 = vld [vmem:[#allocation2 + $0x500] sm:$0xff]  ;;  %v150_v34 = vld [vmem:[#allocation2 + $0x310] sm:$0xff] }
  0x17   :  { %637 = vmatpush.msra.mxu3 %v279_v19  ;;  %597 = vmatpush.msra.mxu1 %v277_v24  ;;  %v151_v35 = vld [vmem:[#allocation2 + $0x318] sm:$0xff]  ;;  %v181_v36 = vld [vmem:[#allocation2 + $0x408] sm:$0xff]  ;;  %v180_v37 = vld [vmem:[#allocation2 + $0x400] sm:$0xff] }
  0x18   :  { %618 = vmatpush.msra.mxu2 %v246_v22  ;;  %577 = vmatpush.msra.mxu0 %v276_v25  ;;  %v118_v38 = vld [vmem:[#allocation2 + $0x210] sm:$0xff]  ;;  %v119_v39 = vld [vmem:[#allocation2 + $0x218] sm:$0xff]  ;;  %v149_v40 = vld [vmem:[#allocation2 + $0x308] sm:$0xff] }
  0x19   :  { %638 = vmatpush.msra.mxu3 %v247_v23  ;;  %598 = vmatpush.msra.mxu1 %v245_v28  ;;  %v148_v41 = vld [vmem:[#allocation2 + $0x300] sm:$0xff]  ;;  %v86_v42 = vld [vmem:[#allocation2 + $0x110] sm:$0xff]  ;;  %v87_v43 = vld [vmem:[#allocation2 + $0x118] sm:$0xff] }
  0x1a   :  { %619 = vmatpush.msra.mxu2 %v214_v26  ;;  %578 = vmatpush.msra.mxu0 %v244_v29  ;;  %v117_v44 = vld [vmem:[#allocation2 + $0x208] sm:$0xff]  ;;  %v116_v45 = vld [vmem:[#allocation2 + $0x200] sm:$0xff]  ;;  %v54_v46 = vld [vmem:[#allocation2 + $0x10] sm:$0xff] }
  0x1b   :  { %639 = vmatpush.msra.mxu3 %v215_v27  ;;  %599 = vmatpush.msra.mxu1 %v213_v32  ;;  %v55_v47 = vld [vmem:[#allocation2 + $0x18] sm:$0xff]  ;;  %v442_v48 = vld [vmem:[#allocation2 + $0xc30] sm:$0xf]  ;;  %v85_v50 = vld [vmem:[#allocation2 + $0x108] sm:$0xff] }
  0x1c   :  { %620 = vmatpush.msra.mxu2 %v182_v30  ;;  %579 = vmatpush.msra.mxu0 %v212_v33  ;;  %v443_v49 = vld [vmem:[#allocation2 + $0xc38] sm:$0xf]  ;;  %v84_v51 = vld [vmem:[#allocation2 + $0x100] sm:$0xff]  ;;  %v410_v52 = vld [vmem:[#allocation2 + $0xb30] sm:$0xff] }
  0x1d   :  { %640 = vmatpush.msra.mxu3 %v183_v31  ;;  %600 = vmatpush.msra.mxu1 %v181_v36  ;;  %v411_v53 = vld [vmem:[#allocation2 + $0xb38] sm:$0xff]  ;;  %v53_v54 = vld [vmem:[#allocation2 + $0x8] sm:$0xff]  ;;  %v52_v55 = vld [vmem:[#allocation2] sm:$0xff] }
  0x1e   :  { %621 = vmatpush.msra.mxu2 %v150_v34  ;;  %580 = vmatpush.msra.mxu0 %v180_v37  ;;  %v378_v56 = vld [vmem:[#allocation2 + $0xa30] sm:$0xff]  ;;  %v379_v57 = vld [vmem:[#allocation2 + $0xa38] sm:$0xff]  ;;  %v441_v58 = vld [vmem:[#allocation2 + $0xc28] sm:$0xf] }
  0x1f   :  { %641 = vmatpush.msra.mxu3 %v151_v35  ;;  %601 = vmatpush.msra.mxu1 %v149_v40  ;;  %v440_v59 = vld [vmem:[#allocation2 + $0xc20] sm:$0xf]  ;;  %v346_v60 = vld [vmem:[#allocation2 + $0x930] sm:$0xff]  ;;  %v347_v61 = vld [vmem:[#allocation2 + $0x938] sm:$0xff] }
  0x20   :  { %622 = vmatpush.msra.mxu2 %v118_v38  ;;  %581 = vmatpush.msra.mxu0 %v148_v41  ;;  %v409_v62 = vld [vmem:[#allocation2 + $0xb28] sm:$0xff]  ;;  %v408_v63 = vld [vmem:[#allocation2 + $0xb20] sm:$0xff]  ;;  %v314_v0 = vld [vmem:[#allocation2 + $0x830] sm:$0xff] }
  0x21   :  { %642 = vmatpush.msra.mxu3 %v119_v39  ;;  %602 = vmatpush.msra.mxu1 %v117_v44  ;;  %v315_v1 = vld [vmem:[#allocation2 + $0x838] sm:$0xff]  ;;  %v377_v2 = vld [vmem:[#allocation2 + $0xa28] sm:$0xff]  ;;  %v376_v3 = vld [vmem:[#allocation2 + $0xa20] sm:$0xff] }
  0x22   :  { %623 = vmatpush.msra.mxu2 %v86_v42  ;;  %582 = vmatpush.msra.mxu0 %v116_v45  ;;  %v282_v4 = vld [vmem:[#allocation2 + $0x730] sm:$0xff]  ;;  %v283_v5 = vld [vmem:[#allocation2 + $0x738] sm:$0xff]  ;;  %v345_v6 = vld [vmem:[#allocation2 + $0x928] sm:$0xff] }
  0x23   :  { %643 = vmatpush.msra.mxu3 %v87_v43  ;;  %603 = vmatpush.msra.mxu1 %v85_v50  ;;  %v344_v7 = vld [vmem:[#allocation2 + $0x920] sm:$0xff]  ;;  %v250_v8 = vld [vmem:[#allocation2 + $0x630] sm:$0xff]  ;;  %v251_v9 = vld [vmem:[#allocation2 + $0x638] sm:$0xff] }
  0x24   :  { %624 = vmatpush.msra.mxu2 %v54_v46  ;;  %583 = vmatpush.msra.mxu0 %v84_v51  ;;  %v313_v10 = vld [vmem:[#allocation2 + $0x828] sm:$0xff]  ;;  %v312_v11 = vld [vmem:[#allocation2 + $0x820] sm:$0xff]  ;;  %v218_v12 = vld [vmem:[#allocation2 + $0x530] sm:$0xff] }
  0x25   :  { %644 = vmatpush.msra.mxu3 %v55_v47  ;;  %604 = vmatpush.msra.mxu1 %v53_v54  ;;  %v219_v13 = vld [vmem:[#allocation2 + $0x538] sm:$0xff]  ;;  %v281_v14 = vld [vmem:[#allocation2 + $0x728] sm:$0xff]  ;;  %v280_v15 = vld [vmem:[#allocation2 + $0x720] sm:$0xff] }
  0x26   :  { %2586 = vmatpush.msk.msrb.mxu2 %vm472_vm0, %v442_v48  ;;  %584 = vmatpush.msra.mxu0 %v52_v55  ;;  %v186_v16 = vld [vmem:[#allocation2 + $0x430] sm:$0xff]  ;;  %v187_v17 = vld [vmem:[#allocation2 + $0x438] sm:$0xff]  ;;  %v249_v18 = vld [vmem:[#allocation2 + $0x628] sm:$0xff] }
  0x27   :  { %2588 = vmatpush.msk.msrb.mxu3 %vm472_vm0, %v443_v49  ;;  %2584 = vmatpush.msk.msrb.mxu1 %vm472_vm0, %v441_v58  ;;  %v248_v19 = vld [vmem:[#allocation2 + $0x620] sm:$0xff]  ;;  %v154_v20 = vld [vmem:[#allocation2 + $0x330] sm:$0xff]  ;;  %v155_v21 = vld [vmem:[#allocation2 + $0x338] sm:$0xff] }
  0x28   :  { %693 = vmatpush.msrb.mxu2 %v410_v52  ;;  %2582 = vmatpush.msk.msrb.mxu0 %vm472_vm0, %v440_v59  ;;  %v217_v22 = vld [vmem:[#allocation2 + $0x528] sm:$0xff]  ;;  %v216_v23 = vld [vmem:[#allocation2 + $0x520] sm:$0xff]  ;;  %v122_v24 = vld [vmem:[#allocation2 + $0x230] sm:$0xff] }
  0x29   :  { %713 = vmatpush.msrb.mxu3 %v411_v53  ;;  %673 = vmatpush.msrb.mxu1 %v409_v62  ;;  %v123_v25 = vld [vmem:[#allocation2 + $0x238] sm:$0xff]  ;;  %v185_v26 = vld [vmem:[#allocation2 + $0x428] sm:$0xff]  ;;  %v184_v27 = vld [vmem:[#allocation2 + $0x420] sm:$0xff] }
  0x2a   :  { %694 = vmatpush.msrb.mxu2 %v378_v56  ;;  %653 = vmatpush.msrb.mxu0 %v408_v63  ;;  %v90_v28 = vld [vmem:[#allocation2 + $0x130] sm:$0xff]  ;;  %v91_v29 = vld [vmem:[#allocation2 + $0x138] sm:$0xff]  ;;  %v153_v30 = vld [vmem:[#allocation2 + $0x328] sm:$0xff] }
  0x2b   :  { %714 = vmatpush.msrb.mxu3 %v379_v57  ;;  %674 = vmatpush.msrb.mxu1 %v377_v2  ;;  %v2811_v31 = vld [vmem:[%s3131_s0] sm:$0x3]  ;;  %v58_v32 = vld [vmem:[#allocation2 + $0x30] sm:$0xff]  ;;  %v59_v33 = vld [vmem:[#allocation2 + $0x38] sm:$0xff] }
  0x2c   :  { %695 = vmatpush.msrb.mxu2 %v346_v60  ;;  %654 = vmatpush.msrb.mxu0 %v376_v3  ;;  %v446_v34 = vld [vmem:[#allocation2 + $0xc50] sm:$0xf]  ;;  %v447_v35 = vld [vmem:[#allocation2 + $0xc58] sm:$0xf]  ;;  %v152_v36 = vld [vmem:[#allocation2 + $0x320] sm:$0xff] }
  0x2d   :  { %715 = vmatpush.msrb.mxu3 %v347_v61  ;;  %675 = vmatpush.msrb.mxu1 %v345_v6  ;;  %v121_v37 = vld [vmem:[#allocation2 + $0x228] sm:$0xff]  ;;  %v414_v38 = vld [vmem:[#allocation2 + $0xb50] sm:$0xff]  ;;  %v415_v39 = vld [vmem:[#allocation2 + $0xb58] sm:$0xff] }
  0x2e   :  { %696 = vmatpush.msrb.mxu2 %v314_v0  ;;  %655 = vmatpush.msrb.mxu0 %v344_v7  ;;  %v120_v40 = vld [vmem:[#allocation2 + $0x220] sm:$0xff]  ;;  %v89_v41 = vld [vmem:[#allocation2 + $0x128] sm:$0xff]  ;;  %v382_v42 = vld [vmem:[#allocation2 + $0xa50] sm:$0xff] }
  0x2f   :  { %716 = vmatpush.msrb.mxu3 %v315_v1  ;;  %676 = vmatpush.msrb.mxu1 %v313_v10  ;;  %v383_v43 = vld [vmem:[#allocation2 + $0xa58] sm:$0xff]  ;;  %v88_v44 = vld [vmem:[#allocation2 + $0x120] sm:$0xff]  ;;  %v57_v45 = vld [vmem:[#allocation2 + $0x28] sm:$0xff] }
  0x30   :  { %697 = vmatpush.msrb.mxu2 %v282_v4  ;;  %656 = vmatpush.msrb.mxu0 %v312_v11  ;;  %v350_v46 = vld [vmem:[#allocation2 + $0x950] sm:$0xff]  ;;  %v351_v47 = vld [vmem:[#allocation2 + $0x958] sm:$0xff]  ;;  %v445_v48 = vld [vmem:[#allocation2 + $0xc48] sm:$0xf] }
  0x31   :  { %717 = vmatpush.msrb.mxu3 %v283_v5  ;;  %677 = vmatpush.msrb.mxu1 %v281_v14  ;;  %v56_v49 = vld [vmem:[#allocation2 + $0x20] sm:$0xff]  ;;  %v318_v50 = vld [vmem:[#allocation2 + $0x850] sm:$0xff]  ;;  %v413_v52 = vld [vmem:[#allocation2 + $0xb48] sm:$0xff] }
  0x32   :  { %698 = vmatpush.msrb.mxu2 %v250_v8  ;;  %657 = vmatpush.msrb.mxu0 %v280_v15  ;;  %v444_v51 = vld [vmem:[#allocation2 + $0xc40] sm:$0xf]  ;;  %v319_v53 = vld [vmem:[#allocation2 + $0x858] sm:$0xff]  ;;  %v286_v54 = vld [vmem:[#allocation2 + $0x750] sm:$0xff] }
  0x33   :  { %718 = vmatpush.msrb.mxu3 %v251_v9  ;;  %678 = vmatpush.msrb.mxu1 %v249_v18  ;;  %v412_v55 = vld [vmem:[#allocation2 + $0xb40] sm:$0xff]  ;;  %v381_v56 = vld [vmem:[#allocation2 + $0xa48] sm:$0xff]  ;;  %v287_v57 = vld [vmem:[#allocation2 + $0x758] sm:$0xff] }
  0x34   :  { %699 = vmatpush.msrb.mxu2 %v218_v12  ;;  %658 = vmatpush.msrb.mxu0 %v248_v19  ;;  %v254_v58 = vld [vmem:[#allocation2 + $0x650] sm:$0xff]  ;;  %v380_v59 = vld [vmem:[#allocation2 + $0xa40] sm:$0xff]  ;;  %v349_v60 = vld [vmem:[#allocation2 + $0x948] sm:$0xff] }
  0x35   :  { %719 = vmatpush.msrb.mxu3 %v219_v13  ;;  %679 = vmatpush.msrb.mxu1 %v217_v22  ;;  %v255_v61 = vld [vmem:[#allocation2 + $0x658] sm:$0xff]  ;;  %v222_v62 = vld [vmem:[#allocation2 + $0x550] sm:$0xff]  ;;  %v348_v63 = vld [vmem:[#allocation2 + $0x940] sm:$0xff] }
  0x36   :  { %700 = vmatpush.msrb.mxu2 %v186_v16  ;;  %659 = vmatpush.msrb.mxu0 %v216_v23  ;;  %v317_v0 = vld [vmem:[#allocation2 + $0x848] sm:$0xff]  ;;  %v223_v1 = vld [vmem:[#allocation2 + $0x558] sm:$0xff]  ;;  %v190_v2 = vld [vmem:[#allocation2 + $0x450] sm:$0xff] }
  0x37   :  { %720 = vmatpush.msrb.mxu3 %v187_v17  ;;  %680 = vmatpush.msrb.mxu1 %v185_v26  ;;  %v316_v3 = vld [vmem:[#allocation2 + $0x840] sm:$0xff]  ;;  %v285_v4 = vld [vmem:[#allocation2 + $0x748] sm:$0xff]  ;;  %v191_v5 = vld [vmem:[#allocation2 + $0x458] sm:$0xff] }
  0x38   :  { %701 = vmatpush.msrb.mxu2 %v154_v20  ;;  %660 = vmatpush.msrb.mxu0 %v184_v27  ;;  %v158_v6 = vld [vmem:[#allocation2 + $0x350] sm:$0xff]  ;;  %v284_v7 = vld [vmem:[#allocation2 + $0x740] sm:$0xff]  ;;  %v253_v8 = vld [vmem:[#allocation2 + $0x648] sm:$0xff] }
  0x39   :  { %721 = vmatpush.msrb.mxu3 %v155_v21  ;;  %681 = vmatpush.msrb.mxu1 %v153_v30  ;;  %v159_v9 = vld [vmem:[#allocation2 + $0x358] sm:$0xff]  ;;  %v126_v10 = vld [vmem:[#allocation2 + $0x250] sm:$0xff]  ;;  %v252_v11 = vld [vmem:[#allocation2 + $0x640] sm:$0xff] }
  0x3a   :  { %702 = vmatpush.msrb.mxu2 %v122_v24  ;;  %2581 = vmatmul.msk.f32.vlgmr.msra.gmra.mxu3 %vm468_vm1, %v2811_v31  ;;  %v221_v12 = vld [vmem:[#allocation2 + $0x548] sm:$0xff]  ;;  %v127_v13 = vld [vmem:[#allocation2 + $0x258] sm:$0xff]  ;;  %v94_v14 = vld [vmem:[#allocation2 + $0x150] sm:$0xff] }
  0x3b   :  { %722 = vmatpush.msrb.mxu3 %v123_v25  ;;  %2579 = vmatmul.msk.f32.vlgmr.msra.gmra.mxu2 %vm468_vm1, %v2811_v31  ;;  %v220_v15 = vld [vmem:[#allocation2 + $0x540] sm:$0xff]  ;;  %v189_v16 = vld [vmem:[#allocation2 + $0x448] sm:$0xff]  ;;  %v95_v17 = vld [vmem:[#allocation2 + $0x158] sm:$0xff] }
  0x3c   :  { %703 = vmatpush.msrb.mxu2 %v90_v28  ;;  %661 = vmatpush.msrb.mxu0 %v152_v36  ;;  %v62_v18 = vld [vmem:[#allocation2 + $0x50] sm:$0xff]  ;;  %v188_v19 = vld [vmem:[#allocation2 + $0x440] sm:$0xff]  ;;  %v157_v20 = vld [vmem:[#allocation2 + $0x348] sm:$0xff] }
  0x3d   :  { %723 = vmatpush.msrb.mxu3 %v91_v29  ;;  %682 = vmatpush.msrb.mxu1 %v121_v37  ;;  %v63_v21 = vld [vmem:[#allocation2 + $0x58] sm:$0xff]  ;;  %v450_v22 = vld [vmem:[#allocation2 + $0xc70] sm:$0xf]  ;;  %v156_v24 = vld [vmem:[#allocation2 + $0x340] sm:$0xff] }
  0x3e   :  { %704 = vmatpush.msrb.mxu2 %v58_v32  ;;  %662 = vmatpush.msrb.mxu0 %v120_v40  ;;  %v451_v23 = vld [vmem:[#allocation2 + $0xc78] sm:$0xf]  ;;  %v125_v25 = vld [vmem:[#allocation2 + $0x248] sm:$0xff]  ;;  %v418_v26 = vld [vmem:[#allocation2 + $0xb70] sm:$0xff] }
  0x3f   :  { %724 = vmatpush.msrb.mxu3 %v59_v33  ;;  %683 = vmatpush.msrb.mxu1 %v89_v41  ;;  %v419_v27 = vld [vmem:[#allocation2 + $0xb78] sm:$0xff]  ;;  %v124_v28 = vld [vmem:[#allocation2 + $0x240] sm:$0xff]  ;;  %v93_v29 = vld [vmem:[#allocation2 + $0x148] sm:$0xff] }
  0x40   :  { %2594 = vmatpush.msk.msra.mxu2 %vm472_vm0, %v446_v34  ;;  %663 = vmatpush.msrb.mxu0 %v88_v44  ;;  %v386_v30 = vld [vmem:[#allocation2 + $0xa70] sm:$0xff]  ;;  %v387_v32 = vld [vmem:[#allocation2 + $0xa78] sm:$0xff]  ;;  %v92_v33 = vld [vmem:[#allocation2 + $0x140] sm:$0xff] }
  0x41   :  { %2596 = vmatpush.msk.msra.mxu3 %vm472_vm0, %v447_v35  ;;  %684 = vmatpush.msrb.mxu1 %v57_v45  ;;  %v61_v34 = vld [vmem:[#allocation2 + $0x48] sm:$0xff]  ;;  %v354_v35 = vld [vmem:[#allocation2 + $0x970] sm:$0xff]  ;;  %v355_v36 = vld [vmem:[#allocation2 + $0x978] sm:$0xff] }
  0x42   :  { %773 = vmatpush.msra.mxu2 %v414_v38  ;;  %2577 = vmatmul.msk.f32.vlgmr.msra.gmra.mxu1 %vm468_vm1, %v2811_v31  ;;  %v449_v37 = vld [vmem:[#allocation2 + $0xc68] sm:$0xf]  ;;  %v60_v38 = vld [vmem:[#allocation2 + $0x40] sm:$0xff]  ;;  %vm3010_vm5 = vmor %vm1306_vm4, %vm1265_vm3 }
  0x43   :  { %793 = vmatpush.msra.mxu3 %v415_v39  ;;  %2592 = vmatpush.msk.msra.mxu1 %vm472_vm0, %v445_v48  ;;  %v322_v39 = vld [vmem:[#allocation2 + $0x870] sm:$0xff]  ;;  %v448_v40 = vld [vmem:[#allocation2 + $0xc60] sm:$0xf]  ;;  %v417_v41 = vld [vmem:[#allocation2 + $0xb68] sm:$0xff] }
  0x44   :  { %774 = vmatpush.msra.mxu2 %v382_v42  ;;  %664 = vmatpush.msrb.mxu0 %v56_v49  ;;  %v323_v42 = vld [vmem:[#allocation2 + $0x878] sm:$0xff]  ;;  %v416_v44 = vld [vmem:[#allocation2 + $0xb60] sm:$0xff]  ;;  %v385_v45 = vld [vmem:[#allocation2 + $0xa68] sm:$0xff] }
  0x45   :  { %794 = vmatpush.msra.mxu3 %v383_v43  ;;  %2575 = vmatmul.msk.f32.vlgmr.msra.gmra.mxu0 %vm468_vm1, %v2811_v31  ;;  %v290_v43 = vld [vmem:[#allocation2 + $0x770] sm:$0xff]  ;;  %v384_v48 = vld [vmem:[#allocation2 + $0xa60] sm:$0xff]  ;;  %v353_v49 = vld [vmem:[#allocation2 + $0x968] sm:$0xff] }
  0x46   :  { %775 = vmatpush.msra.mxu2 %v350_v46  ;;  %2590 = vmatpush.msk.msra.mxu0 %vm472_vm0, %v444_v51  ;;  %v291_v46 = vld [vmem:[#allocation2 + $0x778] sm:$0xff]  ;;  %v226_v51 = vld [vmem:[#allocation2 + $0x570] sm:$0xff]  ;;  %vm3017_vm6 = vmor %vm1267_vm2, %vm3010_vm5 }
  0x47   :  { %795 = vmatpush.msra.mxu3 %v351_v47  ;;  %753 = vmatpush.msra.mxu1 %v413_v52  ;;  %v258_v47 = vld [vmem:[#allocation2 + $0x670] sm:$0xff]  ;;  %v352_v52 = vld [vmem:[#allocation2 + $0x960] sm:$0xff]  ;;  %vm3025_vm8 = vmor %vm1309_vm7, %vm3017_vm6 }
  0x48   :  { %776 = vmatpush.msra.mxu2 %v318_v50  ;;  %733 = vmatpush.msra.mxu0 %v412_v55  ;;  %v259_v50 = vld [vmem:[#allocation2 + $0x678] sm:$0xff]  ;;  %v194_v55 = vld [vmem:[#allocation2 + $0x470] sm:$0xff] }
  0x49   :  { %796 = vmatpush.msra.mxu3 %v319_v53  ;;  %754 = vmatpush.msra.mxu1 %v381_v56  ;;  %v321_v53 = vld [vmem:[#allocation2 + $0x868] sm:$0xff]  ;;  %v320_v56 = vld [vmem:[#allocation2 + $0x860] sm:$0xff] }
  0x4a   :  { %777 = vmatpush.msra.mxu2 %v286_v54  ;;  %734 = vmatpush.msra.mxu0 %v380_v59  ;;  %v227_v54 = vld [vmem:[#allocation2 + $0x578] sm:$0xff]  ;;  %v162_v59 = vld [vmem:[#allocation2 + $0x370] sm:$0xff] }
  0x4b   :  { %797 = vmatpush.msra.mxu3 %v287_v57  ;;  %755 = vmatpush.msra.mxu1 %v349_v60  ;;  %v289_v57 = vld [vmem:[#allocation2 + $0x768] sm:$0xff]  ;;  %v288_v60 = vld [vmem:[#allocation2 + $0x760] sm:$0xff] }
  0x4c   :  { %778 = vmatpush.msra.mxu2 %v254_v58  ;;  %735 = vmatpush.msra.mxu0 %v348_v63  ;;  %v195_v58 = vld [vmem:[#allocation2 + $0x478] sm:$0xff]  ;;  %v130_v63 = vld [vmem:[#allocation2 + $0x270] sm:$0xff] }
  0x4d   :  { %798 = vmatpush.msra.mxu3 %v255_v61  ;;  %756 = vmatpush.msra.mxu1 %v317_v0  ;;  %v257_v61 = vld [vmem:[#allocation2 + $0x668] sm:$0xff]  ;;  %v256_v0 = vld [vmem:[#allocation2 + $0x660] sm:$0xff] }
  0x4e   :  { %779 = vmatpush.msra.mxu2 %v222_v62  ;;  %736 = vmatpush.msra.mxu0 %v316_v3  ;;  %v163_v62 = vld [vmem:[#allocation2 + $0x378] sm:$0xff]  ;;  %v98_v3 = vld [vmem:[#allocation2 + $0x170] sm:$0xff] }
  0x4f   :  { %799 = vmatpush.msra.mxu3 %v223_v1  ;;  %757 = vmatpush.msra.mxu1 %v285_v4  ;;  %v225_v1 = vld [vmem:[#allocation2 + $0x568] sm:$0xff]  ;;  %v224_v4 = vld [vmem:[#allocation2 + $0x560] sm:$0xff] }
  0x50   :  { %780 = vmatpush.msra.mxu2 %v190_v2  ;;  %737 = vmatpush.msra.mxu0 %v284_v7  ;;  %v131_v2 = vld [vmem:[#allocation2 + $0x278] sm:$0xff]  ;;  %v66_v7 = vld [vmem:[#allocation2 + $0x70] sm:$0xff] }
  0x51   :  { %800 = vmatpush.msra.mxu3 %v191_v5  ;;  %758 = vmatpush.msra.mxu1 %v253_v8  ;;  %v193_v5 = vld [vmem:[#allocation2 + $0x468] sm:$0xff]  ;;  %v192_v8 = vld [vmem:[#allocation2 + $0x460] sm:$0xff] }
  0x52   :  { %781 = vmatpush.msra.mxu2 %v158_v6  ;;  %738 = vmatpush.msra.mxu0 %v252_v11  ;;  %v99_v6 = vld [vmem:[#allocation2 + $0x178] sm:$0xff]  ;;  %v454_v11 = vld [vmem:[#allocation2 + $0xc90] sm:$0xf] }
  0x53   :  { %801 = vmatpush.msra.mxu3 %v159_v9  ;;  %759 = vmatpush.msra.mxu1 %v221_v12  ;;  %v161_v9 = vld [vmem:[#allocation2 + $0x368] sm:$0xff]  ;;  %v455_v12 = vld [vmem:[#allocation2 + $0xc98] sm:$0xf] }
  0x54   :  { %782 = vmatpush.msra.mxu2 %v126_v10  ;;  %739 = vmatpush.msra.mxu0 %v220_v15  ;;  %v67_v10 = vld [vmem:[#allocation2 + $0x78] sm:$0xff]  ;;  %v422_v15 = vld [vmem:[#allocation2 + $0xb90] sm:$0xff] }
  0x55   :  { %802 = vmatpush.msra.mxu3 %v127_v13  ;;  %760 = vmatpush.msra.mxu1 %v189_v16  ;;  %v160_v13 = vld [vmem:[#allocation2 + $0x360] sm:$0xff]  ;;  %v423_v16 = vld [vmem:[#allocation2 + $0xb98] sm:$0xff] }
  0x56   :  { %783 = vmatpush.msra.mxu2 %v94_v14  ;;  %740 = vmatpush.msra.mxu0 %v188_v19  ;;  %v129_v14 = vld [vmem:[#allocation2 + $0x268] sm:$0xff]  ;;  %v390_v19 = vld [vmem:[#allocation2 + $0xa90] sm:$0xff] }
  0x57   :  { %803 = vmatpush.msra.mxu3 %v95_v17  ;;  %761 = vmatpush.msra.mxu1 %v157_v20  ;;  %v128_v17 = vld [vmem:[#allocation2 + $0x260] sm:$0xff]  ;;  %v391_v20 = vld [vmem:[#allocation2 + $0xa98] sm:$0xff] }
  0x58   :  { %784 = vmatpush.msra.mxu2 %v62_v18  ;;  %2589 = vmatmul.msk.f32.vlgmr.msrb.gmra.mxu3 %vm468_vm1, %v2811_v31  ;;  %v97_v18 = vld [vmem:[#allocation2 + $0x168] sm:$0xff] }
  0x59   :  { %804 = vmatpush.msra.mxu3 %v63_v21  ;;  %2587 = vmatmul.msk.f32.vlgmr.msrb.gmra.mxu2 %vm468_vm1, %v2811_v31  ;;  %v96_v21 = vld [vmem:[#allocation2 + $0x160] sm:$0xff] }
  0x5a   :  { %2602 = vmatpush.msk.msrb.mxu2 %vm472_vm0, %v450_v22  ;;  %741 = vmatpush.msra.mxu0 %v156_v24  ;;  %v65_v22 = vld [vmem:[#allocation2 + $0x68] sm:$0xff]  ;;  %v359_v24 = vld [vmem:[#allocation2 + $0x998] sm:$0xff] }
  0x5b   :  { %2604 = vmatpush.msk.msrb.mxu3 %vm472_vm0, %v451_v23  ;;  %762 = vmatpush.msra.mxu1 %v125_v25  ;;  %v358_v23 = vld [vmem:[#allocation2 + $0x990] sm:$0xff]  ;;  %v453_v25 = vld [vmem:[#allocation2 + $0xc88] sm:$0xf] }
  0x5c   :  { %853 = vmatpush.msrb.mxu2 %v418_v26  ;;  %742 = vmatpush.msra.mxu0 %v124_v28  ;;  %v64_v26 = vld [vmem:[#allocation2 + $0x60] sm:$0xff] }
  0x5d   :  { %873 = vmatpush.msrb.mxu3 %v419_v27  ;;  %763 = vmatpush.msra.mxu1 %v93_v29  ;;  %v326_v27 = vld [vmem:[#allocation2 + $0x890] sm:$0xff]  ;;  %v452_v28 = vld [vmem:[#allocation2 + $0xc80] sm:$0xf]  ;;  %v421_v29 = vld [vmem:[#allocation2 + $0xb88] sm:$0xff] }
  0x5e   :  { %854 = vmatpush.msrb.mxu2 %v386_v30  ;;  %743 = vmatpush.msra.mxu0 %v92_v33  ;;  %v327_v30 = vld [vmem:[#allocation2 + $0x898] sm:$0xff]  ;;  %v420_v33 = vld [vmem:[#allocation2 + $0xb80] sm:$0xff] }
  0x5f   :  { %874 = vmatpush.msrb.mxu3 %v387_v32  ;;  %764 = vmatpush.msra.mxu1 %v61_v34  ;;  %v294_v32 = vld [vmem:[#allocation2 + $0x790] sm:$0xff]  ;;  %v389_v34 = vld [vmem:[#allocation2 + $0xa88] sm:$0xff] }
  0x60   :  { %855 = vmatpush.msrb.mxu2 %v354_v35  ;;  %2585 = vmatmul.msk.f32.vlgmr.msrb.gmra.mxu1 %vm468_vm1, %v2811_v31  ;;  %v295_v35 = vld [vmem:[#allocation2 + $0x798] sm:$0xff] }
  0x61   :  { %875 = vmatpush.msrb.mxu3 %v355_v36  ;;  %2600 = vmatpush.msk.msrb.mxu1 %vm472_vm0, %v449_v37  ;;  %v262_v36 = vld [vmem:[#allocation2 + $0x690] sm:$0xff]  ;;  %v388_v37 = vld [vmem:[#allocation2 + $0xa80] sm:$0xff] }
  0x62   :  { %744 = vmatpush.msra.mxu0 %v60_v38  ;;  %856 = vmatpush.msrb.mxu2 %v322_v39  ;;  %v357_v38 = vld [vmem:[#allocation2 + $0x988] sm:$0xff]  ;;  %v263_v39 = vld [vmem:[#allocation2 + $0x698] sm:$0xff] }
  0x63   :  { %2583 = vmatmul.msk.f32.vlgmr.msrb.gmra.mxu0 %vm468_vm1, %v2811_v31  ;;  %833 = vmatpush.msrb.mxu1 %v417_v41  ;;  %v356_v41 = vld [vmem:[#allocation2 + $0x980] sm:$0xff] }
  0x64   :  { %2598 = vmatpush.msk.msrb.mxu0 %vm472_vm0, %v448_v40  ;;  %876 = vmatpush.msrb.mxu3 %v323_v42  ;;  %v230_v40 = vld [vmem:[#allocation2 + $0x590] sm:$0xff]  ;;  %v325_v42 = vld [vmem:[#allocation2 + $0x888] sm:$0xff] }
  0x65   :  { %857 = vmatpush.msrb.mxu2 %v290_v43  ;;  %834 = vmatpush.msrb.mxu1 %v385_v45  ;;  %v231_v43 = vld [vmem:[#allocation2 + $0x598] sm:$0xff]  ;;  %v324_v45 = vld [vmem:[#allocation2 + $0x880] sm:$0xff] }
  0x66   :  { %813 = vmatpush.msrb.mxu0 %v416_v44  ;;  %877 = vmatpush.msrb.mxu3 %v291_v46  ;;  %v198_v44 = vld [vmem:[#allocation2 + $0x490] sm:$0xff]  ;;  %v293_v46 = vld [vmem:[#allocation2 + $0x788] sm:$0xff] }
  0x67   :  { %858 = vmatpush.msrb.mxu2 %v258_v47  ;;  %835 = vmatpush.msrb.mxu1 %v353_v49  ;;  %v199_v47 = vld [vmem:[#allocation2 + $0x498] sm:$0xff]  ;;  %v292_v49 = vld [vmem:[#allocation2 + $0x780] sm:$0xff] }
  0x68   :  { %814 = vmatpush.msrb.mxu0 %v384_v48  ;;  %878 = vmatpush.msrb.mxu3 %v259_v50  ;;  %v166_v48 = vld [vmem:[#allocation2 + $0x390] sm:$0xff]  ;;  %v261_v50 = vld [vmem:[#allocation2 + $0x688] sm:$0xff] }
  0x69   :  { %859 = vmatpush.msrb.mxu2 %v226_v51  ;;  %836 = vmatpush.msrb.mxu1 %v321_v53  ;;  %v167_v51 = vld [vmem:[#allocation2 + $0x398] sm:$0xff]  ;;  %v260_v53 = vld [vmem:[#allocation2 + $0x680] sm:$0xff] }
  0x6a   :  { %815 = vmatpush.msrb.mxu0 %v352_v52  ;;  %879 = vmatpush.msrb.mxu3 %v227_v54  ;;  %v134_v52 = vld [vmem:[#allocation2 + $0x290] sm:$0xff]  ;;  %v229_v54 = vld [vmem:[#allocation2 + $0x588] sm:$0xff] }
  0x6b   :  { %860 = vmatpush.msrb.mxu2 %v194_v55  ;;  %837 = vmatpush.msrb.mxu1 %v289_v57  ;;  %v135_v55 = vld [vmem:[#allocation2 + $0x298] sm:$0xff]  ;;  %v228_v57 = vld [vmem:[#allocation2 + $0x580] sm:$0xff] }
  0x6c   :  { %816 = vmatpush.msrb.mxu0 %v320_v56  ;;  %880 = vmatpush.msrb.mxu3 %v195_v58  ;;  %v102_v56 = vld [vmem:[#allocation2 + $0x190] sm:$0xff]  ;;  %v197_v58 = vld [vmem:[#allocation2 + $0x488] sm:$0xff] }
  0x6d   :  { %861 = vmatpush.msrb.mxu2 %v162_v59  ;;  %838 = vmatpush.msrb.mxu1 %v257_v61  ;;  %v103_v59 = vld [vmem:[#allocation2 + $0x198] sm:$0xff]  ;;  %v196_v61 = vld [vmem:[#allocation2 + $0x480] sm:$0xff] }
  0x6e   :  { %817 = vmatpush.msrb.mxu0 %v288_v60  ;;  %881 = vmatpush.msrb.mxu3 %v163_v62  ;;  %v70_v60 = vld [vmem:[#allocation2 + $0x90] sm:$0xff]  ;;  %v165_v62 = vld [vmem:[#allocation2 + $0x388] sm:$0xff] }
  0x6f   :  { %862 = vmatpush.msrb.mxu2 %v130_v63  ;;  %839 = vmatpush.msrb.mxu1 %v225_v1  ;;  %v71_v63 = vld [vmem:[#allocation2 + $0x98] sm:$0xff] }
  0x70   :  { %818 = vmatpush.msrb.mxu0 %v256_v0  ;;  %882 = vmatpush.msrb.mxu3 %v131_v2  ;;  %v458_v0 = vld [vmem:[#allocation2 + $0xcb0] sm:$0xf]  ;;  %v459_v1 = vld [vmem:[#allocation2 + $0xcb8] sm:$0xf]  ;;  %v164_v2 = vld [vmem:[#allocation2 + $0x380] sm:$0xff] }
  0x71   :  { %863 = vmatpush.msrb.mxu2 %v98_v3  ;;  %840 = vmatpush.msrb.mxu1 %v193_v5  ;;  %v133_v3 = vld [vmem:[#allocation2 + $0x288] sm:$0xff]  ;;  %v427_v5 = vld [vmem:[#allocation2 + $0xbb8] sm:$0xff] }
  0x72   :  { %819 = vmatpush.msrb.mxu0 %v224_v4  ;;  %883 = vmatpush.msrb.mxu3 %v99_v6  ;;  %v426_v4 = vld [vmem:[#allocation2 + $0xbb0] sm:$0xff]  ;;  %v132_v6 = vld [vmem:[#allocation2 + $0x280] sm:$0xff] }
  0x73   :  { %864 = vmatpush.msrb.mxu2 %v66_v7  ;;  %841 = vmatpush.msrb.mxu1 %v161_v9  ;;  %v101_v7 = vld [vmem:[#allocation2 + $0x188] sm:$0xff]  ;;  %v395_v9 = vld [vmem:[#allocation2 + $0xab8] sm:$0xff] }
  0x74   :  { %820 = vmatpush.msrb.mxu0 %v192_v8  ;;  %884 = vmatpush.msrb.mxu3 %v67_v10  ;;  %v394_v8 = vld [vmem:[#allocation2 + $0xab0] sm:$0xff]  ;;  %v100_v10 = vld [vmem:[#allocation2 + $0x180] sm:$0xff] }
  0x75   :  { %2595 = vmatmul.msk.f32.vlgmr.msra.gmra.mxu2 %vm468_vm1, %v2811_v31  ;;  %2597 = vmatmul.msk.f32.vlgmr.msra.gmra.mxu3 %vm468_vm1, %v2811_v31 }
  0x76   :  { %2610 = vmatpush.msk.msra.mxu2 %vm472_vm0, %v454_v11  ;;  %2612 = vmatpush.msk.msra.mxu3 %vm472_vm0, %v455_v12  ;;  %v69_v11 = vld [vmem:[#allocation2 + $0x88] sm:$0xff]  ;;  %v362_v12 = vld [vmem:[#allocation2 + $0x9b0] sm:$0xff] }
  0x77   :  { %821 = vmatpush.msrb.mxu0 %v160_v13  ;;  %842 = vmatpush.msrb.mxu1 %v129_v14  ;;  %v363_v13 = vld [vmem:[#allocation2 + $0x9b8] sm:$0xff]  ;;  %v457_v14 = vld [vmem:[#allocation2 + $0xca8] sm:$0xf] }
  0x78   :  { %933 = vmatpush.msra.mxu2 %v422_v15  ;;  %953 = vmatpush.msra.mxu3 %v423_v16  ;;  %v68_v15 = vld [vmem:[#allocation2 + $0x80] sm:$0xff]  ;;  %v330_v16 = vld [vmem:[#allocation2 + $0x8b0] sm:$0xff] }
  0x79   :  { %822 = vmatpush.msrb.mxu0 %v128_v17  ;;  %843 = vmatpush.msrb.mxu1 %v97_v18  ;;  %v456_v17 = vld [vmem:[#allocation2 + $0xca0] sm:$0xf]  ;;  %v425_v18 = vld [vmem:[#allocation2 + $0xba8] sm:$0xff] }
  0x7a   :  { %934 = vmatpush.msra.mxu2 %v390_v19  ;;  %954 = vmatpush.msra.mxu3 %v391_v20  ;;  %v331_v19 = vld [vmem:[#allocation2 + $0x8b8] sm:$0xff]  ;;  %v298_v20 = vld [vmem:[#allocation2 + $0x7b0] sm:$0xff] }
  0x7b   :  { %823 = vmatpush.msrb.mxu0 %v96_v21  ;;  %844 = vmatpush.msrb.mxu1 %v65_v22  ;;  %v424_v21 = vld [vmem:[#allocation2 + $0xba0] sm:$0xff]  ;;  %v393_v22 = vld [vmem:[#allocation2 + $0xaa8] sm:$0xff] }
  0x7c   :  { %935 = vmatpush.msra.mxu2 %v358_v23  ;;  %2593 = vmatmul.msk.f32.vlgmr.msra.gmra.mxu1 %vm468_vm1, %v2811_v31  ;;  %v299_v23 = vld [vmem:[#allocation2 + $0x7b8] sm:$0xff] }
  0x7d   :  { %955 = vmatpush.msra.mxu3 %v359_v24  ;;  %2608 = vmatpush.msk.msra.mxu1 %vm472_vm0, %v453_v25  ;;  %v266_v24 = vld [vmem:[#allocation2 + $0x6b0] sm:$0xff]  ;;  %v392_v25 = vld [vmem:[#allocation2 + $0xaa0] sm:$0xff] }
  0x7e   :  { %824 = vmatpush.msrb.mxu0 %v64_v26  ;;  %936 = vmatpush.msra.mxu2 %v326_v27  ;;  %v361_v26 = vld [vmem:[#allocation2 + $0x9a8] sm:$0xff]  ;;  %v267_v27 = vld [vmem:[#allocation2 + $0x6b8] sm:$0xff] }
  0x7f   :  { %2591 = vmatmul.msk.f32.vlgmr.msra.gmra.mxu0 %vm468_vm1, %v2811_v31  ;;  %913 = vmatpush.msra.mxu1 %v421_v29  ;;  %v360_v29 = vld [vmem:[#allocation2 + $0x9a0] sm:$0xff] }
  0x80   :  { %2606 = vmatpush.msk.msra.mxu0 %vm472_vm0, %v452_v28  ;;  %956 = vmatpush.msra.mxu3 %v327_v30  ;;  %v234_v28 = vld [vmem:[#allocation2 + $0x5b0] sm:$0xff]  ;;  %v329_v30 = vld [vmem:[#allocation2 + $0x8a8] sm:$0xff] }
  0x81   :  { %937 = vmatpush.msra.mxu2 %v294_v32  ;;  %914 = vmatpush.msra.mxu1 %v389_v34  ;;  %v235_v32 = vld [vmem:[#allocation2 + $0x5b8] sm:$0xff]  ;;  %v328_v34 = vld [vmem:[#allocation2 + $0x8a0] sm:$0xff] }
  0x82   :  { %893 = vmatpush.msra.mxu0 %v420_v33  ;;  %957 = vmatpush.msra.mxu3 %v295_v35  ;;  %v202_v33 = vld [vmem:[#allocation2 + $0x4b0] sm:$0xff]  ;;  %v297_v35 = vld [vmem:[#allocation2 + $0x7a8] sm:$0xff] }
  0x83   :  { %938 = vmatpush.msra.mxu2 %v262_v36  ;;  %915 = vmatpush.msra.mxu1 %v357_v38  ;;  %v203_v36 = vld [vmem:[#allocation2 + $0x4b8] sm:$0xff]  ;;  %v296_v38 = vld [vmem:[#allocation2 + $0x7a0] sm:$0xff] }
  0x84   :  { %894 = vmatpush.msra.mxu0 %v388_v37  ;;  %958 = vmatpush.msra.mxu3 %v263_v39  ;;  %v170_v37 = vld [vmem:[#allocation2 + $0x3b0] sm:$0xff]  ;;  %v265_v39 = vld [vmem:[#allocation2 + $0x6a8] sm:$0xff] }
  0x85   :  { %939 = vmatpush.msra.mxu2 %v230_v40  ;;  %916 = vmatpush.msra.mxu1 %v325_v42  ;;  %v171_v40 = vld [vmem:[#allocation2 + $0x3b8] sm:$0xff]  ;;  %v264_v42 = vld [vmem:[#allocation2 + $0x6a0] sm:$0xff] }
  0x86   :  { %895 = vmatpush.msra.mxu0 %v356_v41  ;;  %959 = vmatpush.msra.mxu3 %v231_v43  ;;  %v138_v41 = vld [vmem:[#allocation2 + $0x2b0] sm:$0xff]  ;;  %v233_v43 = vld [vmem:[#allocation2 + $0x5a8] sm:$0xff] }
  0x87   :  { %940 = vmatpush.msra.mxu2 %v198_v44  ;;  %917 = vmatpush.msra.mxu1 %v293_v46  ;;  %v139_v44 = vld [vmem:[#allocation2 + $0x2b8] sm:$0xff]  ;;  %v232_v46 = vld [vmem:[#allocation2 + $0x5a0] sm:$0xff] }
  0x88   :  { %896 = vmatpush.msra.mxu0 %v324_v45  ;;  %960 = vmatpush.msra.mxu3 %v199_v47  ;;  %v106_v45 = vld [vmem:[#allocation2 + $0x1b0] sm:$0xff]  ;;  %v201_v47 = vld [vmem:[#allocation2 + $0x4a8] sm:$0xff] }
  0x89   :  { %941 = vmatpush.msra.mxu2 %v166_v48  ;;  %918 = vmatpush.msra.mxu1 %v261_v50  ;;  %v107_v48 = vld [vmem:[#allocation2 + $0x1b8] sm:$0xff]  ;;  %v200_v50 = vld [vmem:[#allocation2 + $0x4a0] sm:$0xff] }
  0x8a   :  { %897 = vmatpush.msra.mxu0 %v292_v49  ;;  %961 = vmatpush.msra.mxu3 %v167_v51  ;;  %v74_v49 = vld [vmem:[#allocation2 + $0xb0] sm:$0xff]  ;;  %v169_v51 = vld [vmem:[#allocation2 + $0x3a8] sm:$0xff] }
  0x8b   :  { %942 = vmatpush.msra.mxu2 %v134_v52  ;;  %919 = vmatpush.msra.mxu1 %v229_v54  ;;  %v75_v52 = vld [vmem:[#allocation2 + $0xb8] sm:$0xff] }
  0x8c   :  { %898 = vmatpush.msra.mxu0 %v260_v53  ;;  %962 = vmatpush.msra.mxu3 %v135_v55  ;;  %v462_v53 = vld [vmem:[#allocation2 + $0xcd0] sm:$0xf]  ;;  %v463_v54 = vld [vmem:[#allocation2 + $0xcd8] sm:$0xf]  ;;  %v168_v55 = vld [vmem:[#allocation2 + $0x3a0] sm:$0xff] }
  0x8d   :  { %943 = vmatpush.msra.mxu2 %v102_v56  ;;  %920 = vmatpush.msra.mxu1 %v197_v58  ;;  %v137_v56 = vld [vmem:[#allocation2 + $0x2a8] sm:$0xff]  ;;  %v431_v58 = vld [vmem:[#allocation2 + $0xbd8] sm:$0xff] }
  0x8e   :  { %899 = vmatpush.msra.mxu0 %v228_v57  ;;  %963 = vmatpush.msra.mxu3 %v103_v59  ;;  %v430_v57 = vld [vmem:[#allocation2 + $0xbd0] sm:$0xff]  ;;  %v136_v59 = vld [vmem:[#allocation2 + $0x2a0] sm:$0xff] }
  0x8f   :  { %944 = vmatpush.msra.mxu2 %v70_v60  ;;  %921 = vmatpush.msra.mxu1 %v165_v62  ;;  %v105_v60 = vld [vmem:[#allocation2 + $0x1a8] sm:$0xff]  ;;  %v399_v62 = vld [vmem:[#allocation2 + $0xad8] sm:$0xff] }
  0x90   :  { %900 = vmatpush.msra.mxu0 %v196_v61  ;;  %964 = vmatpush.msra.mxu3 %v71_v63  ;;  %v398_v61 = vld [vmem:[#allocation2 + $0xad0] sm:$0xff]  ;;  %v104_v63 = vld [vmem:[#allocation2 + $0x1a0] sm:$0xff] }
  0x91   :  { %2603 = vmatmul.msk.f32.vlgmr.msrb.gmra.mxu2 %vm468_vm1, %v2811_v31  ;;  %2605 = vmatmul.msk.f32.vlgmr.msrb.gmra.mxu3 %vm468_vm1, %v2811_v31 }
  0x92   :  { %2618 = vmatpush.msk.msrb.mxu2 %vm472_vm0, %v458_v0  ;;  %2620 = vmatpush.msk.msrb.mxu3 %vm472_vm0, %v459_v1  ;;  %v73_v0 = vld [vmem:[#allocation2 + $0xa8] sm:$0xff]  ;;  %v366_v1 = vld [vmem:[#allocation2 + $0x9d0] sm:$0xff] }
  0x93   :  { %901 = vmatpush.msra.mxu0 %v164_v2  ;;  %922 = vmatpush.msra.mxu1 %v133_v3  ;;  %v367_v2 = vld [vmem:[#allocation2 + $0x9d8] sm:$0xff]  ;;  %v461_v3 = vld [vmem:[#allocation2 + $0xcc8] sm:$0xf] }
  0x94   :  { %1013 = vmatpush.msrb.mxu2 %v426_v4  ;;  %1033 = vmatpush.msrb.mxu3 %v427_v5  ;;  %v72_v4 = vld [vmem:[#allocation2 + $0xa0] sm:$0xff]  ;;  %v334_v5 = vld [vmem:[#allocation2 + $0x8d0] sm:$0xff] }
  0x95   :  { %902 = vmatpush.msra.mxu0 %v132_v6  ;;  %923 = vmatpush.msra.mxu1 %v101_v7  ;;  %v460_v6 = vld [vmem:[#allocation2 + $0xcc0] sm:$0xf]  ;;  %v429_v7 = vld [vmem:[#allocation2 + $0xbc8] sm:$0xff] }
  0x96   :  { %1014 = vmatpush.msrb.mxu2 %v394_v8  ;;  %1034 = vmatpush.msrb.mxu3 %v395_v9  ;;  %v335_v8 = vld [vmem:[#allocation2 + $0x8d8] sm:$0xff]  ;;  %v302_v9 = vld [vmem:[#allocation2 + $0x7d0] sm:$0xff] }
  0x97   :  { %903 = vmatpush.msra.mxu0 %v100_v10  ;;  %924 = vmatpush.msra.mxu1 %v69_v11  ;;  %v428_v10 = vld [vmem:[#allocation2 + $0xbc0] sm:$0xff]  ;;  %v397_v11 = vld [vmem:[#allocation2 + $0xac8] sm:$0xff] }
  0x98   :  { %1015 = vmatpush.msrb.mxu2 %v362_v12  ;;  %2601 = vmatmul.msk.f32.vlgmr.msrb.gmra.mxu1 %vm468_vm1, %v2811_v31  ;;  %v303_v12 = vld [vmem:[#allocation2 + $0x7d8] sm:$0xff] }
  0x99   :  { %1035 = vmatpush.msrb.mxu3 %v363_v13  ;;  %2616 = vmatpush.msk.msrb.mxu1 %vm472_vm0, %v457_v14  ;;  %v270_v13 = vld [vmem:[#allocation2 + $0x6d0] sm:$0xff]  ;;  %v396_v14 = vld [vmem:[#allocation2 + $0xac0] sm:$0xff] }
  0x9a   :  { %904 = vmatpush.msra.mxu0 %v68_v15  ;;  %1016 = vmatpush.msrb.mxu2 %v330_v16  ;;  %v365_v15 = vld [vmem:[#allocation2 + $0x9c8] sm:$0xff]  ;;  %v271_v16 = vld [vmem:[#allocation2 + $0x6d8] sm:$0xff] }
  0x9b   :  { %2599 = vmatmul.msk.f32.vlgmr.msrb.gmra.mxu0 %vm468_vm1, %v2811_v31  ;;  %993 = vmatpush.msrb.mxu1 %v425_v18  ;;  %v364_v18 = vld [vmem:[#allocation2 + $0x9c0] sm:$0xff] }
  0x9c   :  { %2614 = vmatpush.msk.msrb.mxu0 %vm472_vm0, %v456_v17  ;;  %1036 = vmatpush.msrb.mxu3 %v331_v19  ;;  %v238_v17 = vld [vmem:[#allocation2 + $0x5d0] sm:$0xff]  ;;  %v239_v19 = vld [vmem:[#allocation2 + $0x5d8] sm:$0xff] }
  0x9d   :  { %1017 = vmatpush.msrb.mxu2 %v298_v20  ;;  %994 = vmatpush.msrb.mxu1 %v393_v22  ;;  %v206_v20 = vld [vmem:[#allocation2 + $0x4d0] sm:$0xff]  ;;  %v301_v22 = vld [vmem:[#allocation2 + $0x7c8] sm:$0xff] }
  0x9e   :  { %973 = vmatpush.msrb.mxu0 %v424_v21  ;;  %1037 = vmatpush.msrb.mxu3 %v299_v23  ;;  %v332_v21 = vld [vmem:[#allocation2 + $0x8c0] sm:$0xff]  ;;  %v207_v23 = vld [vmem:[#allocation2 + $0x4d8] sm:$0xff] }
  0x9f   :  { %1018 = vmatpush.msrb.mxu2 %v266_v24  ;;  %995 = vmatpush.msrb.mxu1 %v361_v26  ;;  %v174_v24 = vld [vmem:[#allocation2 + $0x3d0] sm:$0xff]  ;;  %v269_v26 = vld [vmem:[#allocation2 + $0x6c8] sm:$0xff] }
  0xa0   :  { %974 = vmatpush.msrb.mxu0 %v392_v25  ;;  %1038 = vmatpush.msrb.mxu3 %v267_v27  ;;  %v300_v25 = vld [vmem:[#allocation2 + $0x7c0] sm:$0xff] }
  0xa1   :  { %1019 = vmatpush.msrb.mxu2 %v234_v28  ;;  %996 = vmatpush.msrb.mxu1 %v329_v30  ;;  %v175_v28 = vld [vmem:[#allocation2 + $0x3d8] sm:$0xff] }
  0xa2   :  { %975 = vmatpush.msrb.mxu0 %v360_v29  ;;  %1039 = vmatpush.msrb.mxu3 %v235_v32  ;;  %v142_v29 = vld [vmem:[#allocation2 + $0x2d0] sm:$0xff]  ;;  %v268_v32 = vld [vmem:[#allocation2 + $0x6c0] sm:$0xff] }
  0xa3   :  { %1020 = vmatpush.msrb.mxu2 %v202_v33  ;;  %997 = vmatpush.msrb.mxu1 %v297_v35  ;;  %v237_v33 = vld [vmem:[#allocation2 + $0x5c8] sm:$0xff]  ;;  %v143_v35 = vld [vmem:[#allocation2 + $0x2d8] sm:$0xff] }
  0xa4   :  { %976 = vmatpush.msrb.mxu0 %v328_v34  ;;  %1040 = vmatpush.msrb.mxu3 %v203_v36  ;;  %v110_v36 = vld [vmem:[#allocation2 + $0x1d0] sm:$0xff] }
  0xa5   :  { %1021 = vmatpush.msrb.mxu2 %v170_v37  ;;  %998 = vmatpush.msrb.mxu1 %v265_v39  ;;  %v236_v39 = vld [vmem:[#allocation2 + $0x5c0] sm:$0xff] }
  0xa6   :  { %977 = vmatpush.msrb.mxu0 %v296_v38  ;;  %1041 = vmatpush.msrb.mxu3 %v171_v40  ;;  %v205_v40 = vld [vmem:[#allocation2 + $0x4c8] sm:$0xff] }
  0xa7   :  { %1022 = vmatpush.msrb.mxu2 %v138_v41  ;;  %999 = vmatpush.msrb.mxu1 %v233_v43  ;;  %v78_v43 = vld [vmem:[#allocation2 + $0xd0] sm:$0xff] }
  0xa8   :  { %978 = vmatpush.msrb.mxu0 %v264_v42  ;;  %1042 = vmatpush.msrb.mxu3 %v139_v44  ;;  %v111_v42 = vld [vmem:[#allocation2 + $0x1d8] sm:$0xff] }
  0xa9   :  { %1023 = vmatpush.msrb.mxu2 %v106_v45  ;;  %1000 = vmatpush.msrb.mxu1 %v201_v47  ;;  %v173_v47 = vld [vmem:[#allocation2 + $0x3c8] sm:$0xff] }
  0xaa   :  { %979 = vmatpush.msrb.mxu0 %v232_v46  ;;  %1043 = vmatpush.msrb.mxu3 %v107_v48  ;;  %v204_v46 = vld [vmem:[#allocation2 + $0x4c0] sm:$0xff] }
  0xab   :  { %1024 = vmatpush.msrb.mxu2 %v74_v49  ;;  %1001 = vmatpush.msrb.mxu1 %v169_v51  ;;  %v79_v49 = vld [vmem:[#allocation2 + $0xd8] sm:$0xff]  ;;  %v466_v51 = vld [vmem:[#allocation2 + $0xcf0] sm:$0xf] }
  0xac   :  { %980 = vmatpush.msrb.mxu0 %v200_v50  ;;  %1044 = vmatpush.msrb.mxu3 %v75_v52  ;;  %v467_v52 = vld [vmem:[#allocation2 + $0xcf8] sm:$0xf] }
  0xad   :  { %2611 = vmatmul.msk.f32.vlgmr.msra.gmra.mxu2 %vm468_vm1, %v2811_v31  ;;  %2613 = vmatmul.msk.f32.vlgmr.msra.gmra.mxu3 %vm468_vm1, %v2811_v31 }
  0xae   :  { %2626 = vmatpush.msk.msra.mxu2 %vm472_vm0, %v462_v53  ;;  %2628 = vmatpush.msk.msra.mxu3 %vm472_vm0, %v463_v54  ;;  %v172_v53 = vld [vmem:[#allocation2 + $0x3c0] sm:$0xff] }
  0xaf   :  { %981 = vmatpush.msrb.mxu0 %v168_v55  ;;  %1002 = vmatpush.msrb.mxu1 %v137_v56  ;;  %v2882_v54 = vld [vmem:[%s3131_s0] sm:$0x3]  ;;  %v141_v55 = vld [vmem:[#allocation2 + $0x2c8] sm:$0xff]  ;;  %v434_v56 = vld [vmem:[#allocation2 + $0xbf0] sm:$0xff] }
  0xb0   :  { %1093 = vmatpush.msra.mxu2 %v430_v57  ;;  %1113 = vmatpush.msra.mxu3 %v431_v58  ;;  %v435_v57 = vld [vmem:[#allocation2 + $0xbf8] sm:$0xff]  ;;  %v140_v58 = vld [vmem:[#allocation2 + $0x2c0] sm:$0xff] }
  0xb1   :  { %982 = vmatpush.msrb.mxu0 %v136_v59  ;;  %1003 = vmatpush.msrb.mxu1 %v105_v60  ;;  %v109_v59 = vld [vmem:[#allocation2 + $0x1c8] sm:$0xff]  ;;  %v402_v60 = vld [vmem:[#allocation2 + $0xaf0] sm:$0xff] }
  0xb2   :  { %1094 = vmatpush.msra.mxu2 %v398_v61  ;;  %1114 = vmatpush.msra.mxu3 %v399_v62  ;;  %v403_v61 = vld [vmem:[#allocation2 + $0xaf8] sm:$0xff]  ;;  %v108_v62 = vld [vmem:[#allocation2 + $0x1c0] sm:$0xff] }
  0xb3   :  { %983 = vmatpush.msrb.mxu0 %v104_v63  ;;  %1004 = vmatpush.msrb.mxu1 %v73_v0  ;;  %v77_v63 = vld [vmem:[#allocation2 + $0xc8] sm:$0xff]  ;;  %v370_v0 = vld [vmem:[#allocation2 + $0x9f0] sm:$0xff] }
  0xb4   :  { %1095 = vmatpush.msra.mxu2 %v366_v1  ;;  %2609 = vmatmul.msk.f32.vlgmr.msra.gmra.mxu1 %vm468_vm1, %v2811_v31  ;;  %v371_v1 = vld [vmem:[#allocation2 + $0x9f8] sm:$0xff] }
  0xb5   :  { %1115 = vmatpush.msra.mxu3 %v367_v2  ;;  %2624 = vmatpush.msk.msra.mxu1 %vm472_vm0, %v461_v3  ;;  %v465_v2 = vld [vmem:[#allocation2 + $0xce8] sm:$0xf]  ;;  %v76_v3 = vld [vmem:[#allocation2 + $0xc0] sm:$0xff] }
  0xb6   :  { %984 = vmatpush.msrb.mxu0 %v72_v4  ;;  %1096 = vmatpush.msra.mxu2 %v334_v5  ;;  %v338_v4 = vld [vmem:[#allocation2 + $0x8f0] sm:$0xff]  ;;  %v464_v5 = vld [vmem:[#allocation2 + $0xce0] sm:$0xf] }
  0xb7   :  { %2607 = vmatmul.msk.f32.vlgmr.msra.gmra.mxu0 %vm468_vm1, %v2811_v31  ;;  %1073 = vmatpush.msra.mxu1 %v429_v7  ;;  %v333_v31 = vld [vmem:[#allocation2 + $0x8c8] sm:$0xff]  ;;  %v339_v7 = vld [vmem:[#allocation2 + $0x8f8] sm:$0xff] }
  0xb8   :  { %2622 = vmatpush.msk.msra.mxu0 %vm472_vm0, %v460_v6  ;;  %1116 = vmatpush.msra.mxu3 %v335_v8  ;;  %v433_v6 = vld [vmem:[#allocation2 + $0xbe8] sm:$0xff]  ;;  %v306_v8 = vld [vmem:[#allocation2 + $0x7f0] sm:$0xff] }
  0xb9   :  { %1097 = vmatpush.msra.mxu2 %v302_v9  ;;  %1074 = vmatpush.msra.mxu1 %v397_v11  ;;  %v432_v9 = vld [vmem:[#allocation2 + $0xbe0] sm:$0xff]  ;;  %v307_v11 = vld [vmem:[#allocation2 + $0x7f8] sm:$0xff] }
  0xba   :  { %1053 = vmatpush.msra.mxu0 %v428_v10  ;;  %1117 = vmatpush.msra.mxu3 %v303_v12  ;;  %v401_v10 = vld [vmem:[#allocation2 + $0xae8] sm:$0xff]  ;;  %v274_v12 = vld [vmem:[#allocation2 + $0x6f0] sm:$0xff] }
  0xbb   :  { %1098 = vmatpush.msra.mxu2 %v270_v13  ;;  %1075 = vmatpush.msra.mxu1 %v365_v15  ;;  %v400_v13 = vld [vmem:[#allocation2 + $0xae0] sm:$0xff]  ;;  %v275_v15 = vld [vmem:[#allocation2 + $0x6f8] sm:$0xff] }
  0xbc   :  { %1054 = vmatpush.msra.mxu0 %v396_v14  ;;  %1118 = vmatpush.msra.mxu3 %v271_v16  ;;  %v369_v14 = vld [vmem:[#allocation2 + $0x9e8] sm:$0xff]  ;;  %v242_v16 = vld [vmem:[#allocation2 + $0x5f0] sm:$0xff] }
  0xbd   :  { %1099 = vmatpush.msra.mxu2 %v238_v17  ;;  %1076 = vmatpush.msra.mxu1 %v333_v31  ;;  %v646_v34 = vpop.f32.mrf.mxu3  ;;  %v368_v17 = vld [vmem:[#allocation2 + $0x9e0] sm:$0xff]  ;;  %v243_v31 = vld [vmem:[#allocation2 + $0x5f8] sm:$0xff] }
  0xbe   :  { %1055 = vmatpush.msra.mxu0 %v364_v18  ;;  %1119 = vmatpush.msra.mxu3 %v239_v19  ;;  %v626_v27 = vpop.f32.mrf.mxu2  ;;  %v1243_v38 = vrot.slane %v646_v34, 2  ;;  %v337_v18 = vld [vmem:[#allocation2 + $0x8e8] sm:$0xff]  ;;  %v210_v19 = vld [vmem:[#allocation2 + $0x4f0] sm:$0xff]  ;;  %v147_v34 = vld [vmem:[#allocation2 + $0x2f8] sm:$0xff] }
  0xbf   :  { %1100 = vmatpush.msra.mxu2 %v206_v20  ;;  %1077 = vmatpush.msra.mxu1 %v301_v22  ;;  %v1242_v30 = vrot.slane %v626_v27, 4  ;;  %v606_v37 = vpop.f32.mrf.mxu1  ;;  %v336_v20 = vld [vmem:[#allocation2 + $0x8e0] sm:$0xff]  ;;  %v211_v22 = vld [vmem:[#allocation2 + $0x4f8] sm:$0xff]  ;;  %v146_v27 = vld [vmem:[#allocation2 + $0x2f0] sm:$0xff] }
  0xc0   :  { %1056 = vmatpush.msra.mxu0 %v332_v21  ;;  %1120 = vmatpush.msra.mxu3 %v207_v23  ;;  %v1241_v41 = vrot.slane %v606_v37, 6  ;;  %v305_v21 = vld [vmem:[#allocation2 + $0x7e8] sm:$0xff]  ;;  %v178_v23 = vld [vmem:[#allocation2 + $0x3f0] sm:$0xff] }
  0xc1   :  { %1101 = vmatpush.msra.mxu2 %v174_v24  ;;  %1078 = vmatpush.msra.mxu1 %v269_v26  ;;  %v1268_v44 = vsel %vm1267_vm2, %v1242_v30, %v1243_v38  ;;  %v304_v24 = vld [vmem:[#allocation2 + $0x7e0] sm:$0xff]  ;;  %v179_v26 = vld [vmem:[#allocation2 + $0x3f8] sm:$0xff]  ;;  %v241_v30 = vld [vmem:[#allocation2 + $0x5e8] sm:$0xff] }
  0xc2   :  { %1057 = vmatpush.msra.mxu0 %v300_v25  ;;  %1121 = vmatpush.msra.mxu3 %v175_v28  ;;  %v586_v45 = vpop.f32.mrf.mxu0  ;;  %v273_v25 = vld [vmem:[#allocation2 + $0x6e8] sm:$0xff]  ;;  %v240_v38 = vld [vmem:[#allocation2 + $0x5e0] sm:$0xff] }
  0xc3   :  { %1102 = vmatpush.msra.mxu2 %v142_v29  ;;  %1079 = vmatpush.msra.mxu1 %v237_v33  ;;  %v1266_v48 = vsel %vm1265_vm3, %v586_v45, %v1241_v41  ;;  %v272_v29 = vld [vmem:[#allocation2 + $0x6e0] sm:$0xff]  ;;  %v115_v41 = vld [vmem:[#allocation2 + $0x1f8] sm:$0xff] }
  0xc4   :  { %1058 = vmatpush.msra.mxu0 %v268_v32  ;;  %1122 = vmatpush.msra.mxu3 %v143_v35  ;;  %v1269_v50 = vsel %vm472_vm0, %v1266_v48, %v1268_v44  ;;  %v114_v35 = vld [vmem:[#allocation2 + $0x1f0] sm:$0xff]  ;;  %v208_v45 = vld [vmem:[#allocation2 + $0x4e0] sm:$0xff]  ;;  %v83_v48 = vld [vmem:[#allocation2 + $0xf8] sm:$0xff] }
  0xc5   :  { %1103 = vmatpush.msra.mxu2 %v110_v36  ;;  %1080 = vmatpush.msra.mxu1 %v205_v40  ;;  %1299 = vst [vmem:[%s3135_s4] sm:$0xff] %v1269_v50  ;;  %v1699_v50 = vld [vmem:[#allocation4 + $0xc10] sm:$0xf] }
  0xc6   :  { %1059 = vmatpush.msra.mxu0 %v236_v39  ;;  %1123 = vmatpush.msra.mxu3 %v111_v42  ;;  %v209_v39 = vld [vmem:[#allocation2 + $0x4e8] sm:$0xff]  ;;  %v82_v42 = vld [vmem:[#allocation2 + $0xf0] sm:$0xff] }
  0xc7   :  { %1104 = vmatpush.msra.mxu2 %v78_v43  ;;  %1081 = vmatpush.msra.mxu1 %v173_v47 }
  0xc8   :  { %1060 = vmatpush.msra.mxu0 %v204_v46  ;;  %1124 = vmatpush.msra.mxu3 %v79_v49  ;;  %v177_v46 = vld [vmem:[#allocation2 + $0x3e8] sm:$0xff] }
  0xc9   :  { %2619 = vmatmul.msk.f32.vlgmr.msrb.gmra.mxu2 %vm468_vm1, %v2882_v54  ;;  %2621 = vmatmul.msk.f32.vlgmr.msrb.gmra.mxu3 %vm468_vm1, %v2882_v54 }
  0xca   :  { %2634 = vmatpush.msk.msrb.mxu2 %vm472_vm0, %v466_v51  ;;  %2636 = vmatpush.msk.msrb.mxu3 %vm472_vm0, %v467_v52  ;;  %v1700_v51 = vld [vmem:[#allocation4 + $0xc18] sm:$0xf]  ;;  %v176_v52 = vld [vmem:[#allocation2 + $0x3e0] sm:$0xff] }
  0xcb   :  { %1061 = vmatpush.msra.mxu0 %v172_v53  ;;  %1082 = vmatpush.msra.mxu1 %v141_v55  ;;  %v145_v53 = vld [vmem:[#allocation2 + $0x2e8] sm:$0xff]  ;;  %v1667_v55 = vld [vmem:[#allocation4 + $0xb10] sm:$0xff] }
  0xcc   :  { %1173 = vmatpush.msrb.mxu2 %v434_v56  ;;  %1193 = vmatpush.msrb.mxu3 %v435_v57  ;;  %v1668_v56 = vld [vmem:[#allocation4 + $0xb18] sm:$0xff]  ;;  %v144_v57 = vld [vmem:[#allocation2 + $0x2e0] sm:$0xff] }
  0xcd   :  { %1062 = vmatpush.msra.mxu0 %v140_v58  ;;  %1083 = vmatpush.msra.mxu1 %v109_v59  ;;  %v113_v58 = vld [vmem:[#allocation2 + $0x1e8] sm:$0xff]  ;;  %v1635_v59 = vld [vmem:[#allocation4 + $0xa10] sm:$0xff] }
  0xce   :  { %1174 = vmatpush.msrb.mxu2 %v402_v60  ;;  %1194 = vmatpush.msrb.mxu3 %v403_v61  ;;  %v1636_v60 = vld [vmem:[#allocation4 + $0xa18] sm:$0xff]  ;;  %v112_v61 = vld [vmem:[#allocation2 + $0x1e0] sm:$0xff] }
  0xcf   :  { %1063 = vmatpush.msra.mxu0 %v108_v62  ;;  %1084 = vmatpush.msra.mxu1 %v77_v63  ;;  %v81_v62 = vld [vmem:[#allocation2 + $0xe8] sm:$0xff]  ;;  %v1603_v63 = vld [vmem:[#allocation4 + $0x910] sm:$0xff] }
  0xd0   :  { %1175 = vmatpush.msrb.mxu2 %v370_v0  ;;  %2617 = vmatmul.msk.f32.vlgmr.msrb.gmra.mxu1 %vm468_vm1, %v2882_v54  ;;  %v1604_v0 = vld [vmem:[#allocation4 + $0x918] sm:$0xff] }
  0xd1   :  { %1195 = vmatpush.msrb.mxu3 %v371_v1  ;;  %2632 = vmatpush.msk.msrb.mxu1 %vm472_vm0, %v465_v2  ;;  %v1698_v1 = vld [vmem:[#allocation4 + $0xc08] sm:$0xf]  ;;  %v80_v2 = vld [vmem:[#allocation2 + $0xe0] sm:$0xff] }
  0xd2   :  { %1064 = vmatpush.msra.mxu0 %v76_v3  ;;  %1176 = vmatpush.msrb.mxu2 %v338_v4  ;;  %v1571_v3 = vld [vmem:[#allocation4 + $0x810] sm:$0xff]  ;;  %v1697_v4 = vld [vmem:[#allocation4 + $0xc00] sm:$0xf] }
  0xd3   :  { %2615 = vmatmul.msk.f32.vlgmr.msrb.gmra.mxu0 %vm468_vm1, %v2882_v54  ;;  %1153 = vmatpush.msrb.mxu1 %v433_v6  ;;  %v1572_v6 = vld [vmem:[#allocation4 + $0x818] sm:$0xff] }
  0xd4   :  { %2630 = vmatpush.msk.msrb.mxu0 %vm472_vm0, %v464_v5  ;;  %1196 = vmatpush.msrb.mxu3 %v339_v7  ;;  %v1666_v5 = vld [vmem:[#allocation4 + $0xb08] sm:$0xff]  ;;  %v1539_v7 = vld [vmem:[#allocation4 + $0x710] sm:$0xff] }
  0xd5   :  { %1177 = vmatpush.msrb.mxu2 %v306_v8  ;;  %1154 = vmatpush.msrb.mxu1 %v401_v10  ;;  %v1665_v8 = vld [vmem:[#allocation4 + $0xb00] sm:$0xff]  ;;  %v1540_v10 = vld [vmem:[#allocation4 + $0x718] sm:$0xff] }
  0xd6   :  { %1133 = vmatpush.msrb.mxu0 %v432_v9  ;;  %1197 = vmatpush.msrb.mxu3 %v307_v11  ;;  %v1634_v9 = vld [vmem:[#allocation4 + $0xa08] sm:$0xff]  ;;  %v1507_v11 = vld [vmem:[#allocation4 + $0x610] sm:$0xff] }
  0xd7   :  { %1178 = vmatpush.msrb.mxu2 %v274_v12  ;;  %1155 = vmatpush.msrb.mxu1 %v369_v14  ;;  %v1633_v12 = vld [vmem:[#allocation4 + $0xa00] sm:$0xff]  ;;  %v1508_v14 = vld [vmem:[#allocation4 + $0x618] sm:$0xff] }
  0xd8   :  { %1134 = vmatpush.msrb.mxu0 %v400_v13  ;;  %1198 = vmatpush.msrb.mxu3 %v275_v15  ;;  %v1602_v13 = vld [vmem:[#allocation4 + $0x908] sm:$0xff]  ;;  %v1475_v15 = vld [vmem:[#allocation4 + $0x510] sm:$0xff] }
  0xd9   :  { %1179 = vmatpush.msrb.mxu2 %v242_v16  ;;  %1156 = vmatpush.msrb.mxu1 %v337_v18  ;;  %v1601_v16 = vld [vmem:[#allocation4 + $0x900] sm:$0xff]  ;;  %v1476_v18 = vld [vmem:[#allocation4 + $0x518] sm:$0xff] }
  0xda   :  { %1135 = vmatpush.msrb.mxu0 %v368_v17  ;;  %1199 = vmatpush.msrb.mxu3 %v243_v31  ;;  %v1570_v17 = vld [vmem:[#allocation4 + $0x808] sm:$0xff]  ;;  %v1443_v31 = vld [vmem:[#allocation4 + $0x410] sm:$0xff] }
  0xdb   :  { %1180 = vmatpush.msrb.mxu2 %v210_v19  ;;  %1157 = vmatpush.msrb.mxu1 %v305_v21  ;;  %v726_v33 = vpop.f32.mrf.mxu3  ;;  %v1569_v19 = vld [vmem:[#allocation4 + $0x800] sm:$0xff]  ;;  %v1444_v21 = vld [vmem:[#allocation4 + $0x418] sm:$0xff] }
  0xdc   :  { %1136 = vmatpush.msrb.mxu0 %v336_v20  ;;  %v706_v28 = vpop.f32.mrf.mxu2  ;;  %1200 = vmatpush.msrb.mxu3 %v211_v22  ;;  %v1246_v37 = vrot.slane %v726_v33, 2  ;;  %v1538_v20 = vld [vmem:[#allocation4 + $0x708] sm:$0xff]  ;;  %v1411_v22 = vld [vmem:[#allocation4 + $0x310] sm:$0xff]  ;;  %v1380_v33 = vld [vmem:[#allocation4 + $0x218] sm:$0xff] }
  0xdd   :  { %1181 = vmatpush.msrb.mxu2 %v178_v23  ;;  %v1245_v32 = vrot.slane %v706_v28, 4  ;;  %1158 = vmatpush.msrb.mxu1 %v273_v25  ;;  %v686_v36 = vpop.f32.mrf.mxu1  ;;  %v1537_v23 = vld [vmem:[#allocation4 + $0x700] sm:$0xff]  ;;  %v1412_v25 = vld [vmem:[#allocation4 + $0x318] sm:$0xff] }
  0xde   :  { %1137 = vmatpush.msrb.mxu0 %v304_v24  ;;  %1201 = vmatpush.msrb.mxu3 %v179_v26  ;;  %v1244_v40 = vrot.slane %v686_v36, 6  ;;  %v1506_v24 = vld [vmem:[#allocation4 + $0x608] sm:$0xff]  ;;  %v1379_v26 = vld [vmem:[#allocation4 + $0x210] sm:$0xff]  ;;  %v1505_v28 = vld [vmem:[#allocation4 + $0x600] sm:$0xff] }
  0xdf   :  { %1182 = vmatpush.msrb.mxu2 %v146_v27  ;;  %1159 = vmatpush.msrb.mxu1 %v241_v30  ;;  %v1271_v43 = vsel %vm1267_vm2, %v1245_v32, %v1246_v37  ;;  %v1473_v37 = vld [vmem:[#allocation4 + $0x500] sm:$0xff] }
  0xe0   :  { %1138 = vmatpush.msrb.mxu0 %v272_v29  ;;  %v666_v44 = vpop.f32.mrf.mxu0  ;;  %1202 = vmatpush.msrb.mxu3 %v147_v34  ;;  %v1474_v29 = vld [vmem:[#allocation4 + $0x508] sm:$0xff]  ;;  %v1347_v34 = vld [vmem:[#allocation4 + $0x110] sm:$0xff] }
  0xe1   :  { %1183 = vmatpush.msrb.mxu2 %v114_v35  ;;  %v1270_v47 = vsel %vm1265_vm3, %v666_v44, %v1244_v40  ;;  %1160 = vmatpush.msrb.mxu1 %v209_v39  ;;  %v1348_v40 = vld [vmem:[#allocation4 + $0x118] sm:$0xff]  ;;  %v1441_v44 = vld [vmem:[#allocation4 + $0x400] sm:$0xff] }
  0xe2   :  { %1139 = vmatpush.msrb.mxu0 %v240_v38  ;;  %v1272_v49 = vsel %vm472_vm0, %v1270_v47, %v1271_v43  ;;  %1203 = vmatpush.msrb.mxu3 %v115_v41  ;;  %v1442_v38 = vld [vmem:[#allocation4 + $0x408] sm:$0xff]  ;;  %v1315_v41 = vld [vmem:[#allocation4 + $0x10] sm:$0xff]  ;;  %v1316_v47 = vld [vmem:[#allocation4 + $0x18] sm:$0xff] }
  0xe3   :  { %1184 = vmatpush.msrb.mxu2 %v82_v42  ;;  %1300 = vst [vmem:[%s3135_s4 + $0x8] sm:$0xff] %v1272_v49  ;;  %1161 = vmatpush.msrb.mxu1 %v177_v46  ;;  %v1703_v49 = vld [vmem:[#allocation4 + $0xc30] sm:$0xf] }
  0xe4   :  { %1140 = vmatpush.msrb.mxu0 %v208_v45  ;;  %1204 = vmatpush.msrb.mxu3 %v83_v48  ;;  %v1410_v45 = vld [vmem:[#allocation4 + $0x308] sm:$0xff] }
  0xe5   :  { %2627 = vmatmul.msk.f32.vlgmr.msra.gmra.mxu2 %vm468_vm1, %v2882_v54  ;;  %2629 = vmatmul.msk.f32.vlgmr.msra.gmra.mxu3 %vm468_vm1, %v2882_v54 }
  0xe6   :  { %2642 = vmatpush.msk.msra.mxu2 %vm472_vm0, %v1699_v50  ;;  %2644 = vmatpush.msk.msra.mxu3 %vm472_vm0, %v1700_v51  ;;  %v1704_v50 = vld [vmem:[#allocation4 + $0xc38] sm:$0xf]  ;;  %v1409_v51 = vld [vmem:[#allocation4 + $0x300] sm:$0xff] }
  0xe7   :  { %1141 = vmatpush.msrb.mxu0 %v176_v52  ;;  %1162 = vmatpush.msrb.mxu1 %v145_v53  ;;  %v1378_v52 = vld [vmem:[#allocation4 + $0x208] sm:$0xff]  ;;  %v1671_v53 = vld [vmem:[#allocation4 + $0xb30] sm:$0xff] }
  0xe8   :  { %1872 = vmatpush.msra.mxu2 %v1667_v55  ;;  %1892 = vmatpush.msra.mxu3 %v1668_v56  ;;  %v1672_v55 = vld [vmem:[#allocation4 + $0xb38] sm:$0xff]  ;;  %v1377_v56 = vld [vmem:[#allocation4 + $0x200] sm:$0xff] }
  0xe9   :  { %1142 = vmatpush.msrb.mxu0 %v144_v57  ;;  %1163 = vmatpush.msrb.mxu1 %v113_v58  ;;  %v1346_v57 = vld [vmem:[#allocation4 + $0x108] sm:$0xff]  ;;  %v1639_v58 = vld [vmem:[#allocation4 + $0xa30] sm:$0xff] }
  0xea   :  { %1873 = vmatpush.msra.mxu2 %v1635_v59  ;;  %1893 = vmatpush.msra.mxu3 %v1636_v60  ;;  %v1640_v59 = vld [vmem:[#allocation4 + $0xa38] sm:$0xff]  ;;  %v1345_v60 = vld [vmem:[#allocation4 + $0x100] sm:$0xff] }
  0xeb   :  { %1143 = vmatpush.msrb.mxu0 %v112_v61  ;;  %1164 = vmatpush.msrb.mxu1 %v81_v62  ;;  %v1314_v61 = vld [vmem:[#allocation4 + $0x8] sm:$0xff]  ;;  %v1607_v62 = vld [vmem:[#allocation4 + $0x930] sm:$0xff] }
  0xec   :  { %1874 = vmatpush.msra.mxu2 %v1603_v63  ;;  %2625 = vmatmul.msk.f32.vlgmr.msra.gmra.mxu1 %vm468_vm1, %v2882_v54  ;;  %v1608_v63 = vld [vmem:[#allocation4 + $0x938] sm:$0xff] }
  0xed   :  { %1894 = vmatpush.msra.mxu3 %v1604_v0  ;;  %2640 = vmatpush.msk.msra.mxu1 %vm472_vm0, %v1698_v1  ;;  %v1702_v0 = vld [vmem:[#allocation4 + $0xc28] sm:$0xf]  ;;  %v1313_v1 = vld [vmem:[#allocation4] sm:$0xff] }
  0xee   :  { %1144 = vmatpush.msrb.mxu0 %v80_v2  ;;  %1875 = vmatpush.msra.mxu2 %v1571_v3  ;;  %v1575_v2 = vld [vmem:[#allocation4 + $0x830] sm:$0xff]  ;;  %v1701_v3 = vld [vmem:[#allocation4 + $0xc20] sm:$0xf] }
  0xef   :  { %2623 = vmatmul.msk.f32.vlgmr.msra.gmra.mxu0 %vm468_vm1, %v2882_v54  ;;  %1852 = vmatpush.msra.mxu1 %v1666_v5  ;;  %v1576_v5 = vld [vmem:[#allocation4 + $0x838] sm:$0xff] }
  0xf0   :  { %2638 = vmatpush.msk.msra.mxu0 %vm472_vm0, %v1697_v4  ;;  %1895 = vmatpush.msra.mxu3 %v1572_v6  ;;  %v1670_v4 = vld [vmem:[#allocation4 + $0xb28] sm:$0xff]  ;;  %v1543_v6 = vld [vmem:[#allocation4 + $0x730] sm:$0xff] }
  0xf1   :  { %1876 = vmatpush.msra.mxu2 %v1539_v7  ;;  %1853 = vmatpush.msra.mxu1 %v1634_v9  ;;  %v1669_v7 = vld [vmem:[#allocation4 + $0xb20] sm:$0xff]  ;;  %v1544_v9 = vld [vmem:[#allocation4 + $0x738] sm:$0xff] }
  0xf2   :  { %1832 = vmatpush.msra.mxu0 %v1665_v8  ;;  %1896 = vmatpush.msra.mxu3 %v1540_v10  ;;  %v1638_v8 = vld [vmem:[#allocation4 + $0xa28] sm:$0xff]  ;;  %v1511_v10 = vld [vmem:[#allocation4 + $0x630] sm:$0xff] }
  0xf3   :  { %1877 = vmatpush.msra.mxu2 %v1507_v11  ;;  %1854 = vmatpush.msra.mxu1 %v1602_v13  ;;  %v1637_v11 = vld [vmem:[#allocation4 + $0xa20] sm:$0xff]  ;;  %v1512_v13 = vld [vmem:[#allocation4 + $0x638] sm:$0xff] }
  0xf4   :  { %1833 = vmatpush.msra.mxu0 %v1633_v12  ;;  %1897 = vmatpush.msra.mxu3 %v1508_v14  ;;  %v1606_v12 = vld [vmem:[#allocation4 + $0x928] sm:$0xff]  ;;  %v1479_v14 = vld [vmem:[#allocation4 + $0x530] sm:$0xff] }
  0xf5   :  { %1878 = vmatpush.msra.mxu2 %v1475_v15  ;;  %1855 = vmatpush.msra.mxu1 %v1570_v17  ;;  %v1605_v15 = vld [vmem:[#allocation4 + $0x920] sm:$0xff]  ;;  %v1447_v17 = vld [vmem:[#allocation4 + $0x430] sm:$0xff] }
  0xf6   :  { %1834 = vmatpush.msra.mxu0 %v1601_v16  ;;  %1898 = vmatpush.msra.mxu3 %v1476_v18  ;;  %v1480_v16 = vld [vmem:[#allocation4 + $0x538] sm:$0xff]  ;;  %v1573_v18 = vld [vmem:[#allocation4 + $0x820] sm:$0xff] }
  0xf7   :  { %1879 = vmatpush.msra.mxu2 %v1443_v31  ;;  %1856 = vmatpush.msra.mxu1 %v1538_v20  ;;  %v1542_v31 = vld [vmem:[#allocation4 + $0x728] sm:$0xff]  ;;  %v1415_v20 = vld [vmem:[#allocation4 + $0x330] sm:$0xff] }
  0xf8   :  { %1835 = vmatpush.msra.mxu0 %v1569_v19  ;;  %v786_v27 = vpop.f32.mrf.mxu2  ;;  %1899 = vmatpush.msra.mxu3 %v1444_v21  ;;  %v806_v32 = vpop.f32.mrf.mxu3  ;;  %v1448_v19 = vld [vmem:[#allocation4 + $0x438] sm:$0xff]  ;;  %v1541_v21 = vld [vmem:[#allocation4 + $0x720] sm:$0xff] }
  0xf9   :  { %1880 = vmatpush.msra.mxu2 %v1411_v22  ;;  %v1248_v30 = vrot.slane %v786_v27, 4  ;;  %1857 = vmatpush.msra.mxu1 %v1506_v24  ;;  %v766_v35 = vpop.f32.mrf.mxu1  ;;  %v1249_v36 = vrot.slane %v806_v32, 2  ;;  %v1510_v22 = vld [vmem:[#allocation4 + $0x628] sm:$0xff]  ;;  %v1383_v24 = vld [vmem:[#allocation4 + $0x230] sm:$0xff] }
  0xfa   :  { %1836 = vmatpush.msra.mxu0 %v1537_v23  ;;  %1900 = vmatpush.msra.mxu3 %v1412_v25  ;;  %v1247_v39 = vrot.slane %v766_v35, 6  ;;  %v1416_v23 = vld [vmem:[#allocation4 + $0x338] sm:$0xff]  ;;  %v1478_v27 = vld [vmem:[#allocation4 + $0x528] sm:$0xff]  ;;  %v1351_v32 = vld [vmem:[#allocation4 + $0x130] sm:$0xff] }
  0xfb   :  { %1881 = vmatpush.msra.mxu2 %v1379_v26  ;;  %1858 = vmatpush.msra.mxu1 %v1474_v29  ;;  %v1274_v42 = vsel %vm1267_vm2, %v1248_v30, %v1249_v36  ;;  %v1509_v26 = vld [vmem:[#allocation4 + $0x620] sm:$0xff]  ;;  %v1384_v30 = vld [vmem:[#allocation4 + $0x238] sm:$0xff]  ;;  %v1446_v36 = vld [vmem:[#allocation4 + $0x428] sm:$0xff] }
  0xfc   :  { %1837 = vmatpush.msra.mxu0 %v1505_v28  ;;  %v746_v43 = vpop.f32.mrf.mxu0  ;;  %1901 = vmatpush.msra.mxu3 %v1380_v33  ;;  %v1477_v35 = vld [vmem:[#allocation4 + $0x520] sm:$0xff] }
  0xfd   :  { %1882 = vmatpush.msra.mxu2 %v1347_v34  ;;  %v1273_v46 = vsel %vm1265_vm3, %v746_v43, %v1247_v39  ;;  %1859 = vmatpush.msra.mxu1 %v1442_v38  ;;  %v1352_v38 = vld [vmem:[#allocation4 + $0x138] sm:$0xff]  ;;  %v1319_v39 = vld [vmem:[#allocation4 + $0x30] sm:$0xff]  ;;  %v1414_v43 = vld [vmem:[#allocation4 + $0x328] sm:$0xff] }
  0xfe   :  { %1838 = vmatpush.msra.mxu0 %v1473_v37  ;;  %v1275_v48 = vsel %vm472_vm0, %v1273_v46, %v1274_v42  ;;  %1902 = vmatpush.msra.mxu3 %v1348_v40  ;;  %v1445_v42 = vld [vmem:[#allocation4 + $0x420] sm:$0xff] }
  0xff   :  { %1883 = vmatpush.msra.mxu2 %v1315_v41  ;;  %1301 = vst [vmem:[%s3135_s4 + $0x10] sm:$0xff] %v1275_v48  ;;  %1860 = vmatpush.msra.mxu1 %v1410_v45  ;;  %v1320_v45 = vld [vmem:[#allocation4 + $0x38] sm:$0xff]  ;;  %v2937_v46 = vld [vmem:[%s3132_s1] sm:$0x3]  ;;  %v1707_v48 = vld [vmem:[#allocation4 + $0xc50] sm:$0xf] }
 0x100   :  { %1839 = vmatpush.msra.mxu0 %v1441_v44  ;;  %1903 = vmatpush.msra.mxu3 %v1316_v47 }
 0x101   :  { %2635 = vmatmul.msk.f32.vlgmr.msrb.gmra.mxu2 %vm468_vm1, %v2882_v54  ;;  %2637 = vmatmul.msk.f32.vlgmr.msrb.gmra.mxu3 %vm468_vm1, %v2882_v54 }
 0x102   :  { %2650 = vmatpush.msk.msrb.mxu2 %vm472_vm0, %v1703_v49  ;;  %2652 = vmatpush.msk.msrb.mxu3 %vm472_vm0, %v1704_v50  ;;  %v1708_v49 = vld [vmem:[#allocation4 + $0xc58] sm:$0xf]  ;;  %v1413_v50 = vld [vmem:[#allocation4 + $0x320] sm:$0xff] }
 0x103   :  { %1840 = vmatpush.msra.mxu0 %v1409_v51  ;;  %1861 = vmatpush.msra.mxu1 %v1378_v52  ;;  %v1382_v51 = vld [vmem:[#allocation4 + $0x228] sm:$0xff]  ;;  %v1675_v52 = vld [vmem:[#allocation4 + $0xb50] sm:$0xff] }
 0x104   :  { %1952 = vmatpush.msrb.mxu2 %v1671_v53  ;;  %1972 = vmatpush.msrb.mxu3 %v1672_v55  ;;  %v1676_v53 = vld [vmem:[#allocation4 + $0xb58] sm:$0xff]  ;;  %v1381_v55 = vld [vmem:[#allocation4 + $0x220] sm:$0xff] }
 0x105   :  { %1841 = vmatpush.msra.mxu0 %v1377_v56  ;;  %1862 = vmatpush.msra.mxu1 %v1346_v57  ;;  %v1350_v56 = vld [vmem:[#allocation4 + $0x128] sm:$0xff]  ;;  %v1643_v57 = vld [vmem:[#allocation4 + $0xa50] sm:$0xff] }
 0x106   :  { %1953 = vmatpush.msrb.mxu2 %v1639_v58  ;;  %1973 = vmatpush.msrb.mxu3 %v1640_v59  ;;  %v1644_v58 = vld [vmem:[#allocation4 + $0xa58] sm:$0xff]  ;;  %v1349_v59 = vld [vmem:[#allocation4 + $0x120] sm:$0xff] }
 0x107   :  { %1842 = vmatpush.msra.mxu0 %v1345_v60  ;;  %1863 = vmatpush.msra.mxu1 %v1314_v61  ;;  %v1318_v60 = vld [vmem:[#allocation4 + $0x28] sm:$0xff]  ;;  %v1611_v61 = vld [vmem:[#allocation4 + $0x950] sm:$0xff] }
 0x108   :  { %1954 = vmatpush.msrb.mxu2 %v1607_v62  ;;  %2633 = vmatmul.msk.f32.vlgmr.msrb.gmra.mxu1 %vm468_vm1, %v2882_v54  ;;  %v1612_v62 = vld [vmem:[#allocation4 + $0x958] sm:$0xff] }
 0x109   :  { %1974 = vmatpush.msrb.mxu3 %v1608_v63  ;;  %2648 = vmatpush.msk.msrb.mxu1 %vm472_vm0, %v1702_v0  ;;  %v1706_v63 = vld [vmem:[#allocation4 + $0xc48] sm:$0xf]  ;;  %v1317_v0 = vld [vmem:[#allocation4 + $0x20] sm:$0xff] }
 0x10a   :  { %1843 = vmatpush.msra.mxu0 %v1313_v1  ;;  %1955 = vmatpush.msrb.mxu2 %v1575_v2  ;;  %v1579_v1 = vld [vmem:[#allocation4 + $0x850] sm:$0xff]  ;;  %v1705_v2 = vld [vmem:[#allocation4 + $0xc40] sm:$0xf] }
 0x10b   :  { %2631 = vmatmul.msk.f32.vlgmr.msrb.gmra.mxu0 %vm468_vm1, %v2882_v54  ;;  %1932 = vmatpush.msrb.mxu1 %v1670_v4  ;;  %v1574_v54 = vld [vmem:[#allocation4 + $0x828] sm:$0xff]  ;;  %v1580_v4 = vld [vmem:[#allocation4 + $0x858] sm:$0xff] }
 0x10c   :  { %2646 = vmatpush.msk.msrb.mxu0 %vm472_vm0, %v1701_v3  ;;  %1975 = vmatpush.msrb.mxu3 %v1576_v5  ;;  %v1674_v3 = vld [vmem:[#allocation4 + $0xb48] sm:$0xff]  ;;  %v1547_v5 = vld [vmem:[#allocation4 + $0x750] sm:$0xff] }
 0x10d   :  { %1956 = vmatpush.msrb.mxu2 %v1543_v6  ;;  %1933 = vmatpush.msrb.mxu1 %v1638_v8  ;;  %v1673_v6 = vld [vmem:[#allocation4 + $0xb40] sm:$0xff]  ;;  %v1548_v8 = vld [vmem:[#allocation4 + $0x758] sm:$0xff] }
 0x10e   :  { %1912 = vmatpush.msrb.mxu0 %v1669_v7  ;;  %1976 = vmatpush.msrb.mxu3 %v1544_v9  ;;  %v1642_v7 = vld [vmem:[#allocation4 + $0xa48] sm:$0xff]  ;;  %v1515_v9 = vld [vmem:[#allocation4 + $0x650] sm:$0xff] }
 0x10f   :  { %1957 = vmatpush.msrb.mxu2 %v1511_v10  ;;  %1934 = vmatpush.msrb.mxu1 %v1606_v12  ;;  %v1641_v10 = vld [vmem:[#allocation4 + $0xa40] sm:$0xff]  ;;  %v1516_v12 = vld [vmem:[#allocation4 + $0x658] sm:$0xff] }
 0x110   :  { %1913 = vmatpush.msrb.mxu0 %v1637_v11  ;;  %1977 = vmatpush.msrb.mxu3 %v1512_v13  ;;  %v1610_v11 = vld [vmem:[#allocation4 + $0x948] sm:$0xff]  ;;  %v1483_v13 = vld [vmem:[#allocation4 + $0x550] sm:$0xff] }
 0x111   :  { %1958 = vmatpush.msrb.mxu2 %v1479_v14  ;;  %1935 = vmatpush.msrb.mxu1 %v1574_v54  ;;  %v1609_v14 = vld [vmem:[#allocation4 + $0x940] sm:$0xff]  ;;  %v1484_v54 = vld [vmem:[#allocation4 + $0x558] sm:$0xff] }
 0x112   :  { %1914 = vmatpush.msrb.mxu0 %v1605_v15  ;;  %1978 = vmatpush.msrb.mxu3 %v1480_v16  ;;  %v1578_v15 = vld [vmem:[#allocation4 + $0x848] sm:$0xff]  ;;  %v1451_v16 = vld [vmem:[#allocation4 + $0x450] sm:$0xff] }
 0x113   :  { %1959 = vmatpush.msrb.mxu2 %v1447_v17  ;;  %1936 = vmatpush.msrb.mxu1 %v1542_v31  ;;  %v1577_v17 = vld [vmem:[#allocation4 + $0x840] sm:$0xff]  ;;  %v1452_v31 = vld [vmem:[#allocation4 + $0x458] sm:$0xff] }
 0x114   :  { %1915 = vmatpush.msrb.mxu0 %v1573_v18  ;;  %v866_v25 = vpop.f32.mrf.mxu2  ;;  %1979 = vmatpush.msrb.mxu3 %v1448_v19  ;;  %v886_v29 = vpop.f32.mrf.mxu3  ;;  %v1546_v18 = vld [vmem:[#allocation4 + $0x748] sm:$0xff]  ;;  %v1419_v19 = vld [vmem:[#allocation4 + $0x350] sm:$0xff] }
 0x115   :  { %1960 = vmatpush.msrb.mxu2 %v1415_v20  ;;  %v1251_v28 = vrot.slane %v866_v25, 4  ;;  %1937 = vmatpush.msrb.mxu1 %v1510_v22  ;;  %v846_v33 = vpop.f32.mrf.mxu1  ;;  %v1252_v34 = vrot.slane %v886_v29, 2  ;;  %v1545_v20 = vld [vmem:[#allocation4 + $0x740] sm:$0xff]  ;;  %v1420_v22 = vld [vmem:[#allocation4 + $0x358] sm:$0xff] }
 0x116   :  { %1916 = vmatpush.msrb.mxu0 %v1541_v21  ;;  %1980 = vmatpush.msrb.mxu3 %v1416_v23  ;;  %v1250_v37 = vrot.slane %v846_v33, 6  ;;  %v1514_v21 = vld [vmem:[#allocation4 + $0x648] sm:$0xff]  ;;  %v1387_v23 = vld [vmem:[#allocation4 + $0x250] sm:$0xff]  ;;  %v1513_v25 = vld [vmem:[#allocation4 + $0x640] sm:$0xff] }
 0x117   :  { %1961 = vmatpush.msrb.mxu2 %v1383_v24  ;;  %1938 = vmatpush.msrb.mxu1 %v1478_v27  ;;  %v1277_v40 = vsel %vm1267_vm2, %v1251_v28, %v1252_v34  ;;  %v1388_v29 = vld [vmem:[#allocation4 + $0x258] sm:$0xff]  ;;  %v1481_v34 = vld [vmem:[#allocation4 + $0x540] sm:$0xff] }
 0x118   :  { %1917 = vmatpush.msrb.mxu0 %v1509_v26  ;;  %v826_v41 = vpop.f32.mrf.mxu0  ;;  %1981 = vmatpush.msrb.mxu3 %v1384_v30  ;;  %v1482_v26 = vld [vmem:[#allocation4 + $0x548] sm:$0xff]  ;;  %v1355_v30 = vld [vmem:[#allocation4 + $0x150] sm:$0xff] }
 0x119   :  { %1962 = vmatpush.msrb.mxu2 %v1351_v32  ;;  %v1276_v44 = vsel %vm1265_vm3, %v826_v41, %v1250_v37  ;;  %1939 = vmatpush.msrb.mxu1 %v1446_v36  ;;  %v1356_v37 = vld [vmem:[#allocation4 + $0x158] sm:$0xff]  ;;  %v1449_v41 = vld [vmem:[#allocation4 + $0x440] sm:$0xff] }
 0x11a   :  { %1918 = vmatpush.msrb.mxu0 %v1477_v35  ;;  %v1278_v47 = vsel %vm472_vm0, %v1276_v44, %v1277_v40  ;;  %1982 = vmatpush.msrb.mxu3 %v1352_v38  ;;  %v1450_v35 = vld [vmem:[#allocation4 + $0x448] sm:$0xff]  ;;  %v1323_v38 = vld [vmem:[#allocation4 + $0x50] sm:$0xff]  ;;  %v1324_v44 = vld [vmem:[#allocation4 + $0x58] sm:$0xff] }
 0x11b   :  { %1963 = vmatpush.msrb.mxu2 %v1319_v39  ;;  %1302 = vst [vmem:[%s3135_s4 + $0x18] sm:$0xff] %v1278_v47  ;;  %1940 = vmatpush.msrb.mxu1 %v1414_v43  ;;  %v1711_v47 = vld [vmem:[#allocation4 + $0xc70] sm:$0xf] }
 0x11c   :  { %1919 = vmatpush.msrb.mxu0 %v1445_v42  ;;  %1983 = vmatpush.msrb.mxu3 %v1320_v45  ;;  %v1418_v42 = vld [vmem:[#allocation4 + $0x348] sm:$0xff] }
 0x11d   :  { %2643 = vmatmul.msk.f32.vlgmr.msra.gmra.mxu2 %vm468_vm1, %v2937_v46  ;;  %2645 = vmatmul.msk.f32.vlgmr.msra.gmra.mxu3 %vm468_vm1, %v2937_v46 }
 0x11e   :  { %2658 = vmatpush.msk.msra.mxu2 %vm472_vm0, %v1707_v48  ;;  %2660 = vmatpush.msk.msra.mxu3 %vm472_vm0, %v1708_v49  ;;  %v1712_v48 = vld [vmem:[#allocation4 + $0xc78] sm:$0xf]  ;;  %v1417_v49 = vld [vmem:[#allocation4 + $0x340] sm:$0xff] }
 0x11f   :  { %1920 = vmatpush.msrb.mxu0 %v1413_v50  ;;  %1941 = vmatpush.msrb.mxu1 %v1382_v51  ;;  %v1386_v50 = vld [vmem:[#allocation4 + $0x248] sm:$0xff]  ;;  %v1679_v51 = vld [vmem:[#allocation4 + $0xb70] sm:$0xff] }
 0x120   :  { %2032 = vmatpush.msra.mxu2 %v1675_v52  ;;  %2052 = vmatpush.msra.mxu3 %v1676_v53  ;;  %v1680_v52 = vld [vmem:[#allocation4 + $0xb78] sm:$0xff]  ;;  %v1385_v53 = vld [vmem:[#allocation4 + $0x240] sm:$0xff] }
 0x121   :  { %1921 = vmatpush.msrb.mxu0 %v1381_v55  ;;  %1942 = vmatpush.msrb.mxu1 %v1350_v56  ;;  %v1354_v55 = vld [vmem:[#allocation4 + $0x148] sm:$0xff]  ;;  %v1647_v56 = vld [vmem:[#allocation4 + $0xa70] sm:$0xff] }
 0x122   :  { %2033 = vmatpush.msra.mxu2 %v1643_v57  ;;  %2053 = vmatpush.msra.mxu3 %v1644_v58  ;;  %v1648_v57 = vld [vmem:[#allocation4 + $0xa78] sm:$0xff]  ;;  %v1353_v58 = vld [vmem:[#allocation4 + $0x140] sm:$0xff] }
 0x123   :  { %1922 = vmatpush.msrb.mxu0 %v1349_v59  ;;  %1943 = vmatpush.msrb.mxu1 %v1318_v60  ;;  %v1322_v59 = vld [vmem:[#allocation4 + $0x48] sm:$0xff]  ;;  %v1615_v60 = vld [vmem:[#allocation4 + $0x970] sm:$0xff] }
 0x124   :  { %2034 = vmatpush.msra.mxu2 %v1611_v61  ;;  %2641 = vmatmul.msk.f32.vlgmr.msra.gmra.mxu1 %vm468_vm1, %v2937_v46  ;;  %v1616_v61 = vld [vmem:[#allocation4 + $0x978] sm:$0xff] }
 0x125   :  { %2054 = vmatpush.msra.mxu3 %v1612_v62  ;;  %2656 = vmatpush.msk.msra.mxu1 %vm472_vm0, %v1706_v63  ;;  %v1710_v62 = vld [vmem:[#allocation4 + $0xc68] sm:$0xf]  ;;  %v1321_v63 = vld [vmem:[#allocation4 + $0x40] sm:$0xff] }
 0x126   :  { %1923 = vmatpush.msrb.mxu0 %v1317_v0  ;;  %2035 = vmatpush.msra.mxu2 %v1579_v1  ;;  %v1583_v0 = vld [vmem:[#allocation4 + $0x870] sm:$0xff]  ;;  %v1709_v1 = vld [vmem:[#allocation4 + $0xc60] sm:$0xf] }
 0x127   :  { %2639 = vmatmul.msk.f32.vlgmr.msra.gmra.mxu0 %vm468_vm1, %v2937_v46  ;;  %2012 = vmatpush.msra.mxu1 %v1674_v3  ;;  %v1584_v3 = vld [vmem:[#allocation4 + $0x878] sm:$0xff] }
 0x128   :  { %2654 = vmatpush.msk.msra.mxu0 %vm472_vm0, %v1705_v2  ;;  %2055 = vmatpush.msra.mxu3 %v1580_v4  ;;  %v1678_v2 = vld [vmem:[#allocation4 + $0xb68] sm:$0xff]  ;;  %v1551_v4 = vld [vmem:[#allocation4 + $0x770] sm:$0xff] }
 0x129   :  { %2036 = vmatpush.msra.mxu2 %v1547_v5  ;;  %2013 = vmatpush.msra.mxu1 %v1642_v7  ;;  %v1677_v5 = vld [vmem:[#allocation4 + $0xb60] sm:$0xff]  ;;  %v1552_v7 = vld [vmem:[#allocation4 + $0x778] sm:$0xff] }
 0x12a   :  { %1992 = vmatpush.msra.mxu0 %v1673_v6  ;;  %2056 = vmatpush.msra.mxu3 %v1548_v8  ;;  %v1646_v6 = vld [vmem:[#allocation4 + $0xa68] sm:$0xff]  ;;  %v1519_v8 = vld [vmem:[#allocation4 + $0x670] sm:$0xff] }
 0x12b   :  { %2037 = vmatpush.msra.mxu2 %v1515_v9  ;;  %2014 = vmatpush.msra.mxu1 %v1610_v11  ;;  %v1645_v9 = vld [vmem:[#allocation4 + $0xa60] sm:$0xff]  ;;  %v1520_v11 = vld [vmem:[#allocation4 + $0x678] sm:$0xff] }
 0x12c   :  { %1993 = vmatpush.msra.mxu0 %v1641_v10  ;;  %2057 = vmatpush.msra.mxu3 %v1516_v12  ;;  %v1614_v10 = vld [vmem:[#allocation4 + $0x968] sm:$0xff]  ;;  %v1487_v12 = vld [vmem:[#allocation4 + $0x570] sm:$0xff] }
 0x12d   :  { %2038 = vmatpush.msra.mxu2 %v1483_v13  ;;  %2015 = vmatpush.msra.mxu1 %v1578_v15  ;;  %v1613_v13 = vld [vmem:[#allocation4 + $0x960] sm:$0xff]  ;;  %v1488_v15 = vld [vmem:[#allocation4 + $0x578] sm:$0xff] }
 0x12e   :  { %1994 = vmatpush.msra.mxu0 %v1609_v14  ;;  %2058 = vmatpush.msra.mxu3 %v1484_v54  ;;  %v1582_v14 = vld [vmem:[#allocation4 + $0x868] sm:$0xff]  ;;  %v1455_v54 = vld [vmem:[#allocation4 + $0x470] sm:$0xff] }
 0x12f   :  { %2039 = vmatpush.msra.mxu2 %v1451_v16  ;;  %2016 = vmatpush.msra.mxu1 %v1546_v18  ;;  %v1581_v16 = vld [vmem:[#allocation4 + $0x860] sm:$0xff]  ;;  %v1456_v18 = vld [vmem:[#allocation4 + $0x478] sm:$0xff] }
 0x130   :  { %1995 = vmatpush.msra.mxu0 %v1577_v17  ;;  %v946_v24 = vpop.f32.mrf.mxu2  ;;  %2059 = vmatpush.msra.mxu3 %v1452_v31  ;;  %v966_v28 = vpop.f32.mrf.mxu3  ;;  %v1550_v17 = vld [vmem:[#allocation4 + $0x768] sm:$0xff]  ;;  %v1423_v31 = vld [vmem:[#allocation4 + $0x370] sm:$0xff] }
 0x131   :  { %2040 = vmatpush.msra.mxu2 %v1419_v19  ;;  %v1254_v27 = vrot.slane %v946_v24, 4  ;;  %2017 = vmatpush.msra.mxu1 %v1514_v21  ;;  %v926_v32 = vpop.f32.mrf.mxu1  ;;  %v1255_v33 = vrot.slane %v966_v28, 2  ;;  %v1549_v19 = vld [vmem:[#allocation4 + $0x760] sm:$0xff]  ;;  %v1424_v21 = vld [vmem:[#allocation4 + $0x378] sm:$0xff] }
 0x132   :  { %1996 = vmatpush.msra.mxu0 %v1545_v20  ;;  %2060 = vmatpush.msra.mxu3 %v1420_v22  ;;  %v1253_v36 = vrot.slane %v926_v32, 6  ;;  %v1518_v20 = vld [vmem:[#allocation4 + $0x668] sm:$0xff]  ;;  %v1391_v22 = vld [vmem:[#allocation4 + $0x270] sm:$0xff]  ;;  %v1517_v24 = vld [vmem:[#allocation4 + $0x660] sm:$0xff] }
 0x133   :  { %2041 = vmatpush.msra.mxu2 %v1387_v23  ;;  %2018 = vmatpush.msra.mxu1 %v1482_v26  ;;  %v1280_v39 = vsel %vm1267_vm2, %v1254_v27, %v1255_v33  ;;  %v1392_v28 = vld [vmem:[#allocation4 + $0x278] sm:$0xff]  ;;  %v1485_v33 = vld [vmem:[#allocation4 + $0x560] sm:$0xff] }
 0x134   :  { %1997 = vmatpush.msra.mxu0 %v1513_v25  ;;  %v906_v40 = vpop.f32.mrf.mxu0  ;;  %2061 = vmatpush.msra.mxu3 %v1388_v29  ;;  %v1486_v25 = vld [vmem:[#allocation4 + $0x568] sm:$0xff]  ;;  %v1359_v29 = vld [vmem:[#allocation4 + $0x170] sm:$0xff] }
 0x135   :  { %2042 = vmatpush.msra.mxu2 %v1355_v30  ;;  %v1279_v43 = vsel %vm1265_vm3, %v906_v40, %v1253_v36  ;;  %2019 = vmatpush.msra.mxu1 %v1450_v35  ;;  %v1360_v36 = vld [vmem:[#allocation4 + $0x178] sm:$0xff]  ;;  %v1453_v40 = vld [vmem:[#allocation4 + $0x460] sm:$0xff] }
 0x136   :  { %1998 = vmatpush.msra.mxu0 %v1481_v34  ;;  %v1281_v45 = vsel %vm472_vm0, %v1279_v43, %v1280_v39  ;;  %2062 = vmatpush.msra.mxu3 %v1356_v37  ;;  %v1454_v34 = vld [vmem:[#allocation4 + $0x468] sm:$0xff]  ;;  %v1327_v37 = vld [vmem:[#allocation4 + $0x70] sm:$0xff]  ;;  %v1328_v43 = vld [vmem:[#allocation4 + $0x78] sm:$0xff] }
 0x137   :  { %2043 = vmatpush.msra.mxu2 %v1323_v38  ;;  %1303 = vst [vmem:[%s3135_s4 + $0x20] sm:$0xff] %v1281_v45  ;;  %2020 = vmatpush.msra.mxu1 %v1418_v42  ;;  %v1715_v45 = vld [vmem:[#allocation4 + $0xc90] sm:$0xf] }
 0x138   :  { %1999 = vmatpush.msra.mxu0 %v1449_v41  ;;  %2063 = vmatpush.msra.mxu3 %v1324_v44  ;;  %v1422_v41 = vld [vmem:[#allocation4 + $0x368] sm:$0xff] }
 0x139   :  { %2651 = vmatmul.msk.f32.vlgmr.msrb.gmra.mxu2 %vm468_vm1, %v2937_v46  ;;  %2653 = vmatmul.msk.f32.vlgmr.msrb.gmra.mxu3 %vm468_vm1, %v2937_v46 }
 0x13a   :  { %2666 = vmatpush.msk.msrb.mxu2 %vm472_vm0, %v1711_v47  ;;  %2668 = vmatpush.msk.msrb.mxu3 %vm472_vm0, %v1712_v48  ;;  %v1716_v47 = vld [vmem:[#allocation4 + $0xc98] sm:$0xf]  ;;  %v1421_v48 = vld [vmem:[#allocation4 + $0x360] sm:$0xff] }
 0x13b   :  { %2000 = vmatpush.msra.mxu0 %v1417_v49  ;;  %2021 = vmatpush.msra.mxu1 %v1386_v50  ;;  %v1390_v49 = vld [vmem:[#allocation4 + $0x268] sm:$0xff]  ;;  %v1683_v50 = vld [vmem:[#allocation4 + $0xb90] sm:$0xff] }
 0x13c   :  { %2112 = vmatpush.msrb.mxu2 %v1679_v51  ;;  %2132 = vmatpush.msrb.mxu3 %v1680_v52  ;;  %v1684_v51 = vld [vmem:[#allocation4 + $0xb98] sm:$0xff]  ;;  %v1389_v52 = vld [vmem:[#allocation4 + $0x260] sm:$0xff] }
 0x13d   :  { %2001 = vmatpush.msra.mxu0 %v1385_v53  ;;  %2022 = vmatpush.msra.mxu1 %v1354_v55  ;;  %v1358_v53 = vld [vmem:[#allocation4 + $0x168] sm:$0xff]  ;;  %v1651_v55 = vld [vmem:[#allocation4 + $0xa90] sm:$0xff] }
 0x13e   :  { %2113 = vmatpush.msrb.mxu2 %v1647_v56  ;;  %2133 = vmatpush.msrb.mxu3 %v1648_v57  ;;  %v1652_v56 = vld [vmem:[#allocation4 + $0xa98] sm:$0xff]  ;;  %v1357_v57 = vld [vmem:[#allocation4 + $0x160] sm:$0xff] }
 0x13f   :  { %2002 = vmatpush.msra.mxu0 %v1353_v58  ;;  %2023 = vmatpush.msra.mxu1 %v1322_v59  ;;  %v1326_v58 = vld [vmem:[#allocation4 + $0x68] sm:$0xff]  ;;  %v1619_v59 = vld [vmem:[#allocation4 + $0x990] sm:$0xff] }
 0x140   :  { %2114 = vmatpush.msrb.mxu2 %v1615_v60  ;;  %2649 = vmatmul.msk.f32.vlgmr.msrb.gmra.mxu1 %vm468_vm1, %v2937_v46  ;;  %v1620_v60 = vld [vmem:[#allocation4 + $0x998] sm:$0xff] }
 0x141   :  { %2134 = vmatpush.msrb.mxu3 %v1616_v61  ;;  %2664 = vmatpush.msk.msrb.mxu1 %vm472_vm0, %v1710_v62  ;;  %v1714_v61 = vld [vmem:[#allocation4 + $0xc88] sm:$0xf]  ;;  %v1325_v62 = vld [vmem:[#allocation4 + $0x60] sm:$0xff] }
 0x142   :  { %2003 = vmatpush.msra.mxu0 %v1321_v63  ;;  %2115 = vmatpush.msrb.mxu2 %v1583_v0  ;;  %v1587_v63 = vld [vmem:[#allocation4 + $0x890] sm:$0xff]  ;;  %v1713_v0 = vld [vmem:[#allocation4 + $0xc80] sm:$0xf] }
 0x143   :  { %2647 = vmatmul.msk.f32.vlgmr.msrb.gmra.mxu0 %vm468_vm1, %v2937_v46  ;;  %2092 = vmatpush.msrb.mxu1 %v1678_v2  ;;  %v1588_v2 = vld [vmem:[#allocation4 + $0x898] sm:$0xff] }
 0x144   :  { %2662 = vmatpush.msk.msrb.mxu0 %vm472_vm0, %v1709_v1  ;;  %2135 = vmatpush.msrb.mxu3 %v1584_v3  ;;  %v1682_v1 = vld [vmem:[#allocation4 + $0xb88] sm:$0xff]  ;;  %v1555_v3 = vld [vmem:[#allocation4 + $0x790] sm:$0xff] }
 0x145   :  { %2116 = vmatpush.msrb.mxu2 %v1551_v4  ;;  %2093 = vmatpush.msrb.mxu1 %v1646_v6  ;;  %v1681_v4 = vld [vmem:[#allocation4 + $0xb80] sm:$0xff]  ;;  %v1556_v6 = vld [vmem:[#allocation4 + $0x798] sm:$0xff] }
 0x146   :  { %2072 = vmatpush.msrb.mxu0 %v1677_v5  ;;  %2136 = vmatpush.msrb.mxu3 %v1552_v7  ;;  %v1650_v5 = vld [vmem:[#allocation4 + $0xa88] sm:$0xff]  ;;  %v1523_v7 = vld [vmem:[#allocation4 + $0x690] sm:$0xff] }
 0x147   :  { %2117 = vmatpush.msrb.mxu2 %v1519_v8  ;;  %2094 = vmatpush.msrb.mxu1 %v1614_v10  ;;  %v1649_v8 = vld [vmem:[#allocation4 + $0xa80] sm:$0xff]  ;;  %v1524_v10 = vld [vmem:[#allocation4 + $0x698] sm:$0xff] }
 0x148   :  { %2073 = vmatpush.msrb.mxu0 %v1645_v9  ;;  %2137 = vmatpush.msrb.mxu3 %v1520_v11  ;;  %v1618_v9 = vld [vmem:[#allocation4 + $0x988] sm:$0xff]  ;;  %v1491_v11 = vld [vmem:[#allocation4 + $0x590] sm:$0xff] }
 0x149   :  { %2118 = vmatpush.msrb.mxu2 %v1487_v12  ;;  %2095 = vmatpush.msrb.mxu1 %v1582_v14  ;;  %v1617_v12 = vld [vmem:[#allocation4 + $0x980] sm:$0xff]  ;;  %v1492_v14 = vld [vmem:[#allocation4 + $0x598] sm:$0xff] }
 0x14a   :  { %2074 = vmatpush.msrb.mxu0 %v1613_v13  ;;  %2138 = vmatpush.msrb.mxu3 %v1488_v15  ;;  %v1586_v13 = vld [vmem:[#allocation4 + $0x888] sm:$0xff]  ;;  %v1459_v15 = vld [vmem:[#allocation4 + $0x490] sm:$0xff] }
 0x14b   :  { %2119 = vmatpush.msrb.mxu2 %v1455_v54  ;;  %2096 = vmatpush.msrb.mxu1 %v1550_v17  ;;  %v1585_v54 = vld [vmem:[#allocation4 + $0x880] sm:$0xff]  ;;  %v1460_v17 = vld [vmem:[#allocation4 + $0x498] sm:$0xff] }
 0x14c   :  { %2075 = vmatpush.msrb.mxu0 %v1581_v16  ;;  %v1026_v23 = vpop.f32.mrf.mxu2  ;;  %2139 = vmatpush.msrb.mxu3 %v1456_v18  ;;  %v1046_v27 = vpop.f32.mrf.mxu3  ;;  %v1554_v16 = vld [vmem:[#allocation4 + $0x788] sm:$0xff]  ;;  %v1427_v18 = vld [vmem:[#allocation4 + $0x390] sm:$0xff] }
 0x14d   :  { %2120 = vmatpush.msrb.mxu2 %v1423_v31  ;;  %v1257_v26 = vrot.slane %v1026_v23, 4  ;;  %2097 = vmatpush.msrb.mxu1 %v1518_v20  ;;  %v1006_v30 = vpop.f32.mrf.mxu1  ;;  %v1258_v32 = vrot.slane %v1046_v27, 2  ;;  %v1553_v31 = vld [vmem:[#allocation4 + $0x780] sm:$0xff]  ;;  %v1428_v20 = vld [vmem:[#allocation4 + $0x398] sm:$0xff] }
 0x14e   :  { %2076 = vmatpush.msrb.mxu0 %v1549_v19  ;;  %2140 = vmatpush.msrb.mxu3 %v1424_v21  ;;  %v1256_v35 = vrot.slane %v1006_v30, 6  ;;  %v1522_v19 = vld [vmem:[#allocation4 + $0x688] sm:$0xff]  ;;  %v1395_v21 = vld [vmem:[#allocation4 + $0x290] sm:$0xff]  ;;  %v1521_v23 = vld [vmem:[#allocation4 + $0x680] sm:$0xff] }
 0x14f   :  { %2121 = vmatpush.msrb.mxu2 %v1391_v22  ;;  %2098 = vmatpush.msrb.mxu1 %v1486_v25  ;;  %v1283_v38 = vsel %vm1267_vm2, %v1257_v26, %v1258_v32  ;;  %v1396_v27 = vld [vmem:[#allocation4 + $0x298] sm:$0xff]  ;;  %v1489_v32 = vld [vmem:[#allocation4 + $0x580] sm:$0xff] }
 0x150   :  { %2077 = vmatpush.msrb.mxu0 %v1517_v24  ;;  %v986_v39 = vpop.f32.mrf.mxu0  ;;  %2141 = vmatpush.msrb.mxu3 %v1392_v28  ;;  %v1490_v24 = vld [vmem:[#allocation4 + $0x588] sm:$0xff]  ;;  %v1363_v28 = vld [vmem:[#allocation4 + $0x190] sm:$0xff] }
 0x151   :  { %2122 = vmatpush.msrb.mxu2 %v1359_v29  ;;  %v1282_v42 = vsel %vm1265_vm3, %v986_v39, %v1256_v35  ;;  %2099 = vmatpush.msrb.mxu1 %v1454_v34  ;;  %v1364_v35 = vld [vmem:[#allocation4 + $0x198] sm:$0xff]  ;;  %v1457_v39 = vld [vmem:[#allocation4 + $0x480] sm:$0xff] }
 0x152   :  { %2078 = vmatpush.msrb.mxu0 %v1485_v33  ;;  %v1284_v44 = vsel %vm472_vm0, %v1282_v42, %v1283_v38  ;;  %2142 = vmatpush.msrb.mxu3 %v1360_v36  ;;  %v1458_v33 = vld [vmem:[#allocation4 + $0x488] sm:$0xff]  ;;  %v1331_v36 = vld [vmem:[#allocation4 + $0x90] sm:$0xff]  ;;  %v1332_v42 = vld [vmem:[#allocation4 + $0x98] sm:$0xff] }
 0x153   :  { %2123 = vmatpush.msrb.mxu2 %v1327_v37  ;;  %1304 = vst [vmem:[%s3135_s4 + $0x28] sm:$0xff] %v1284_v44  ;;  %2100 = vmatpush.msrb.mxu1 %v1422_v41  ;;  %v1719_v44 = vld [vmem:[#allocation4 + $0xcb0] sm:$0xf] }
 0x154   :  { %2079 = vmatpush.msrb.mxu0 %v1453_v40  ;;  %2143 = vmatpush.msrb.mxu3 %v1328_v43  ;;  %v1426_v40 = vld [vmem:[#allocation4 + $0x388] sm:$0xff] }
 0x155   :  { %2659 = vmatmul.msk.f32.vlgmr.msra.gmra.mxu2 %vm468_vm1, %v2937_v46  ;;  %2661 = vmatmul.msk.f32.vlgmr.msra.gmra.mxu3 %vm468_vm1, %v2937_v46 }
 0x156   :  { %2674 = vmatpush.msk.msra.mxu2 %vm472_vm0, %v1715_v45  ;;  %2676 = vmatpush.msk.msra.mxu3 %vm472_vm0, %v1716_v47  ;;  %v1720_v45 = vld [vmem:[#allocation4 + $0xcb8] sm:$0xf]  ;;  %v1425_v47 = vld [vmem:[#allocation4 + $0x380] sm:$0xff] }
 0x157   :  { %2080 = vmatpush.msrb.mxu0 %v1421_v48  ;;  %2101 = vmatpush.msrb.mxu1 %v1390_v49  ;;  %v1394_v48 = vld [vmem:[#allocation4 + $0x288] sm:$0xff]  ;;  %v1687_v49 = vld [vmem:[#allocation4 + $0xbb0] sm:$0xff] }
 0x158   :  { %2192 = vmatpush.msra.mxu2 %v1683_v50  ;;  %2212 = vmatpush.msra.mxu3 %v1684_v51  ;;  %v1688_v50 = vld [vmem:[#allocation4 + $0xbb8] sm:$0xff]  ;;  %v1393_v51 = vld [vmem:[#allocation4 + $0x280] sm:$0xff] }
 0x159   :  { %2081 = vmatpush.msrb.mxu0 %v1389_v52  ;;  %2102 = vmatpush.msrb.mxu1 %v1358_v53  ;;  %v1362_v52 = vld [vmem:[#allocation4 + $0x188] sm:$0xff]  ;;  %v1655_v53 = vld [vmem:[#allocation4 + $0xab0] sm:$0xff] }
 0x15a   :  { %2193 = vmatpush.msra.mxu2 %v1651_v55  ;;  %2213 = vmatpush.msra.mxu3 %v1652_v56  ;;  %v1656_v55 = vld [vmem:[#allocation4 + $0xab8] sm:$0xff]  ;;  %v1361_v56 = vld [vmem:[#allocation4 + $0x180] sm:$0xff] }
 0x15b   :  { %2082 = vmatpush.msrb.mxu0 %v1357_v57  ;;  %2103 = vmatpush.msrb.mxu1 %v1326_v58  ;;  %v1330_v57 = vld [vmem:[#allocation4 + $0x88] sm:$0xff]  ;;  %v1623_v58 = vld [vmem:[#allocation4 + $0x9b0] sm:$0xff] }
 0x15c   :  { %2194 = vmatpush.msra.mxu2 %v1619_v59  ;;  %2657 = vmatmul.msk.f32.vlgmr.msra.gmra.mxu1 %vm468_vm1, %v2937_v46  ;;  %v1624_v59 = vld [vmem:[#allocation4 + $0x9b8] sm:$0xff] }
 0x15d   :  { %2214 = vmatpush.msra.mxu3 %v1620_v60  ;;  %2672 = vmatpush.msk.msra.mxu1 %vm472_vm0, %v1714_v61  ;;  %v1718_v60 = vld [vmem:[#allocation4 + $0xca8] sm:$0xf]  ;;  %v1329_v61 = vld [vmem:[#allocation4 + $0x80] sm:$0xff] }
 0x15e   :  { %2083 = vmatpush.msrb.mxu0 %v1325_v62  ;;  %2195 = vmatpush.msra.mxu2 %v1587_v63  ;;  %v1591_v62 = vld [vmem:[#allocation4 + $0x8b0] sm:$0xff]  ;;  %v1717_v63 = vld [vmem:[#allocation4 + $0xca0] sm:$0xf] }
 0x15f   :  { %2655 = vmatmul.msk.f32.vlgmr.msra.gmra.mxu0 %vm468_vm1, %v2937_v46  ;;  %2172 = vmatpush.msra.mxu1 %v1682_v1  ;;  %v1592_v1 = vld [vmem:[#allocation4 + $0x8b8] sm:$0xff] }
 0x160   :  { %2670 = vmatpush.msk.msra.mxu0 %vm472_vm0, %v1713_v0  ;;  %2215 = vmatpush.msra.mxu3 %v1588_v2  ;;  %v1686_v0 = vld [vmem:[#allocation4 + $0xba8] sm:$0xff]  ;;  %v1559_v2 = vld [vmem:[#allocation4 + $0x7b0] sm:$0xff] }
 0x161   :  { %2196 = vmatpush.msra.mxu2 %v1555_v3  ;;  %2173 = vmatpush.msra.mxu1 %v1650_v5  ;;  %v1685_v3 = vld [vmem:[#allocation4 + $0xba0] sm:$0xff]  ;;  %v1560_v5 = vld [vmem:[#allocation4 + $0x7b8] sm:$0xff] }
 0x162   :  { %2152 = vmatpush.msra.mxu0 %v1681_v4  ;;  %2216 = vmatpush.msra.mxu3 %v1556_v6  ;;  %v1654_v4 = vld [vmem:[#allocation4 + $0xaa8] sm:$0xff]  ;;  %v1527_v6 = vld [vmem:[#allocation4 + $0x6b0] sm:$0xff] }
 0x163   :  { %2197 = vmatpush.msra.mxu2 %v1523_v7  ;;  %2174 = vmatpush.msra.mxu1 %v1618_v9  ;;  %v1653_v7 = vld [vmem:[#allocation4 + $0xaa0] sm:$0xff]  ;;  %v1528_v9 = vld [vmem:[#allocation4 + $0x6b8] sm:$0xff] }
 0x164   :  { %2153 = vmatpush.msra.mxu0 %v1649_v8  ;;  %2217 = vmatpush.msra.mxu3 %v1524_v10  ;;  %v1622_v8 = vld [vmem:[#allocation4 + $0x9a8] sm:$0xff]  ;;  %v1495_v10 = vld [vmem:[#allocation4 + $0x5b0] sm:$0xff] }
 0x165   :  { %2198 = vmatpush.msra.mxu2 %v1491_v11  ;;  %2175 = vmatpush.msra.mxu1 %v1586_v13  ;;  %v1621_v11 = vld [vmem:[#allocation4 + $0x9a0] sm:$0xff]  ;;  %v1496_v13 = vld [vmem:[#allocation4 + $0x5b8] sm:$0xff] }
 0x166   :  { %2154 = vmatpush.msra.mxu0 %v1617_v12  ;;  %2218 = vmatpush.msra.mxu3 %v1492_v14  ;;  %v1590_v12 = vld [vmem:[#allocation4 + $0x8a8] sm:$0xff]  ;;  %v1463_v14 = vld [vmem:[#allocation4 + $0x4b0] sm:$0xff] }
 0x167   :  { %2199 = vmatpush.msra.mxu2 %v1459_v15  ;;  %2176 = vmatpush.msra.mxu1 %v1554_v16  ;;  %v1589_v15 = vld [vmem:[#allocation4 + $0x8a0] sm:$0xff]  ;;  %v1464_v16 = vld [vmem:[#allocation4 + $0x4b8] sm:$0xff] }
 0x168   :  { %2155 = vmatpush.msra.mxu0 %v1585_v54  ;;  %v1106_v22 = vpop.f32.mrf.mxu2  ;;  %2219 = vmatpush.msra.mxu3 %v1460_v17  ;;  %v1126_v26 = vpop.f32.mrf.mxu3  ;;  %v1558_v54 = vld [vmem:[#allocation4 + $0x7a8] sm:$0xff]  ;;  %v1431_v17 = vld [vmem:[#allocation4 + $0x3b0] sm:$0xff] }
 0x169   :  { %2200 = vmatpush.msra.mxu2 %v1427_v18  ;;  %v1260_v25 = vrot.slane %v1106_v22, 4  ;;  %2177 = vmatpush.msra.mxu1 %v1522_v19  ;;  %v1086_v29 = vpop.f32.mrf.mxu1  ;;  %v1261_v30 = vrot.slane %v1126_v26, 2  ;;  %v1526_v19 = vld [vmem:[#allocation4 + $0x6a8] sm:$0xff]  ;;  %v1468_v18 = vld [vmem:[#allocation4 + $0x4d8] sm:$0xff] }
 0x16a   :  { %2156 = vmatpush.msra.mxu0 %v1553_v31  ;;  %2220 = vmatpush.msra.mxu3 %v1428_v20  ;;  %v1259_v34 = vrot.slane %v1086_v29, 6  ;;  %v1557_v31 = vld [vmem:[#allocation4 + $0x7a0] sm:$0xff]  ;;  %v1432_v20 = vld [vmem:[#allocation4 + $0x3b8] sm:$0xff]  ;;  %v1367_v29 = vld [vmem:[#allocation4 + $0x1b0] sm:$0xff] }
 0x16b   :  { %2201 = vmatpush.msra.mxu2 %v1395_v21  ;;  %2178 = vmatpush.msra.mxu1 %v1490_v24  ;;  %v1286_v37 = vsel %vm1267_vm2, %v1260_v25, %v1261_v30  ;;  %v1399_v21 = vld [vmem:[#allocation4 + $0x2b0] sm:$0xff]  ;;  %v1494_v24 = vld [vmem:[#allocation4 + $0x5a8] sm:$0xff] }
 0x16c   :  { %2157 = vmatpush.msra.mxu0 %v1521_v23  ;;  %v1066_v38 = vpop.f32.mrf.mxu0  ;;  %2221 = vmatpush.msra.mxu3 %v1396_v27  ;;  %v1525_v23 = vld [vmem:[#allocation4 + $0x6a0] sm:$0xff] }
 0x16d   :  { %2202 = vmatpush.msra.mxu2 %v1363_v28  ;;  %v1285_v41 = vsel %vm1265_vm3, %v1066_v38, %v1259_v34  ;;  %2179 = vmatpush.msra.mxu1 %v1458_v33  ;;  %v1400_v28 = vld [vmem:[#allocation4 + $0x2b8] sm:$0xff]  ;;  %v1493_v33 = vld [vmem:[#allocation4 + $0x5a0] sm:$0xff]  ;;  %v1462_v34 = vld [vmem:[#allocation4 + $0x4a8] sm:$0xff] }
 0x16e   :  { %2158 = vmatpush.msra.mxu0 %v1489_v32  ;;  %v1287_v43 = vsel %vm472_vm0, %v1285_v41, %v1286_v37  ;;  %2222 = vmatpush.msra.mxu3 %v1364_v35  ;;  %v1335_v37 = vld [vmem:[#allocation4 + $0xb0] sm:$0xff]  ;;  %v1461_v41 = vld [vmem:[#allocation4 + $0x4a0] sm:$0xff] }
 0x16f   :  { %2203 = vmatpush.msra.mxu2 %v1331_v36  ;;  %1305 = vst [vmem:[%s3135_s4 + $0x30] sm:$0xff] %v1287_v43  ;;  %2180 = vmatpush.msra.mxu1 %v1426_v40  ;;  %v1368_v36 = vld [vmem:[#allocation4 + $0x1b8] sm:$0xff] }
 0x170   :  { %2159 = vmatpush.msra.mxu0 %v1457_v39  ;;  %2223 = vmatpush.msra.mxu3 %v1332_v42  ;;  %v1430_v42 = vld [vmem:[#allocation4 + $0x3a8] sm:$0xff] }
 0x171   :  { %2667 = vmatmul.msk.f32.vlgmr.msrb.gmra.mxu2 %vm468_vm1, %v2937_v46  ;;  %2669 = vmatmul.msk.f32.vlgmr.msrb.gmra.mxu3 %vm468_vm1, %v2937_v46 }
 0x172   :  { %2682 = vmatpush.msk.msrb.mxu2 %vm472_vm0, %v1719_v44  ;;  %2684 = vmatpush.msk.msrb.mxu3 %vm472_vm0, %v1720_v45  ;;  %v1336_v44 = vld [vmem:[#allocation4 + $0xb8] sm:$0xff] }
 0x173   :  { %2160 = vmatpush.msra.mxu0 %v1425_v47  ;;  %2181 = vmatpush.msra.mxu1 %v1394_v48  ;;  %v1723_v47 = vld [vmem:[#allocation4 + $0xcd0] sm:$0xf]  ;;  %v1724_v48 = vld [vmem:[#allocation4 + $0xcd8] sm:$0xf] }
 0x174   :  { %2272 = vmatpush.msrb.mxu2 %v1687_v49  ;;  %2292 = vmatpush.msrb.mxu3 %v1688_v50  ;;  %v1429_v49 = vld [vmem:[#allocation4 + $0x3a0] sm:$0xff]  ;;  %v1398_v50 = vld [vmem:[#allocation4 + $0x2a8] sm:$0xff] }
 0x175   :  { %2161 = vmatpush.msra.mxu0 %v1393_v51  ;;  %2182 = vmatpush.msra.mxu1 %v1362_v52  ;;  %v1691_v51 = vld [vmem:[#allocation4 + $0xbd0] sm:$0xff]  ;;  %v1692_v52 = vld [vmem:[#allocation4 + $0xbd8] sm:$0xff] }
 0x176   :  { %2273 = vmatpush.msrb.mxu2 %v1655_v53  ;;  %2293 = vmatpush.msrb.mxu3 %v1656_v55  ;;  %v1397_v53 = vld [vmem:[#allocation4 + $0x2a0] sm:$0xff]  ;;  %v1366_v55 = vld [vmem:[#allocation4 + $0x1a8] sm:$0xff] }
 0x177   :  { %2162 = vmatpush.msra.mxu0 %v1361_v56  ;;  %2183 = vmatpush.msra.mxu1 %v1330_v57  ;;  %v1659_v56 = vld [vmem:[#allocation4 + $0xad0] sm:$0xff]  ;;  %v1660_v57 = vld [vmem:[#allocation4 + $0xad8] sm:$0xff] }
 0x178   :  { %2274 = vmatpush.msrb.mxu2 %v1623_v58  ;;  %2665 = vmatmul.msk.f32.vlgmr.msrb.gmra.mxu1 %vm468_vm1, %v2937_v46  ;;  %v1365_v58 = vld [vmem:[#allocation4 + $0x1a0] sm:$0xff] }
 0x179   :  { %2294 = vmatpush.msrb.mxu3 %v1624_v59  ;;  %2680 = vmatpush.msk.msrb.mxu1 %vm472_vm0, %v1718_v60  ;;  %v1334_v59 = vld [vmem:[#allocation4 + $0xa8] sm:$0xff]  ;;  %v1627_v60 = vld [vmem:[#allocation4 + $0x9d0] sm:$0xff] }
 0x17a   :  { %2163 = vmatpush.msra.mxu0 %v1329_v61  ;;  %2275 = vmatpush.msrb.mxu2 %v1591_v62  ;;  %v1722_v61 = vld [vmem:[#allocation4 + $0xcc8] sm:$0xf]  ;;  %v1333_v62 = vld [vmem:[#allocation4 + $0xa0] sm:$0xff] }
 0x17b   :  { %2663 = vmatmul.msk.f32.vlgmr.msrb.gmra.mxu0 %vm468_vm1, %v2937_v46  ;;  %2252 = vmatpush.msrb.mxu1 %v1686_v0  ;;  %v3045_v0 = vld [vmem:[%s3132_s1] sm:$0x3] }
 0x17c   :  { %2678 = vmatpush.msk.msrb.mxu0 %vm472_vm0, %v1717_v63  ;;  %2295 = vmatpush.msrb.mxu3 %v1592_v1  ;;  %v1595_v63 = vld [vmem:[#allocation4 + $0x8d0] sm:$0xff]  ;;  %v1721_v1 = vld [vmem:[#allocation4 + $0xcc0] sm:$0xf] }
 0x17d   :  { %2276 = vmatpush.msrb.mxu2 %v1559_v2  ;;  %2253 = vmatpush.msrb.mxu1 %v1654_v4  ;;  %v1690_v2 = vld [vmem:[#allocation4 + $0xbc8] sm:$0xff]  ;;  %v1563_v4 = vld [vmem:[#allocation4 + $0x7d0] sm:$0xff] }
 0x17e   :  { %2232 = vmatpush.msrb.mxu0 %v1685_v3  ;;  %2296 = vmatpush.msrb.mxu3 %v1560_v5  ;;  %v1596_v3 = vld [vmem:[#allocation4 + $0x8d8] sm:$0xff]  ;;  %v1689_v5 = vld [vmem:[#allocation4 + $0xbc0] sm:$0xff] }
 0x17f   :  { %2277 = vmatpush.msrb.mxu2 %v1527_v6  ;;  %2254 = vmatpush.msrb.mxu1 %v1622_v8  ;;  %v1658_v6 = vld [vmem:[#allocation4 + $0xac8] sm:$0xff]  ;;  %v1531_v8 = vld [vmem:[#allocation4 + $0x6d0] sm:$0xff] }
 0x180   :  { %2233 = vmatpush.msrb.mxu0 %v1653_v7  ;;  %2297 = vmatpush.msrb.mxu3 %v1528_v9  ;;  %v1564_v7 = vld [vmem:[#allocation4 + $0x7d8] sm:$0xff]  ;;  %v1657_v9 = vld [vmem:[#allocation4 + $0xac0] sm:$0xff] }
 0x181   :  { %2278 = vmatpush.msrb.mxu2 %v1495_v10  ;;  %2255 = vmatpush.msrb.mxu1 %v1590_v12  ;;  %v1626_v10 = vld [vmem:[#allocation4 + $0x9c8] sm:$0xff]  ;;  %v1499_v12 = vld [vmem:[#allocation4 + $0x5d0] sm:$0xff] }
 0x182   :  { %2234 = vmatpush.msrb.mxu0 %v1621_v11  ;;  %2298 = vmatpush.msrb.mxu3 %v1496_v13  ;;  %v1532_v11 = vld [vmem:[#allocation4 + $0x6d8] sm:$0xff]  ;;  %v1625_v13 = vld [vmem:[#allocation4 + $0x9c0] sm:$0xff] }
 0x183   :  { %2279 = vmatpush.msrb.mxu2 %v1463_v14  ;;  %2256 = vmatpush.msrb.mxu1 %v1558_v54  ;;  %v1594_v14 = vld [vmem:[#allocation4 + $0x8c8] sm:$0xff]  ;;  %v1467_v54 = vld [vmem:[#allocation4 + $0x4d0] sm:$0xff] }
 0x184   :  { %2235 = vmatpush.msrb.mxu0 %v1589_v15  ;;  %v1186_v22 = vpop.f32.mrf.mxu2  ;;  %2299 = vmatpush.msrb.mxu3 %v1464_v16  ;;  %v1206_v26 = vpop.f32.mrf.mxu3  ;;  %v1500_v15 = vld [vmem:[#allocation4 + $0x5d8] sm:$0xff]  ;;  %v1593_v16 = vld [vmem:[#allocation4 + $0x8c0] sm:$0xff] }
 0x185   :  { %2280 = vmatpush.msrb.mxu2 %v1431_v17  ;;  %v1263_v25 = vrot.slane %v1186_v22, 4  ;;  %2257 = vmatpush.msrb.mxu1 %v1526_v19  ;;  %v1166_v30 = vpop.f32.mrf.mxu1  ;;  %v1264_v32 = vrot.slane %v1206_v26, 2  ;;  %v1562_v17 = vld [vmem:[#allocation4 + $0x7c8] sm:$0xff]  ;;  %v1561_v19 = vld [vmem:[#allocation4 + $0x7c0] sm:$0xff]  ;;  %v1403_v22 = vld [vmem:[#allocation4 + $0x2d0] sm:$0xff] }
 0x186   :  { %2236 = vmatpush.msrb.mxu0 %v1557_v31  ;;  %2300 = vmatpush.msrb.mxu3 %v1432_v20  ;;  %v1262_v35 = vrot.slane %v1166_v30, 6  ;;  %v1435_v31 = vld [vmem:[#allocation4 + $0x3d0] sm:$0xff]  ;;  %v1530_v20 = vld [vmem:[#allocation4 + $0x6c8] sm:$0xff] }
 0x187   :  { %2281 = vmatpush.msrb.mxu2 %v1399_v21  ;;  %2258 = vmatpush.msrb.mxu1 %v1494_v24  ;;  %v1289_v38 = vsel %vm1267_vm2, %v1263_v25, %v1264_v32  ;;  %v1436_v21 = vld [vmem:[#allocation4 + $0x3d8] sm:$0xff]  ;;  %v1529_v24 = vld [vmem:[#allocation4 + $0x6c0] sm:$0xff]  ;;  %v1498_v25 = vld [vmem:[#allocation4 + $0x5c8] sm:$0xff] }
 0x188   :  { %2237 = vmatpush.msrb.mxu0 %v1525_v23  ;;  %v1146_v39 = vpop.f32.mrf.mxu0  ;;  %2301 = vmatpush.msrb.mxu3 %v1400_v28  ;;  %v1404_v28 = vld [vmem:[#allocation4 + $0x2d8] sm:$0xff] }
 0x189   :  { %2282 = vmatpush.msrb.mxu2 %v1367_v29  ;;  %v1288_v43 = vsel %vm1265_vm3, %v1146_v39, %v1262_v35  ;;  %2259 = vmatpush.msrb.mxu1 %v1462_v34  ;;  %v1371_v29 = vld [vmem:[#allocation4 + $0x1d0] sm:$0xff]  ;;  %v1466_v34 = vld [vmem:[#allocation4 + $0x4c8] sm:$0xff] }
 0x18a   :  { %2238 = vmatpush.msrb.mxu0 %v1493_v33  ;;  %v1290_v45 = vsel %vm472_vm0, %v1288_v43, %v1289_v38  ;;  %2302 = vmatpush.msrb.mxu3 %v1368_v36  ;;  %v1497_v33 = vld [vmem:[#allocation4 + $0x5c0] sm:$0xff]  ;;  %v1372_v36 = vld [vmem:[#allocation4 + $0x1d8] sm:$0xff] }
 0x18b   :  { %2283 = vmatpush.msrb.mxu2 %v1335_v37  ;;  %1311 = vst.msk [vmem:[%s3135_s4 + $0x38] sm:$0xff] %vm3025_vm8, %v1290_v45  ;;  %2260 = vmatpush.msrb.mxu1 %v1430_v42  ;;  %v1339_v37 = vld [vmem:[#allocation4 + $0xd0] sm:$0xff]  ;;  %v1434_v42 = vld [vmem:[#allocation4 + $0x3c8] sm:$0xff] }
 0x18c   :  { %2239 = vmatpush.msrb.mxu0 %v1461_v41  ;;  %2303 = vmatpush.msrb.mxu3 %v1336_v44  ;;  %v1465_v41 = vld [vmem:[#allocation4 + $0x4c0] sm:$0xff]  ;;  %v1340_v44 = vld [vmem:[#allocation4 + $0xd8] sm:$0xff] }
 0x18d   :  { %2675 = vmatmul.msk.f32.vlgmr.msra.gmra.mxu2 %vm468_vm1, %v2937_v46  ;;  %2677 = vmatmul.msk.f32.vlgmr.msra.gmra.mxu3 %vm468_vm1, %v2937_v46  ;;  %v1628_v46 = vld [vmem:[#allocation4 + $0x9d8] sm:$0xff] }
 0x18e   :  { %2690 = vmatpush.msk.msra.mxu2 %vm472_vm0, %v1723_v47  ;;  %2692 = vmatpush.msk.msra.mxu3 %vm472_vm0, %v1724_v48  ;;  %v1727_v47 = vld [vmem:[#allocation4 + $0xcf0] sm:$0xf]  ;;  %v1728_v48 = vld [vmem:[#allocation4 + $0xcf8] sm:$0xf] }
 0x18f   :  { %2240 = vmatpush.msrb.mxu0 %v1429_v49  ;;  %2261 = vmatpush.msrb.mxu1 %v1398_v50  ;;  %v1433_v49 = vld [vmem:[#allocation4 + $0x3c0] sm:$0xff]  ;;  %v1402_v50 = vld [vmem:[#allocation4 + $0x2c8] sm:$0xff] }
 0x190   :  { %2352 = vmatpush.msra.mxu2 %v1691_v51  ;;  %2372 = vmatpush.msra.mxu3 %v1692_v52  ;;  %v1695_v51 = vld [vmem:[#allocation4 + $0xbf0] sm:$0xff]  ;;  %v1696_v52 = vld [vmem:[#allocation4 + $0xbf8] sm:$0xff] }
 0x191   :  { %2241 = vmatpush.msrb.mxu0 %v1397_v53  ;;  %2262 = vmatpush.msrb.mxu1 %v1366_v55  ;;  %v1401_v53 = vld [vmem:[#allocation4 + $0x2c0] sm:$0xff]  ;;  %v1370_v55 = vld [vmem:[#allocation4 + $0x1c8] sm:$0xff] }
 0x192   :  { %2353 = vmatpush.msra.mxu2 %v1659_v56  ;;  %2373 = vmatpush.msra.mxu3 %v1660_v57  ;;  %v1663_v56 = vld [vmem:[#allocation4 + $0xaf0] sm:$0xff]  ;;  %v1664_v57 = vld [vmem:[#allocation4 + $0xaf8] sm:$0xff] }
 0x193   :  { %2242 = vmatpush.msrb.mxu0 %v1365_v58  ;;  %2263 = vmatpush.msrb.mxu1 %v1334_v59  ;;  %v1369_v58 = vld [vmem:[#allocation4 + $0x1c0] sm:$0xff]  ;;  %v1338_v59 = vld [vmem:[#allocation4 + $0xc8] sm:$0xff] }
 0x194   :  { %2354 = vmatpush.msra.mxu2 %v1627_v60  ;;  %2673 = vmatmul.msk.f32.vlgmr.msra.gmra.mxu1 %vm468_vm1, %v3045_v0  ;;  %v1631_v60 = vld [vmem:[#allocation4 + $0x9f0] sm:$0xff] }
 0x195   :  { %2374 = vmatpush.msra.mxu3 %v1628_v46  ;;  %2688 = vmatpush.msk.msra.mxu1 %vm472_vm0, %v1722_v61  ;;  %v1632_v46 = vld [vmem:[#allocation4 + $0x9f8] sm:$0xff]  ;;  %v1726_v61 = vld [vmem:[#allocation4 + $0xce8] sm:$0xf] }
 0x196   :  { %2243 = vmatpush.msrb.mxu0 %v1333_v62  ;;  %2355 = vmatpush.msra.mxu2 %v1595_v63  ;;  %v1337_v62 = vld [vmem:[#allocation4 + $0xc0] sm:$0xff]  ;;  %v1599_v63 = vld [vmem:[#allocation4 + $0x8f0] sm:$0xff] }
 0x197   :  { %2671 = vmatmul.msk.f32.vlgmr.msra.gmra.mxu0 %vm468_vm1, %v3045_v0  ;;  %2332 = vmatpush.msra.mxu1 %v1690_v2  ;;  %v1694_v2 = vld [vmem:[#allocation4 + $0xbe8] sm:$0xff] }
 0x198   :  { %2686 = vmatpush.msk.msra.mxu0 %vm472_vm0, %v1721_v1  ;;  %2375 = vmatpush.msra.mxu3 %v1596_v3  ;;  %v1725_v1 = vld [vmem:[#allocation4 + $0xce0] sm:$0xf]  ;;  %v1600_v3 = vld [vmem:[#allocation4 + $0x8f8] sm:$0xff] }
 0x199   :  { %2356 = vmatpush.msra.mxu2 %v1563_v4  ;;  %2333 = vmatpush.msra.mxu1 %v1658_v6  ;;  %v1567_v4 = vld [vmem:[#allocation4 + $0x7f0] sm:$0xff]  ;;  %v1662_v6 = vld [vmem:[#allocation4 + $0xae8] sm:$0xff] }
 0x19a   :  { %2312 = vmatpush.msra.mxu0 %v1689_v5  ;;  %2376 = vmatpush.msra.mxu3 %v1564_v7  ;;  %v1693_v5 = vld [vmem:[#allocation4 + $0xbe0] sm:$0xff]  ;;  %v1568_v7 = vld [vmem:[#allocation4 + $0x7f8] sm:$0xff] }
 0x19b   :  { %2357 = vmatpush.msra.mxu2 %v1531_v8  ;;  %2334 = vmatpush.msra.mxu1 %v1626_v10  ;;  %v1535_v8 = vld [vmem:[#allocation4 + $0x6f0] sm:$0xff]  ;;  %v1630_v10 = vld [vmem:[#allocation4 + $0x9e8] sm:$0xff] }
 0x19c   :  { %2313 = vmatpush.msra.mxu0 %v1657_v9  ;;  %2377 = vmatpush.msra.mxu3 %v1532_v11  ;;  %v1661_v9 = vld [vmem:[#allocation4 + $0xae0] sm:$0xff]  ;;  %v1536_v11 = vld [vmem:[#allocation4 + $0x6f8] sm:$0xff] }
 0x19d   :  { %2358 = vmatpush.msra.mxu2 %v1499_v12  ;;  %2335 = vmatpush.msra.mxu1 %v1594_v14  ;;  %v1503_v12 = vld [vmem:[#allocation4 + $0x5f0] sm:$0xff]  ;;  %v1598_v14 = vld [vmem:[#allocation4 + $0x8e8] sm:$0xff] }
 0x19e   :  { %2314 = vmatpush.msra.mxu0 %v1625_v13  ;;  %2378 = vmatpush.msra.mxu3 %v1500_v15  ;;  %v1629_v13 = vld [vmem:[#allocation4 + $0x9e0] sm:$0xff]  ;;  %v1504_v15 = vld [vmem:[#allocation4 + $0x5f8] sm:$0xff] }
 0x19f   :  { %2359 = vmatpush.msra.mxu2 %v1467_v54  ;;  %2336 = vmatpush.msra.mxu1 %v1562_v17  ;;  %v1471_v54 = vld [vmem:[#allocation4 + $0x4f0] sm:$0xff]  ;;  %v1566_v17 = vld [vmem:[#allocation4 + $0x7e8] sm:$0xff] }
 0x1a0   :  { %2315 = vmatpush.msra.mxu0 %v1593_v16  ;;  %v1885_v23 = vpop.f32.mrf.mxu2  ;;  %2379 = vmatpush.msra.mxu3 %v1468_v18  ;;  %v1905_v27 = vpop.f32.mrf.mxu3  ;;  %v1597_v16 = vld [vmem:[#allocation4 + $0x8e0] sm:$0xff]  ;;  %v1472_v18 = vld [vmem:[#allocation4 + $0x4f8] sm:$0xff] }
 0x1a1   :  { %2360 = vmatpush.msra.mxu2 %v1435_v31  ;;  %v2501_v26 = vrot.slane %v1885_v23, 4  ;;  %2337 = vmatpush.msra.mxu1 %v1530_v20  ;;  %v1865_v30 = vpop.f32.mrf.mxu1  ;;  %v2502_v32 = vrot.slane %v1905_v27, 2  ;;  %v1565_v31 = vld [vmem:[#allocation4 + $0x7e0] sm:$0xff]  ;;  %v1439_v20 = vld [vmem:[#allocation4 + $0x3f0] sm:$0xff] }
 0x1a2   :  { %2316 = vmatpush.msra.mxu0 %v1561_v19  ;;  %2380 = vmatpush.msra.mxu3 %v1436_v21  ;;  %v2500_v35 = vrot.slane %v1865_v30, 6  ;;  %v1534_v19 = vld [vmem:[#allocation4 + $0x6e8] sm:$0xff]  ;;  %v1533_v23 = vld [vmem:[#allocation4 + $0x6e0] sm:$0xff]  ;;  %v1407_v27 = vld [vmem:[#allocation4 + $0x2f0] sm:$0xff] }
 0x1a3   :  { %2361 = vmatpush.msra.mxu2 %v1403_v22  ;;  %2338 = vmatpush.msra.mxu1 %v1498_v25  ;;  %v2525_v38 = vsel %vm1267_vm2, %v2501_v26, %v2502_v32  ;;  %v1440_v22 = vld [vmem:[#allocation4 + $0x3f8] sm:$0xff]  ;;  %v1502_v26 = vld [vmem:[#allocation4 + $0x5e8] sm:$0xff]  ;;  %v1501_v32 = vld [vmem:[#allocation4 + $0x5e0] sm:$0xff] }
 0x1a4   :  { %2317 = vmatpush.msra.mxu0 %v1529_v24  ;;  %v1845_v39 = vpop.f32.mrf.mxu0  ;;  %2381 = vmatpush.msra.mxu3 %v1404_v28  ;;  %v1408_v30 = vld [vmem:[#allocation4 + $0x2f8] sm:$0xff] }
 0x1a5   :  { %2362 = vmatpush.msra.mxu2 %v1371_v29  ;;  %v2524_v43 = vsel %vm1265_vm3, %v1845_v39, %v2500_v35  ;;  %2339 = vmatpush.msra.mxu1 %v1466_v34  ;;  %v1470_v34 = vld [vmem:[#allocation4 + $0x4e8] sm:$0xff]  ;;  %v1375_v35 = vld [vmem:[#allocation4 + $0x1f0] sm:$0xff] }
 0x1a6   :  { %2318 = vmatpush.msra.mxu0 %v1497_v33  ;;  %v2526_v45 = vsel %vm472_vm0, %v2524_v43, %v2525_v38  ;;  %2382 = vmatpush.msra.mxu3 %v1372_v36  ;;  %v1376_v38 = vld [vmem:[#allocation4 + $0x1f8] sm:$0xff] }
 0x1a7   :  { %2363 = vmatpush.msra.mxu2 %v1339_v37  ;;  %2556 = vst [vmem:[%s3136_s5] sm:$0xff] %v2526_v45  ;;  %2340 = vmatpush.msra.mxu1 %v1434_v42  ;;  %v1438_v42 = vld [vmem:[#allocation4 + $0x3e8] sm:$0xff]  ;;  %v1344_v45 = vld [vmem:[#allocation4 + $0xf8] sm:$0xff] }
 0x1a8   :  { %2319 = vmatpush.msra.mxu0 %v1465_v41  ;;  %2383 = vmatpush.msra.mxu3 %v1340_v44  ;;  %v1469_v41 = vld [vmem:[#allocation4 + $0x4e0] sm:$0xff]  ;;  %v1343_v44 = vld [vmem:[#allocation4 + $0xf0] sm:$0xff] }
 0x1a9   :  { %2683 = vmatmul.msk.f32.vlgmr.msrb.gmra.mxu2 %vm468_vm1, %v3045_v0  ;;  %2685 = vmatmul.msk.f32.vlgmr.msrb.gmra.mxu3 %vm468_vm1, %v3045_v0 }
 0x1aa   :  { %2698 = vmatpush.msk.msrb.mxu2 %vm472_vm0, %v1727_v47  ;;  %2700 = vmatpush.msk.msrb.mxu3 %vm472_vm0, %v1728_v48  ;;  %v1437_v47 = vld [vmem:[#allocation4 + $0x3e0] sm:$0xff]  ;;  %v1406_v48 = vld [vmem:[#allocation4 + $0x2e8] sm:$0xff] }
 0x1ab   :  { %2320 = vmatpush.msra.mxu0 %v1433_v49  ;;  %2341 = vmatpush.msra.mxu1 %v1402_v50  ;;  %v1405_v49 = vld [vmem:[#allocation4 + $0x2e0] sm:$0xff]  ;;  %v1374_v50 = vld [vmem:[#allocation4 + $0x1e8] sm:$0xff] }
 0x1ac   :  { %2432 = vmatpush.msrb.mxu2 %v1695_v51  ;;  %2452 = vmatpush.msrb.mxu3 %v1696_v52  ;;  %v1373_v51 = vld [vmem:[#allocation4 + $0x1e0] sm:$0xff]  ;;  %v1342_v52 = vld [vmem:[#allocation4 + $0xe8] sm:$0xff] }
 0x1ad   :  { %2321 = vmatpush.msra.mxu0 %v1401_v53  ;;  %2342 = vmatpush.msra.mxu1 %v1370_v55  ;;  %v1341_v53 = vld [vmem:[#allocation4 + $0xe0] sm:$0xff] }
 0x1ae   :  { %2433 = vmatpush.msrb.mxu2 %v1663_v56  ;;  %2453 = vmatpush.msrb.mxu3 %v1664_v57 }
 0x1af   :  { %2322 = vmatpush.msra.mxu0 %v1369_v58  ;;  %2343 = vmatpush.msra.mxu1 %v1338_v59 }
 0x1b0   :  { %2434 = vmatpush.msrb.mxu2 %v1631_v60  ;;  %2681 = vmatmul.msk.f32.vlgmr.msrb.gmra.mxu1 %vm468_vm1, %v3045_v0 }
 0x1b1   :  { %2454 = vmatpush.msrb.mxu3 %v1632_v46  ;;  %2696 = vmatpush.msk.msrb.mxu1 %vm472_vm0, %v1726_v61 }
 0x1b2   :  { %2323 = vmatpush.msra.mxu0 %v1337_v62  ;;  %2435 = vmatpush.msrb.mxu2 %v1599_v63 }
 0x1b3   :  { %2679 = vmatmul.msk.f32.vlgmr.msrb.gmra.mxu0 %vm468_vm1, %v3045_v0  ;;  %2412 = vmatpush.msrb.mxu1 %v1694_v2 }
 0x1b4   :  { %2694 = vmatpush.msk.msrb.mxu0 %vm472_vm0, %v1725_v1  ;;  %2455 = vmatpush.msrb.mxu3 %v1600_v3 }
 0x1b5   :  { %2436 = vmatpush.msrb.mxu2 %v1567_v4  ;;  %2413 = vmatpush.msrb.mxu1 %v1662_v6 }
 0x1b6   :  { %2392 = vmatpush.msrb.mxu0 %v1693_v5  ;;  %2456 = vmatpush.msrb.mxu3 %v1568_v7 }
 0x1b7   :  { %2437 = vmatpush.msrb.mxu2 %v1535_v8  ;;  %2414 = vmatpush.msrb.mxu1 %v1630_v10 }
 0x1b8   :  { %2393 = vmatpush.msrb.mxu0 %v1661_v9  ;;  %2457 = vmatpush.msrb.mxu3 %v1536_v11 }
 0x1b9   :  { %2438 = vmatpush.msrb.mxu2 %v1503_v12  ;;  %2415 = vmatpush.msrb.mxu1 %v1598_v14 }
 0x1ba   :  { %2394 = vmatpush.msrb.mxu0 %v1629_v13  ;;  %2458 = vmatpush.msrb.mxu3 %v1504_v15 }
 0x1bb   :  { %2439 = vmatpush.msrb.mxu2 %v1471_v54  ;;  %2416 = vmatpush.msrb.mxu1 %v1566_v17 }
 0x1bc   :  { %2395 = vmatpush.msrb.mxu0 %v1597_v16  ;;  %v1965_v21 = vpop.f32.mrf.mxu2  ;;  %2459 = vmatpush.msrb.mxu3 %v1472_v18  ;;  %v1985_v25 = vpop.f32.mrf.mxu3 }
 0x1bd   :  { %2691 = vmatmul.msk.f32.vlgmr.msra.gmra.mxu2 %vm468_vm1, %v3045_v0  ;;  %v2504_v24 = vrot.slane %v1965_v21, 4  ;;  %2693 = vmatmul.msk.f32.vlgmr.msra.gmra.mxu3 %vm468_vm1, %v3045_v0  ;;  %v1945_v28 = vpop.f32.mrf.mxu1  ;;  %v2505_v29 = vrot.slane %v1985_v25, 2 }
 0x1be   :  { %2396 = vmatpush.msrb.mxu0 %v1565_v31  ;;  %2417 = vmatpush.msrb.mxu1 %v1534_v19  ;;  %v2503_v33 = vrot.slane %v1945_v28, 6 }
 0x1bf   :  { %2440 = vmatpush.msrb.mxu2 %v1439_v20  ;;  %2460 = vmatpush.msrb.mxu3 %v1440_v22  ;;  %v2528_v36 = vsel %vm1267_vm2, %v2504_v24, %v2505_v29 }
 0x1c0   :  { %2397 = vmatpush.msrb.mxu0 %v1533_v23  ;;  %v1925_v37 = vpop.f32.mrf.mxu0  ;;  %2418 = vmatpush.msrb.mxu1 %v1502_v26 }
 0x1c1   :  { %2441 = vmatpush.msrb.mxu2 %v1407_v27  ;;  %v2527_v39 = vsel %vm1265_vm3, %v1925_v37, %v2503_v33  ;;  %2461 = vmatpush.msrb.mxu3 %v1408_v30 }
 0x1c2   :  { %2398 = vmatpush.msrb.mxu0 %v1501_v32  ;;  %v2529_v43 = vsel %vm472_vm0, %v2527_v39, %v2528_v36  ;;  %2419 = vmatpush.msrb.mxu1 %v1470_v34 }
 0x1c3   :  { %2442 = vmatpush.msrb.mxu2 %v1375_v35  ;;  %2557 = vst [vmem:[%s3136_s5 + $0x8] sm:$0xff] %v2529_v43  ;;  %2462 = vmatpush.msrb.mxu3 %v1376_v38 }
 0x1c4   :  { %2689 = vmatmul.msk.f32.vlgmr.msra.gmra.mxu1 %vm468_vm1, %v3045_v0  ;;  %2399 = vmatpush.msrb.mxu0 %v1469_v41 }
 0x1c5   :  { %2420 = vmatpush.msrb.mxu1 %v1438_v42  ;;  %2443 = vmatpush.msrb.mxu2 %v1343_v44 }
 0x1c6   :  { %2463 = vmatpush.msrb.mxu3 %v1344_v45  ;;  %2687 = vmatmul.msk.f32.vlgmr.msra.gmra.mxu0 %vm468_vm1, %v3045_v0 }
 0x1c7   :  { %2699 = vmatmul.msk.f32.vlgmr.msrb.gmra.mxu2 %vm468_vm1, %v3045_v0  ;;  %2701 = vmatmul.msk.f32.vlgmr.msrb.gmra.mxu3 %vm468_vm1, %v3045_v0 }
 0x1c8   :  { %2400 = vmatpush.msrb.mxu0 %v1437_v47  ;;  %2421 = vmatpush.msrb.mxu1 %v1406_v48 }
 0x1ca   :  { %2401 = vmatpush.msrb.mxu0 %v1405_v49  ;;  %2422 = vmatpush.msrb.mxu1 %v1374_v50 }
 0x1cc   :  { %2402 = vmatpush.msrb.mxu0 %v1373_v51  ;;  %2423 = vmatpush.msrb.mxu1 %v1342_v52 }
 0x1cd   :  { %2697 = vmatmul.msk.f32.vlgmr.msrb.gmra.mxu1 %vm468_vm1, %v3045_v0 }
 0x1ce   :  { %2403 = vmatpush.msrb.mxu0 %v1341_v53 }
 0x1cf   :  { %2695 = vmatmul.msk.f32.vlgmr.msrb.gmra.mxu0 %vm468_vm1, %v3045_v0 }
 0x1d8   :  { %v2045_v55 = vpop.f32.mrf.mxu2  ;;  %v2065_v57 = vpop.f32.mrf.mxu3 }
 0x1d9   :  { %v2507_v56 = vrot.slane %v2045_v55, 4  ;;  %v2025_v58 = vpop.f32.mrf.mxu1  ;;  %v2508_v59 = vrot.slane %v2065_v57, 2 }
 0x1da   :  { %v2506_v60 = vrot.slane %v2025_v58, 6 }
 0x1db   :  { %v2531_v46 = vsel %vm1267_vm2, %v2507_v56, %v2508_v59 }
 0x1dc   :  { %v2005_v61 = vpop.f32.mrf.mxu0 }
 0x1dd   :  { %v2530_v62 = vsel %vm1265_vm3, %v2005_v61, %v2506_v60 }
 0x1de   :  { %v2532_v63 = vsel %vm472_vm0, %v2530_v62, %v2531_v46 }
 0x1df   :  { %2558 = vst [vmem:[%s3136_s5 + $0x10] sm:$0xff] %v2532_v63 }
 0x1f4   :  { %v2125_v1 = vpop.f32.mrf.mxu2  ;;  %v2145_v0 = vpop.f32.mrf.mxu3 }
 0x1f5   :  { %v2510_v2 = vrot.slane %v2125_v1, 4  ;;  %v2105_v3 = vpop.f32.mrf.mxu1  ;;  %v2511_v4 = vrot.slane %v2145_v0, 2 }
 0x1f6   :  { %v2509_v5 = vrot.slane %v2105_v3, 6 }
 0x1f7   :  { %v2534_v6 = vsel %vm1267_vm2, %v2510_v2, %v2511_v4 }
 0x1f8   :  { %v2085_v7 = vpop.f32.mrf.mxu0 }
 0x1f9   :  { %v2533_v8 = vsel %vm1265_vm3, %v2085_v7, %v2509_v5 }
 0x1fa   :  { %v2535_v9 = vsel %vm472_vm0, %v2533_v8, %v2534_v6 }
 0x1fb   :  { %2559 = vst [vmem:[%s3136_s5 + $0x18] sm:$0xff] %v2535_v9 }
 0x210   :  { %v2205_v10 = vpop.f32.mrf.mxu2  ;;  %v2225_v12 = vpop.f32.mrf.mxu3 }
 0x211   :  { %v2513_v11 = vrot.slane %v2205_v10, 4  ;;  %v2185_v13 = vpop.f32.mrf.mxu1  ;;  %v2514_v14 = vrot.slane %v2225_v12, 2 }
 0x212   :  { %v2512_v15 = vrot.slane %v2185_v13, 6 }
 0x213   :  { %v2537_v54 = vsel %vm1267_vm2, %v2513_v11, %v2514_v14 }
 0x214   :  { %v2165_v16 = vpop.f32.mrf.mxu0 }
 0x215   :  { %v2536_v17 = vsel %vm1265_vm3, %v2165_v16, %v2512_v15 }
 0x216   :  { %v2538_v18 = vsel %vm472_vm0, %v2536_v17, %v2537_v54 }
 0x217   :  { %2560 = vst [vmem:[%s3136_s5 + $0x20] sm:$0xff] %v2538_v18 }
 0x22c   :  { %v2285_v31 = vpop.f32.mrf.mxu2  ;;  %v2305_v20 = vpop.f32.mrf.mxu3 }
 0x22d   :  { %v2516_v19 = vrot.slane %v2285_v31, 4  ;;  %v2265_v21 = vpop.f32.mrf.mxu1  ;;  %v2517_v22 = vrot.slane %v2305_v20, 2 }
 0x22e   :  { %v2515_v23 = vrot.slane %v2265_v21, 6 }
 0x22f   :  { %v2540_v24 = vsel %vm1267_vm2, %v2516_v19, %v2517_v22 }
 0x230   :  { %v2245_v25 = vpop.f32.mrf.mxu0 }
 0x231   :  { %v2539_v26 = vsel %vm1265_vm3, %v2245_v25, %v2515_v23 }
 0x232   :  { %v2541_v27 = vsel %vm472_vm0, %v2539_v26, %v2540_v24 }
 0x233   :  { %2561 = vst [vmem:[%s3136_s5 + $0x28] sm:$0xff] %v2541_v27 }
 0x240   :  { %v2365_v28 = vpop.f32.mrf.mxu2  ;;  %v2385_v32 = vpop.f32.mrf.mxu3 }
 0x241   :  { %v2345_v29 = vpop.f32.mrf.mxu1  ;;  %v2519_v30 = vrot.slane %v2365_v28, 4  ;;  %v2520_v34 = vrot.slane %v2385_v32, 2 }
 0x242   :  { %v2518_v33 = vrot.slane %v2345_v29, 6 }
 0x243   :  { %v2543_v35 = vsel %vm1267_vm2, %v2519_v30, %v2520_v34  ;;  %v2325_v36 = vpop.f32.mrf.mxu0 }
 0x244   :  { %v2542_v37 = vsel %vm1265_vm3, %v2325_v36, %v2518_v33 }
 0x245   :  { %v2544_v38 = vsel %vm472_vm0, %v2542_v37, %v2543_v35 }
 0x246   :  { %2562 = vst [vmem:[%s3136_s5 + $0x30] sm:$0xff] %v2544_v38 }
 0x24a   :  { %v2445_v39 = vpop.f32.mrf.mxu2  ;;  %v2425_v41 = vpop.f32.mrf.mxu1 }
 0x24b   :  { %v2522_v42 = vrot.slane %v2445_v39, 4  ;;  %v2465_v43 = vpop.f32.mrf.mxu3  ;;  %v2521_v44 = vrot.slane %v2425_v41, 6 }
 0x24c   :  { %v2523_v45 = vrot.slane %v2465_v43, 2  ;;  %v2405_v47 = vpop.f32.mrf.mxu0 }
 0x24d   :  { %v2545_v49 = vsel %vm1265_vm3, %v2405_v47, %v2521_v44 }
 0x24e   :  { %v2546_v48 = vsel %vm1267_vm2, %v2522_v42, %v2523_v45 }
 0x24f   :  { %v2547_v50 = vsel %vm472_vm0, %v2545_v49, %v2546_v48 }
 0x250   :  { %2563 = vst.msk [vmem:[%s3136_s5 + $0x38] sm:$0xff] %vm3025_vm8, %v2547_v50 }
 0x251   :  { %2572 = vsyncpa [#allocation3], 1 }
 0x252   :  { %2573 = vsyncpa [#allocation5], 1 }

// kernel: cmla_forward.15
= control target key start
LH: loop header
LB: loop body
LE: loop exit
PB: predicated region body
PF: predicated region fallthrough
CT: control target
= control target key end

     0   :  { %vm72_vm0 = vcmask 1043456   ;;  %vm68_vm1 = vcmask 818176   ;;  %vm100_vm2 = vcmask 654336   ;;  %s655_s1 = inlined_call_operand.vmem [shape: f32[2,100,80], index: 1, kind: input, shape index: {}]   ;;  %s656_s2 = inlined_call_operand.vmem [shape: f32[3,80,80], index: 2, kind: input, shape index: {}]   ;;  %s657_s0 = inlined_call_operand.vmem [shape: f32[2,8,100], index: 0, kind: input, shape index: {}]   ;;  %s658_s3 = inlined_call_operand.vmem [shape: f32[3,1,80], index: 3, kind: input, shape index: {}]   ;;  %s659_s4 = inlined_call_operand.vmem [shape: f32[2,3,8,80], index: 4, kind: output, shape index: {}]  }
   0x1   :  { %v67_v0 = vld [vmem:[%s655_s1 + $0x60] sm:$0xf]  ;;  %v66_v1 = vld [vmem:[%s655_s1 + $0x58] sm:$0xff]  ;;  %v65_v2 = vld [vmem:[%s655_s1 + $0x50] sm:$0xff] }
   0x2   :  { %313 = vmatpush.msk.msra.mxu0 %vm72_vm0, %v67_v0  ;;  %v64_v3 = vld [vmem:[%s655_s1 + $0x48] sm:$0xff]  ;;  %v396_v5 = vld [vmem:[%s656_s2 + $0x40] sm:$0xff]  ;;  %v404_v7 = vld [vmem:[%s656_s2 + $0x38] sm:$0xff] }
   0x3   :  { %v390_v4 = vld [vmem:[%s656_s2 + $0x48] sm:$0xff]  ;;  %v63_v6 = vld [vmem:[%s655_s1 + $0x40] sm:$0xff]  ;;  %v62_v8 = vld [vmem:[%s655_s1 + $0x38] sm:$0xff] }
   0x4   :  { %80 = vmatpush.msra.mxu0 %v66_v1  ;;  %110 = vmatpush.msra.mxu1 %v390_v4  ;;  %v413_v9 = vld [vmem:[%s656_s2 + $0x98] sm:$0xff]  ;;  %v418_v10 = vld [vmem:[%s656_s2 + $0x30] sm:$0xff]  ;;  %v310_v11 = vld [vmem:[%s656_s2 + $0xe8] sm:$0xff] }
   0x5   :  { %134 = vmatpush.msra.mxu2 %v413_v9  ;;  %v427_v12 = vld [vmem:[%s656_s2 + $0x90] sm:$0xff]  ;;  %v309_v13 = vld [vmem:[%s656_s2 + $0xe0] sm:$0xff]  ;;  %v436_v14 = vld [vmem:[%s656_s2 + $0x88] sm:$0xff]  ;;  %159 = vmatpush.msra.mxu3 %v310_v11 }
   0x6   :  { %81 = vmatpush.msra.mxu0 %v65_v2  ;;  %111 = vmatpush.msra.mxu1 %v396_v5  ;;  %v61_v15 = vld [vmem:[%s655_s1 + $0x30] sm:$0xff]  ;;  %v444_v16 = vld [vmem:[%s656_s2 + $0x28] sm:$0xff]  ;;  %v308_v17 = vld [vmem:[%s656_s2 + $0xd8] sm:$0xff] }
   0x7   :  { %135 = vmatpush.msra.mxu2 %v427_v12  ;;  %v454_v18 = vld [vmem:[%s656_s2 + $0x80] sm:$0xff]  ;;  %v60_v19 = vld [vmem:[%s655_s1 + $0x28] sm:$0xff]  ;;  %160 = vmatpush.msra.mxu3 %v309_v13  ;;  %v307_v21 = vld [vmem:[%s656_s2 + $0xd0] sm:$0xff] }
   0x8   :  { %82 = vmatpush.msra.mxu0 %v64_v3  ;;  %112 = vmatpush.msra.mxu1 %v404_v7  ;;  %v462_v20 = vld [vmem:[%s656_s2 + $0x20] sm:$0xff]  ;;  %v472_v22 = vld [vmem:[%s656_s2 + $0x78] sm:$0xff]  ;;  %v306_v25 = vld [vmem:[%s656_s2 + $0xc8] sm:$0xff] }
   0x9   :  { %136 = vmatpush.msra.mxu2 %v436_v14  ;;  %v59_v23 = vld [vmem:[%s655_s1 + $0x20] sm:$0xff]  ;;  %v480_v24 = vld [vmem:[%s656_s2 + $0x18] sm:$0xff]  ;;  %161 = vmatpush.msra.mxu3 %v308_v17  ;;  %v490_v26 = vld [vmem:[%s656_s2 + $0x70] sm:$0xff] }
   0xa   :  { %83 = vmatpush.msra.mxu0 %v63_v6  ;;  %113 = vmatpush.msra.mxu1 %v418_v10  ;;  %v58_v27 = vld [vmem:[%s655_s1 + $0x18] sm:$0xff]  ;;  %v498_v28 = vld [vmem:[%s656_s2 + $0x10] sm:$0xff]  ;;  %v305_v29 = vld [vmem:[%s656_s2 + $0xc0] sm:$0xff] }
   0xb   :  { %137 = vmatpush.msra.mxu2 %v454_v18  ;;  %162 = vmatpush.msra.mxu3 %v307_v21  ;;  %v57_v30 = vld [vmem:[%s655_s1 + $0x10] sm:$0xff]  ;;  %v511_v31 = vld [vmem:[%s656_s2 + $0x8] sm:$0xff]  ;;  %v521_v33 = vld [vmem:[%s656_s2] sm:$0xff] }
   0xc   :  { %84 = vmatpush.msra.mxu0 %v62_v8  ;;  %114 = vmatpush.msra.mxu1 %v444_v16  ;;  %v56_v32 = vld [vmem:[%s655_s1 + $0x8] sm:$0xff]  ;;  %v55_v35 = vld [vmem:[%s655_s1] sm:$0xff]  ;;  %v331_v38 = vld [vmem:[%s655_s1 + $0xb8] sm:$0xff] }
   0xd   :  { %138 = vmatpush.msra.mxu2 %v472_v22  ;;  %163 = vmatpush.msra.mxu3 %v306_v25  ;;  %v333_v34 = vld [vmem:[%s655_s1 + $0xc8] sm:$0xf]  ;;  %v54_v36 = vld [vmem:[%s657_s0] sm:$0xff]  ;;  %v330_v39 = vld [vmem:[%s655_s1 + $0xb0] sm:$0xff] }
   0xe   :  { %85 = vmatpush.msra.mxu0 %v61_v15  ;;  %115 = vmatpush.msra.mxu1 %v462_v20  ;;  %v332_v37 = vld [vmem:[%s655_s1 + $0xc0] sm:$0xff]  ;;  %v329_v40 = vld [vmem:[%s655_s1 + $0xa8] sm:$0xff]  ;;  %v304_v42 = vld [vmem:[%s656_s2 + $0xb8] sm:$0xff] }
   0xf   :  { %139 = vmatpush.msra.mxu2 %v490_v26  ;;  %164 = vmatpush.msra.mxu3 %v305_v29  ;;  %v294_v41 = vld [vmem:[%s656_s2 + $0x68] sm:$0xff]  ;;  %v328_v43 = vld [vmem:[%s655_s1 + $0xa0] sm:$0xff]  ;;  %v303_v45 = vld [vmem:[%s656_s2 + $0xb0] sm:$0xff] }
  0x10   :  { %86 = vmatpush.msra.mxu0 %v60_v19  ;;  %116 = vmatpush.msra.mxu1 %v480_v24  ;;  %v293_v44 = vld [vmem:[%s656_s2 + $0x60] sm:$0xff]  ;;  %v327_v46 = vld [vmem:[%s655_s1 + $0x98] sm:$0xff]  ;;  %v302_v48 = vld [vmem:[%s656_s2 + $0xa8] sm:$0xff] }
  0x11   :  { %140 = vmatpush.msra.mxu2 %v294_v41  ;;  %165 = vmatpush.msra.mxu3 %v304_v42  ;;  %v292_v47 = vld [vmem:[%s656_s2 + $0x58] sm:$0xff]  ;;  %v326_v49 = vld [vmem:[%s655_s1 + $0x90] sm:$0xff]  ;;  %v301_v51 = vld [vmem:[%s656_s2 + $0xa0] sm:$0xff] }
  0x12   :  { %87 = vmatpush.msra.mxu0 %v59_v23  ;;  %117 = vmatpush.msra.mxu1 %v498_v28  ;;  %v291_v50 = vld [vmem:[%s656_s2 + $0x50] sm:$0xff]  ;;  %v325_v52 = vld [vmem:[%s655_s1 + $0x88] sm:$0xff]  ;;  %v324_v53 = vld [vmem:[%s655_s1 + $0x80] sm:$0xff] }
  0x13   :  { %141 = vmatpush.msra.mxu2 %v293_v44  ;;  %166 = vmatpush.msra.mxu3 %v303_v45  ;;  %v323_v54 = vld [vmem:[%s655_s1 + $0x78] sm:$0xff]  ;;  %v322_v55 = vld [vmem:[%s655_s1 + $0x70] sm:$0xff]  ;;  %v321_v56 = vld [vmem:[%s655_s1 + $0x68] sm:$0xff] }
  0x14   :  { %88 = vmatpush.msra.mxu0 %v58_v27  ;;  %118 = vmatpush.msra.mxu1 %v511_v31  ;;  %v320_v59 = vld [vmem:[%s657_s0 + $0x8] sm:$0xff]  ;;  %v342_v60 = vld [vmem:[%s658_s3] ss:$0 sm:$0xff]  ;;  %v343_v63 = vld [vmem:[%s658_s3 + $0x1] ss:$0 sm:$0xff] }
  0x15   :  { %142 = vmatpush.msra.mxu2 %v292_v47  ;;  %167 = vmatpush.msra.mxu3 %v302_v48  ;;  %v344_v0 = vld [vmem:[%s658_s3 + $0x2] ss:$0 sm:$0xff] }
  0x16   :  { %89 = vmatpush.msra.mxu0 %v57_v30  ;;  %119 = vmatpush.msra.mxu1 %v521_v33 }
  0x17   :  { %143 = vmatpush.msra.mxu2 %v291_v50  ;;  %168 = vmatpush.msra.mxu3 %v301_v51 }
  0x18   :  { %90 = vmatpush.msra.mxu0 %v56_v32  ;;  %334 = vmatpush.msk.msrb.mxu1 %vm72_vm0, %v333_v34 }
  0x19   :  { %227 = vmatpush.msrb.mxu2 %v390_v4  ;;  %249 = vmatpush.msrb.mxu3 %v413_v9 }
  0x1a   :  { %91 = vmatpush.msra.mxu0 %v55_v35  ;;  %201 = vmatpush.msrb.mxu1 %v332_v37 }
  0x1b   :  { %314 = vmatmul.msk.f32.vlgmr.msra.gmra.mxu0 %vm68_vm1, %v54_v36  ;;  %228 = vmatpush.msrb.mxu2 %v396_v5 }
  0x1c   :  { %271 = vmatpush.msrb.mxu0 %v310_v11  ;;  %202 = vmatpush.msrb.mxu1 %v331_v38 }
  0x1d   :  { %250 = vmatpush.msrb.mxu3 %v427_v12  ;;  %229 = vmatpush.msrb.mxu2 %v404_v7 }
  0x1e   :  { %272 = vmatpush.msrb.mxu0 %v309_v13  ;;  %203 = vmatpush.msrb.mxu1 %v330_v39 }
  0x1f   :  { %251 = vmatpush.msrb.mxu3 %v436_v14  ;;  %230 = vmatpush.msrb.mxu2 %v418_v10 }
  0x20   :  { %273 = vmatpush.msrb.mxu0 %v308_v17  ;;  %204 = vmatpush.msrb.mxu1 %v329_v40 }
  0x21   :  { %252 = vmatpush.msrb.mxu3 %v454_v18  ;;  %231 = vmatpush.msrb.mxu2 %v444_v16 }
  0x22   :  { %274 = vmatpush.msrb.mxu0 %v307_v21  ;;  %205 = vmatpush.msrb.mxu1 %v328_v43 }
  0x23   :  { %253 = vmatpush.msrb.mxu3 %v472_v22  ;;  %232 = vmatpush.msrb.mxu2 %v462_v20 }
  0x24   :  { %275 = vmatpush.msrb.mxu0 %v306_v25  ;;  %206 = vmatpush.msrb.mxu1 %v327_v46 }
  0x25   :  { %254 = vmatpush.msrb.mxu3 %v490_v26  ;;  %233 = vmatpush.msrb.mxu2 %v480_v24 }
  0x26   :  { %276 = vmatpush.msrb.mxu0 %v305_v29  ;;  %207 = vmatpush.msrb.mxu1 %v326_v49 }
  0x27   :  { %255 = vmatpush.msrb.mxu3 %v294_v41  ;;  %234 = vmatpush.msrb.mxu2 %v498_v28 }
  0x28   :  { %277 = vmatpush.msrb.mxu0 %v304_v42  ;;  %208 = vmatpush.msrb.mxu1 %v325_v52 }
  0x29   :  { %256 = vmatpush.msrb.mxu3 %v293_v44  ;;  %235 = vmatpush.msrb.mxu2 %v511_v31 }
  0x2a   :  { %278 = vmatpush.msrb.mxu0 %v303_v45  ;;  %209 = vmatpush.msrb.mxu1 %v324_v53 }
  0x2b   :  { %257 = vmatpush.msrb.mxu3 %v292_v47  ;;  %236 = vmatpush.msrb.mxu2 %v521_v33 }
  0x2c   :  { %279 = vmatpush.msrb.mxu0 %v302_v48  ;;  %210 = vmatpush.msrb.mxu1 %v323_v54 }
  0x2d   :  { %258 = vmatpush.msrb.mxu3 %v291_v50 }
  0x2e   :  { %280 = vmatpush.msrb.mxu0 %v301_v51  ;;  %211 = vmatpush.msrb.mxu1 %v322_v55 }
  0x30   :  { %212 = vmatpush.msrb.mxu1 %v321_v56 }
  0x98   :  { %v93_v57 = vpop.f32.mrf.mxu0 }
  0x99   :  { %345 = vtanh.f32 %v93_v57 }
  0x9f   :  { %v346_v58 = vpop.eup %345 }
  0xa0   :  { %315 = vmatmul.msk.f32.vlgmr.msra.gmra.mxu1 %vm100_vm2, %v346_v58  ;;  %316 = vmatmul.msk.f32.vlgmr.msra.gmra.mxu2 %vm100_vm2, %v346_v58 }
  0xa1   :  { %318 = vmatmul.msk.f32.vlgmr.msra.gmra.mxu3 %vm100_vm2, %v346_v58 }
  0xa8   :  { %335 = vmatmul.msk.f32.vlgmr.msrb.gmra.mxu1 %vm68_vm1, %v320_v59 }
 0x11d   :  { %v121_v61 = vpop.f32.mrf.mxu1 }
 0x11e   :  { %v122_v62 = vadd.f32 %v342_v60, %v121_v61 }
 0x120   :  { %124 = vst.msk [vmem:[%s659_s4] sm:$0xff] %vm100_vm2, %v122_v62 }
 0x123   :  { %v145_v1 = vpop.f32.mrf.mxu2 }
 0x124   :  { %v146_v2 = vadd.f32 %v343_v63, %v145_v1  ;;  %v170_v3 = vpop.f32.mrf.mxu3 }
 0x125   :  { %v171_v4 = vadd.f32 %v344_v0, %v170_v3  ;;  %v214_v5 = vpop.f32.mrf.mxu1 }
 0x126   :  { %317 = vst.msk [vmem:[%s659_s4 + $0x8] sm:$0xff] %vm100_vm2, %v146_v2  ;;  %347 = vtanh.f32 %v214_v5 }
 0x127   :  { %319 = vst.msk [vmem:[%s659_s4 + $0x10] sm:$0xff] %vm100_vm2, %v171_v4 }
 0x12c   :  { %v348_v6 = vpop.eup %347 }
 0x12d   :  { %336 = vmatmul.msk.f32.vlgmr.msrb.gmra.mxu2 %vm100_vm2, %v348_v6  ;;  %338 = vmatmul.msk.f32.vlgmr.msrb.gmra.mxu3 %vm100_vm2, %v348_v6 }
 0x12e   :  { %340 = vmatmul.msk.f32.vlgmr.msrb.gmra.mxu0 %vm100_vm2, %v348_v6 }
 0x1ab   :  { %v282_v7 = vpop.f32.mrf.mxu0 }
 0x1ac   :  { %v283_v8 = vadd.f32 %v344_v0, %v282_v7 }
 0x1ae   :  { %341 = vst.msk [vmem:[%s659_s4 + $0x28] sm:$0xff] %vm100_vm2, %v283_v8 }
 0x1b0   :  { %v238_v9 = vpop.f32.mrf.mxu2  ;;  %v260_v10 = vpop.f32.mrf.mxu3 }
 0x1b1   :  { %v239_v11 = vadd.f32 %v342_v60, %v238_v9  ;;  %v261_v12 = vadd.f32 %v343_v63, %v260_v10 }
 0x1b3   :  { %337 = vst.msk [vmem:[%s659_s4 + $0x18] sm:$0xff] %vm100_vm2, %v239_v11 }
 0x1b4   :  { %339 = vst.msk [vmem:[%s659_s4 + $0x20] sm:$0xff] %vm100_vm2, %v261_v12 }

// kernel: cmla_forward.17
= control target key start
LH: loop header
LB: loop body
LE: loop exit
PB: predicated region body
PF: predicated region fallthrough
CT: control target
= control target key end

     0   :  { %vm16_vm0 = vcmask 326656   ;;  %vm52_vm1 = vcmask 261120   ;;  %s179_s1 = inlined_call_operand.vmem [shape: f32[2,32,40], index: 1, kind: input, shape index: {}]   ;;  %s180_s0 = inlined_call_operand.vmem [shape: f32[2,8,40], index: 0, kind: input, shape index: {}]   ;;  %s181_s2 = inlined_call_operand.vmem [shape: f32[2,8,32], index: 2, kind: output, shape index: {}]  }
   0x1   :  { %v15_v0 = vld [vmem:[%s179_s1 + $0x18] sm:$0xff]  ;;  %v14_v2 = vld [vmem:[%s179_s1 + $0x10] sm:$0xff]  ;;  %v13_v4 = vld [vmem:[%s179_s1 + $0x8] sm:$0xff] }
   0x2   :  { %v111_v1 = vld [vmem:[%s179_s1 + $0x38] sm:$0xff]  ;;  %102 = vmatpush.xpose.msk.msra.mxu0 %vm16_vm0, %v15_v0  ;;  %v110_v3 = vld [vmem:[%s179_s1 + $0x30] sm:$0xff]  ;;  %v109_v5 = vld [vmem:[%s179_s1 + $0x28] sm:$0xff] }
   0x3   :  { %112 = vmatpush.xpose.msk.msra.mxu1 %vm16_vm0, %v111_v1  ;;  %v12_v6 = vld [vmem:[%s179_s1] sm:$0xff]  ;;  %v107_v9 = vld [vmem:[%s180_s0 + $0x8] sm:$0xff] }
   0x4   :  { %v108_v7 = vld [vmem:[%s179_s1 + $0x20] sm:$0xff] }
   0x5   :  { %v11_v8 = vld [vmem:[%s180_s0] sm:$0xff] }
   0x6   :  { %103 = vmatpush.xpose.msk.msra.mxu0 %vm16_vm0, %v14_v2 }
   0x7   :  { %113 = vmatpush.xpose.msk.msra.mxu1 %vm16_vm0, %v110_v3 }
   0xa   :  { %104 = vmatpush.xpose.msk.msra.mxu0 %vm16_vm0, %v13_v4 }
   0xb   :  { %114 = vmatpush.xpose.msk.msra.mxu1 %vm16_vm0, %v109_v5 }
   0xe   :  { %105 = vmatpush.xpose.msk.msra.mxu0 %vm16_vm0, %v12_v6 }
   0xf   :  { %115 = vmatpush.xpose.msk.msra.mxu1 %vm16_vm0, %v108_v7 }
  0x11   :  { %106 = vmatmul.msk.f32.vlgmr.msra.gmra.mxu0 %vm16_vm0, %v11_v8 }
  0x12   :  { %116 = vmatmul.msk.f32.vlgmr.msra.gmra.mxu1 %vm16_vm0, %v107_v9 }
  0x8e   :  { %v49_v10 = vpop.f32.mrf.mxu0 }
  0x8f   :  { %v93_v11 = vpop.f32.mrf.mxu1  ;;  %53 = vst.msk [vmem:[%s181_s2] sm:$0xff] %vm52_vm1, %v49_v10 }
  0x90   :  { %117 = vst.msk [vmem:[%s181_s2 + $0x8] sm:$0xff] %vm52_vm1, %v93_v11 }

// kernel: cmla_forward.16
= control target key start
LH: loop header
LB: loop body
LE: loop exit
PB: predicated region body
PF: predicated region fallthrough
CT: control target
= control target key end

     0   :  { %v1196_v27 = vmov 0.0   ;;  %vm60_vm8 = vcmask 654336   ;;  %vm180_vm9 = vcmask 648192   ;;  %s1845_s3 = inlined_call_operand.vmem [shape: f32[3,80,80], index: 3, kind: input, shape index: {}]   ;;  %s1846_s4 = inlined_call_operand.vmem [shape: f32[3,1,80], index: 4, kind: input, shape index: {}]   ;;  %s1847_s0 = inlined_call_operand.vmem [shape: f32[8,2,80], index: 0, kind: input, shape index: {}]   ;;  %s1848_s1 = inlined_call_operand.vmem [shape: f32[8,2,80], index: 1, kind: input, shape index: {}]   ;;  %s1849_s2 = inlined_call_operand.vmem [shape: f32[8,2,80], index: 2, kind: input, shape index: {}]   ;;  %s1850_s5 = inlined_call_operand.vmem [shape: f32[8,2,80], index: 5, kind: output, shape index: {}]  }
   0x1   :  { %v1230_v0 = vld [vmem:[%s1845_s3 + $0x48] sm:$0xff]  ;;  %v1235_v1 = vld [vmem:[%s1845_s3 + $0x98] sm:$0xff]  ;;  %v1240_v2 = vld [vmem:[%s1845_s3 + $0x40] sm:$0xff] }
   0x2   :  { %70 = vmatpush.msra.mxu0 %v1230_v0  ;;  %93 = vmatpush.msra.mxu1 %v1235_v1  ;;  %v1247_v3 = vld [vmem:[%s1845_s3 + $0x90] sm:$0xff]  ;;  %v1252_v4 = vld [vmem:[%s1845_s3 + $0x38] sm:$0xff]  ;;  %v1257_v5 = vld [vmem:[%s1845_s3 + $0x88] sm:$0xff] }
   0x3   :  { %191 = vmatpush.msra.mxu3 %v1230_v0  ;;  %v1265_v6 = vld [vmem:[%s1845_s3 + $0x30] sm:$0xff]  ;;  %v1270_v7 = vld [vmem:[%s1845_s3 + $0x80] sm:$0xff]  ;;  %v1278_v8 = vld [vmem:[%s1845_s3 + $0x28] sm:$0xff] }
   0x4   :  { %71 = vmatpush.msra.mxu0 %v1240_v2  ;;  %94 = vmatpush.msra.mxu1 %v1247_v3  ;;  %v1283_v9 = vld [vmem:[%s1845_s3 + $0x78] sm:$0xff]  ;;  %v1288_v10 = vld [vmem:[%s1845_s3 + $0xe8] sm:$0xff]  ;;  %v1296_v11 = vld [vmem:[%s1845_s3 + $0xe0] sm:$0xff] }
   0x5   :  { %192 = vmatpush.msra.mxu3 %v1240_v2  ;;  %v1301_v12 = vld [vmem:[%s1845_s3 + $0x20] sm:$0xff]  ;;  %v1306_v13 = vld [vmem:[%s1845_s3 + $0x70] sm:$0xff]  ;;  %116 = vmatpush.msra.mxu2 %v1288_v10  ;;  %v1315_v14 = vld [vmem:[%s1845_s3 + $0x18] sm:$0xff] }
   0x6   :  { %72 = vmatpush.msra.mxu0 %v1252_v4  ;;  %95 = vmatpush.msra.mxu1 %v1257_v5  ;;  %v1320_v15 = vld [vmem:[%s1845_s3 + $0xd8] sm:$0xff]  ;;  %v1325_v16 = vld [vmem:[%s1845_s3 + $0x68] sm:$0xff]  ;;  %v1334_v17 = vld [vmem:[%s1845_s3 + $0xd0] sm:$0xff] }
   0x7   :  { %193 = vmatpush.msra.mxu3 %v1252_v4  ;;  %117 = vmatpush.msra.mxu2 %v1296_v11  ;;  %v1339_v18 = vld [vmem:[%s1845_s3 + $0x10] sm:$0xff]  ;;  %v1344_v19 = vld [vmem:[%s1845_s3 + $0x60] sm:$0xff]  ;;  %v1353_v20 = vld [vmem:[%s1845_s3 + $0xc8] sm:$0xff] }
   0x8   :  { %73 = vmatpush.msra.mxu0 %v1265_v6  ;;  %96 = vmatpush.msra.mxu1 %v1270_v7  ;;  %v1358_v21 = vld [vmem:[%s1845_s3 + $0x8] sm:$0xff]  ;;  %v1363_v22 = vld [vmem:[%s1845_s3 + $0x58] sm:$0xff]  ;;  %v1372_v23 = vld [vmem:[%s1845_s3 + $0xc0] sm:$0xff] }
   0x9   :  { %194 = vmatpush.msra.mxu3 %v1265_v6  ;;  %118 = vmatpush.msra.mxu2 %v1320_v15  ;;  %v1377_v24 = vld [vmem:[%s1845_s3] sm:$0xff]  ;;  %v1382_v25 = vld [vmem:[%s1845_s3 + $0x50] sm:$0xff]  ;;  %v1392_v26 = vld [vmem:[%s1845_s3 + $0xb8] sm:$0xff] }
   0xa   :  { %74 = vmatpush.msra.mxu0 %v1278_v8  ;;  %97 = vmatpush.msra.mxu1 %v1283_v9  ;;  %v1400_v28 = vld [vmem:[%s1845_s3 + $0xb0] sm:$0xff]  ;;  %v1407_v29 = vld [vmem:[%s1845_s3 + $0xa8] sm:$0xff]  ;;  %v1416_v30 = vld [vmem:[%s1845_s3 + $0xa0] sm:$0xff] }
   0xb   :  { %195 = vmatpush.msra.mxu3 %v1278_v8  ;;  %119 = vmatpush.msra.mxu2 %v1334_v17  ;;  %v1490_v31 = vld [vmem:[%s1846_s4] ss:$0 sm:$0xff]  ;;  %v1495_v32 = vld [vmem:[%s1846_s4 + $0x1] ss:$0 sm:$0xff]  ;;  %v1508_v51 = vld [vmem:[%s1846_s4 + $0x2] ss:$0 sm:$0xff] }
   0xc   :  { %75 = vmatpush.msra.mxu0 %v1301_v12  ;;  %98 = vmatpush.msra.mxu1 %v1306_v13  ;;  %v130_v34 = vld [vmem:[%s1847_s0] sm:$0x3] }
   0xd   :  { %196 = vmatpush.msra.mxu3 %v1301_v12  ;;  %120 = vmatpush.msra.mxu2 %v1353_v20  ;;  %v151_v36 = vld [vmem:[%s1848_s1] sm:$0x3] }
   0xe   :  { %76 = vmatpush.msra.mxu0 %v1315_v14  ;;  %99 = vmatpush.msra.mxu1 %v1325_v16 }
   0xf   :  { %197 = vmatpush.msra.mxu3 %v1315_v14  ;;  %121 = vmatpush.msra.mxu2 %v1372_v23 }
  0x10   :  { %77 = vmatpush.msra.mxu0 %v1339_v18  ;;  %100 = vmatpush.msra.mxu1 %v1344_v19 }
  0x11   :  { %198 = vmatpush.msra.mxu3 %v1339_v18  ;;  %122 = vmatpush.msra.mxu2 %v1392_v26 }
  0x12   :  { %78 = vmatpush.msra.mxu0 %v1358_v21  ;;  %101 = vmatpush.msra.mxu1 %v1363_v22 }
  0x13   :  { %199 = vmatpush.msra.mxu3 %v1358_v21  ;;  %123 = vmatpush.msra.mxu2 %v1400_v28 }
  0x14   :  { %79 = vmatpush.msra.mxu0 %v1377_v24  ;;  %102 = vmatpush.msra.mxu1 %v1382_v25 }
  0x15   :  { %80 = vmatmul.f32.vlgmr.msra.gmra.mxu0 %v1196_v27  ;;  %103 = vmatmul.f32.vlgmr.msra.gmra.mxu1 %v1196_v27 }
  0x16   :  { %211 = vmatpush.msrb.mxu0 %v1235_v1  ;;  %231 = vmatpush.msrb.mxu1 %v1288_v10 }
  0x17   :  { %200 = vmatpush.msra.mxu3 %v1377_v24  ;;  %124 = vmatpush.msra.mxu2 %v1407_v29 }
  0x18   :  { %212 = vmatpush.msrb.mxu0 %v1247_v3  ;;  %232 = vmatpush.msrb.mxu1 %v1296_v11 }
  0x19   :  { %329 = vmatpush.msrb.mxu3 %v1235_v1  ;;  %125 = vmatpush.msra.mxu2 %v1416_v30 }
  0x1a   :  { %213 = vmatpush.msrb.mxu0 %v1257_v5  ;;  %233 = vmatpush.msrb.mxu1 %v1320_v15 }
  0x1b   :  { %330 = vmatpush.msrb.mxu3 %v1247_v3  ;;  %126 = vmatmul.f32.vlgmr.msra.gmra.mxu2 %v1196_v27 }
  0x1c   :  { %214 = vmatpush.msrb.mxu0 %v1270_v7  ;;  %234 = vmatpush.msrb.mxu1 %v1334_v17 }
  0x1d   :  { %309 = vmatpush.msrb.mxu2 %v1230_v0  ;;  %331 = vmatpush.msrb.mxu3 %v1257_v5 }
  0x1e   :  { %215 = vmatpush.msrb.mxu0 %v1283_v9  ;;  %235 = vmatpush.msrb.mxu1 %v1353_v20 }
  0x1f   :  { %310 = vmatpush.msrb.mxu2 %v1240_v2  ;;  %332 = vmatpush.msrb.mxu3 %v1270_v7 }
  0x20   :  { %216 = vmatpush.msrb.mxu0 %v1306_v13  ;;  %236 = vmatpush.msrb.mxu1 %v1372_v23 }
  0x21   :  { %311 = vmatpush.msrb.mxu2 %v1252_v4  ;;  %333 = vmatpush.msrb.mxu3 %v1283_v9 }
  0x22   :  { %217 = vmatpush.msrb.mxu0 %v1325_v16  ;;  %237 = vmatpush.msrb.mxu1 %v1392_v26 }
  0x23   :  { %312 = vmatpush.msrb.mxu2 %v1265_v6  ;;  %334 = vmatpush.msrb.mxu3 %v1306_v13 }
  0x24   :  { %218 = vmatpush.msrb.mxu0 %v1344_v19  ;;  %238 = vmatpush.msrb.mxu1 %v1400_v28 }
  0x25   :  { %313 = vmatpush.msrb.mxu2 %v1278_v8  ;;  %335 = vmatpush.msrb.mxu3 %v1325_v16 }
  0x26   :  { %219 = vmatpush.msrb.mxu0 %v1363_v22  ;;  %239 = vmatpush.msrb.mxu1 %v1407_v29 }
  0x27   :  { %314 = vmatpush.msrb.mxu2 %v1301_v12  ;;  %336 = vmatpush.msrb.mxu3 %v1344_v19 }
  0x28   :  { %220 = vmatpush.msrb.mxu0 %v1382_v25  ;;  %240 = vmatpush.msrb.mxu1 %v1416_v30 }
  0x29   :  { %315 = vmatpush.msrb.mxu2 %v1315_v14  ;;  %337 = vmatpush.msrb.mxu3 %v1363_v22 }
  0x2a   :  { %349 = vmatpush.msra.mxu0 %v1288_v10  ;;  %427 = vmatpush.msra.mxu1 %v1230_v0 }
  0x2b   :  { %316 = vmatpush.msrb.mxu2 %v1339_v18  ;;  %338 = vmatpush.msrb.mxu3 %v1382_v25 }
  0x2c   :  { %350 = vmatpush.msra.mxu0 %v1296_v11  ;;  %428 = vmatpush.msra.mxu1 %v1240_v2 }
  0x2d   :  { %317 = vmatpush.msrb.mxu2 %v1358_v21 }
  0x2e   :  { %351 = vmatpush.msra.mxu0 %v1320_v15  ;;  %429 = vmatpush.msra.mxu1 %v1252_v4 }
  0x2f   :  { %318 = vmatpush.msrb.mxu2 %v1377_v24 }
  0x30   :  { %352 = vmatpush.msra.mxu0 %v1334_v17  ;;  %430 = vmatpush.msra.mxu1 %v1265_v6 }
  0x31   :  { %447 = vmatpush.msra.mxu2 %v1235_v1 }
  0x32   :  { %353 = vmatpush.msra.mxu0 %v1353_v20  ;;  %431 = vmatpush.msra.mxu1 %v1278_v8 }
  0x33   :  { %448 = vmatpush.msra.mxu2 %v1247_v3 }
  0x34   :  { %354 = vmatpush.msra.mxu0 %v1372_v23  ;;  %432 = vmatpush.msra.mxu1 %v1301_v12 }
  0x35   :  { %449 = vmatpush.msra.mxu2 %v1257_v5 }
  0x36   :  { %355 = vmatpush.msra.mxu0 %v1392_v26  ;;  %433 = vmatpush.msra.mxu1 %v1315_v14 }
  0x37   :  { %450 = vmatpush.msra.mxu2 %v1270_v7 }
  0x38   :  { %356 = vmatpush.msra.mxu0 %v1400_v28  ;;  %434 = vmatpush.msra.mxu1 %v1339_v18 }
  0x39   :  { %451 = vmatpush.msra.mxu2 %v1283_v9 }
  0x3a   :  { %357 = vmatpush.msra.mxu0 %v1407_v29  ;;  %435 = vmatpush.msra.mxu1 %v1358_v21 }
  0x3b   :  { %452 = vmatpush.msra.mxu2 %v1306_v13 }
  0x3c   :  { %358 = vmatpush.msra.mxu0 %v1416_v30  ;;  %436 = vmatpush.msra.mxu1 %v1377_v24 }
  0x3d   :  { %453 = vmatpush.msra.mxu2 %v1325_v16 }
  0x3f   :  { %454 = vmatpush.msra.mxu2 %v1344_v19 }
  0x41   :  { %455 = vmatpush.msra.mxu2 %v1363_v22 }
  0x43   :  { %456 = vmatpush.msra.mxu2 %v1382_v25 }
  0x92   :  { %v81_v33 = vpop.f32.mrf.mxu0  ;;  %v104_v35 = vpop.f32.mrf.mxu1 }
  0x93   :  { %v82_v37 = vadd.f32 %v1490_v31, %v81_v33  ;;  %v105_v38 = vadd.f32 %v1495_v32, %v104_v35  ;;  %v172_v33 = vld [vmem:[%s1849_s2] sm:$0x3] }
  0x95   :  { %v131_v39 = vadd.f32 %v130_v34, %v82_v37  ;;  %v152_v40 = vadd.f32 %v151_v36, %v105_v38 }
  0x97   :  { %v1034_v41 = vmul.f32 -1.442695, %v131_v39  ;;  %v1035_v42 = vmul.f32 -1.442695, %v152_v40 }
  0x99   :  { %1103 = vpow2.f32 %v1034_v41 }
  0x9a   :  { %1105 = vpow2.f32 %v1035_v42 }
  0x9e   :  { %v127_v54 = vpop.f32.mrf.mxu2 }
  0x9f   :  { %v1104_v43 = vpop.eup %1103  ;;  %v128_v59 = vadd.f32 %v1508_v51, %v127_v54 }
  0xa0   :  { %v1106_v44 = vpop.eup %1105  ;;  %v135_v45 = vadd.f32 1.0, %v1104_v43 }
  0xa1   :  { %v156_v46 = vadd.f32 1.0, %v1106_v44 }
  0xa2   :  { %1107 = vrcp.f32 %v135_v45  ;;  %v147_v55 = vand.u32 2147483648, %v135_v45  ;;  %v145_v57 = vand.u32 2147483647, %v135_v45  ;;  %vm141_vm1 = vweird.f32 %v135_v45 }
  0xa3   :  { %1109 = vrcp.f32 %v156_v46  ;;  %vm162_vm4 = vweird.f32 %v156_v46  ;;  %v168_v34 = vand.u32 2147483648, %v156_v46  ;;  %v166_v36 = vand.u32 2147483647, %v156_v46 }
  0xa4   :  { %v148_v61 = vor.u32 1.1754944e-38, %v147_v55  ;;  %vm146_vm3 = vcmp.eq.f32.partialorder %v145_v57, 8.507059e+37 }
  0xa5   :  { %v169_v39 = vor.u32 1.1754944e-38, %v168_v34  ;;  %vm167_vm7 = vcmp.eq.f32.partialorder %v166_v36, 8.507059e+37 }
  0xa8   :  { %v1108_v47 = vpop.eup %1107 }
  0xa9   :  { %v1110_v48 = vpop.eup %1109  ;;  %v137_v49 = vmul.f32 %v1108_v47, %v135_v45  ;;  %vm142_vm0 = vweird.f32 %v1108_v47 }
  0xaa   :  { %v158_v50 = vmul.f32 %v1110_v48, %v156_v46  ;;  %vm143_vm2 = vmor %vm141_vm1, %vm142_vm0  ;;  %vm163_vm5 = vweird.f32 %v1110_v48 }
  0xab   :  { %v138_v52 = vsub.f32 1.0, %v137_v49  ;;  %vm164_vm6 = vmor %vm162_vm4, %vm163_vm5 }
  0xac   :  { %v159_v53 = vsub.f32 1.0, %v158_v50 }
  0xad   :  { %v139_v56 = vmul.f32 %v1108_v47, %v138_v52 }
  0xae   :  { %v160_v58 = vmul.f32 %v1110_v48, %v159_v53  ;;  %v1039_v53 = vld [vmem:[%s1847_s0 + $0x2] sm:$0x3] }
  0xaf   :  { %v140_v60 = vadd.f32 %v1108_v47, %v139_v56 }
  0xb0   :  { %v161_v27 = vadd.f32 %v1110_v48, %v160_v58 }
  0xb1   :  { %v144_v62 = vsel %vm143_vm2, %v1108_v47, %v140_v60  ;;  %v1041_v47 = vld [vmem:[%s1848_s1 + $0x2] sm:$0x3] }
  0xb2   :  { %v149_v63 = vsel %vm146_vm3, %v148_v61, %v144_v62  ;;  %v165_v38 = vsel %vm164_vm6, %v1110_v48, %v161_v27 }
  0xb3   :  { %v173_v35 = vmul.f32 %v149_v63, %v128_v59  ;;  %v170_v40 = vsel %vm167_vm7, %v169_v39, %v165_v38 }
  0xb4   :  { %v176_v41 = vsub.f32 1.0, %v170_v40  ;;  %v178_v44 = vmul.f32 0.0, %v170_v40 }
  0xb5   :  { %v174_v37 = vadd.f32 %v173_v35, %v172_v33 }
  0xb7   :  { %1111 = vtanh.f32 %v174_v37 }
  0xbd   :  { %v1112_v42 = vpop.eup %1111 }
  0xbe   :  { %v177_v43 = vmul.f32 %v1112_v42, %v176_v41 }
  0xc0   :  { %v1514_v45 = vadd.f32 %v178_v44, %v177_v43 }
  0xc2   :  { %181 = vst.msk [vmem:[%s1850_s5] sm:$0x3] %vm180_vm9, %v1514_v45  ;;  %1036 = vmatmul.msk.f32.vlgmr.msra.gmra.mxu3 %vm60_vm8, %v1514_v45  ;;  %1037 = vmatmul.msk.f32.vlgmr.msrb.gmra.mxu0 %vm60_vm8, %v1514_v45 }
  0xc3   :  { %1038 = vmatmul.msk.f32.vlgmr.msrb.gmra.mxu1 %vm60_vm8, %v1514_v45  ;;  %467 = vmatpush.msra.mxu3 %v1288_v10 }
  0xc4   :  { %545 = vmatpush.msrb.mxu0 %v1230_v0  ;;  %565 = vmatpush.msrb.mxu1 %v1235_v1 }
  0xc5   :  { %468 = vmatpush.msra.mxu3 %v1296_v11 }
  0xc6   :  { %546 = vmatpush.msrb.mxu0 %v1240_v2  ;;  %566 = vmatpush.msrb.mxu1 %v1247_v3 }
  0xc7   :  { %469 = vmatpush.msra.mxu3 %v1320_v15 }
  0xc8   :  { %547 = vmatpush.msrb.mxu0 %v1252_v4  ;;  %567 = vmatpush.msrb.mxu1 %v1257_v5 }
  0xc9   :  { %470 = vmatpush.msra.mxu3 %v1334_v17 }
  0xca   :  { %548 = vmatpush.msrb.mxu0 %v1265_v6  ;;  %568 = vmatpush.msrb.mxu1 %v1270_v7 }
  0xcb   :  { %471 = vmatpush.msra.mxu3 %v1353_v20 }
  0xcc   :  { %549 = vmatpush.msrb.mxu0 %v1278_v8  ;;  %569 = vmatpush.msrb.mxu1 %v1283_v9 }
  0xcd   :  { %472 = vmatpush.msra.mxu3 %v1372_v23 }
  0xce   :  { %550 = vmatpush.msrb.mxu0 %v1301_v12  ;;  %570 = vmatpush.msrb.mxu1 %v1306_v13 }
  0xcf   :  { %473 = vmatpush.msra.mxu3 %v1392_v26 }
  0xd0   :  { %551 = vmatpush.msrb.mxu0 %v1315_v14  ;;  %571 = vmatpush.msrb.mxu1 %v1325_v16 }
  0xd1   :  { %474 = vmatpush.msra.mxu3 %v1400_v28 }
  0xd2   :  { %552 = vmatpush.msrb.mxu0 %v1339_v18  ;;  %572 = vmatpush.msrb.mxu1 %v1344_v19 }
  0xd3   :  { %475 = vmatpush.msra.mxu3 %v1407_v29 }
  0xd4   :  { %553 = vmatpush.msrb.mxu0 %v1358_v21  ;;  %573 = vmatpush.msrb.mxu1 %v1363_v22 }
  0xd5   :  { %476 = vmatpush.msra.mxu3 %v1416_v30 }
  0xd6   :  { %554 = vmatpush.msrb.mxu0 %v1377_v24  ;;  %574 = vmatpush.msrb.mxu1 %v1382_v25 }
 0x13f   :  { %v222_v46 = vpop.f32.mrf.mxu0 }
 0x140   :  { %v223_v48 = vadd.f32 %v1495_v32, %v222_v46  ;;  %v242_v39 = vpop.f32.mrf.mxu1 }
 0x141   :  { %v243_v42 = vadd.f32 %v1508_v51, %v242_v39 }
 0x142   :  { %v269_v49 = vadd.f32 %v1041_v47, %v223_v48  ;;  %v1043_v47 = vld [vmem:[%s1849_s2 + $0x2] sm:$0x3] }
 0x144   :  { %v1042_v50 = vmul.f32 -1.442695, %v269_v49 }
 0x145   :  { %v202_v52 = vpop.f32.mrf.mxu3 }
 0x146   :  { %1113 = vpow2.f32 %v1042_v50  ;;  %v203_v54 = vadd.f32 %v1490_v31, %v202_v52 }
 0x148   :  { %v247_v55 = vadd.f32 %v1039_v53, %v203_v54 }
 0x14a   :  { %v1040_v56 = vmul.f32 -1.442695, %v247_v55 }
 0x14c   :  { %v1114_v57 = vpop.eup %1113  ;;  %1115 = vpow2.f32 %v1040_v56 }
 0x14d   :  { %v273_v58 = vadd.f32 1.0, %v1114_v57 }
 0x14f   :  { %1117 = vrcp.f32 %v273_v58  ;;  %v285_v48 = vand.u32 2147483648, %v273_v58  ;;  %vm279_vm15 = vweird.f32 %v273_v58  ;;  %v283_v50 = vand.u32 2147483647, %v273_v58 }
 0x151   :  { %v286_v54 = vor.u32 1.1754944e-38, %v285_v48  ;;  %vm284_vm1 = vcmp.eq.f32.partialorder %v283_v50, 8.507059e+37 }
 0x152   :  { %v1116_v59 = vpop.eup %1115 }
 0x153   :  { %v251_v60 = vadd.f32 1.0, %v1116_v59 }
 0x155   :  { %1119 = vrcp.f32 %v251_v60  ;;  %v1118_v61 = vpop.eup %1117  ;;  %v263_v35 = vand.u32 2147483648, %v251_v60  ;;  %v261_v37 = vand.u32 2147483647, %v251_v60  ;;  %vm257_vm11 = vweird.f32 %v251_v60 }
 0x156   :  { %v275_v62 = vmul.f32 %v1118_v61, %v273_v58  ;;  %vm280_vm14 = vweird.f32 %v1118_v61  ;;  %v1048_v58 = vld [vmem:[%s1847_s0 + $0x4] sm:$0x3] }
 0x157   :  { %v264_v41 = vor.u32 1.1754944e-38, %v263_v35  ;;  %vm262_vm13 = vcmp.eq.f32.partialorder %v261_v37, 8.507059e+37  ;;  %vm281_vm0 = vmor %vm279_vm15, %vm280_vm14 }
 0x158   :  { %v276_v33 = vsub.f32 1.0, %v275_v62 }
 0x15a   :  { %v277_v38 = vmul.f32 %v1118_v61, %v276_v33 }
 0x15b   :  { %v1120_v63 = vpop.eup %1119 }
 0x15c   :  { %v253_v27 = vmul.f32 %v1120_v63, %v251_v60  ;;  %vm258_vm10 = vweird.f32 %v1120_v63  ;;  %v278_v46 = vadd.f32 %v1118_v61, %v277_v38 }
 0x15d   :  { %vm259_vm12 = vmor %vm257_vm11, %vm258_vm10 }
 0x15e   :  { %v254_v34 = vsub.f32 1.0, %v253_v27  ;;  %v282_v53 = vsel %vm281_vm0, %v1118_v61, %v278_v46 }
 0x15f   :  { %v287_v55 = vsel %vm284_vm1, %v286_v54, %v282_v53 }
 0x160   :  { %v255_v36 = vmul.f32 %v1120_v63, %v254_v34  ;;  %v294_v56 = vsub.f32 1.0, %v287_v55  ;;  %v296_v60 = vmul.f32 %v287_v55, %v1514_v45 }
 0x162   :  { %v256_v40 = vadd.f32 %v1120_v63, %v255_v36 }
 0x164   :  { %v260_v43 = vsel %vm259_vm12, %v1120_v63, %v256_v40  ;;  %v1050_v63 = vld [vmem:[%s1848_s1 + $0x4] sm:$0x3] }
 0x165   :  { %v265_v44 = vsel %vm262_vm13, %v264_v41, %v260_v43 }
 0x166   :  { %v291_v49 = vmul.f32 %v265_v44, %v243_v42 }
 0x168   :  { %v292_v52 = vadd.f32 %v1043_v47, %v291_v49 }
 0x16a   :  { %1121 = vtanh.f32 %v292_v52 }
 0x170   :  { %v1122_v57 = vpop.eup %1121 }
 0x171   :  { %v295_v59 = vmul.f32 %v1122_v57, %v294_v56 }
 0x173   :  { %v1570_v62 = vadd.f32 %v296_v60, %v295_v59 }
 0x175   :  { %1044 = vst.msk [vmem:[%s1850_s5 + $0x2] sm:$0x3] %vm180_vm9, %v1570_v62  ;;  %1045 = vmatmul.msk.f32.vlgmr.msrb.gmra.mxu2 %vm60_vm8, %v1570_v62  ;;  %1046 = vmatmul.msk.f32.vlgmr.msrb.gmra.mxu3 %vm60_vm8, %v1570_v62 }
 0x176   :  { %1047 = vmatmul.msk.f32.vlgmr.msra.gmra.mxu0 %vm60_vm8, %v1570_v62  ;;  %585 = vmatpush.msrb.mxu2 %v1288_v10 }
 0x177   :  { %663 = vmatpush.msrb.mxu3 %v1230_v0  ;;  %683 = vmatpush.msra.mxu0 %v1235_v1 }
 0x178   :  { %586 = vmatpush.msrb.mxu2 %v1296_v11 }
 0x179   :  { %664 = vmatpush.msrb.mxu3 %v1240_v2  ;;  %684 = vmatpush.msra.mxu0 %v1247_v3 }
 0x17a   :  { %587 = vmatpush.msrb.mxu2 %v1320_v15 }
 0x17b   :  { %665 = vmatpush.msrb.mxu3 %v1252_v4  ;;  %685 = vmatpush.msra.mxu0 %v1257_v5 }
 0x17c   :  { %588 = vmatpush.msrb.mxu2 %v1334_v17 }
 0x17d   :  { %666 = vmatpush.msrb.mxu3 %v1265_v6  ;;  %686 = vmatpush.msra.mxu0 %v1270_v7 }
 0x17e   :  { %589 = vmatpush.msrb.mxu2 %v1353_v20 }
 0x17f   :  { %667 = vmatpush.msrb.mxu3 %v1278_v8  ;;  %687 = vmatpush.msra.mxu0 %v1283_v9 }
 0x180   :  { %590 = vmatpush.msrb.mxu2 %v1372_v23 }
 0x181   :  { %668 = vmatpush.msrb.mxu3 %v1301_v12  ;;  %688 = vmatpush.msra.mxu0 %v1306_v13 }
 0x182   :  { %591 = vmatpush.msrb.mxu2 %v1392_v26 }
 0x183   :  { %669 = vmatpush.msrb.mxu3 %v1315_v14  ;;  %689 = vmatpush.msra.mxu0 %v1325_v16 }
 0x184   :  { %592 = vmatpush.msrb.mxu2 %v1400_v28 }
 0x185   :  { %670 = vmatpush.msrb.mxu3 %v1339_v18  ;;  %690 = vmatpush.msra.mxu0 %v1344_v19 }
 0x186   :  { %593 = vmatpush.msrb.mxu2 %v1407_v29 }
 0x187   :  { %671 = vmatpush.msrb.mxu3 %v1358_v21  ;;  %691 = vmatpush.msra.mxu0 %v1363_v22 }
 0x188   :  { %594 = vmatpush.msrb.mxu2 %v1416_v30 }
 0x189   :  { %672 = vmatpush.msrb.mxu3 %v1377_v24  ;;  %692 = vmatpush.msra.mxu0 %v1382_v25 }
 0x1f3   :  { %v360_v53 = vpop.f32.mrf.mxu0 }
 0x1f4   :  { %v361_v57 = vadd.f32 %v1508_v51, %v360_v53 }
 0x1f8   :  { %v320_v45 = vpop.f32.mrf.mxu2  ;;  %v340_v61 = vpop.f32.mrf.mxu3 }
 0x1f9   :  { %v321_v27 = vadd.f32 %v1490_v31, %v320_v45  ;;  %v341_v33 = vadd.f32 %v1495_v32, %v340_v61 }
 0x1fb   :  { %v365_v34 = vadd.f32 %v1048_v58, %v321_v27  ;;  %v387_v35 = vadd.f32 %v1050_v63, %v341_v33  ;;  %v1052_v58 = vld [vmem:[%s1849_s2 + $0x4] sm:$0x3] }
 0x1fd   :  { %v1049_v36 = vmul.f32 -1.442695, %v365_v34  ;;  %v1051_v37 = vmul.f32 -1.442695, %v387_v35 }
 0x1ff   :  { %1123 = vpow2.f32 %v1049_v36 }
 0x200   :  { %1125 = vpow2.f32 %v1051_v37 }
 0x205   :  { %v1124_v38 = vpop.eup %1123 }
 0x206   :  { %v1126_v39 = vpop.eup %1125  ;;  %v369_v40 = vadd.f32 1.0, %v1124_v38 }
 0x207   :  { %v391_v41 = vadd.f32 1.0, %v1126_v39 }
 0x208   :  { %1127 = vrcp.f32 %v369_v40  ;;  %v381_v48 = vand.u32 2147483648, %v369_v40  ;;  %v379_v52 = vand.u32 2147483647, %v369_v40  ;;  %vm375_vm3 = vweird.f32 %v369_v40 }
 0x209   :  { %1129 = vrcp.f32 %v391_v41  ;;  %v403_v63 = vand.u32 2147483648, %v391_v41  ;;  %vm397_vm7 = vweird.f32 %v391_v41  ;;  %v401_v27 = vand.u32 2147483647, %v391_v41 }
 0x20a   :  { %v382_v56 = vor.u32 1.1754944e-38, %v381_v48  ;;  %vm380_vm5 = vcmp.eq.f32.partialorder %v379_v52, 8.507059e+37  ;;  %v1059_v48 = vld [vmem:[%s1848_s1 + $0x6] sm:$0x3] }
 0x20b   :  { %v404_v35 = vor.u32 1.1754944e-38, %v403_v63  ;;  %vm402_vm11 = vcmp.eq.f32.partialorder %v401_v27, 8.507059e+37 }
 0x20e   :  { %v1128_v42 = vpop.eup %1127 }
 0x20f   :  { %v1130_v43 = vpop.eup %1129  ;;  %v371_v44 = vmul.f32 %v1128_v42, %v369_v40  ;;  %vm376_vm2 = vweird.f32 %v1128_v42 }
 0x210   :  { %v393_v46 = vmul.f32 %v1130_v43, %v391_v41  ;;  %vm377_vm4 = vmor %vm375_vm3, %vm376_vm2  ;;  %vm398_vm6 = vweird.f32 %v1130_v43  ;;  %v1057_v41 = vld [vmem:[%s1847_s0 + $0x6] sm:$0x3] }
 0x211   :  { %v372_v47 = vsub.f32 1.0, %v371_v44  ;;  %vm399_vm10 = vmor %vm397_vm7, %vm398_vm6 }
 0x212   :  { %v394_v49 = vsub.f32 1.0, %v393_v46 }
 0x213   :  { %v373_v50 = vmul.f32 %v1128_v42, %v372_v47 }
 0x214   :  { %v395_v54 = vmul.f32 %v1130_v43, %v394_v49 }
 0x215   :  { %v374_v55 = vadd.f32 %v1128_v42, %v373_v50 }
 0x216   :  { %v396_v45 = vadd.f32 %v1130_v43, %v395_v54 }
 0x217   :  { %v378_v59 = vsel %vm377_vm4, %v1128_v42, %v374_v55 }
 0x218   :  { %v383_v60 = vsel %vm380_vm5, %v382_v56, %v378_v59  ;;  %v400_v34 = vsel %vm399_vm10, %v1130_v43, %v396_v45 }
 0x219   :  { %v409_v61 = vmul.f32 %v383_v60, %v361_v57  ;;  %v405_v36 = vsel %vm402_vm11, %v404_v35, %v400_v34 }
 0x21a   :  { %v412_v37 = vsub.f32 1.0, %v405_v36  ;;  %v414_v40 = vmul.f32 %v405_v36, %v1570_v62 }
 0x21b   :  { %v410_v33 = vadd.f32 %v1052_v58, %v409_v61 }
 0x21d   :  { %1131 = vtanh.f32 %v410_v33 }
 0x223   :  { %v1132_v38 = vpop.eup %1131 }
 0x224   :  { %v413_v39 = vmul.f32 %v1132_v38, %v412_v37 }
 0x226   :  { %v1626_v42 = vadd.f32 %v414_v40, %v413_v39  ;;  %v1061_v40 = vld [vmem:[%s1849_s2 + $0x6] sm:$0x3] }
 0x228   :  { %1053 = vst.msk [vmem:[%s1850_s5 + $0x4] sm:$0x3] %vm180_vm9, %v1626_v42  ;;  %1054 = vmatmul.msk.f32.vlgmr.msra.gmra.mxu1 %vm60_vm8, %v1626_v42  ;;  %1055 = vmatmul.msk.f32.vlgmr.msra.gmra.mxu2 %vm60_vm8, %v1626_v42 }
 0x229   :  { %1056 = vmatmul.msk.f32.vlgmr.msra.gmra.mxu3 %vm60_vm8, %v1626_v42  ;;  %703 = vmatpush.msra.mxu1 %v1288_v10 }
 0x22a   :  { %781 = vmatpush.msra.mxu2 %v1230_v0  ;;  %801 = vmatpush.msra.mxu3 %v1235_v1 }
 0x22b   :  { %704 = vmatpush.msra.mxu1 %v1296_v11 }
 0x22c   :  { %782 = vmatpush.msra.mxu2 %v1240_v2  ;;  %802 = vmatpush.msra.mxu3 %v1247_v3 }
 0x22d   :  { %705 = vmatpush.msra.mxu1 %v1320_v15 }
 0x22e   :  { %783 = vmatpush.msra.mxu2 %v1252_v4  ;;  %803 = vmatpush.msra.mxu3 %v1257_v5 }
 0x22f   :  { %706 = vmatpush.msra.mxu1 %v1334_v17 }
 0x230   :  { %784 = vmatpush.msra.mxu2 %v1265_v6  ;;  %804 = vmatpush.msra.mxu3 %v1270_v7 }
 0x231   :  { %707 = vmatpush.msra.mxu1 %v1353_v20 }
 0x232   :  { %785 = vmatpush.msra.mxu2 %v1278_v8  ;;  %805 = vmatpush.msra.mxu3 %v1283_v9 }
 0x233   :  { %708 = vmatpush.msra.mxu1 %v1372_v23 }
 0x234   :  { %786 = vmatpush.msra.mxu2 %v1301_v12  ;;  %806 = vmatpush.msra.mxu3 %v1306_v13 }
 0x235   :  { %709 = vmatpush.msra.mxu1 %v1392_v26 }
 0x236   :  { %787 = vmatpush.msra.mxu2 %v1315_v14  ;;  %807 = vmatpush.msra.mxu3 %v1325_v16 }
 0x237   :  { %710 = vmatpush.msra.mxu1 %v1400_v28 }
 0x238   :  { %788 = vmatpush.msra.mxu2 %v1339_v18  ;;  %808 = vmatpush.msra.mxu3 %v1344_v19 }
 0x239   :  { %711 = vmatpush.msra.mxu1 %v1407_v29 }
 0x23a   :  { %789 = vmatpush.msra.mxu2 %v1358_v21  ;;  %809 = vmatpush.msra.mxu3 %v1363_v22 }
 0x23b   :  { %712 = vmatpush.msra.mxu1 %v1416_v30 }
 0x23c   :  { %790 = vmatpush.msra.mxu2 %v1377_v24  ;;  %810 = vmatpush.msra.mxu3 %v1382_v25 }
 0x2a5   :  { %v438_v62 = vpop.f32.mrf.mxu1 }
 0x2a6   :  { %v439_v43 = vadd.f32 %v1490_v31, %v438_v62 }
 0x2a8   :  { %v483_v44 = vadd.f32 %v1057_v41, %v439_v43 }
 0x2aa   :  { %v1058_v46 = vmul.f32 -1.442695, %v483_v44 }
 0x2ab   :  { %v458_v47 = vpop.f32.mrf.mxu2 }
 0x2ac   :  { %1133 = vpow2.f32 %v1058_v46  ;;  %v459_v49 = vadd.f32 %v1495_v32, %v458_v47  ;;  %v478_v27 = vpop.f32.mrf.mxu3 }
 0x2ad   :  { %v479_v37 = vadd.f32 %v1508_v51, %v478_v27 }
 0x2ae   :  { %v505_v50 = vadd.f32 %v1059_v48, %v459_v49 }
 0x2b0   :  { %v1060_v52 = vmul.f32 -1.442695, %v505_v50 }
 0x2b2   :  { %v1134_v53 = vpop.eup %1133  ;;  %1135 = vpow2.f32 %v1060_v52 }
 0x2b3   :  { %v487_v54 = vadd.f32 1.0, %v1134_v53 }
 0x2b5   :  { %1137 = vrcp.f32 %v487_v54  ;;  %v499_v45 = vand.u32 2147483648, %v487_v54  ;;  %v497_v61 = vand.u32 2147483647, %v487_v54  ;;  %vm493_vm13 = vweird.f32 %v487_v54 }
 0x2b7   :  { %v500_v35 = vor.u32 1.1754944e-38, %v499_v45  ;;  %vm498_vm15 = vcmp.eq.f32.partialorder %v497_v61, 8.507059e+37 }
 0x2b8   :  { %v1136_v55 = vpop.eup %1135 }
 0x2b9   :  { %v509_v56 = vadd.f32 1.0, %v1136_v55 }
 0x2bb   :  { %v1138_v57 = vpop.eup %1137  ;;  %1139 = vrcp.f32 %v509_v56  ;;  %v521_v41 = vand.u32 2147483648, %v509_v56  ;;  %v519_v44 = vand.u32 2147483647, %v509_v56  ;;  %vm515_vm1 = vweird.f32 %v509_v56 }
 0x2bc   :  { %v489_v59 = vmul.f32 %v1138_v57, %v487_v54  ;;  %vm494_vm12 = vweird.f32 %v1138_v57 }
 0x2bd   :  { %vm495_vm14 = vmor %vm493_vm13, %vm494_vm12  ;;  %v522_v48 = vor.u32 1.1754944e-38, %v521_v41  ;;  %vm520_vm3 = vcmp.eq.f32.partialorder %v519_v44, 8.507059e+37  ;;  %v1187_v41 = vld [vmem:[%s1845_s3 + $0xc8] sm:$0xff]  ;;  %v1189_v44 = vld [vmem:[%s1845_s3 + $0xb8] sm:$0xff] }
 0x2be   :  { %v490_v60 = vsub.f32 1.0, %v489_v59 }
 0x2c0   :  { %v491_v58 = vmul.f32 %v1138_v57, %v490_v60 }
 0x2c1   :  { %v1140_v63 = vpop.eup %1139 }
 0x2c2   :  { %v511_v33 = vmul.f32 %v1140_v63, %v509_v56  ;;  %v492_v34 = vadd.f32 %v1138_v57, %v491_v58  ;;  %vm516_vm0 = vweird.f32 %v1140_v63  ;;  %v1070_v56 = vld [vmem:[%s1849_s2 + $0x8] sm:$0x3] }
 0x2c3   :  { %vm517_vm2 = vmor %vm515_vm1, %vm516_vm0 }
 0x2c4   :  { %v512_v36 = vsub.f32 1.0, %v511_v33  ;;  %v496_v38 = vsel %vm495_vm14, %v1138_v57, %v492_v34 }
 0x2c5   :  { %v501_v39 = vsel %vm498_vm15, %v500_v35, %v496_v38  ;;  %v1183_v38 = vld [vmem:[%s1845_s3 + $0xe8] sm:$0xff] }
 0x2c6   :  { %v513_v62 = vmul.f32 %v1140_v63, %v512_v36  ;;  %v527_v43 = vmul.f32 %v501_v39, %v479_v37  ;;  %v1184_v39 = vld [vmem:[%s1845_s3 + $0xe0] sm:$0xff] }
 0x2c8   :  { %v514_v46 = vadd.f32 %v1140_v63, %v513_v62  ;;  %v528_v47 = vadd.f32 %v1061_v40, %v527_v43  ;;  %v1185_v40 = vld [vmem:[%s1845_s3 + $0xd8] sm:$0xff]  ;;  %v1186_v62 = vld [vmem:[%s1845_s3 + $0xd0] sm:$0xff]  ;;  %v1188_v43 = vld [vmem:[%s1845_s3 + $0xc0] sm:$0xff] }
 0x2ca   :  { %v518_v49 = vsel %vm517_vm2, %v1140_v63, %v514_v46  ;;  %1141 = vtanh.f32 %v528_v47  ;;  %v1190_v46 = vld [vmem:[%s1845_s3 + $0xb0] sm:$0xff]  ;;  %v1191_v47 = vld [vmem:[%s1845_s3 + $0xa8] sm:$0xff] }
 0x2cb   :  { %v523_v50 = vsel %vm520_vm3, %v522_v48, %v518_v49  ;;  %v1192_v48 = vld [vmem:[%s1845_s3 + $0xa0] sm:$0xff] }
 0x2cc   :  { %v530_v52 = vsub.f32 1.0, %v523_v50  ;;  %v532_v55 = vmul.f32 %v523_v50, %v1626_v42  ;;  %v1077_v50 = vld [vmem:[%s1848_s1 + $0xa] sm:$0x3] }
 0x2d0   :  { %v1142_v53 = vpop.eup %1141 }
 0x2d1   :  { %v531_v54 = vmul.f32 %v1142_v53, %v530_v52 }
 0x2d3   :  { %v1682_v57 = vadd.f32 %v532_v55, %v531_v54 }
 0x2d5   :  { %1062 = vst.msk [vmem:[%s1850_s5 + $0x6] sm:$0x3] %vm180_vm9, %v1682_v57  ;;  %1063 = vmatmul.msk.f32.vlgmr.msrb.gmra.mxu0 %vm60_vm8, %v1682_v57  ;;  %1064 = vmatmul.msk.f32.vlgmr.msrb.gmra.mxu1 %vm60_vm8, %v1682_v57 }
 0x2d6   :  { %1065 = vmatmul.msk.f32.vlgmr.msrb.gmra.mxu2 %vm60_vm8, %v1682_v57  ;;  %821 = vmatpush.msrb.mxu0 %v1288_v10 }
 0x2d7   :  { %899 = vmatpush.msrb.mxu1 %v1230_v0  ;;  %919 = vmatpush.msrb.mxu2 %v1235_v1  ;;  %v1066_v1 = vld [vmem:[%s1847_s0 + $0x8] sm:$0x3] }
 0x2d8   :  { %822 = vmatpush.msrb.mxu0 %v1296_v11 }
 0x2d9   :  { %900 = vmatpush.msrb.mxu1 %v1240_v2  ;;  %920 = vmatpush.msrb.mxu2 %v1247_v3  ;;  %v1068_v3 = vld [vmem:[%s1848_s1 + $0x8] sm:$0x3] }
 0x2da   :  { %823 = vmatpush.msrb.mxu0 %v1320_v15 }
 0x2db   :  { %901 = vmatpush.msrb.mxu1 %v1252_v4  ;;  %921 = vmatpush.msrb.mxu2 %v1257_v5 }
 0x2dc   :  { %824 = vmatpush.msrb.mxu0 %v1334_v17 }
 0x2dd   :  { %902 = vmatpush.msrb.mxu1 %v1265_v6  ;;  %922 = vmatpush.msrb.mxu2 %v1270_v7 }
 0x2de   :  { %825 = vmatpush.msrb.mxu0 %v1353_v20 }
 0x2df   :  { %903 = vmatpush.msrb.mxu1 %v1278_v8  ;;  %923 = vmatpush.msrb.mxu2 %v1283_v9 }
 0x2e0   :  { %826 = vmatpush.msrb.mxu0 %v1372_v23 }
 0x2e1   :  { %904 = vmatpush.msrb.mxu1 %v1301_v12  ;;  %924 = vmatpush.msrb.mxu2 %v1306_v13 }
 0x2e2   :  { %827 = vmatpush.msrb.mxu0 %v1392_v26 }
 0x2e3   :  { %905 = vmatpush.msrb.mxu1 %v1315_v14  ;;  %925 = vmatpush.msrb.mxu2 %v1325_v16 }
 0x2e4   :  { %828 = vmatpush.msrb.mxu0 %v1400_v28 }
 0x2e5   :  { %906 = vmatpush.msrb.mxu1 %v1339_v18  ;;  %926 = vmatpush.msrb.mxu2 %v1344_v19 }
 0x2e6   :  { %829 = vmatpush.msrb.mxu0 %v1407_v29 }
 0x2e7   :  { %907 = vmatpush.msrb.mxu1 %v1358_v21  ;;  %927 = vmatpush.msrb.mxu2 %v1363_v22 }
 0x2e8   :  { %830 = vmatpush.msrb.mxu0 %v1416_v30 }
 0x2e9   :  { %908 = vmatpush.msrb.mxu1 %v1377_v24  ;;  %928 = vmatpush.msrb.mxu2 %v1382_v25 }
 0x352   :  { %v556_v0 = vpop.f32.mrf.mxu0  ;;  %v576_v2 = vpop.f32.mrf.mxu1 }
 0x353   :  { %v557_v4 = vadd.f32 %v1490_v31, %v556_v0  ;;  %v577_v5 = vadd.f32 %v1495_v32, %v576_v2 }
 0x355   :  { %v601_v6 = vadd.f32 %v1066_v1, %v557_v4  ;;  %v623_v7 = vadd.f32 %v1068_v3, %v577_v5 }
 0x357   :  { %v1067_v8 = vmul.f32 -1.442695, %v601_v6  ;;  %v1069_v9 = vmul.f32 -1.442695, %v623_v7 }
 0x359   :  { %1143 = vpow2.f32 %v1067_v8  ;;  %v596_v24 = vpop.f32.mrf.mxu2 }
 0x35a   :  { %1145 = vpow2.f32 %v1069_v9  ;;  %v597_v28 = vadd.f32 %v1508_v51, %v596_v24  ;;  %v1079_v24 = vld [vmem:[%s1849_s2 + $0xa] sm:$0x3] }
 0x35f   :  { %v1144_v10 = vpop.eup %1143 }
 0x360   :  { %v1146_v11 = vpop.eup %1145  ;;  %v605_v12 = vadd.f32 1.0, %v1144_v10 }
 0x361   :  { %v627_v13 = vadd.f32 1.0, %v1146_v11 }
 0x362   :  { %1147 = vrcp.f32 %v605_v12  ;;  %v617_v20 = vand.u32 2147483648, %v605_v12  ;;  %v615_v22 = vand.u32 2147483647, %v605_v12  ;;  %vm611_vm5 = vweird.f32 %v605_v12 }
 0x363   :  { %1149 = vrcp.f32 %v627_v13  ;;  %v639_v59 = vand.u32 2147483648, %v627_v13  ;;  %vm633_vm11 = vweird.f32 %v627_v13  ;;  %v637_v45 = vand.u32 2147483647, %v627_v13 }
 0x364   :  { %v618_v26 = vor.u32 1.1754944e-38, %v617_v20  ;;  %vm616_vm7 = vcmp.eq.f32.partialorder %v615_v22, 8.507059e+37 }
 0x365   :  { %v640_v63 = vor.u32 1.1754944e-38, %v639_v59  ;;  %vm638_vm13 = vcmp.eq.f32.partialorder %v637_v45, 8.507059e+37 }
 0x368   :  { %v1148_v14 = vpop.eup %1147 }
 0x369   :  { %v1150_v15 = vpop.eup %1149  ;;  %v607_v16 = vmul.f32 %v1148_v14, %v605_v12  ;;  %vm612_vm4 = vweird.f32 %v1148_v14 }
 0x36a   :  { %v629_v17 = vmul.f32 %v1150_v15, %v627_v13  ;;  %vm613_vm6 = vmor %vm611_vm5, %vm612_vm4  ;;  %vm634_vm10 = vweird.f32 %v1150_v15 }
 0x36b   :  { %v608_v18 = vsub.f32 1.0, %v607_v16  ;;  %vm635_vm12 = vmor %vm633_vm11, %vm634_vm10 }
 0x36c   :  { %v630_v19 = vsub.f32 1.0, %v629_v17 }
 0x36d   :  { %v609_v21 = vmul.f32 %v1148_v14, %v608_v18 }
 0x36e   :  { %v631_v23 = vmul.f32 %v1150_v15, %v630_v19 }
 0x36f   :  { %v610_v25 = vadd.f32 %v1148_v14, %v609_v21 }
 0x370   :  { %v632_v42 = vadd.f32 %v1150_v15, %v631_v23 }
 0x371   :  { %v614_v29 = vsel %vm613_vm6, %v1148_v14, %v610_v25 }
 0x372   :  { %v619_v30 = vsel %vm616_vm7, %v618_v26, %v614_v29  ;;  %v636_v61 = vsel %vm635_vm12, %v1150_v15, %v632_v42 }
 0x373   :  { %v645_v60 = vmul.f32 %v619_v30, %v597_v28  ;;  %v641_v27 = vsel %vm638_vm13, %v640_v63, %v636_v61  ;;  %v1084_v63 = vld [vmem:[%s1847_s0 + $0xc] sm:$0x3] }
 0x374   :  { %v648_v33 = vsub.f32 1.0, %v641_v27  ;;  %v650_v36 = vmul.f32 %v641_v27, %v1682_v57  ;;  %v1075_v57 = vld [vmem:[%s1847_s0 + $0xa] sm:$0x3] }
 0x375   :  { %v646_v58 = vadd.f32 %v1070_v56, %v645_v60 }
 0x377   :  { %1151 = vtanh.f32 %v646_v58 }
 0x37d   :  { %v1152_v34 = vpop.eup %1151 }
 0x37e   :  { %v649_v35 = vmul.f32 %v1152_v34, %v648_v33  ;;  %v1086_v33 = vld [vmem:[%s1848_s1 + $0xc] sm:$0x3] }
 0x380   :  { %v1738_v37 = vadd.f32 %v650_v36, %v649_v35 }
 0x382   :  { %1071 = vst.msk [vmem:[%s1850_s5 + $0x8] sm:$0x3] %vm180_vm9, %v1738_v37  ;;  %1072 = vmatmul.msk.f32.vlgmr.msrb.gmra.mxu3 %vm60_vm8, %v1738_v37  ;;  %1073 = vmatmul.msk.f32.vlgmr.msra.gmra.mxu0 %vm60_vm8, %v1738_v37 }
 0x383   :  { %1074 = vmatmul.msk.f32.vlgmr.msra.gmra.mxu1 %vm60_vm8, %v1738_v37  ;;  %939 = vmatpush.msrb.mxu3 %v1183_v38 }
 0x385   :  { %940 = vmatpush.msrb.mxu3 %v1184_v39 }
 0x387   :  { %941 = vmatpush.msrb.mxu3 %v1185_v40 }
 0x389   :  { %942 = vmatpush.msrb.mxu3 %v1186_v62 }
 0x38b   :  { %943 = vmatpush.msrb.mxu3 %v1187_v41 }
 0x38d   :  { %944 = vmatpush.msrb.mxu3 %v1188_v43 }
 0x38f   :  { %945 = vmatpush.msrb.mxu3 %v1189_v44 }
 0x391   :  { %946 = vmatpush.msrb.mxu3 %v1190_v46 }
 0x393   :  { %947 = vmatpush.msrb.mxu3 %v1191_v47 }
 0x395   :  { %948 = vmatpush.msrb.mxu3 %v1192_v48 }
 0x3ff   :  { %v694_v49 = vpop.f32.mrf.mxu0 }
 0x400   :  { %v695_v52 = vadd.f32 %v1495_v32, %v694_v49  ;;  %v714_v17 = vpop.f32.mrf.mxu1 }
 0x401   :  { %v715_v20 = vadd.f32 %v1508_v51, %v714_v17 }
 0x402   :  { %v741_v53 = vadd.f32 %v1077_v50, %v695_v52 }
 0x404   :  { %v1078_v54 = vmul.f32 -1.442695, %v741_v53 }
 0x405   :  { %v674_v55 = vpop.f32.mrf.mxu3 }
 0x406   :  { %1153 = vpow2.f32 %v1078_v54  ;;  %v675_v0 = vadd.f32 %v1490_v31, %v674_v55 }
 0x408   :  { %v719_v1 = vadd.f32 %v1075_v57, %v675_v0  ;;  %v1812_v0 = vld [vmem:[%s1846_s4 + $0x2] ss:$0 sm:$0xff] }
 0x40a   :  { %v1076_v2 = vmul.f32 -1.442695, %v719_v1 }
 0x40c   :  { %v1154_v3 = vpop.eup %1153  ;;  %1155 = vpow2.f32 %v1076_v2 }
 0x40d   :  { %v745_v4 = vadd.f32 1.0, %v1154_v3 }
 0x40f   :  { %1157 = vrcp.f32 %v745_v4  ;;  %v757_v25 = vand.u32 2147483648, %v745_v4  ;;  %vm751_vm3 = vweird.f32 %v745_v4  ;;  %v755_v28 = vand.u32 2147483647, %v745_v4 }
 0x411   :  { %v758_v42 = vor.u32 1.1754944e-38, %v757_v25  ;;  %vm756_vm5 = vcmp.eq.f32.partialorder %v755_v28, 8.507059e+37  ;;  %v1095_v25 = vld [vmem:[%s1848_s1 + $0xe] sm:$0x3] }
 0x412   :  { %v1156_v5 = vpop.eup %1155 }
 0x413   :  { %v723_v6 = vadd.f32 1.0, %v1156_v5  ;;  %v1088_v5 = vld [vmem:[%s1849_s2 + $0xc] sm:$0x3] }
 0x415   :  { %1159 = vrcp.f32 %v723_v6  ;;  %v1158_v7 = vpop.eup %1157  ;;  %v735_v13 = vand.u32 2147483648, %v723_v6  ;;  %v733_v15 = vand.u32 2147483647, %v723_v6  ;;  %vm729_vm15 = vweird.f32 %v723_v6 }
 0x416   :  { %v747_v8 = vmul.f32 %v1158_v7, %v745_v4  ;;  %vm752_vm2 = vweird.f32 %v1158_v7 }
 0x417   :  { %v736_v19 = vor.u32 1.1754944e-38, %v735_v13  ;;  %vm734_vm1 = vcmp.eq.f32.partialorder %v733_v15, 8.507059e+37  ;;  %vm753_vm4 = vmor %vm751_vm3, %vm752_vm2 }
 0x418   :  { %v748_v11 = vsub.f32 1.0, %v747_v8 }
 0x41a   :  { %v749_v16 = vmul.f32 %v1158_v7, %v748_v11 }
 0x41b   :  { %v1160_v9 = vpop.eup %1159 }
 0x41c   :  { %v725_v10 = vmul.f32 %v1160_v9, %v723_v6  ;;  %vm730_vm14 = vweird.f32 %v1160_v9  ;;  %v750_v23 = vadd.f32 %v1158_v7, %v749_v16 }
 0x41d   :  { %vm731_vm0 = vmor %vm729_vm15, %vm730_vm14 }
 0x41e   :  { %v726_v12 = vsub.f32 1.0, %v725_v10  ;;  %v754_v30 = vsel %vm753_vm4, %v1158_v7, %v750_v23 }
 0x41f   :  { %v759_v51 = vsel %vm756_vm5, %v758_v42, %v754_v30 }
 0x420   :  { %v727_v14 = vmul.f32 %v1160_v9, %v726_v12  ;;  %v766_v56 = vsub.f32 1.0, %v759_v51  ;;  %v768_v45 = vmul.f32 %v759_v51, %v1738_v37 }
 0x422   :  { %v728_v18 = vadd.f32 %v1160_v9, %v727_v14 }
 0x424   :  { %v732_v21 = vsel %vm731_vm0, %v1160_v9, %v728_v18 }
 0x425   :  { %v737_v22 = vsel %vm734_vm1, %v736_v19, %v732_v21  ;;  %v1093_v19 = vld [vmem:[%s1847_s0 + $0xe] sm:$0x3] }
 0x426   :  { %v763_v26 = vmul.f32 %v737_v22, %v715_v20  ;;  %v1194_v20 = vld [vmem:[%s1846_s4] ss:$0 sm:$0xff] }
 0x428   :  { %v764_v29 = vadd.f32 %v1079_v24, %v763_v26  ;;  %v1195_v26 = vld [vmem:[%s1846_s4 + $0x1] ss:$0 sm:$0xff] }
 0x42a   :  { %1161 = vtanh.f32 %v764_v29 }
 0x430   :  { %v1162_v59 = vpop.eup %1161 }
 0x431   :  { %v767_v60 = vmul.f32 %v1162_v59, %v766_v56 }
 0x433   :  { %v769_v58 = vadd.f32 %v768_v45, %v767_v60 }
 0x435   :  { %1080 = vst.msk [vmem:[%s1850_s5 + $0xa] sm:$0x3] %vm180_vm9, %v769_v58  ;;  %1081 = vmatmul.msk.f32.vlgmr.msra.gmra.mxu2 %vm60_vm8, %v769_v58  ;;  %1082 = vmatmul.msk.f32.vlgmr.msra.gmra.mxu3 %vm60_vm8, %v769_v58 }
 0x436   :  { %1083 = vmatmul.msk.f32.vlgmr.msrb.gmra.mxu0 %vm60_vm8, %v769_v58 }
 0x4b3   :  { %v832_v53 = vpop.f32.mrf.mxu0 }
 0x4b4   :  { %v833_v1 = vadd.f32 %v1812_v0, %v832_v53 }
 0x4b8   :  { %v792_v61 = vpop.f32.mrf.mxu2  ;;  %v812_v27 = vpop.f32.mrf.mxu3 }
 0x4b9   :  { %v793_v34 = vadd.f32 %v1490_v31, %v792_v61  ;;  %v813_v35 = vadd.f32 %v1495_v32, %v812_v27 }
 0x4bb   :  { %v837_v36 = vadd.f32 %v1084_v63, %v793_v34  ;;  %v859_v37 = vadd.f32 %v1086_v33, %v813_v35 }
 0x4bd   :  { %v1085_v38 = vmul.f32 -1.442695, %v837_v36  ;;  %v1087_v39 = vmul.f32 -1.442695, %v859_v37 }
 0x4bf   :  { %1163 = vpow2.f32 %v1085_v38 }
 0x4c0   :  { %1165 = vpow2.f32 %v1087_v39 }
 0x4c5   :  { %v1164_v40 = vpop.eup %1163 }
 0x4c6   :  { %v1166_v62 = vpop.eup %1165  ;;  %v841_v41 = vadd.f32 1.0, %v1164_v40 }
 0x4c7   :  { %v863_v43 = vadd.f32 1.0, %v1166_v62 }
 0x4c8   :  { %1167 = vrcp.f32 %v841_v41  ;;  %v853_v31 = vand.u32 2147483648, %v841_v41  ;;  %v851_v52 = vand.u32 2147483647, %v841_v41  ;;  %vm847_vm7 = vweird.f32 %v841_v41 }
 0x4c9   :  { %1169 = vrcp.f32 %v863_v43  ;;  %v875_v7 = vand.u32 2147483648, %v863_v43  ;;  %vm869_vm13 = vweird.f32 %v863_v43  ;;  %v873_v8 = vand.u32 2147483647, %v863_v43 }
 0x4ca   :  { %v854_v57 = vor.u32 1.1754944e-38, %v853_v31  ;;  %vm852_vm11 = vcmp.eq.f32.partialorder %v851_v52, 8.507059e+37 }
 0x4cb   :  { %v876_v11 = vor.u32 1.1754944e-38, %v875_v7  ;;  %vm874_vm15 = vcmp.eq.f32.partialorder %v873_v8, 8.507059e+37 }
 0x4ce   :  { %v1168_v44 = vpop.eup %1167 }
 0x4cf   :  { %v1170_v46 = vpop.eup %1169  ;;  %v843_v47 = vmul.f32 %v1168_v44, %v841_v41  ;;  %vm848_vm6 = vweird.f32 %v1168_v44  ;;  %v1097_v41 = vld [vmem:[%s1849_s2 + $0xe] sm:$0x3] }
 0x4d0   :  { %v865_v48 = vmul.f32 %v1170_v46, %v863_v43  ;;  %vm849_vm10 = vmor %vm847_vm7, %vm848_vm6  ;;  %vm870_vm12 = vweird.f32 %v1170_v46 }
 0x4d1   :  { %v844_v49 = vsub.f32 1.0, %v843_v47  ;;  %vm871_vm14 = vmor %vm869_vm13, %vm870_vm12 }
 0x4d2   :  { %v866_v50 = vsub.f32 1.0, %v865_v48 }
 0x4d3   :  { %v845_v32 = vmul.f32 %v1168_v44, %v844_v49 }
 0x4d4   :  { %v867_v54 = vmul.f32 %v1170_v46, %v866_v50 }
 0x4d5   :  { %v846_v55 = vadd.f32 %v1168_v44, %v845_v32 }
 0x4d6   :  { %v868_v4 = vadd.f32 %v1170_v46, %v867_v54 }
 0x4d7   :  { %v850_v2 = vsel %vm849_vm10, %v1168_v44, %v846_v55 }
 0x4d8   :  { %v855_v3 = vsel %vm852_vm11, %v854_v57, %v850_v2  ;;  %v872_v10 = vsel %vm871_vm14, %v1170_v46, %v868_v4 }
 0x4d9   :  { %v881_v6 = vmul.f32 %v855_v3, %v833_v1  ;;  %v877_v12 = vsel %vm874_vm15, %v876_v11, %v872_v10 }
 0x4da   :  { %v884_v13 = vsub.f32 1.0, %v877_v12  ;;  %v886_v16 = vmul.f32 %v877_v12, %v769_v58 }
 0x4db   :  { %v882_v9 = vadd.f32 %v1088_v5, %v881_v6 }
 0x4dd   :  { %1171 = vtanh.f32 %v882_v9 }
 0x4e3   :  { %v1172_v14 = vpop.eup %1171 }
 0x4e4   :  { %v885_v15 = vmul.f32 %v1172_v14, %v884_v13 }
 0x4e6   :  { %v887_v17 = vadd.f32 %v886_v16, %v885_v15 }
 0x4e8   :  { %1089 = vst.msk [vmem:[%s1850_s5 + $0xc] sm:$0x3] %vm180_vm9, %v887_v17  ;;  %1090 = vmatmul.msk.f32.vlgmr.msrb.gmra.mxu1 %vm60_vm8, %v887_v17  ;;  %1091 = vmatmul.msk.f32.vlgmr.msrb.gmra.mxu2 %vm60_vm8, %v887_v17 }
 0x4e9   :  { %1092 = vmatmul.msk.f32.vlgmr.msrb.gmra.mxu3 %vm60_vm8, %v887_v17 }
 0x565   :  { %v910_v18 = vpop.f32.mrf.mxu1 }
 0x566   :  { %v911_v21 = vadd.f32 %v1194_v20, %v910_v18 }
 0x568   :  { %v955_v22 = vadd.f32 %v1093_v19, %v911_v21 }
 0x56a   :  { %v1094_v23 = vmul.f32 -1.442695, %v955_v22 }
 0x56b   :  { %v930_v24 = vpop.f32.mrf.mxu2 }
 0x56c   :  { %1173 = vpow2.f32 %v1094_v23  ;;  %v931_v28 = vadd.f32 %v1195_v26, %v930_v24  ;;  %v950_v34 = vpop.f32.mrf.mxu3 }
 0x56d   :  { %v951_v39 = vadd.f32 %v1812_v0, %v950_v34 }
 0x56e   :  { %v977_v29 = vadd.f32 %v1095_v25, %v931_v28 }
 0x570   :  { %v1096_v30 = vmul.f32 -1.442695, %v977_v29 }
 0x572   :  { %v1174_v42 = vpop.eup %1173  ;;  %1175 = vpow2.f32 %v1096_v30 }
 0x573   :  { %v959_v51 = vadd.f32 1.0, %v1174_v42 }
 0x575   :  { %1177 = vrcp.f32 %v959_v51  ;;  %v971_v61 = vand.u32 2147483648, %v959_v51  ;;  %v969_v27 = vand.u32 2147483647, %v959_v51  ;;  %vm965_vm0 = vweird.f32 %v959_v51 }
 0x577   :  { %v972_v37 = vor.u32 1.1754944e-38, %v971_v61  ;;  %vm970_vm2 = vcmp.eq.f32.partialorder %v969_v27, 8.507059e+37 }
 0x578   :  { %v1176_v56 = vpop.eup %1175 }
 0x579   :  { %v981_v59 = vadd.f32 1.0, %v1176_v56 }
 0x57b   :  { %v1178_v60 = vpop.eup %1177  ;;  %1179 = vrcp.f32 %v981_v59  ;;  %v993_v44 = vand.u32 2147483648, %v981_v59  ;;  %v991_v47 = vand.u32 2147483647, %v981_v59  ;;  %vm987_vm4 = vweird.f32 %v981_v59 }
 0x57c   :  { %v961_v45 = vmul.f32 %v1178_v60, %v959_v51  ;;  %vm966_vm8 = vweird.f32 %v1178_v60 }
 0x57d   :  { %vm967_vm1 = vmor %vm965_vm0, %vm966_vm8  ;;  %v994_v31 = vor.u32 1.1754944e-38, %v993_v44  ;;  %vm992_vm6 = vcmp.eq.f32.partialorder %v991_v47, 8.507059e+37 }
 0x57e   :  { %v962_v58 = vsub.f32 1.0, %v961_v45 }
 0x580   :  { %v963_v63 = vmul.f32 %v1178_v60, %v962_v58 }
 0x581   :  { %v1180_v33 = vpop.eup %1179 }
 0x582   :  { %v983_v35 = vmul.f32 %v1180_v33, %v981_v59  ;;  %v964_v36 = vadd.f32 %v1178_v60, %v963_v63  ;;  %vm988_vm3 = vweird.f32 %v1180_v33 }
 0x583   :  { %vm989_vm5 = vmor %vm987_vm4, %vm988_vm3 }
 0x584   :  { %v984_v38 = vsub.f32 1.0, %v983_v35  ;;  %v968_v40 = vsel %vm967_vm1, %v1178_v60, %v964_v36 }
 0x585   :  { %v973_v62 = vsel %vm970_vm2, %v972_v37, %v968_v40 }
 0x586   :  { %v985_v43 = vmul.f32 %v1180_v33, %v984_v38  ;;  %v999_v46 = vmul.f32 %v973_v62, %v951_v39 }
 0x588   :  { %v986_v48 = vadd.f32 %v1180_v33, %v985_v43  ;;  %v1000_v49 = vadd.f32 %v1097_v41, %v999_v46 }
 0x58a   :  { %v990_v50 = vsel %vm989_vm5, %v1180_v33, %v986_v48  ;;  %1181 = vtanh.f32 %v1000_v49 }
 0x58b   :  { %v995_v32 = vsel %vm992_vm6, %v994_v31, %v990_v50 }
 0x58c   :  { %v1002_v52 = vsub.f32 1.0, %v995_v32  ;;  %v1004_v55 = vmul.f32 %v995_v32, %v887_v17 }
 0x590   :  { %v1182_v53 = vpop.eup %1181 }
 0x591   :  { %v1003_v54 = vmul.f32 %v1182_v53, %v1002_v52 }
 0x593   :  { %v1005_v57 = vadd.f32 %v1004_v55, %v1003_v54 }
 0x595   :  { %1098 = vst.msk [vmem:[%s1850_s5 + $0xe] sm:$0x3] %vm180_vm9, %v1005_v57 }

</bundles_post_ra>
